<compile_context>
chip_gen: v6e
topology: v6e:2x2x1
jax: 0.10.0
libtpu: 0.0.40
codegen_flags: <defaults>
</compile_context>

<pallas_src>
import jax
import jax.numpy as jnp
from jax.experimental import pallas as pl
from jax.experimental.pallas import tpu as pltpu


def _double_conv_kernel(x_ref, w1_ref, b1_ref, w2_ref, b2_ref, o_ref,
                        y1_ref, y2_ref):
    """Fused conv3x3+LReLU -> conv3x3+LReLU -> maxpool2x2 for one row chunk.

    x_ref : (th+4, Wp, Cin)    bf16  zero-padded halo input rows
    w1_ref: (3, 3, Cin, Cout)  bf16  conv1 weights; w1_ref[dy, dx] is (Cin, Cout)
    b1_ref: (1, Cout)          f32
    w2_ref: (3, 3, Cout, Cout) bf16
    b2_ref: (1, Cout)          f32
    o_ref : (th//2, W//2, Cout)      pooled output rows for this chunk
    y1_ref: (th+2, Wp, Cout)   bf16  scratch: conv1 output (+ zero borders)
    y2_ref: (th*W, Cout)       f32   scratch: conv2 output, pre-pool
    """
    th = x_ref.shape[0] - 4
    Wp = x_ref.shape[1]
    W = Wp - 2
    Cin = x_ref.shape[2]
    Cout = o_ref.shape[-1]
    t = pl.program_id(1)
    t_last = pl.num_programs(1) - 1

    # ---- conv1 + bias + LeakyReLU(0.2) on th+2 extended rows (conv2 halo) ----
    rows1 = (th + 2) * W
    acc1 = jnp.zeros((rows1, Cout), jnp.float32)
    for dy in range(3):
        for dx in range(3):
            a = x_ref[dy:dy + th + 2, dx:dx + W, :].reshape(rows1, Cin)
            acc1 = acc1 + jnp.dot(a, w1_ref[dy, dx],
                                  preferred_element_type=jnp.float32)
    acc1 = acc1 + b1_ref[...]
    acc1 = jnp.where(acc1 >= 0, acc1, 0.2 * acc1)

    # Stage conv1 output with zeroed W-padding columns (conv2's zero padding).
    y1_ref[...] = jnp.zeros(y1_ref.shape, y1_ref.dtype)
    y1_ref[:, 1:1 + W, :] = acc1.reshape(th + 2, W, Cout).astype(y1_ref.dtype)

    # Rows outside the image must be conv2's zero padding, not conv1-of-padding.
    @pl.when(t == 0)
    def _():
        y1_ref[0:1, :, :] = jnp.zeros((1, Wp, Cout), y1_ref.dtype)

    @pl.when(t == t_last)
    def _():
        y1_ref[th + 1:th + 2, :, :] = jnp.zeros((1, Wp, Cout), y1_ref.dtype)

    # ---- conv2 + bias + LeakyReLU(0.2) ----
    rows2 = th * W
    acc2 = jnp.zeros((rows2, Cout), jnp.float32)
    for dy in range(3):
        for dx in range(3):
            a2 = y1_ref[dy:dy + th, dx:dx + W, :].reshape(rows2, Cout)
            acc2 = acc2 + jnp.dot(a2, w2_ref[dy, dx],
                                  preferred_element_type=jnp.float32)
    acc2 = acc2 + b2_ref[...]
    acc2 = jnp.where(acc2 >= 0, acc2, 0.2 * acc2)
    y2_ref[...] = acc2

    # ---- fused 2x2 max pool, stride 2 (epilogue) ----
    # y2 rows are (h, w) row-major; since W is even, adjacent row pairs
    # (2k, 2k+1) are the W-direction pool pairs. After that, consecutive
    # groups of W//2 rows pair up in the H direction.
    wmax = jnp.maximum(y2_ref[pl.ds(0, rows2 // 2, stride=2), :],
                       y2_ref[pl.ds(1, rows2 // 2, stride=2), :])
    x4 = wmax.reshape(th // 2, 2, W // 2, Cout)
    pooled = jnp.maximum(x4[:, 0], x4[:, 1])                 # (th/2, W/2, Cout)
    o_ref[...] = pooled.astype(o_ref.dtype)


def _choose_row_tile(H, W, Cin, Cout, budget_bytes=12 * 1024 * 1024):
    """Largest even row-tile th dividing H whose per-step VMEM estimate fits.

    Budget is kept well under v7x's 64 MiB VMEM (and the 48 MiB scoped limit
    we request) so double-buffering and compiler temporaries have headroom.
    """
    Wp = W + 2
    best = 2
    for th in range(2, H + 1, 2):
        if H % th:
            continue
        est = (
            2 * (th + 4) * Wp * Cin * 2              # input block x2 buffers, bf16
            + 2 * (th // 2) * (W // 2) * Cout * 4    # output block x2 buffers
            + (th + 2) * Wp * Cout * 2               # conv1 scratch, bf16
            + th * W * Cout * 4                      # conv2 scratch, f32
            + (th + 2) * W * Cout * 8                # live f32 accumulators
            + (th + 2) * W * Cin * 2                 # live bf16 matmul operand
            + 9 * (Cin + Cout) * Cout * 2 * 2        # resident bf16 weights
        )
        if est <= budget_bytes:
            best = th
    return best


def double_conv(x_nchw, params):
    """DoubleConv.forward: conv3x3+LReLU -> conv3x3+LReLU -> maxpool2x2.

    NCHW in / NCHW out (PyTorch convention at the boundary).
    """
    w1, b1, w2, b2 = params
    N, Cin, H, W = x_nchw.shape
    Cout = w1.shape[0]
    assert H % 2 == 0 and W % 2 == 0, "spatial dims must be even for 2x2 pool"
    # TODO(synk): also tile along W for extremely large W*C (current design keeps
    # one full padded row strip per grid step in VMEM).

    th = _choose_row_tile(H, W, Cin, Cout)
    T = H // th
    Wp = W + 2

    # NCHW -> NHWC, bf16 MXU operands; pad H by 2 / W by 1 (conv1 is evaluated
    # on th+2 extended rows so conv2 has its halo without extra HBM traffic).
    x = jnp.transpose(x_nchw, (0, 2, 3, 1)).astype(jnp.bfloat16)
    xp = jnp.pad(x, ((0, 0), (2, 2), (1, 1), (0, 0)))       # (N, H+4, Wp, Cin)

    # Overlapping halo row chunks: chunk t holds padded rows [t*th, t*th+th+4).
    row_idx = jnp.arange(T)[:, None] * th + jnp.arange(th + 4)[None, :]
    chunks = xp[:, row_idx]                                  # (N, T, th+4, Wp, Cin)
    chunks = chunks.reshape(N * T, th + 4, Wp, Cin)

    # (Cout, Cin, 3, 3) -> (3, 3, Cin, Cout): w[dy, dx] is the per-tap matmul.
    w1m = jnp.transpose(w1, (2, 3, 1, 0)).astype(jnp.bfloat16)
    w2m = jnp.transpose(w2, (2, 3, 1, 0)).astype(jnp.bfloat16)
    b1m = b1.reshape(1, Cout).astype(jnp.float32)
    b2m = b2.reshape(1, Cout).astype(jnp.float32)

    out = pl.pallas_call(
        _double_conv_kernel,
        out_shape=jax.ShapeDtypeStruct((N * T, th // 2, W // 2, Cout),
                                       x_nchw.dtype),
        grid_spec=pltpu.PrefetchScalarGridSpec(
            num_scalar_prefetch=0,
            grid=(N, T),
            in_specs=[
                pl.BlockSpec((None, th + 4, Wp, Cin),
                             lambda n, t: (n * T + t, 0, 0, 0)),
                pl.BlockSpec((3, 3, Cin, Cout), lambda n, t: (0, 0, 0, 0)),
                pl.BlockSpec((1, Cout), lambda n, t: (0, 0)),
                pl.BlockSpec((3, 3, Cout, Cout), lambda n, t: (0, 0, 0, 0)),
                pl.BlockSpec((1, Cout), lambda n, t: (0, 0)),
            ],
            out_specs=pl.BlockSpec((None, th // 2, W // 2, Cout),
                                   lambda n, t: (n * T + t, 0, 0, 0)),
            scratch_shapes=[
                pltpu.VMEM((th + 2, Wp, Cout), jnp.bfloat16),   # conv1 out (+pad)
                pltpu.VMEM((th * W, Cout), jnp.float32),        # conv2 out pre-pool
            ],
        ),
        compiler_params=pltpu.CompilerParams(
            dimension_semantics=("parallel", "parallel"),
            vmem_limit_bytes=48 * 1024 * 1024,
        ),
    )(chunks, w1m, b1m, w2m, b2m)

    out = out.reshape(N, H // 2, W // 2, Cout)
    return jnp.transpose(out, (0, 3, 1, 2))                   # NHWC -> NCHW


def init_params(key, in_dim, out_dim, dtype=jnp.float32):
    # Deterministic synthetic init (PyTorch Conv2d-style U(-s, s), s = 1/sqrt(fan_in)).
    k1, k2, k3, k4 = jax.random.split(key, 4)
    s1 = 1.0 / (in_dim * 9) ** 0.5
    s2 = 1.0 / (out_dim * 9) ** 0.5
    w1 = jax.random.uniform(k1, (out_dim, in_dim, 3, 3), dtype, -s1, s1)
    b1 = jax.random.uniform(k2, (out_dim,), dtype, -s1, s1)
    w2 = jax.random.uniform(k3, (out_dim, out_dim, 3, 3), dtype, -s2, s2)
    b2 = jax.random.uniform(k4, (out_dim,), dtype, -s2, s2)
    return (w1, b1, w2, b2)


def _reference(x_nchw, params):
    # Pure-JAX reference with identical semantics (sanity check).
    w1, b1, w2, b2 = params

    def conv(x, w, b):
        y = jax.lax.conv_general_dilated(
            x, w, window_strides=(1, 1), padding=((1, 1), (1, 1)),
            dimension_numbers=("NCHW", "OIHW", "NCHW"))
        y = y + b[None, :, None, None]
        return jnp.where(y >= 0, y, 0.2 * y)

    y = conv(x_nchw, w1, b1)
    y = conv(y, w2, b2)
    return jax.lax.reduce_window(y, -jnp.inf, jax.lax.max,
                                 (1, 1, 2, 2), (1, 1, 2, 2), "VALID")


if __name__ == "__main__":
    key = jax.random.PRNGKey(0)
    kx, kp = jax.random.split(key)
    N, Cin, Cout, H, W = 2, 4, 8, 16, 16
    x = jax.random.normal(kx, (N, Cin, H, W), jnp.float32)
    params = init_params(kp, Cin, Cout)

    fwd = jax.jit(double_conv)
    out = jax.block_until_ready(fwd(x, params))
    ref = jax.block_until_ready(_reference(x, params))

    assert out.shape == (N, Cout, H // 2, W // 2), out.shape
    # bf16 MXU operands with f32 accumulation: allow bf16-level tolerance.
    err = float(jnp.max(jnp.abs(out - ref)))
    assert jnp.allclose(out, ref, atol=3e-2, rtol=3e-2), err
    print("KERNEL_OK")
</pallas_src>

<mosaic_0001>
module attributes {stable_mosaic.version = 11 : i64} {
  func.func @_double_conv_kernel(%arg0: i32, %arg1: i32, %arg2: memref<1x20x18x4xbf16, #tpu.memory_space<vmem>>, %arg3: memref<3x3x4x8xbf16, #tpu.memory_space<vmem>>, %arg4: memref<1x8xf32, #tpu.memory_space<vmem>>, %arg5: memref<3x3x8x8xbf16, #tpu.memory_space<vmem>>, %arg6: memref<1x8xf32, #tpu.memory_space<vmem>>, %arg7: memref<1x8x8x8xf32, #tpu.memory_space<vmem>>, %arg8: memref<18x18x8xbf16, #tpu.memory_space<vmem>>, %arg9: memref<256x8xf32, #tpu.memory_space<vmem>>) attributes {dimension_semantics = [#tpu.dimension_semantics<parallel>, #tpu.dimension_semantics<parallel>], iteration_bounds = array<i64: 2, 1>, scalar_prefetch = 0 : i64, scratch_operands = 2 : i64, tpu.core_type = #tpu.core_type<tc>, window_params = [{transform_indices = @transform_0, window_bounds = array<i64: 1, 20, 18, 4>}, {pipeline_mode = #tpu.pipeline_mode<synchronous>, transform_indices = @transform_1, window_bounds = array<i64: 3, 3, 4, 8>}, {pipeline_mode = #tpu.pipeline_mode<synchronous>, transform_indices = @transform_2, window_bounds = array<i64: 1, 8>}, {pipeline_mode = #tpu.pipeline_mode<synchronous>, transform_indices = @transform_3, window_bounds = array<i64: 3, 3, 8, 8>}, {pipeline_mode = #tpu.pipeline_mode<synchronous>, transform_indices = @transform_4, window_bounds = array<i64: 1, 8>}, {transform_indices = @transform_5, window_bounds = array<i64: 1, 8, 8, 8>}]} {
    %cst = arith.constant 0.000000e+00 : f32
    %0 = vector.broadcast %cst : f32 to vector<288x8xf32>
    %c0 = arith.constant 0 : index
    %c0_0 = arith.constant 0 : index
    %c0_1 = arith.constant 0 : index
    %c0_2 = arith.constant 0 : index
    %1 = vector.load %arg2[%c0, %c0_0, %c0_1, %c0_2] : memref<1x20x18x4xbf16, #tpu.memory_space<vmem>>, vector<1x18x16x4xbf16>
    %2 = vector.shape_cast %1 : vector<1x18x16x4xbf16> to vector<18x16x4xbf16>
    %3 = vector.shape_cast %2 : vector<18x16x4xbf16> to vector<288x4xbf16>
    %c0_3 = arith.constant 0 : index
    %c0_4 = arith.constant 0 : index
    %c0_5 = arith.constant 0 : index
    %c0_6 = arith.constant 0 : index
    %4 = vector.load %arg3[%c0_3, %c0_4, %c0_5, %c0_6] : memref<3x3x4x8xbf16, #tpu.memory_space<vmem>>, vector<1x1x4x8xbf16>
    %5 = vector.shape_cast %4 : vector<1x1x4x8xbf16> to vector<4x8xbf16>
    %cst_7 = arith.constant dense<0.000000e+00> : vector<288x8xf32>
    %6 = tpu.matmul %3, %5, %cst_7 {dimension_numbers = #tpu.dot_dimension_numbers<[1], [0], [0], [1], [0, 0, 1, 1], [], []>} : vector<288x4xbf16>, vector<4x8xbf16>, vector<288x8xf32> -> vector<288x8xf32>
    %7 = arith.addf %0, %6 : vector<288x8xf32>
    %c0_8 = arith.constant 0 : index
    %c0_9 = arith.constant 0 : index
    %c1 = arith.constant 1 : index
    %c0_10 = arith.constant 0 : index
    %8 = vector.load %arg2[%c0_8, %c0_9, %c1, %c0_10] : memref<1x20x18x4xbf16, #tpu.memory_space<vmem>>, vector<1x18x16x4xbf16>
    %9 = vector.shape_cast %8 : vector<1x18x16x4xbf16> to vector<18x16x4xbf16>
    %10 = vector.shape_cast %9 : vector<18x16x4xbf16> to vector<288x4xbf16>
    %c0_11 = arith.constant 0 : index
    %c1_12 = arith.constant 1 : index
    %c0_13 = arith.constant 0 : index
    %c0_14 = arith.constant 0 : index
    %11 = vector.load %arg3[%c0_11, %c1_12, %c0_13, %c0_14] : memref<3x3x4x8xbf16, #tpu.memory_space<vmem>>, vector<1x1x4x8xbf16>
    %12 = vector.shape_cast %11 : vector<1x1x4x8xbf16> to vector<4x8xbf16>
    %cst_15 = arith.constant dense<0.000000e+00> : vector<288x8xf32>
    %13 = tpu.matmul %10, %12, %cst_15 {dimension_numbers = #tpu.dot_dimension_numbers<[1], [0], [0], [1], [0, 0, 1, 1], [], []>} : vector<288x4xbf16>, vector<4x8xbf16>, vector<288x8xf32> -> vector<288x8xf32>
    %14 = arith.addf %7, %13 : vector<288x8xf32>
    %c0_16 = arith.constant 0 : index
    %c0_17 = arith.constant 0 : index
    %c2 = arith.constant 2 : index
    %c0_18 = arith.constant 0 : index
    %15 = vector.load %arg2[%c0_16, %c0_17, %c2, %c0_18] : memref<1x20x18x4xbf16, #tpu.memory_space<vmem>>, vector<1x18x16x4xbf16>
    %16 = vector.shape_cast %15 : vector<1x18x16x4xbf16> to vector<18x16x4xbf16>
    %17 = vector.shape_cast %16 : vector<18x16x4xbf16> to vector<288x4xbf16>
    %c0_19 = arith.constant 0 : index
    %c2_20 = arith.constant 2 : index
    %c0_21 = arith.constant 0 : index
    %c0_22 = arith.constant 0 : index
    %18 = vector.load %arg3[%c0_19, %c2_20, %c0_21, %c0_22] : memref<3x3x4x8xbf16, #tpu.memory_space<vmem>>, vector<1x1x4x8xbf16>
    %19 = vector.shape_cast %18 : vector<1x1x4x8xbf16> to vector<4x8xbf16>
    %cst_23 = arith.constant dense<0.000000e+00> : vector<288x8xf32>
    %20 = tpu.matmul %17, %19, %cst_23 {dimension_numbers = #tpu.dot_dimension_numbers<[1], [0], [0], [1], [0, 0, 1, 1], [], []>} : vector<288x4xbf16>, vector<4x8xbf16>, vector<288x8xf32> -> vector<288x8xf32>
    %21 = arith.addf %14, %20 : vector<288x8xf32>
    %c0_24 = arith.constant 0 : index
    %c1_25 = arith.constant 1 : index
    %c0_26 = arith.constant 0 : index
    %c0_27 = arith.constant 0 : index
    %22 = vector.load %arg2[%c0_24, %c1_25, %c0_26, %c0_27] : memref<1x20x18x4xbf16, #tpu.memory_space<vmem>>, vector<1x18x16x4xbf16>
    %23 = vector.shape_cast %22 : vector<1x18x16x4xbf16> to vector<18x16x4xbf16>
    %24 = vector.shape_cast %23 : vector<18x16x4xbf16> to vector<288x4xbf16>
    %c1_28 = arith.constant 1 : index
    %c0_29 = arith.constant 0 : index
    %c0_30 = arith.constant 0 : index
    %c0_31 = arith.constant 0 : index
    %25 = vector.load %arg3[%c1_28, %c0_29, %c0_30, %c0_31] : memref<3x3x4x8xbf16, #tpu.memory_space<vmem>>, vector<1x1x4x8xbf16>
    %26 = vector.shape_cast %25 : vector<1x1x4x8xbf16> to vector<4x8xbf16>
    %cst_32 = arith.constant dense<0.000000e+00> : vector<288x8xf32>
    %27 = tpu.matmul %24, %26, %cst_32 {dimension_numbers = #tpu.dot_dimension_numbers<[1], [0], [0], [1], [0, 0, 1, 1], [], []>} : vector<288x4xbf16>, vector<4x8xbf16>, vector<288x8xf32> -> vector<288x8xf32>
    %28 = arith.addf %21, %27 : vector<288x8xf32>
    %c0_33 = arith.constant 0 : index
    %c1_34 = arith.constant 1 : index
    %c1_35 = arith.constant 1 : index
    %c0_36 = arith.constant 0 : index
    %29 = vector.load %arg2[%c0_33, %c1_34, %c1_35, %c0_36] : memref<1x20x18x4xbf16, #tpu.memory_space<vmem>>, vector<1x18x16x4xbf16>
    %30 = vector.shape_cast %29 : vector<1x18x16x4xbf16> to vector<18x16x4xbf16>
    %31 = vector.shape_cast %30 : vector<18x16x4xbf16> to vector<288x4xbf16>
    %c1_37 = arith.constant 1 : index
    %c1_38 = arith.constant 1 : index
    %c0_39 = arith.constant 0 : index
    %c0_40 = arith.constant 0 : index
    %32 = vector.load %arg3[%c1_37, %c1_38, %c0_39, %c0_40] : memref<3x3x4x8xbf16, #tpu.memory_space<vmem>>, vector<1x1x4x8xbf16>
    %33 = vector.shape_cast %32 : vector<1x1x4x8xbf16> to vector<4x8xbf16>
    %cst_41 = arith.constant dense<0.000000e+00> : vector<288x8xf32>
    %34 = tpu.matmul %31, %33, %cst_41 {dimension_numbers = #tpu.dot_dimension_numbers<[1], [0], [0], [1], [0, 0, 1, 1], [], []>} : vector<288x4xbf16>, vector<4x8xbf16>, vector<288x8xf32> -> vector<288x8xf32>
    %35 = arith.addf %28, %34 : vector<288x8xf32>
    %c0_42 = arith.constant 0 : index
    %c1_43 = arith.constant 1 : index
    %c2_44 = arith.constant 2 : index
    %c0_45 = arith.constant 0 : index
    %36 = vector.load %arg2[%c0_42, %c1_43, %c2_44, %c0_45] : memref<1x20x18x4xbf16, #tpu.memory_space<vmem>>, vector<1x18x16x4xbf16>
    %37 = vector.shape_cast %36 : vector<1x18x16x4xbf16> to vector<18x16x4xbf16>
    %38 = vector.shape_cast %37 : vector<18x16x4xbf16> to vector<288x4xbf16>
    %c1_46 = arith.constant 1 : index
    %c2_47 = arith.constant 2 : index
    %c0_48 = arith.constant 0 : index
    %c0_49 = arith.constant 0 : index
    %39 = vector.load %arg3[%c1_46, %c2_47, %c0_48, %c0_49] : memref<3x3x4x8xbf16, #tpu.memory_space<vmem>>, vector<1x1x4x8xbf16>
    %40 = vector.shape_cast %39 : vector<1x1x4x8xbf16> to vector<4x8xbf16>
    %cst_50 = arith.constant dense<0.000000e+00> : vector<288x8xf32>
    %41 = tpu.matmul %38, %40, %cst_50 {dimension_numbers = #tpu.dot_dimension_numbers<[1], [0], [0], [1], [0, 0, 1, 1], [], []>} : vector<288x4xbf16>, vector<4x8xbf16>, vector<288x8xf32> -> vector<288x8xf32>
    %42 = arith.addf %35, %41 : vector<288x8xf32>
    %c0_51 = arith.constant 0 : index
    %c2_52 = arith.constant 2 : index
    %c0_53 = arith.constant 0 : index
    %c0_54 = arith.constant 0 : index
    %43 = vector.load %arg2[%c0_51, %c2_52, %c0_53, %c0_54] : memref<1x20x18x4xbf16, #tpu.memory_space<vmem>>, vector<1x18x16x4xbf16>
    %44 = vector.shape_cast %43 : vector<1x18x16x4xbf16> to vector<18x16x4xbf16>
    %45 = vector.shape_cast %44 : vector<18x16x4xbf16> to vector<288x4xbf16>
    %c2_55 = arith.constant 2 : index
    %c0_56 = arith.constant 0 : index
    %c0_57 = arith.constant 0 : index
    %c0_58 = arith.constant 0 : index
    %46 = vector.load %arg3[%c2_55, %c0_56, %c0_57, %c0_58] : memref<3x3x4x8xbf16, #tpu.memory_space<vmem>>, vector<1x1x4x8xbf16>
    %47 = vector.shape_cast %46 : vector<1x1x4x8xbf16> to vector<4x8xbf16>
    %cst_59 = arith.constant dense<0.000000e+00> : vector<288x8xf32>
    %48 = tpu.matmul %45, %47, %cst_59 {dimension_numbers = #tpu.dot_dimension_numbers<[1], [0], [0], [1], [0, 0, 1, 1], [], []>} : vector<288x4xbf16>, vector<4x8xbf16>, vector<288x8xf32> -> vector<288x8xf32>
    %49 = arith.addf %42, %48 : vector<288x8xf32>
    %c0_60 = arith.constant 0 : index
    %c2_61 = arith.constant 2 : index
    %c1_62 = arith.constant 1 : index
    %c0_63 = arith.constant 0 : index
    %50 = vector.load %arg2[%c0_60, %c2_61, %c1_62, %c0_63] : memref<1x20x18x4xbf16, #tpu.memory_space<vmem>>, vector<1x18x16x4xbf16>
    %51 = vector.shape_cast %50 : vector<1x18x16x4xbf16> to vector<18x16x4xbf16>
    %52 = vector.shape_cast %51 : vector<18x16x4xbf16> to vector<288x4xbf16>
    %c2_64 = arith.constant 2 : index
    %c1_65 = arith.constant 1 : index
    %c0_66 = arith.constant 0 : index
    %c0_67 = arith.constant 0 : index
    %53 = vector.load %arg3[%c2_64, %c1_65, %c0_66, %c0_67] : memref<3x3x4x8xbf16, #tpu.memory_space<vmem>>, vector<1x1x4x8xbf16>
    %54 = vector.shape_cast %53 : vector<1x1x4x8xbf16> to vector<4x8xbf16>
    %cst_68 = arith.constant dense<0.000000e+00> : vector<288x8xf32>
    %55 = tpu.matmul %52, %54, %cst_68 {dimension_numbers = #tpu.dot_dimension_numbers<[1], [0], [0], [1], [0, 0, 1, 1], [], []>} : vector<288x4xbf16>, vector<4x8xbf16>, vector<288x8xf32> -> vector<288x8xf32>
    %56 = arith.addf %49, %55 : vector<288x8xf32>
    %c0_69 = arith.constant 0 : index
    %c2_70 = arith.constant 2 : index
    %c2_71 = arith.constant 2 : index
    %c0_72 = arith.constant 0 : index
    %57 = vector.load %arg2[%c0_69, %c2_70, %c2_71, %c0_72] : memref<1x20x18x4xbf16, #tpu.memory_space<vmem>>, vector<1x18x16x4xbf16>
    %58 = vector.shape_cast %57 : vector<1x18x16x4xbf16> to vector<18x16x4xbf16>
    %59 = vector.shape_cast %58 : vector<18x16x4xbf16> to vector<288x4xbf16>
    %c2_73 = arith.constant 2 : index
    %c2_74 = arith.constant 2 : index
    %c0_75 = arith.constant 0 : index
    %c0_76 = arith.constant 0 : index
    %60 = vector.load %arg3[%c2_73, %c2_74, %c0_75, %c0_76] : memref<3x3x4x8xbf16, #tpu.memory_space<vmem>>, vector<1x1x4x8xbf16>
    %61 = vector.shape_cast %60 : vector<1x1x4x8xbf16> to vector<4x8xbf16>
    %cst_77 = arith.constant dense<0.000000e+00> : vector<288x8xf32>
    %62 = tpu.matmul %59, %61, %cst_77 {dimension_numbers = #tpu.dot_dimension_numbers<[1], [0], [0], [1], [0, 0, 1, 1], [], []>} : vector<288x4xbf16>, vector<4x8xbf16>, vector<288x8xf32> -> vector<288x8xf32>
    %63 = arith.addf %56, %62 : vector<288x8xf32>
    %c0_78 = arith.constant 0 : index
    %c0_79 = arith.constant 0 : index
    %64 = vector.load %arg4[%c0_78, %c0_79] : memref<1x8xf32, #tpu.memory_space<vmem>>, vector<1x8xf32>
    %65 = vector.broadcast %64 : vector<1x8xf32> to vector<288x8xf32>
    %66 = arith.addf %63, %65 : vector<288x8xf32>
    %cst_80 = arith.constant 0.000000e+00 : f32
    %67 = vector.broadcast %cst_80 : f32 to vector<288x8xf32>
    %68 = arith.cmpf oge, %66, %67 : vector<288x8xf32>
    %cst_81 = arith.constant 2.000000e-01 : f32
    %69 = vector.broadcast %cst_81 : f32 to vector<288x8xf32>
    %70 = arith.mulf %69, %66 : vector<288x8xf32>
    %71 = arith.select %68, %66, %70 : vector<288x8xi1>, vector<288x8xf32>
    %cst_82 = arith.constant 0.000000e+00 : bf16
    %72 = vector.broadcast %cst_82 : bf16 to vector<18x18x8xbf16>
    %c0_83 = arith.constant 0 : index
    %c0_84 = arith.constant 0 : index
    %c0_85 = arith.constant 0 : index
    %73 = vector.load %arg8[%c0_83, %c0_84, %c0_85] : memref<18x18x8xbf16, #tpu.memory_space<vmem>>, vector<18x18x8xbf16>
    tpu.vector_store %arg8[%c0_83, %c0_84, %c0_85], %72 {strides = array<i32>} : memref<18x18x8xbf16, #tpu.memory_space<vmem>>, vector<18x18x8xbf16>,
    %74 = vector.shape_cast %71 : vector<288x8xf32> to vector<18x16x8xf32>
    %75 = arith.truncf %74 : vector<18x16x8xf32> to vector<18x16x8xbf16>
    %c0_86 = arith.constant 0 : index
    %c1_87 = arith.constant 1 : index
    %c0_88 = arith.constant 0 : index
    %76 = vector.load %arg8[%c0_86, %c1_87, %c0_88] : memref<18x18x8xbf16, #tpu.memory_space<vmem>>, vector<18x16x8xbf16>
    tpu.vector_store %arg8[%c0_86, %c1_87, %c0_88], %75 {strides = array<i32>} : memref<18x18x8xbf16, #tpu.memory_space<vmem>>, vector<18x16x8xbf16>,
    %c0_i32 = arith.constant 0 : i32
    %77 = arith.cmpi eq, %arg1, %c0_i32 : i32
    %78 = arith.extui %77 : i1 to i32
    %c0_i32_89 = arith.constant 0 : i32
    %79 = arith.cmpi ne, %78, %c0_i32_89 : i32
    scf.if %79 {
      %cst_179 = arith.constant 0.000000e+00 : bf16
      %159 = vector.broadcast %cst_179 : bf16 to vector<1x18x8xbf16>
      %c0_180 = arith.constant 0 : index
      %c0_181 = arith.constant 0 : index
      %c0_182 = arith.constant 0 : index
      %160 = vector.load %arg8[%c0_180, %c0_181, %c0_182] : memref<18x18x8xbf16, #tpu.memory_space<vmem>>, vector<1x18x8xbf16>
      tpu.vector_store %arg8[%c0_180, %c0_181, %c0_182], %159 {strides = array<i32>} : memref<18x18x8xbf16, #tpu.memory_space<vmem>>, vector<1x18x8xbf16>,
    } else {
    }
    %c0_i32_90 = arith.constant 0 : i32
    %80 = arith.cmpi eq, %arg1, %c0_i32_90 : i32
    %81 = arith.extui %80 : i1 to i32
    %c0_i32_91 = arith.constant 0 : i32
    %82 = arith.cmpi ne, %81, %c0_i32_91 : i32
    scf.if %82 {
      %cst_179 = arith.constant 0.000000e+00 : bf16
      %159 = vector.broadcast %cst_179 : bf16 to vector<1x18x8xbf16>
      %c17 = arith.constant 17 : index
      %c0_180 = arith.constant 0 : index
      %c0_181 = arith.constant 0 : index
      %160 = vector.load %arg8[%c17, %c0_180, %c0_181] : memref<18x18x8xbf16, #tpu.memory_space<vmem>>, vector<1x18x8xbf16>
      tpu.vector_store %arg8[%c17, %c0_180, %c0_181], %159 {strides = array<i32>} : memref<18x18x8xbf16, #tpu.memory_space<vmem>>, vector<1x18x8xbf16>,
    } else {
    }
    %cst_92 = arith.constant 0.000000e+00 : f32
    %83 = vector.broadcast %cst_92 : f32 to vector<256x8xf32>
    %c0_93 = arith.constant 0 : index
    %c0_94 = arith.constant 0 : index
    %c0_95 = arith.constant 0 : index
    %84 = vector.load %arg8[%c0_93, %c0_94, %c0_95] : memref<18x18x8xbf16, #tpu.memory_space<vmem>>, vector<16x16x8xbf16>
    %85 = vector.shape_cast %84 : vector<16x16x8xbf16> to vector<256x8xbf16>
    %c0_96 = arith.constant 0 : index
    %c0_97 = arith.constant 0 : index
    %c0_98 = arith.constant 0 : index
    %c0_99 = arith.constant 0 : index
    %86 = vector.load %arg5[%c0_96, %c0_97, %c0_98, %c0_99] : memref<3x3x8x8xbf16, #tpu.memory_space<vmem>>, vector<1x1x8x8xbf16>
    %87 = vector.shape_cast %86 : vector<1x1x8x8xbf16> to vector<8x8xbf16>
    %cst_100 = arith.constant dense<0.000000e+00> : vector<256x8xf32>
    %88 = tpu.matmul %85, %87, %cst_100 {dimension_numbers = #tpu.dot_dimension_numbers<[1], [0], [0], [1], [0, 0, 1, 1], [], []>} : vector<256x8xbf16>, vector<8x8xbf16>, vector<256x8xf32> -> vector<256x8xf32>
    %89 = arith.addf %83, %88 : vector<256x8xf32>
    %c0_101 = arith.constant 0 : index
    %c1_102 = arith.constant 1 : index
    %c0_103 = arith.constant 0 : index
    %90 = vector.load %arg8[%c0_101, %c1_102, %c0_103] : memref<18x18x8xbf16, #tpu.memory_space<vmem>>, vector<16x16x8xbf16>
    %91 = vector.shape_cast %90 : vector<16x16x8xbf16> to vector<256x8xbf16>
    %c0_104 = arith.constant 0 : index
    %c1_105 = arith.constant 1 : index
    %c0_106 = arith.constant 0 : index
    %c0_107 = arith.constant 0 : index
    %92 = vector.load %arg5[%c0_104, %c1_105, %c0_106, %c0_107] : memref<3x3x8x8xbf16, #tpu.memory_space<vmem>>, vector<1x1x8x8xbf16>
    %93 = vector.shape_cast %92 : vector<1x1x8x8xbf16> to vector<8x8xbf16>
    %cst_108 = arith.constant dense<0.000000e+00> : vector<256x8xf32>
    %94 = tpu.matmul %91, %93, %cst_108 {dimension_numbers = #tpu.dot_dimension_numbers<[1], [0], [0], [1], [0, 0, 1, 1], [], []>} : vector<256x8xbf16>, vector<8x8xbf16>, vector<256x8xf32> -> vector<256x8xf32>
    %95 = arith.addf %89, %94 : vector<256x8xf32>
    %c0_109 = arith.constant 0 : index
    %c2_110 = arith.constant 2 : index
    %c0_111 = arith.constant 0 : index
    %96 = vector.load %arg8[%c0_109, %c2_110, %c0_111] : memref<18x18x8xbf16, #tpu.memory_space<vmem>>, vector<16x16x8xbf16>
    %97 = vector.shape_cast %96 : vector<16x16x8xbf16> to vector<256x8xbf16>
    %c0_112 = arith.constant 0 : index
    %c2_113 = arith.constant 2 : index
    %c0_114 = arith.constant 0 : index
    %c0_115 = arith.constant 0 : index
    %98 = vector.load %arg5[%c0_112, %c2_113, %c0_114, %c0_115] : memref<3x3x8x8xbf16, #tpu.memory_space<vmem>>, vector<1x1x8x8xbf16>
    %99 = vector.shape_cast %98 : vector<1x1x8x8xbf16> to vector<8x8xbf16>
    %cst_116 = arith.constant dense<0.000000e+00> : vector<256x8xf32>
    %100 = tpu.matmul %97, %99, %cst_116 {dimension_numbers = #tpu.dot_dimension_numbers<[1], [0], [0], [1], [0, 0, 1, 1], [], []>} : vector<256x8xbf16>, vector<8x8xbf16>, vector<256x8xf32> -> vector<256x8xf32>
    %101 = arith.addf %95, %100 : vector<256x8xf32>
    %c1_117 = arith.constant 1 : index
    %c0_118 = arith.constant 0 : index
    %c0_119 = arith.constant 0 : index
    %102 = vector.load %arg8[%c1_117, %c0_118, %c0_119] : memref<18x18x8xbf16, #tpu.memory_space<vmem>>, vector<16x16x8xbf16>
    %103 = vector.shape_cast %102 : vector<16x16x8xbf16> to vector<256x8xbf16>
    %c1_120 = arith.constant 1 : index
    %c0_121 = arith.constant 0 : index
    %c0_122 = arith.constant 0 : index
    %c0_123 = arith.constant 0 : index
    %104 = vector.load %arg5[%c1_120, %c0_121, %c0_122, %c0_123] : memref<3x3x8x8xbf16, #tpu.memory_space<vmem>>, vector<1x1x8x8xbf16>
    %105 = vector.shape_cast %104 : vector<1x1x8x8xbf16> to vector<8x8xbf16>
    %cst_124 = arith.constant dense<0.000000e+00> : vector<256x8xf32>
    %106 = tpu.matmul %103, %105, %cst_124 {dimension_numbers = #tpu.dot_dimension_numbers<[1], [0], [0], [1], [0, 0, 1, 1], [], []>} : vector<256x8xbf16>, vector<8x8xbf16>, vector<256x8xf32> -> vector<256x8xf32>
    %107 = arith.addf %101, %106 : vector<256x8xf32>
    %c1_125 = arith.constant 1 : index
    %c1_126 = arith.constant 1 : index
    %c0_127 = arith.constant 0 : index
    %108 = vector.load %arg8[%c1_125, %c1_126, %c0_127] : memref<18x18x8xbf16, #tpu.memory_space<vmem>>, vector<16x16x8xbf16>
    %109 = vector.shape_cast %108 : vector<16x16x8xbf16> to vector<256x8xbf16>
    %c1_128 = arith.constant 1 : index
    %c1_129 = arith.constant 1 : index
    %c0_130 = arith.constant 0 : index
    %c0_131 = arith.constant 0 : index
    %110 = vector.load %arg5[%c1_128, %c1_129, %c0_130, %c0_131] : memref<3x3x8x8xbf16, #tpu.memory_space<vmem>>, vector<1x1x8x8xbf16>
    %111 = vector.shape_cast %110 : vector<1x1x8x8xbf16> to vector<8x8xbf16>
    %cst_132 = arith.constant dense<0.000000e+00> : vector<256x8xf32>
    %112 = tpu.matmul %109, %111, %cst_132 {dimension_numbers = #tpu.dot_dimension_numbers<[1], [0], [0], [1], [0, 0, 1, 1], [], []>} : vector<256x8xbf16>, vector<8x8xbf16>, vector<256x8xf32> -> vector<256x8xf32>
    %113 = arith.addf %107, %112 : vector<256x8xf32>
    %c1_133 = arith.constant 1 : index
    %c2_134 = arith.constant 2 : index
    %c0_135 = arith.constant 0 : index
    %114 = vector.load %arg8[%c1_133, %c2_134, %c0_135] : memref<18x18x8xbf16, #tpu.memory_space<vmem>>, vector<16x16x8xbf16>
    %115 = vector.shape_cast %114 : vector<16x16x8xbf16> to vector<256x8xbf16>
    %c1_136 = arith.constant 1 : index
    %c2_137 = arith.constant 2 : index
    %c0_138 = arith.constant 0 : index
    %c0_139 = arith.constant 0 : index
    %116 = vector.load %arg5[%c1_136, %c2_137, %c0_138, %c0_139] : memref<3x3x8x8xbf16, #tpu.memory_space<vmem>>, vector<1x1x8x8xbf16>
    %117 = vector.shape_cast %116 : vector<1x1x8x8xbf16> to vector<8x8xbf16>
    %cst_140 = arith.constant dense<0.000000e+00> : vector<256x8xf32>
    %118 = tpu.matmul %115, %117, %cst_140 {dimension_numbers = #tpu.dot_dimension_numbers<[1], [0], [0], [1], [0, 0, 1, 1], [], []>} : vector<256x8xbf16>, vector<8x8xbf16>, vector<256x8xf32> -> vector<256x8xf32>
    %119 = arith.addf %113, %118 : vector<256x8xf32>
    %c2_141 = arith.constant 2 : index
    %c0_142 = arith.constant 0 : index
    %c0_143 = arith.constant 0 : index
    %120 = vector.load %arg8[%c2_141, %c0_142, %c0_143] : memref<18x18x8xbf16, #tpu.memory_space<vmem>>, vector<16x16x8xbf16>
    %121 = vector.shape_cast %120 : vector<16x16x8xbf16> to vector<256x8xbf16>
    %c2_144 = arith.constant 2 : index
    %c0_145 = arith.constant 0 : index
    %c0_146 = arith.constant 0 : index
    %c0_147 = arith.constant 0 : index
    %122 = vector.load %arg5[%c2_144, %c0_145, %c0_146, %c0_147] : memref<3x3x8x8xbf16, #tpu.memory_space<vmem>>, vector<1x1x8x8xbf16>
    %123 = vector.shape_cast %122 : vector<1x1x8x8xbf16> to vector<8x8xbf16>
    %cst_148 = arith.constant dense<0.000000e+00> : vector<256x8xf32>
    %124 = tpu.matmul %121, %123, %cst_148 {dimension_numbers = #tpu.dot_dimension_numbers<[1], [0], [0], [1], [0, 0, 1, 1], [], []>} : vector<256x8xbf16>, vector<8x8xbf16>, vector<256x8xf32> -> vector<256x8xf32>
    %125 = arith.addf %119, %124 : vector<256x8xf32>
    %c2_149 = arith.constant 2 : index
    %c1_150 = arith.constant 1 : index
    %c0_151 = arith.constant 0 : index
    %126 = vector.load %arg8[%c2_149, %c1_150, %c0_151] : memref<18x18x8xbf16, #tpu.memory_space<vmem>>, vector<16x16x8xbf16>
    %127 = vector.shape_cast %126 : vector<16x16x8xbf16> to vector<256x8xbf16>
    %c2_152 = arith.constant 2 : index
    %c1_153 = arith.constant 1 : index
    %c0_154 = arith.constant 0 : index
    %c0_155 = arith.constant 0 : index
    %128 = vector.load %arg5[%c2_152, %c1_153, %c0_154, %c0_155] : memref<3x3x8x8xbf16, #tpu.memory_space<vmem>>, vector<1x1x8x8xbf16>
    %129 = vector.shape_cast %128 : vector<1x1x8x8xbf16> to vector<8x8xbf16>
    %cst_156 = arith.constant dense<0.000000e+00> : vector<256x8xf32>
    %130 = tpu.matmul %127, %129, %cst_156 {dimension_numbers = #tpu.dot_dimension_numbers<[1], [0], [0], [1], [0, 0, 1, 1], [], []>} : vector<256x8xbf16>, vector<8x8xbf16>, vector<256x8xf32> -> vector<256x8xf32>
    %131 = arith.addf %125, %130 : vector<256x8xf32>
    %c2_157 = arith.constant 2 : index
    %c2_158 = arith.constant 2 : index
    %c0_159 = arith.constant 0 : index
    %132 = vector.load %arg8[%c2_157, %c2_158, %c0_159] : memref<18x18x8xbf16, #tpu.memory_space<vmem>>, vector<16x16x8xbf16>
    %133 = vector.shape_cast %132 : vector<16x16x8xbf16> to vector<256x8xbf16>
    %c2_160 = arith.constant 2 : index
    %c2_161 = arith.constant 2 : index
    %c0_162 = arith.constant 0 : index
    %c0_163 = arith.constant 0 : index
    %134 = vector.load %arg5[%c2_160, %c2_161, %c0_162, %c0_163] : memref<3x3x8x8xbf16, #tpu.memory_space<vmem>>, vector<1x1x8x8xbf16>
    %135 = vector.shape_cast %134 : vector<1x1x8x8xbf16> to vector<8x8xbf16>
    %cst_164 = arith.constant dense<0.000000e+00> : vector<256x8xf32>
    %136 = tpu.matmul %133, %135, %cst_164 {dimension_numbers = #tpu.dot_dimension_numbers<[1], [0], [0], [1], [0, 0, 1, 1], [], []>} : vector<256x8xbf16>, vector<8x8xbf16>, vector<256x8xf32> -> vector<256x8xf32>
    %137 = arith.addf %131, %136 : vector<256x8xf32>
    %c0_165 = arith.constant 0 : index
    %c0_166 = arith.constant 0 : index
    %138 = vector.load %arg6[%c0_165, %c0_166] : memref<1x8xf32, #tpu.memory_space<vmem>>, vector<1x8xf32>
    %139 = vector.broadcast %138 : vector<1x8xf32> to vector<256x8xf32>
    %140 = arith.addf %137, %139 : vector<256x8xf32>
    %cst_167 = arith.constant 0.000000e+00 : f32
    %141 = vector.broadcast %cst_167 : f32 to vector<256x8xf32>
    %142 = arith.cmpf oge, %140, %141 : vector<256x8xf32>
    %cst_168 = arith.constant 2.000000e-01 : f32
    %143 = vector.broadcast %cst_168 : f32 to vector<256x8xf32>
    %144 = arith.mulf %143, %140 : vector<256x8xf32>
    %145 = arith.select %142, %140, %144 : vector<256x8xi1>, vector<256x8xf32>
    %c0_169 = arith.constant 0 : index
    %c0_170 = arith.constant 0 : index
    %146 = vector.load %arg9[%c0_169, %c0_170] : memref<256x8xf32, #tpu.memory_space<vmem>>, vector<256x8xf32>
    tpu.vector_store %arg9[%c0_169, %c0_170], %145 {strides = array<i32>} : memref<256x8xf32, #tpu.memory_space<vmem>>, vector<256x8xf32>,
    %c0_171 = arith.constant 0 : index
    %c0_172 = arith.constant 0 : index
    %147 = tpu.strided_load %arg9[%c0_171, %c0_172] {strides = array<i32: 2, 1>} : memref<256x8xf32, #tpu.memory_space<vmem>>, vector<128x8xf32>
    %c1_173 = arith.constant 1 : index
    %c0_174 = arith.constant 0 : index
    %148 = tpu.strided_load %arg9[%c1_173, %c0_174] {strides = array<i32: 2, 1>} : memref<256x8xf32, #tpu.memory_space<vmem>>, vector<128x8xf32>
    %149 = arith.maximumf %147, %148 : vector<128x8xf32>
    %150 = vector.shape_cast %149 : vector<128x8xf32> to vector<8x2x8x8xf32>
    %151 = vector.extract_strided_slice %150 {offsets = [0, 0, 0, 0], sizes = [8, 1, 8, 8], strides = [1, 1, 1, 1]} : vector<8x2x8x8xf32> to vector<8x1x8x8xf32>
    %152 = vector.shape_cast %151 : vector<8x1x8x8xf32> to vector<8x8x8xf32>
    %153 = vector.extract_strided_slice %150 {offsets = [0, 1, 0, 0], sizes = [8, 1, 8, 8], strides = [1, 1, 1, 1]} : vector<8x2x8x8xf32> to vector<8x1x8x8xf32>
    %154 = vector.shape_cast %153 : vector<8x1x8x8xf32> to vector<8x8x8xf32>
    %155 = arith.maximumf %152, %154 : vector<8x8x8xf32>
    %c0_175 = arith.constant 0 : index
    %c0_176 = arith.constant 0 : index
    %c0_177 = arith.constant 0 : index
    %c0_178 = arith.constant 0 : index
    %156 = vector.load %arg7[%c0_175, %c0_176, %c0_177, %c0_178] : memref<1x8x8x8xf32, #tpu.memory_space<vmem>>, vector<1x8x8x8xf32>
    %157 = vector.shape_cast %156 : vector<1x8x8x8xf32> to vector<8x8x8xf32>
    %158 = vector.shape_cast %155 : vector<8x8x8xf32> to vector<1x8x8x8xf32>
    tpu.vector_store %arg7[%c0_175, %c0_176, %c0_177, %c0_178], %158 {strides = array<i32>} : memref<1x8x8x8xf32, #tpu.memory_space<vmem>>, vector<1x8x8x8xf32>,
    return
  }
  func.func @transform_0(%arg0: i32, %arg1: i32) -> (i32, i32, i32, i32) {
    %c1_i32 = arith.constant 1 : i32
    %0 = arith.muli %arg0, %c1_i32 : i32
    %1 = arith.addi %0, %arg1 : i32
    %c0_i32 = arith.constant 0 : i32
    %c0_i32_0 = arith.constant 0 : i32
    %c0_i32_1 = arith.constant 0 : i32
    %c0_i32_2 = arith.constant 0 : i32
    return %1, %c0_i32, %c0_i32_0, %c0_i32_1 : i32, i32, i32, i32
  }
  func.func @transform_1(%arg0: i32, %arg1: i32) -> (i32, i32, i32, i32) {
    %c0_i32 = arith.constant 0 : i32
    %c0_i32_0 = arith.constant 0 : i32
    %c0_i32_1 = arith.constant 0 : i32
    %c0_i32_2 = arith.constant 0 : i32
    %c0_i32_3 = arith.constant 0 : i32
    return %c0_i32, %c0_i32_0, %c0_i32_1, %c0_i32_2 : i32, i32, i32, i32
  }
  func.func @transform_2(%arg0: i32, %arg1: i32) -> (i32, i32) {
    %c0_i32 = arith.constant 0 : i32
    %c0_i32_0 = arith.constant 0 : i32
    %c0_i32_1 = arith.constant 0 : i32
    return %c0_i32, %c0_i32_0 : i32, i32
  }
  func.func @transform_3(%arg0: i32, %arg1: i32) -> (i32, i32, i32, i32) {
    %c0_i32 = arith.constant 0 : i32
    %c0_i32_0 = arith.constant 0 : i32
    %c0_i32_1 = arith.constant 0 : i32
    %c0_i32_2 = arith.constant 0 : i32
    %c0_i32_3 = arith.constant 0 : i32
    return %c0_i32, %c0_i32_0, %c0_i32_1, %c0_i32_2 : i32, i32, i32, i32
  }
  func.func @transform_4(%arg0: i32, %arg1: i32) -> (i32, i32) {
    %c0_i32 = arith.constant 0 : i32
    %c0_i32_0 = arith.constant 0 : i32
    %c0_i32_1 = arith.constant 0 : i32
    return %c0_i32, %c0_i32_0 : i32, i32
  }
  func.func @transform_5(%arg0: i32, %arg1: i32) -> (i32, i32, i32, i32) {
    %c1_i32 = arith.constant 1 : i32
    %0 = arith.muli %arg0, %c1_i32 : i32
    %1 = arith.addi %0, %arg1 : i32
    %c0_i32 = arith.constant 0 : i32
    %c0_i32_0 = arith.constant 0 : i32
    %c0_i32_1 = arith.constant 0 : i32
    %c0_i32_2 = arith.constant 0 : i32
    return %1, %c0_i32, %c0_i32_0, %c0_i32_1 : i32, i32, i32, i32
  }
}

</mosaic_0001>

<bundles_post_ra>
// kernel: double_conv.1
= control target key start
LH: loop header
LB: loop body
LE: loop exit
PB: predicated region body
PF: predicated region fallthrough
CT: control target
= control target key end

     0   :  { %s13270_s18 = smov 0   ;;  %s13272_s19 = smov 0   ;;  %s18106_s0 = inlined_call_operand.vmem [shape: bf16[2,20,18,4], index: 0, kind: input, shape index: {}]   ;;  %s18107_s1 = inlined_call_operand.vmem [shape: bf16[3,3,4,8], index: 1, kind: input, shape index: {}]   ;;  %s18108_s2 = inlined_call_operand.vmem [shape: f32[1,8], index: 2, kind: input, shape index: {}]   ;;  %s18109_s3 = inlined_call_operand.vmem [shape: bf16[3,3,8,8], index: 3, kind: input, shape index: {}]   ;;  %s18110_s4 = inlined_call_operand.vmem [shape: f32[1,8], index: 4, kind: input, shape index: {}]   ;;  %s18111_s5 = inlined_call_operand.vmem [shape: f32[2,8,8,8], index: 5, kind: output, shape index: {}]  }
   0x1   :  { %s13274_s20 = smov 0  }
   0x2 LB: > { %s27_s21 = sadd.s32 1, %s13233_s19  ;;  %p11041_p0 = scmp.ge.s32.totalorder %s13237_s20, 1  ;;  %s13237_s20 = sphi %s13274_s20, %s15_s20   ;;  %s13233_s19 = sphi %s13272_s19, %s18624_s19   ;;  %s13229_s18 = sphi %s13270_s18, %s18623_s18  }
   0x3   : > { %p29_p1 = scmp.ge.s32.totalorder %s27_s21, 2  ;;  %p205_p2 = scmp.lt.s32.totalorder %s13237_s20, 3 }
   0x5   : > { %s18626_s21 = smov (%p29_p1, %s27_s21), 0  ;;  %p206_p3 = pnand %p11041_p0, %p205_p2 }
   0x7   : > { %209 = sbr.rel (%p206_p3) target bundleno = 1237 (0x4d5), region = 40 }
   0xc   : > { %v11045_v0 = vld [vmem:[%s18107_s1 + $0x2] sm:$0x3]  ;;  %vm851_vm0 = vcmask 1041408   ;;  %v286_v1 = vld [vmem:[%s18107_s1] sm:$0x3]  ;;  %p236_p4 = scmp.lt.s32.totalorder %s13229_s18, 1 }
   0xd   : > { %13040 = vmatprep.subr.msk.bf16.mxu0 %vm851_vm0, %v11045_v0  ;;  %v853_v2 = vsel %vm851_vm0, %v11045_v0, 0  ;;  %13041 = vmatprep.subr.msk.bf16.mxu1 %vm851_vm0, %v286_v1  ;;  %v1177_v3 = vsel %vm851_vm0, %v286_v1, 0  ;;  %v11136_v4 = vld [vmem:[%s18107_s1 + $0x4] sm:$0x3]  ;;  %v11209_v5 = vld [vmem:[%s18107_s1 + $0x6] sm:$0x3] }
   0xe   : > { %12393 = vmatpush3.bf16.msra.mxu0 %v853_v2  ;;  %12431 = vmatpush3.bf16.msra.mxu1 %v1177_v3  ;;  %s18628_s18 = smov (!%p236_p4, %s13229_s18), 1  ;;  %v13311_v6 = vld [vmem:[%s18107_s1 + $0x8] sm:$0x3]  ;;  %vm305_vm1 = vsmask.f32 3328  ;;  %vm796_vm3 = vcmask 31744  }
   0xf   : > { %13042 = vmatprep.subr.msk.bf16.mxu0 %vm851_vm0, %v11136_v4  ;;  %13043 = vmatprep.subr.msk.bf16.mxu1 %vm851_vm0, %v11209_v5  ;;  %s13058_s7 = smul.u32 240, %s18628_s18  ;;  %vm306_vm2 = vsmask.f32 7440  ;;  %v13320_v7 = vsel %vm851_vm0, %v11136_v4, 0  ;;  %v2049_v8 = vsel %vm851_vm0, %v11209_v5, 0  ;;  %v13325_v9 = vsel %vm851_vm0, %v13311_v6, 0 }
  0x10   : > { %vm13353_vm4 = vmor %vm305_vm1, %vm306_vm2  ;;  %v18137_v36 = vmov 0  ;;  %vm1410_vm5 = vcmask 1042432   ;;  %vm1411_vm6 = vcmask 1046532   ;;  %vm6687_vm8 = vcmask 1043456  }
  0x11   : > { %s13317_s10 = scalar_lea.vmem %s18106_s0, %s13058_s7  ;;  %v18138_v36 = vsel %vm13353_vm4, 4294967295, %v18137_v36  ;;  %vm13648_vm7 = vmor %vm1410_vm5, %vm1411_vm6  ;;  %vm5486_vm9 = vcmask 60416   ;;  %vm5489_vm10 = vcmask 57344   ;;  %vm6014_vm11 = vsmask.f32 7938  ;;  %s12031_s7 = sshll.u32 %s18628_s18, 6 }
  0x12   : > { %v250_v10 = vld [vmem:[%s13317_s10] sm:$0xf]  ;;  %v13329_v11 = vld [vmem:[%s13317_s10 + $0x4] sm:$0xf]  ;;  %v13332_v12 = vld [vmem:[%s13317_s10 + $0x8] sm:$0x1]  ;;  %s17953_s9 = scalar_lea.vmem %s18111_s5, %s12031_s7 }
  0x13   : > { %v309_v13 = vshrl.u32 %v250_v10, 16  ;;  %v312_v14 = vshll.u32 %v250_v10, 16  ;;  %v318_v15 = vshll.u32 %v13329_v11, 16  ;;  %v322_v16 = vshrl.u32 %v13329_v11, 16  ;;  %v252_v17 = vld [vmem:[%s13317_s10 + $0xc] sm:$0xf]  ;;  %vm15812_vm1 = vmand %vm5486_vm9, %vm6014_vm11 }
  0x14   : > { %v328_v18 = vshll.u32 %v13332_v12, 16  ;;  %v11082_v20 = vcombine.low %v250_v10, %v13329_v11  ;;  %v13341_v21 = vld [vmem:[%s13317_s10 + $0x10] sm:$0xf]  ;;  %v13344_v22 = vld [vmem:[%s13317_s10 + $0x14] sm:$0x1]  ;;  %v333_v28 = vshrl.u32 %v252_v17, 16 }
  0x15   : > { %v311_v23 = vrot.slane %v309_v13, 4  ;;  %v314_v24 = vrot.slane %v312_v14, 5  ;;  %v320_v25 = vrot.slane %v318_v15, 5  ;;  %v324_v26 = vrot.slane %v322_v16, 4  ;;  %v254_v35 = vld [vmem:[%s13317_s10 + $0x18] sm:$0xf] }
  0x16   : > { %v330_v27 = vrot.slane %v328_v18, 5  ;;  %12432 = vmatprep.mubr.msk.bf16.mxu1 %vm796_vm3, %v11082_v20  ;;  %v336_v29 = vshll.u32 %v252_v17, 16  ;;  %v342_v30 = vshll.u32 %v13341_v21, 16  ;;  %v346_v33 = vshrl.u32 %v13341_v21, 16  ;;  %18139 = vst [vmem:[#allocation4_spill] sm:$0xff] %v18138_v36 }
  0x17   : > { %v315_v31 = vor.u32 %v314_v24, %v311_v23  ;;  %v325_v32 = vor.u32 %v324_v26, %v320_v25  ;;  %v352_v34 = vshll.u32 %v13344_v22, 16  ;;  %v335_v37 = vrot.slane %v333_v28, 4  ;;  %v13359_v45 = vld [vmem:[%s13317_s10 + $0x1c] sm:$0xf]  ;;  %v13364_v49 = vld [vmem:[%s13317_s10 + $0x20] sm:$0x1] }
  0x18   : > { %v338_v38 = vrot.slane %v336_v29, 5  ;;  %v344_v39 = vrot.slane %v342_v30, 5  ;;  %v1422_v40 = vrot.slane %v13341_v21, 5  ;;  %v348_v43 = vrot.slane %v346_v33, 4  ;;  %v256_v55 = vld [vmem:[%s13317_s10 + $0x24] sm:$0xf] }
  0x19   : > { %v316_v41 = vrot.slane %v315_v31, 4  ;;  %v326_v42 = vrot.slane %v325_v32, 4  ;;  %v354_v44 = vrot.slane %v352_v34, 5  ;;  %v1425_v47 = vrot.slane %v13344_v22, 5  ;;  %v13376_v0 = vld [vmem:[%s13317_s10 + $0x28] sm:$0xf] }
  0x1a   : > { %v339_v46 = vor.u32 %v338_v38, %v335_v37  ;;  %v11083_v48 = vcombine.low %v252_v17, %v13341_v21  ;;  %v357_v50 = vshrl.u32 %v254_v35, 16  ;;  %v349_v53 = vor.u32 %v348_v43, %v344_v39  ;;  %v13383_v4 = vld [vmem:[%s13317_s10 + $0x2c] sm:$0x1]  ;;  %v13398_v31 = vld [vmem:[%s13317_s10 + $0x38] sm:$0x1] }
  0x1b   : > { %v321_v51 = vsel %vm13353_vm4, %v316_v41, %v320_v25  ;;  %v331_v52 = vsel %vm13353_vm4, %v326_v42, %v330_v27  ;;  %v360_v54 = vshll.u32 %v254_v35, 16  ;;  %v366_v59 = vshll.u32 %v13359_v45, 16  ;;  %v13393_v27 = vld [vmem:[%s13317_s10 + $0x34] sm:$0xf] }
  0x1c   : > { %v11046_v56 = vcombine.low %v321_v51, %v331_v52  ;;  %v340_v57 = vrot.slane %v339_v46, 4  ;;  %12433 = vmatmul.mubr.msk.bf16.vlgmr.msra.gmra.mxu1 %vm796_vm3, %v11083_v48  ;;  %v359_v58 = vrot.slane %v357_v50, 4  ;;  %v350_v60 = vrot.slane %v349_v53, 4  ;;  %v260_v48 = vld [vmem:[%s13317_s10 + $0x3c] sm:$0xf] }
  0x1d   : > { %v362_v61 = vrot.slane %v360_v54, 5  ;;  %v370_v62 = vshrl.u32 %v13359_v45, 16  ;;  %v376_v63 = vshll.u32 %v13364_v49, 16  ;;  %12507 = vmatpush3.bf16.msra.mxu1 %v2049_v8  ;;  %v368_v2 = vrot.slane %v366_v59, 5  ;;  %v258_v8 = vld [vmem:[%s13317_s10 + $0x30] sm:$0xf] }
  0x1e   : > { %12394 = vmatprep.mubr.msk.bf16.mxu0 %vm796_vm3, %v11046_v56  ;;  %v345_v1 = vsel %vm13353_vm4, %v340_v57, %v344_v39  ;;  %v11084_v3 = vcombine.low %v254_v35, %v13359_v45  ;;  %v381_v5 = vshrl.u32 %v256_v55, 16  ;;  %v355_v10 = vsel %vm13353_vm4, %v350_v60, %v354_v44  ;;  %v13413_v54 = vld [vmem:[%s13317_s10 + $0x40] sm:$0xf]  ;;  %v13420_v60 = vld [vmem:[%s13317_s10 + $0x44] sm:$0x1] }
  0x1f   : > { %v363_v13 = vor.u32 %v362_v61, %v359_v58  ;;  %v372_v14 = vrot.slane %v370_v62, 4  ;;  %v378_v15 = vrot.slane %v376_v63, 5  ;;  %v11047_v16 = vcombine.low %v345_v1, %v355_v10 }
  0x20   : > { %12436 = vmatprep.mubr.msk.bf16.mxu1 %vm796_vm3, %v11084_v3  ;;  %v383_v17 = vrot.slane %v381_v5, 4  ;;  %v384_v18 = vshll.u32 %v256_v55, 16  ;;  %v390_v20 = vshll.u32 %v13376_v0, 16  ;;  %v394_v25 = vshrl.u32 %v13376_v0, 16  ;;  %v262_v5 = vld [vmem:[%s13317_s10 + $0x48] sm:$0xf] }
  0x21   : > { %v364_v23 = vrot.slane %v363_v13, 4  ;;  %v373_v24 = vor.u32 %v372_v14, %v368_v2  ;;  %v400_v26 = vshll.u32 %v13383_v4, 16  ;;  %12395 = vmatmul.mubr.msk.bf16.vlgmr.msra.gmra.mxu0 %vm796_vm3, %v11047_v16  ;;  %v11085_v30 = vcombine.low %v256_v55, %v13376_v0 }
  0x22   : > { %v386_v28 = vrot.slane %v384_v18, 5  ;;  %v392_v29 = vrot.slane %v390_v20, 5  ;;  %v405_v32 = vshrl.u32 %v258_v8, 16  ;;  %12469 = vmatpush3.bf16.msra.mxu0 %v13320_v7  ;;  %v396_v35 = vrot.slane %v394_v25, 4  ;;  %v13430_v20 = vld [vmem:[%s13317_s10 + $0x4c] sm:$0xf] }
  0x23   : > { %v369_v33 = vsel %vm13353_vm4, %v364_v23, %v368_v2  ;;  %v374_v34 = vrot.slane %v373_v24, 4  ;;  %v402_v37 = vrot.slane %v400_v26, 5  ;;  %v408_v41 = vshll.u32 %v258_v8, 16  ;;  %13044 = vmatprep.subr.msk.bf16.mxu0 %vm851_vm0, %v13311_v6  ;;  %v13437_v26 = vld [vmem:[%s13317_s10 + $0x50] sm:$0x1] }
  0x24   : > { %v387_v38 = vor.u32 %v386_v28, %v383_v17  ;;  %12437 = vmatmul.mubr.msk.bf16.gmra.mxu1 %vm796_vm3, %v11085_v30  ;;  %v407_v39 = vrot.slane %v405_v32, 4  ;;  %v414_v42 = vshll.u32 %v13393_v27, 16  ;;  %v397_v43 = vor.u32 %v396_v35, %v392_v29 }
  0x25   : > { %v379_v7 = vsel %vm13353_vm4, %v374_v34, %v378_v15  ;;  %v418_v44 = vshrl.u32 %v13393_v27, 16  ;;  %v424_v46 = vshll.u32 %v13398_v31, 16  ;;  %v410_v52 = vrot.slane %v408_v41, 5  ;;  %v264_v34 = vld [vmem:[%s13317_s10 + $0x54] sm:$0xf] }
  0x26   : > { %v11048_v50 = vcombine.low %v369_v33, %v379_v7  ;;  %v388_v51 = vrot.slane %v387_v38, 4  ;;  %v416_v53 = vrot.slane %v414_v42, 5  ;;  %v398_v55 = vrot.slane %v397_v43, 4 }
  0x27   : > { %v420_v56 = vrot.slane %v418_v44, 4  ;;  %v426_v6 = vrot.slane %v424_v46, 5  ;;  %v11086_v57 = vcombine.low %v258_v8, %v13393_v27  ;;  %v411_v59 = vor.u32 %v410_v52, %v407_v39  ;;  %v13447_v44 = vld [vmem:[%s13317_s10 + $0x58] sm:$0xf] }
  0x28   : > { %12398 = vmatprep.mubr.msk.bf16.mxu0 %vm796_vm3, %v11048_v50  ;;  %v393_v58 = vsel %vm13353_vm4, %v388_v51, %v392_v29  ;;  %v429_v61 = vshrl.u32 %v260_v48, 16  ;;  %v432_v62 = vshll.u32 %v260_v48, 16  ;;  %v403_v63 = vsel %vm13353_vm4, %v398_v55, %v402_v37  ;;  %v13454_v51 = vld [vmem:[%s13317_s10 + $0x5c] sm:$0x1] }
  0x29   : > { %v421_v1 = vor.u32 %v420_v56, %v416_v53  ;;  %12440 = vmatprep.mubr.msk.bf16.mxu1 %vm796_vm3, %v11086_v57  ;;  %v438_v2 = vshll.u32 %v13413_v54, 16  ;;  %v442_v3 = vshrl.u32 %v13413_v54, 16  ;;  %v11049_v10 = vcombine.low %v393_v58, %v403_v63  ;;  %v266_v57 = vld [vmem:[%s13317_s10 + $0x60] sm:$0xf] }
  0x2a   : > { %v412_v13 = vrot.slane %v411_v59, 4  ;;  %v431_v14 = vrot.slane %v429_v61, 4  ;;  %v434_v15 = vrot.slane %v432_v62, 5  ;;  %v448_v18 = vshll.u32 %v13420_v60, 16 }
  0x2b   : > { %v422_v8 = vrot.slane %v421_v1, 4  ;;  %v440_v16 = vrot.slane %v438_v2, 5  ;;  %v444_v17 = vrot.slane %v442_v3, 4  ;;  %12399 = vmatmul.mubr.msk.bf16.gmra.mxu0 %vm796_vm3, %v11049_v10  ;;  %v11087_v25 = vcombine.low %v260_v48, %v13413_v54 }
  0x2c   : > { %v417_v23 = vsel %vm13353_vm4, %v412_v13, %v416_v53  ;;  %v435_v24 = vor.u32 %v434_v15, %v431_v14  ;;  %v453_v28 = vshrl.u32 %v262_v5, 16  ;;  %v450_v32 = vrot.slane %v448_v18, 5  ;;  %v13469_v15 = vld [vmem:[%s13317_s10 + $0x68] sm:$0x1] }
  0x2d   : > { %v427_v29 = vsel %vm13353_vm4, %v422_v8, %v426_v6  ;;  %v445_v30 = vor.u32 %v444_v17, %v440_v16  ;;  %v456_v33 = vshll.u32 %v262_v5, 16  ;;  %12441 = vmatmul.mubr.msk.bf16.gmra.mxu1 %vm796_vm3, %v11087_v25  ;;  %v462_v39 = vshll.u32 %v13430_v20, 16 }
  0x2e   : > { %v11050_v35 = vcombine.low %v417_v23, %v427_v29  ;;  %v436_v37 = vrot.slane %v435_v24, 4  ;;  %v455_v38 = vrot.slane %v453_v28, 4  ;;  %v466_v7 = vshrl.u32 %v13430_v20, 16 }
  0x2f   : > { %v446_v41 = vrot.slane %v445_v30, 4  ;;  %v458_v42 = vrot.slane %v456_v33, 5  ;;  %v472_v43 = vshll.u32 %v13437_v26, 16  ;;  %v464_v48 = vrot.slane %v462_v39, 5 }
  0x30   : > { %12402 = vmatprep.mubr.msk.bf16.mxu0 %vm796_vm3, %v11050_v35  ;;  %v441_v46 = vsel %vm13353_vm4, %v436_v37, %v440_v16  ;;  %v11088_v50 = vcombine.low %v262_v5, %v13430_v20  ;;  %v477_v52 = vshrl.u32 %v264_v34, 16  ;;  %v468_v56 = vrot.slane %v466_v7, 4  ;;  %v13464_v5 = vld [vmem:[%s13317_s10 + $0x64] sm:$0xf]  ;;  %v268_v35 = vld [vmem:[%s13317_s10 + $0x6c] sm:$0xf] }
  0x31   : > { %v451_v53 = vsel %vm13353_vm4, %v446_v41, %v450_v32  ;;  %v459_v55 = vor.u32 %v458_v42, %v455_v38  ;;  %v474_v6 = vrot.slane %v472_v43, 5  ;;  %v480_v61 = vshll.u32 %v264_v34, 16  ;;  %v13481_v37 = vld [vmem:[%s13317_s10 + $0x70] sm:$0xf]  ;;  %v13484_v7 = vld [vmem:[%s13317_s10 + $0x74] sm:$0x1] }
  0x32   : > { %v11051_v58 = vcombine.low %v441_v46, %v451_v53  ;;  %12444 = vmatprep.mubr.msk.bf16.mxu1 %vm796_vm3, %v11088_v50  ;;  %v479_v59 = vrot.slane %v477_v52, 4  ;;  %v486_v62 = vshll.u32 %v13447_v44, 16  ;;  %v469_v1 = vor.u32 %v468_v56, %v464_v48  ;;  %v270_v52 = vld [vmem:[%s13317_s10 + $0x78] sm:$0xf] }
  0x33   : > { %v460_v63 = vrot.slane %v459_v55, 4  ;;  %v490_v2 = vshrl.u32 %v13447_v44, 16  ;;  %v496_v3 = vshll.u32 %v13454_v51, 16  ;;  %v482_v10 = vrot.slane %v480_v61, 5 }
  0x34   : > { %12403 = vmatmul.mubr.msk.bf16.gmra.mxu0 %vm796_vm3, %v11051_v58  ;;  %v488_v13 = vrot.slane %v486_v62, 5  ;;  %v11089_v14 = vcombine.low %v264_v34, %v13447_v44  ;;  %v501_v8 = vshrl.u32 %v266_v57, 16  ;;  %v470_v17 = vrot.slane %v469_v1, 4  ;;  %v13497_v62 = vld [vmem:[%s13317_s10 + $0x7c] sm:$0xf] }
  0x35   : > { %v465_v16 = vsel %vm13353_vm4, %v460_v63, %v464_v48  ;;  %v492_v18 = vrot.slane %v490_v2, 4  ;;  %v498_v23 = vrot.slane %v496_v3, 5  ;;  %v483_v24 = vor.u32 %v482_v10, %v479_v59  ;;  %v13500_v10 = vld [vmem:[%s13317_s10 + $0x80] sm:$0x1] }
  0x36   : > { %12445 = vmatmul.mubr.msk.bf16.gmra.mxu1 %vm796_vm3, %v11089_v14  ;;  %v503_v25 = vrot.slane %v501_v8, 4  ;;  %v504_v28 = vshll.u32 %v266_v57, 16  ;;  %v510_v29 = vshll.u32 %v13464_v5, 16  ;;  %v475_v30 = vsel %vm13353_vm4, %v470_v17, %v474_v6  ;;  %v272_v17 = vld [vmem:[%s13317_s10 + $0x84] sm:$0xf] }
  0x37   : > { %v493_v32 = vor.u32 %v492_v18, %v488_v13  ;;  %v514_v33 = vshrl.u32 %v13464_v5, 16  ;;  %v520_v34 = vshll.u32 %v13469_v15, 16  ;;  %v11052_v38 = vcombine.low %v465_v16, %v475_v30 }
  0x38   : > { %v484_v39 = vrot.slane %v483_v24, 4  ;;  %v506_v41 = vrot.slane %v504_v28, 5  ;;  %v512_v42 = vrot.slane %v510_v29, 5  ;;  %v11090_v50 = vcombine.low %v266_v57, %v13464_v5 }
  0x39   : > { %v494_v43 = vrot.slane %v493_v32, 4  ;;  %v516_v46 = vrot.slane %v514_v33, 4  ;;  %v522_v48 = vrot.slane %v520_v34, 5  ;;  %12406 = vmatprep.mubr.msk.bf16.mxu0 %vm796_vm3, %v11052_v38  ;;  %v525_v56 = vshrl.u32 %v268_v35, 16  ;;  %v13511_v33 = vld [vmem:[%s13317_s10 + $0x88] sm:$0xf] }
  0x3a   : > { %v489_v53 = vsel %vm13353_vm4, %v484_v39, %v488_v13  ;;  %v507_v55 = vor.u32 %v506_v41, %v503_v25  ;;  %v528_v6 = vshll.u32 %v268_v35, 16  ;;  %12448 = vmatprep.mubr.msk.bf16.mxu1 %vm796_vm3, %v11090_v50  ;;  %v534_v61 = vshll.u32 %v13481_v37, 16  ;;  %v274_v50 = vld [vmem:[%s13317_s10 + $0x90] sm:$0xf] }
  0x3b   : > { %v499_v58 = vsel %vm13353_vm4, %v494_v43, %v498_v23  ;;  %v517_v59 = vor.u32 %v516_v46, %v512_v42  ;;  %v538_v57 = vshrl.u32 %v13481_v37, 16  ;;  %v527_v2 = vrot.slane %v525_v56, 4 }
  0x3c   : > { %v11053_v63 = vcombine.low %v489_v53, %v499_v58  ;;  %v508_v1 = vrot.slane %v507_v55, 4  ;;  %v530_v3 = vrot.slane %v528_v6, 5  ;;  %v536_v14 = vrot.slane %v534_v61, 5 }
  0x3d   : > { %v518_v13 = vrot.slane %v517_v59, 4  ;;  %v540_v8 = vrot.slane %v538_v57, 4  ;;  %v544_v16 = vshll.u32 %v13484_v7, 16  ;;  %v11091_v24 = vcombine.low %v268_v35, %v13481_v37 }
  0x3e   : > { %12407 = vmatmul.mubr.msk.bf16.gmra.mxu0 %vm796_vm3, %v11053_v63  ;;  %v513_v18 = vsel %vm13353_vm4, %v508_v1, %v512_v42  ;;  %v531_v23 = vor.u32 %v530_v3, %v527_v2  ;;  %v549_v25 = vshrl.u32 %v270_v52, 16  ;;  %v552_v32 = vshll.u32 %v270_v52, 16  ;;  %v13516_v42 = vld [vmem:[%s13317_s10 + $0x8c] sm:$0x1] }
  0x3f   : > { %v523_v28 = vsel %vm13353_vm4, %v518_v13, %v522_v48  ;;  %v541_v29 = vor.u32 %v540_v8, %v536_v14  ;;  %v546_v30 = vrot.slane %v544_v16, 5  ;;  %12449 = vmatmul.mubr.msk.bf16.gmra.mxu1 %vm796_vm3, %v11091_v24  ;;  %v558_v41 = vshll.u32 %v13497_v62, 16  ;;  %v13530_v13 = vld [vmem:[%s13317_s10 + $0x94] sm:$0xf] }
  0x40   : > { %v11054_v34 = vcombine.low %v513_v18, %v523_v28  ;;  %v532_v38 = vrot.slane %v531_v23, 4  ;;  %v551_v39 = vrot.slane %v549_v25, 4  ;;  %v554_v43 = vrot.slane %v552_v32, 5  ;;  %v13535_v18 = vld [vmem:[%s13317_s10 + $0x98] sm:$0x1] }
  0x41   : > { %v542_v35 = vrot.slane %v541_v29, 4  ;;  %v562_v46 = vshrl.u32 %v13497_v62, 16  ;;  %v568_v48 = vshll.u32 %v13500_v10, 16  ;;  %v560_v55 = vrot.slane %v558_v41, 5 }
  0x42   : > { %12410 = vmatprep.mubr.msk.bf16.mxu0 %vm796_vm3, %v11054_v34  ;;  %v537_v53 = vsel %vm13353_vm4, %v532_v38, %v536_v14  ;;  %v11092_v56 = vcombine.low %v270_v52, %v13497_v62  ;;  %v573_v6 = vshrl.u32 %v272_v17, 16  ;;  %v555_v59 = vor.u32 %v554_v43, %v551_v39  ;;  %v276_v38 = vld [vmem:[%s13317_s10 + $0x9c] sm:$0xf] }
  0x43   : > { %v547_v58 = vsel %vm13353_vm4, %v542_v35, %v546_v30  ;;  %v564_v61 = vrot.slane %v562_v46, 4  ;;  %v570_v57 = vrot.slane %v568_v48, 5  ;;  %v576_v2 = vshll.u32 %v272_v17, 16 }
  0x44   : > { %v11055_v63 = vcombine.low %v537_v53, %v547_v58  ;;  %12452 = vmatprep.mubr.msk.bf16.mxu1 %vm796_vm3, %v11092_v56  ;;  %v575_v1 = vrot.slane %v573_v6, 4  ;;  %v582_v3 = vshll.u32 %v13511_v33, 16  ;;  %v556_v14 = vrot.slane %v555_v59, 4 }
  0x45   : > { %v565_v52 = vor.u32 %v564_v61, %v560_v55  ;;  %v586_v8 = vshrl.u32 %v13511_v33, 16  ;;  %v592_v16 = vshll.u32 %v13516_v42, 16  ;;  %v578_v23 = vrot.slane %v576_v2, 5  ;;  %v13552_v61 = vld [vmem:[%s13317_s10 + $0xa4] sm:$0x1] }
  0x46   : > { %12411 = vmatmul.mubr.msk.bf16.gmra.mxu0 %vm796_vm3, %v11055_v63  ;;  %v584_v24 = vrot.slane %v582_v3, 5  ;;  %v11093_v25 = vcombine.low %v272_v17, %v13511_v33  ;;  %v597_v28 = vshrl.u32 %v274_v50, 16  ;;  %v561_v29 = vsel %vm13353_vm4, %v556_v14, %v560_v55  ;;  %v13549_v55 = vld [vmem:[%s13317_s10 + $0xa0] sm:$0xf] }
  0x47   : > { %v566_v30 = vrot.slane %v565_v52, 4  ;;  %v588_v32 = vrot.slane %v586_v8, 4  ;;  %v594_v34 = vrot.slane %v592_v16, 5  ;;  %v579_v39 = vor.u32 %v578_v23, %v575_v1 }
  0x48   : > { %12453 = vmatmul.mubr.msk.bf16.gmra.mxu1 %vm796_vm3, %v11093_v25  ;;  %v599_v41 = vrot.slane %v597_v28, 4  ;;  %v600_v35 = vshll.u32 %v274_v50, 16  ;;  %v606_v43 = vshll.u32 %v13530_v13, 16  ;;  %v610_v48 = vshrl.u32 %v13530_v13, 16 }
  0x49   : > { %v571_v17 = vsel %vm13353_vm4, %v566_v30, %v570_v57  ;;  %v589_v46 = vor.u32 %v588_v32, %v584_v24  ;;  %v616_v53 = vshll.u32 %v13535_v18, 16  ;;  %v580_v6 = vrot.slane %v579_v39, 4  ;;  %v278_v57 = vld [vmem:[%s13317_s10 + $0xa8] sm:$0xf] }
  0x4a   : > { %v11056_v56 = vcombine.low %v561_v29, %v571_v17  ;;  %v602_v58 = vrot.slane %v600_v35, 5  ;;  %v608_v59 = vrot.slane %v606_v43, 5  ;;  %v612_v1 = vrot.slane %v610_v48, 4  ;;  %v13565_v29 = vld [vmem:[%s13317_s10 + $0xac] sm:$0xf] }
  0x4b   : > { %v590_v63 = vrot.slane %v589_v46, 4  ;;  %v618_v2 = vrot.slane %v616_v53, 5  ;;  %v11094_v3 = vcombine.low %v274_v50, %v13530_v13  ;;  %v585_v14 = vsel %vm13353_vm4, %v580_v6, %v584_v24  ;;  %v280_v46 = vld [vmem:[%s13317_s10 + $0xb4] sm:$0xf] }
  0x4c   : > { %12414 = vmatprep.mubr.msk.bf16.mxu0 %vm796_vm3, %v11056_v56  ;;  %v603_v52 = vor.u32 %v602_v58, %v599_v41  ;;  %v621_v8 = vshrl.u32 %v276_v38, 16  ;;  %v624_v16 = vshll.u32 %v276_v38, 16  ;;  %v613_v25 = vor.u32 %v612_v1, %v608_v59  ;;  %v13568_v41 = vld [vmem:[%s13317_s10 + $0xb0] sm:$0x1] }
  0x4d   : > { %v595_v23 = vsel %vm13353_vm4, %v590_v63, %v594_v34  ;;  %12456 = vmatprep.mubr.msk.bf16.mxu1 %vm796_vm3, %v11094_v3  ;;  %v630_v28 = vshll.u32 %v13549_v55, 16  ;;  %v634_v50 = vshrl.u32 %v13549_v55, 16  ;;  %v640_v34 = vshll.u32 %v13552_v61, 16 }
  0x4e   : > { %v11057_v30 = vcombine.low %v585_v14, %v595_v23  ;;  %v604_v32 = vrot.slane %v603_v52, 4  ;;  %v623_v39 = vrot.slane %v621_v8, 4  ;;  %v626_v24 = vrot.slane %v624_v16, 5  ;;  %v13579_v14 = vld [vmem:[%s13317_s10 + $0xb8] sm:$0xf] }
  0x4f   : > { %v614_v35 = vrot.slane %v613_v25, 4  ;;  %v632_v43 = vrot.slane %v630_v28, 5  ;;  %v636_v17 = vrot.slane %v634_v50, 4  ;;  %v11095_v56 = vcombine.low %v276_v38, %v13549_v55  ;;  %v13584_v23 = vld [vmem:[%s13317_s10 + $0xbc] sm:$0x1] }
  0x50   : > { %12415 = vmatmul.mubr.msk.bf16.gmra.mxu0 %vm796_vm3, %v11057_v30  ;;  %v609_v48 = vsel %vm13353_vm4, %v604_v32, %v608_v59  ;;  %v627_v53 = vor.u32 %v626_v24, %v623_v39  ;;  %v645_v6 = vshrl.u32 %v278_v57, 16  ;;  %v642_v1 = vrot.slane %v640_v34, 5  ;;  %v282_v50 = vld [vmem:[%s13317_s10 + $0xc0] sm:$0xf] }
  0x51   : > { %v619_v58 = vsel %vm13353_vm4, %v614_v35, %v618_v2  ;;  %v637_v63 = vor.u32 %v636_v17, %v632_v43  ;;  %v648_v3 = vshll.u32 %v278_v57, 16  ;;  %12457 = vmatmul.mubr.msk.bf16.gmra.mxu1 %vm796_vm3, %v11095_v56  ;;  %v654_v59 = vshll.u32 %v13565_v29, 16 }
  0x52   : > { %v11058_v52 = vcombine.low %v609_v48, %v619_v58  ;;  %v628_v8 = vrot.slane %v627_v53, 4  ;;  %v647_v16 = vrot.slane %v645_v6, 4  ;;  %v658_v28 = vshrl.u32 %v13565_v29, 16  ;;  %v13596_v53 = vld [vmem:[%s13317_s10 + $0xc4] sm:$0xf] }
  0x53   : > { %v638_v38 = vrot.slane %v637_v63, 4  ;;  %v650_v25 = vrot.slane %v648_v3, 5  ;;  %v664_v2 = vshll.u32 %v13568_v41, 16  ;;  %v656_v32 = vrot.slane %v654_v59, 5 }
  0x54   : > { %12418 = vmatprep.mubr.msk.bf16.mxu0 %vm796_vm3, %v11058_v52  ;;  %v633_v30 = vsel %vm13353_vm4, %v628_v8, %v632_v43  ;;  %v11096_v39 = vcombine.low %v278_v57, %v13565_v29  ;;  %v669_v24 = vshrl.u32 %v280_v46, 16  ;;  %v660_v34 = vrot.slane %v658_v28, 4  ;;  %v13601_v43 = vld [vmem:[%s13317_s10 + $0xc8] sm:$0x1] }
  0x55   : > { %v643_v35 = vsel %vm13353_vm4, %v638_v38, %v642_v1  ;;  %v651_v17 = vor.u32 %v650_v25, %v647_v16  ;;  %v666_v48 = vrot.slane %v664_v2, 5  ;;  %v672_v58 = vshll.u32 %v280_v46, 16 }
  0x56   : > { %v11059_v56 = vcombine.low %v633_v30, %v643_v35  ;;  %12460 = vmatprep.mubr.msk.bf16.mxu1 %vm796_vm3, %v11096_v39  ;;  %v671_v6 = vrot.slane %v669_v24, 4  ;;  %v678_v63 = vshll.u32 %v13579_v14, 16  ;;  %v661_v57 = vor.u32 %v660_v34, %v656_v32 }
  0x57   : > { %v652_v3 = vrot.slane %v651_v17, 4  ;;  %v682_v52 = vshrl.u32 %v13579_v14, 16  ;;  %v688_v1 = vshll.u32 %v13584_v23, 16  ;;  %v674_v8 = vrot.slane %v672_v58, 5 }
  0x58   : > { %12419 = vmatmul.mubr.msk.bf16.gmra.mxu0 %vm796_vm3, %v11059_v56  ;;  %v680_v16 = vrot.slane %v678_v63, 5  ;;  %v11097_v59 = vcombine.low %v280_v46, %v13579_v14  ;;  %v693_v38 = vshrl.u32 %v282_v50, 16  ;;  %v662_v28 = vrot.slane %v661_v57, 4  ;;  %v13617_v63 = vld [vmem:[%s13317_s10 + $0xd0] sm:$0xf] }
  0x59   : > { %v657_v25 = vsel %vm13353_vm4, %v652_v3, %v656_v32  ;;  %v684_v2 = vrot.slane %v682_v52, 4  ;;  %v690_v30 = vrot.slane %v688_v1, 5  ;;  %v675_v39 = vor.u32 %v674_v8, %v671_v6  ;;  %v284_v32 = vld [vmem:[%s13317_s10 + $0xcc] sm:$0xf]  ;;  %v13620_v1 = vld [vmem:[%s13317_s10 + $0xd4] sm:$0x1] }
  0x5a   : > { %12461 = vmatmul.mubr.msk.bf16.gmra.mxu1 %vm796_vm3, %v11097_v59  ;;  %v695_v24 = vrot.slane %v693_v38, 4  ;;  %v696_v35 = vshll.u32 %v282_v50, 16  ;;  %v702_v17 = vshll.u32 %v13596_v53, 16  ;;  %v667_v34 = vsel %vm13353_vm4, %v662_v28, %v666_v48 }
  0x5b   : > { %v685_v46 = vor.u32 %v684_v2, %v680_v16  ;;  %v706_v56 = vshrl.u32 %v13596_v53, 16  ;;  %v712_v58 = vshll.u32 %v13601_v43, 16  ;;  %v11060_v3 = vcombine.low %v657_v25, %v667_v34  ;;  %v1356_v34 = vld [vmem:[%s13317_s10] sm:$0xe] }
  0x5c   : > { %v676_v57 = vrot.slane %v675_v39, 4  ;;  %v698_v6 = vrot.slane %v696_v35, 5  ;;  %v704_v52 = vrot.slane %v702_v17, 5  ;;  %v11098_v48 = vcombine.low %v282_v50, %v13596_v53 }
  0x5d   : > { %v686_v8 = vrot.slane %v685_v46, 4  ;;  %v708_v59 = vrot.slane %v706_v56, 4  ;;  %v714_v38 = vrot.slane %v712_v58, 5  ;;  %12422 = vmatprep.mubr.msk.bf16.mxu0 %vm796_vm3, %v11060_v3  ;;  %v717_v19 = vshrl.u32 %v284_v32, 16  ;;  %v13635_v46 = vld [vmem:[%s18107_s1 + $0xa] sm:$0x3] }
  0x5e   : > { %v681_v28 = vsel %vm13353_vm4, %v676_v57, %v680_v16  ;;  %v699_v2 = vor.u32 %v698_v6, %v695_v24  ;;  %v720_v25 = vshll.u32 %v284_v32, 16  ;;  %12464 = vmatprep.mubr.msk.bf16.mxu1 %vm796_vm3, %v11098_v48  ;;  %v726_v17 = vshll.u32 %v13617_v63, 16  ;;  %13045 = vmatprep.subr.msk.bf16.mxu1 %vm851_vm0, %v13635_v46 }
  0x5f   : > { %v691_v39 = vsel %vm13353_vm4, %v686_v8, %v690_v30  ;;  %v709_v35 = vor.u32 %v708_v59, %v704_v52  ;;  %v730_v50 = vshrl.u32 %v13617_v63, 16  ;;  %v719_v56 = vrot.slane %v717_v19, 4  ;;  %v13102_v30 = vld [vmem:[%s13317_s10 + $0xc] sm:$0xff]  }
  0x60   : > { %v11061_v16 = vcombine.low %v681_v28, %v691_v39  ;;  %v700_v24 = vrot.slane %v699_v2, 4  ;;  %v722_v58 = vrot.slane %v720_v25, 5  ;;  %v728_v57 = vrot.slane %v726_v17, 5  ;;  %v1357_v59 = vld [vmem:[%s13317_s10 + $0xc] sm:$0xe] }
  0x61   : > { %v710_v3 = vrot.slane %v709_v35, 4  ;;  %v732_v6 = vrot.slane %v730_v50, 4  ;;  %v736_v8 = vshll.u32 %v13620_v1, 16  ;;  %v11099_v2 = vcombine.low %v284_v32, %v13617_v63  ;;  %v1358_v39 = vld [vmem:[%s13317_s10 + $0x18] sm:$0xe] }
  0x62   : > { %12423 = vmatmul.mubr.msk.bf16.gmra.mxu0 %vm796_vm3, %v11061_v16  ;;  %v705_v48 = vsel %vm13353_vm4, %v700_v24, %v704_v52  ;;  %v723_v28 = vor.u32 %v722_v58, %v719_v56  ;;  %v18140_v19 = vmov 0  ;;  %v11118_v25 = vrot.slane %v1356_v34, 9 }
  0x63   : > { %v18141_v19 = vsel %vm13648_vm7, 4294967295, %v18140_v19  ;;  %v715_v35 = vsel %vm13353_vm4, %v710_v3, %v714_v38  ;;  %v733_v17 = vor.u32 %v732_v6, %v728_v57  ;;  %v738_v50 = vrot.slane %v736_v8, 5  ;;  %12465 = vmatmul.mubr.msk.bf16.gmra.mxu1 %vm796_vm3, %v11099_v2 }
  0x64   : > { %18142 = vst [vmem:[#allocation5_spill] sm:$0xff] %v18141_v19  ;;  %v1415_v16 = vrot.slane %v13329_v11, 5  ;;  %v11062_v52 = vcombine.low %v705_v48, %v715_v35  ;;  %v724_v24 = vrot.slane %v723_v28, 4  ;;  %v11119_v32 = vrot.slane %v1357_v59, 9  ;;  %12508 = vmatprep.mubr.msk.bf16.mxu1 %vm796_vm3, %v13102_v30  ;;  %v1359_v59 = vld [vmem:[%s13317_s10 + $0x24] sm:$0xe] }
  0x65   : > { %v1424_v56 = vrot.slane %v1422_v40, 4  ;;  %v734_v58 = vrot.slane %v733_v17, 4  ;;  %v11120_v11 = vrot.slane %v1358_v39, 9  ;;  %v1429_v30 = vrot.slane %v13359_v45, 5  ;;  %v1360_v48 = vld [vmem:[%s13317_s10 + $0x30] sm:$0xe] }
  0x66   : > { %v1416_v34 = vsel %vm13648_vm7, %v11118_v25, %v1415_v16  ;;  %v1417_v38 = vrot.slane %v1415_v16, 4  ;;  %12426 = vmatprep.mubr.msk.bf16.mxu0 %vm796_vm3, %v11062_v52  ;;  %v729_v3 = vsel %vm13353_vm4, %v724_v24, %v728_v57  ;;  %v13669_v6 = vsel %vm13648_vm7, %v11119_v32, %v1422_v40  ;;  %v13103_v45 = vld [vmem:[%s13317_s10 + $0x18] sm:$0xff]   ;;  %v13104_v17 = vld [vmem:[%s13317_s10 + $0x24] sm:$0xff]  }
  0x67   : > { %v13675_v8 = vsel %vm13648_vm7, %v1424_v56, %v1425_v47  ;;  %v739_v57 = vsel %vm13353_vm4, %v734_v58, %v738_v50  ;;  %v18143_v21 = vrot.slane %v13332_v12, 5  ;;  %v1432_v28 = vrot.slane %v13364_v49, 5  ;;  %v1361_v47 = vld [vmem:[%s13317_s10 + $0x3c] sm:$0xe]  ;;  %v1362_v24 = vld [vmem:[%s13317_s10 + $0x48] sm:$0xe] }
  0x68   : > { %v11138_v22 = vcombine.low %v13669_v6, %v13675_v8  ;;  %v11063_v2 = vcombine.low %v729_v3, %v739_v57  ;;  %v1430_v39 = vsel %vm13648_vm7, %v11120_v11, %v1429_v30  ;;  %v1431_v35 = vrot.slane %v1429_v30, 4  ;;  %v1363_v11 = vld [vmem:[%s13317_s10 + $0x54] sm:$0xe] }
  0x69   : > { %v1419_v40 = vsel %vm13648_vm7, %v1417_v38, %v18143_v21  ;;  %v11121_v50 = vrot.slane %v1359_v59, 9  ;;  %v1436_v12 = vrot.slane %v13376_v0, 5  ;;  %v1439_v16 = vrot.slane %v13383_v4, 5 }
  0x6a   : > { %v11137_v25 = vcombine.low %v1416_v34, %v1419_v40  ;;  %v11122_v52 = vrot.slane %v1360_v48, 9  ;;  %12427 = vmatmul.mubr.msk.bf16.gmra.mxu0 %vm796_vm3, %v11063_v2  ;;  %v1433_v49 = vsel %vm13648_vm7, %v1431_v35, %v1432_v28  ;;  %v1443_v32 = vrot.slane %v13393_v27, 5  ;;  %v1364_v48 = vld [vmem:[%s13317_s10 + $0x60] sm:$0xe]  ;;  %v1365_v28 = vld [vmem:[%s13317_s10 + $0x6c] sm:$0xe] }
  0x6b   : > { %v1446_v56 = vrot.slane %v13398_v31, 5  ;;  %v11123_v58 = vrot.slane %v1361_v47, 9  ;;  %v11139_v34 = vcombine.low %v1430_v39, %v1433_v49  ;;  %v13705_v0 = vsel %vm13648_vm7, %v11121_v50, %v1436_v12  ;;  %12509 = vmatmul.mubr.msk.bf16.vlgmr.msra.gmra.mxu1 %vm796_vm3, %v13103_v45  ;;  %v13105_v45 = vld [vmem:[%s13317_s10 + $0x30] sm:$0xff]   ;;  %v1366_v50 = vld [vmem:[%s13317_s10 + $0x78] sm:$0xe] }
  0x6c   : > { %12470 = vmatprep.mubr.msk.bf16.mxu0 %vm796_vm3, %v11137_v25  ;;  %v1438_v4 = vrot.slane %v1436_v12, 4  ;;  %v1450_v38 = vrot.slane %v13413_v54, 5  ;;  %v13712_v27 = vsel %vm13648_vm7, %v11122_v52, %v1443_v32  ;;  %v1445_v31 = vrot.slane %v1443_v32, 4  ;;  %12512 = vmatprep.mubr.msk.bf16.mxu1 %vm796_vm3, %v13104_v17  ;;  %v13106_v12 = vld [vmem:[%s13317_s10 + $0x3c] sm:$0xff]   ;;  %v13760_v32 = vld [vmem:[%s18107_s1 + $0xc] sm:$0x3] }
  0x6d   : > { %v1453_v3 = vrot.slane %v13420_v60, 5  ;;  %v11124_v6 = vrot.slane %v1362_v24, 9  ;;  %v1457_v59 = vrot.slane %v13430_v20, 5  ;;  %v1460_v21 = vrot.slane %v13437_v26, 5 }
  0x6e   : > { %v13717_v8 = vsel %vm13648_vm7, %v1438_v4, %v1439_v16  ;;  %v13722_v54 = vsel %vm13648_vm7, %v11123_v58, %v1450_v38  ;;  %v1452_v30 = vrot.slane %v1450_v38, 4  ;;  %v13730_v57 = vsel %vm13648_vm7, %v1445_v31, %v1446_v56  ;;  %v1368_v31 = vld [vmem:[%s13317_s10 + $0x90] sm:$0xe] }
  0x6f   : > { %v11140_v60 = vcombine.low %v13705_v0, %v13717_v8  ;;  %v11125_v40 = vrot.slane %v1363_v11, 9  ;;  %v11141_v47 = vcombine.low %v13712_v27, %v13730_v57  ;;  %v13742_v2 = vsel %vm13648_vm7, %v11124_v6, %v1457_v59 }
  0x70   : > { %v13738_v20 = vsel %vm13648_vm7, %v1452_v30, %v1453_v3  ;;  %v1459_v25 = vrot.slane %v1457_v59, 4  ;;  %v1464_v26 = vrot.slane %v13447_v44, 5  ;;  %v1467_v35 = vrot.slane %v13454_v51, 5 }
  0x71   : > { %v11142_v39 = vcombine.low %v13722_v54, %v13738_v20  ;;  %v11126_v17 = vrot.slane %v1364_v48, 9  ;;  %v1471_v52 = vrot.slane %v13464_v5, 5  ;;  %v1474_v24 = vrot.slane %v13469_v15, 5  ;;  %v1367_v15 = vld [vmem:[%s13317_s10 + $0x84] sm:$0xe] }
  0x72   : > { %v13753_v16 = vsel %vm13648_vm7, %v1459_v25, %v1460_v21  ;;  %v11127_v49 = vrot.slane %v1365_v28, 9  ;;  %12471 = vmatmul.mubr.msk.bf16.vlgmr.msra.gmra.mxu0 %vm796_vm3, %v11138_v22  ;;  %v13767_v51 = vsel %vm13648_vm7, %v11125_v40, %v1464_v26  ;;  %v1466_v56 = vrot.slane %v1464_v26, 4  ;;  %v1370_v26 = vld [vmem:[%s13317_s10 + $0xa8] sm:$0xe] }
  0x73   : > { %v11143_v44 = vcombine.low %v13742_v2, %v13753_v16  ;;  %v1478_v5 = vrot.slane %v13481_v37, 5  ;;  %12545 = vmatpush3.bf16.msra.mxu0 %v13325_v9  ;;  %12474 = vmatprep.mubr.msk.bf16.mxu0 %vm796_vm3, %v11139_v34  ;;  %v13775_v58 = vsel %vm13648_vm7, %v11126_v17, %v1471_v52  ;;  %v1473_v22 = vrot.slane %v1471_v52, 4 }
  0x74   : > { %v1481_v4 = vrot.slane %v13484_v7, 5  ;;  %v11128_v38 = vrot.slane %v1366_v50, 9  ;;  %12513 = vmatmul.mubr.msk.bf16.gmra.mxu1 %vm796_vm3, %v13105_v45  ;;  %v13781_v11 = vsel %vm13648_vm7, %v1466_v56, %v1467_v35  ;;  %v1485_v34 = vrot.slane %v13497_v62, 5  ;;  %13046 = vmatprep.subr.msk.bf16.mxu0 %vm851_vm0, %v13760_v32  ;;  %v1369_v62 = vld [vmem:[%s13317_s10 + $0x9c] sm:$0xe]  ;;  %v13107_v35 = vld [vmem:[%s13317_s10 + $0x48] sm:$0xff]  }
  0x75   : > { %v13785_v9 = vsel %vm13648_vm7, %v11127_v49, %v1478_v5  ;;  %v1480_v37 = vrot.slane %v1478_v5, 4  ;;  %12516 = vmatprep.mubr.msk.bf16.mxu1 %vm796_vm3, %v13106_v12  ;;  %v11144_v7 = vcombine.low %v13767_v51, %v13781_v11  ;;  %v13796_v3 = vsel %vm13648_vm7, %v1473_v22, %v1474_v24  ;;  %v13108_v24 = vld [vmem:[%s13317_s10 + $0x54] sm:$0xff]  }
  0x76   : > { %v1488_v6 = vrot.slane %v13500_v10, 5  ;;  %v11129_v30 = vrot.slane %v1367_v15, 9  ;;  %v11145_v59 = vcombine.low %v13775_v58, %v13796_v3  ;;  %v13808_v21 = vsel %vm13648_vm7, %v11128_v38, %v1485_v34  ;;  %v1371_v5 = vld [vmem:[%s13317_s10 + $0xb4] sm:$0xe]  ;;  %v1373_v38 = vld [vmem:[%s13317_s10 + $0xcc] sm:$0xe] }
  0x77   : > { %v13804_v48 = vsel %vm13648_vm7, %v1480_v37, %v1481_v4  ;;  %v1487_v40 = vrot.slane %v1485_v34, 4  ;;  %v1492_v10 = vrot.slane %v13511_v33, 5  ;;  %v1495_v25 = vrot.slane %v13516_v42, 5  ;;  %v1372_v4 = vld [vmem:[%s13317_s10 + $0xc0] sm:$0xe] }
  0x78   : > { %v11146_v28 = vcombine.low %v13785_v9, %v13804_v48  ;;  %v11130_v45 = vrot.slane %v1368_v31, 9  ;;  %v1499_v50 = vrot.slane %v13530_v13, 5  ;;  %v1502_v12 = vrot.slane %v13535_v18, 5 }
  0x79   : > { %v13818_v17 = vsel %vm13648_vm7, %v1487_v40, %v1488_v6  ;;  %v11131_v52 = vrot.slane %v1369_v62, 9  ;;  %v13827_v33 = vsel %vm13648_vm7, %v11129_v30, %v1492_v10  ;;  %v1494_v42 = vrot.slane %v1492_v10, 4 }
  0x7a   : > { %v11147_v49 = vcombine.low %v13808_v21, %v13818_v17  ;;  %v1506_v56 = vrot.slane %v13549_v55, 5  ;;  %12475 = vmatmul.mubr.msk.bf16.gmra.mxu0 %vm796_vm3, %v11140_v60  ;;  %v13837_v13 = vsel %vm13648_vm7, %v11130_v45, %v1499_v50  ;;  %v1501_v18 = vrot.slane %v1499_v50, 4 }
  0x7b   : > { %v1509_v15 = vrot.slane %v13552_v61, 5  ;;  %v11132_v22 = vrot.slane %v1370_v26, 9  ;;  %12478 = vmatprep.mubr.msk.bf16.mxu0 %vm796_vm3, %v11141_v47  ;;  %v13846_v55 = vsel %vm13648_vm7, %v1494_v42, %v1495_v25  ;;  %v1513_v60 = vrot.slane %v13565_v29, 5  ;;  %v11246_v26 = vld [vmem:[%s13317_s10 + $0xc] sm:$0xf] }
  0x7c   : > { %v13850_v0 = vsel %vm13648_vm7, %v11131_v52, %v1506_v56  ;;  %v1508_v8 = vrot.slane %v1506_v56, 4  ;;  %12517 = vmatmul.mubr.msk.bf16.gmra.mxu1 %vm796_vm3, %v13107_v35  ;;  %v11148_v61 = vcombine.low %v13827_v33, %v13846_v55  ;;  %v13859_v27 = vsel %vm13648_vm7, %v1501_v18, %v1502_v12  ;;  %v13109_v35 = vld [vmem:[%s13317_s10 + $0x60] sm:$0xff]   ;;  %v13894_v52 = vld [vmem:[%s13317_s10 + $0x10] sm:$0xf] }
  0x7d   : > { %v1516_v57 = vrot.slane %v13568_v41, 5  ;;  %v11133_v47 = vrot.slane %v1371_v5, 9  ;;  %12520 = vmatprep.mubr.msk.bf16.mxu1 %vm796_vm3, %v13108_v24  ;;  %v11149_v29 = vcombine.low %v13837_v13, %v13859_v27  ;;  %v13872_v34 = vsel %vm13648_vm7, %v11132_v22, %v1513_v60  ;;  %v13110_v24 = vld [vmem:[%s13317_s10 + $0x6c] sm:$0xff]   ;;  %v11249_v22 = vld [vmem:[%s13317_s10 + $0x18] sm:$0xf] }
  0x7e   : > { %v13868_v37 = vsel %vm13648_vm7, %v1508_v8, %v1509_v15  ;;  %v1515_v31 = vrot.slane %v1513_v60, 4  ;;  %v1520_v6 = vrot.slane %v13579_v14, 5  ;;  %v1523_v30 = vrot.slane %v13584_v23, 5  ;;  %v13932_v8 = vld [vmem:[%s13317_s10 + $0x1c] sm:$0xf] }
  0x7f   : > { %v11150_v41 = vcombine.low %v13850_v0, %v13868_v37  ;;  %v11134_v62 = vrot.slane %v1372_v4, 9  ;;  %v1527_v10 = vrot.slane %v13596_v53, 5  ;;  %v1530_v25 = vrot.slane %v13601_v43, 5  ;;  %v13943_v4 = vld [vmem:[%s13317_s10 + $0x20] sm:$0x1] }
  0x80   : > { %v13880_v40 = vsel %vm13648_vm7, %v1515_v31, %v1516_v57  ;;  %v11135_v45 = vrot.slane %v1373_v38, 9  ;;  %v13890_v14 = vsel %vm13648_vm7, %v11133_v47, %v1520_v6  ;;  %v1522_v23 = vrot.slane %v1520_v6, 4 }
  0x81   : > { %v11151_v50 = vcombine.low %v13872_v34, %v13880_v40  ;;  %v1534_v12 = vrot.slane %v13617_v63, 5  ;;  %v13899_v53 = vsel %vm13648_vm7, %v11134_v62, %v1527_v10  ;;  %v1529_v43 = vrot.slane %v1527_v10, 4 }
  0x82   : > { %v1537_v42 = vrot.slane %v13620_v1, 5  ;;  %v3385_v56 = vsel %vm851_vm0, %v13635_v46, 0  ;;  %12479 = vmatmul.mubr.msk.bf16.gmra.mxu0 %vm796_vm3, %v11142_v39  ;;  %v13910_v63 = vsel %vm13648_vm7, %v1522_v23, %v1523_v30  ;;  %v13917_v1 = vld [vmem:[%s13317_s10 + $0x14] sm:$0x1]  ;;  %v2319_v15 = vshrl.u32 %v11246_v26, 16 }
  0x83   : > { %v13914_v5 = vsel %vm13648_vm7, %v11135_v45, %v1534_v12  ;;  %v1536_v18 = vrot.slane %v1534_v12, 4  ;;  %12583 = vmatpush3.bf16.msra.mxu1 %v3385_v56  ;;  %12482 = vmatprep.mubr.msk.bf16.mxu0 %vm796_vm3, %v11143_v44  ;;  %v11152_v46 = vcombine.low %v13890_v14, %v13910_v63  ;;  %v13927_v54 = vsel %vm13648_vm7, %v1529_v43, %v1530_v25  ;;  %v11337_v23 = vld [vmem:[%s13317_s10 + $0xc] sm:$0xe]  ;;  %v13111_v12 = vld [vmem:[%s13317_s10 + $0x78] sm:$0xff]  }
  0x84   : > { %v2322_v20 = vshll.u32 %v11246_v26, 16  ;;  %v2328_v39 = vshll.u32 %v13894_v52, 16  ;;  %12521 = vmatmul.mubr.msk.bf16.gmra.mxu1 %vm796_vm3, %v13109_v35  ;;  %v11153_v2 = vcombine.low %v13899_v53, %v13927_v54  ;;  %v2321_v44 = vrot.slane %v2319_v15, 4  ;;  %v13112_v15 = vld [vmem:[%s13317_s10 + $0x84] sm:$0xff]  }
  0x85   : > { %v13939_v16 = vsel %vm13648_vm7, %v1536_v18, %v1537_v42  ;;  %v2332_v60 = vshrl.u32 %v13894_v52, 16  ;;  %12524 = vmatprep.mubr.msk.bf16.mxu1 %vm796_vm3, %v13110_v24  ;;  %v2338_v31 = vshll.u32 %v13917_v1, 16  ;;  %v2343_v30 = vshrl.u32 %v11249_v22, 16  ;;  %v11338_v18 = vld [vmem:[%s13317_s10 + $0x18] sm:$0xe] }
  0x86   : > { %v11154_v57 = vcombine.low %v13914_v5, %v13939_v16  ;;  %v2324_v47 = vrot.slane %v2322_v20, 5  ;;  %v2330_v38 = vrot.slane %v2328_v39, 5  ;;  %v2346_v62 = vshll.u32 %v11249_v22, 16 }
  0x87   : > { %v2334_v6 = vrot.slane %v2332_v60, 4  ;;  %v2352_v10 = vshll.u32 %v13932_v8, 16  ;;  %v2340_v45 = vrot.slane %v2338_v31, 5  ;;  %v2356_v26 = vshrl.u32 %v13932_v8, 16 }
  0x88   : > { %v2325_v25 = vor.u32 %v2324_v47, %v2321_v44  ;;  %v2362_v35 = vshll.u32 %v13943_v4, 16  ;;  %v2345_v43 = vrot.slane %v2343_v30, 4  ;;  %v2348_v42 = vrot.slane %v2346_v62, 5 }
  0x89   : > { %v2335_v24 = vor.u32 %v2334_v6, %v2330_v38  ;;  %v2354_v56 = vrot.slane %v2352_v10, 5  ;;  %v2358_v39 = vrot.slane %v2356_v26, 4  ;;  %v13958_v44 = vsel %vm851_vm0, %v13760_v32, 0 }
  0x8a   : > { %v2326_v20 = vrot.slane %v2325_v25, 4  ;;  %v2364_v22 = vrot.slane %v2362_v35, 5  ;;  %12483 = vmatmul.mubr.msk.bf16.gmra.mxu0 %vm796_vm3, %v11144_v7  ;;  %v2349_v47 = vor.u32 %v2348_v42, %v2345_v43  ;;  %v11355_v31 = vrot.slane %v11337_v23, 9  ;;  %v11252_v7 = vld [vmem:[%s13317_s10 + $0x24] sm:$0xf] }
  0x8b   : > { %v2336_v60 = vrot.slane %v2335_v24, 4  ;;  %v3150_v6 = vrot.slane %v13894_v52, 5  ;;  %12486 = vmatprep.mubr.msk.bf16.mxu0 %vm796_vm3, %v11145_v59  ;;  %v2359_v30 = vor.u32 %v2358_v39, %v2354_v56  ;;  %v3153_v51 = vrot.slane %v13917_v1, 5  ;;  %v11253_v59 = vld [vmem:[%s13317_s10 + $0x28] sm:$0xf] }
  0x8c   : > { %v2331_v32 = vsel %vm13353_vm4, %v2326_v20, %v2330_v38  ;;  %v11356_v11 = vrot.slane %v11338_v18, 9  ;;  %12525 = vmatmul.mubr.msk.bf16.gmra.mxu1 %vm796_vm3, %v13111_v12  ;;  %v2350_v62 = vrot.slane %v2349_v47, 4  ;;  %v3157_v10 = vrot.slane %v13932_v8, 5  ;;  %v11255_v24 = vld [vmem:[%s13317_s10 + $0x30] sm:$0xf] }
  0x8d   : > { %v2341_v52 = vsel %vm13353_vm4, %v2336_v60, %v2340_v45  ;;  %v13978_v58 = vsel %vm13648_vm7, %v11355_v31, %v3150_v6  ;;  %v3152_v3 = vrot.slane %v3150_v6, 4  ;;  %12528 = vmatprep.mubr.msk.bf16.mxu1 %vm796_vm3, %v13112_v15  ;;  %v2360_v38 = vrot.slane %v2359_v30, 4  ;;  %v13987_v45 = vld [vmem:[%s13317_s10 + $0x2c] sm:$0x1]  ;;  %v13997_v43 = vld [vmem:[%s13317_s10 + $0x34] sm:$0xf] }
  0x8e   : > { %v13982_v1 = vcombine.low %v2331_v32, %v2341_v52  ;;  %v3160_v25 = vrot.slane %v13943_v4, 5  ;;  %v2355_v26 = vsel %vm13353_vm4, %v2350_v62, %v2354_v56  ;;  %v2367_v23 = vshrl.u32 %v11252_v7, 16  ;;  %v14008_v18 = vld [vmem:[%s13317_s10 + $0x38] sm:$0x1]  ;;  %v11537_v15 = vld [vmem:[%s18107_s1 + $0xe] sm:$0x3] }
  0x8f   : > { %v13993_v35 = vsel %vm13648_vm7, %v3152_v3, %v3153_v51  ;;  %v2370_v12 = vshll.u32 %v11252_v7, 16  ;;  %v2365_v8 = vsel %vm13353_vm4, %v2360_v38, %v2364_v22  ;;  %v14005_v42 = vsel %vm13648_vm7, %v11356_v11, %v3157_v10  ;;  %v13113_v20 = vld [vmem:[%s13317_s10 + $0x90] sm:$0xff]   ;;  %13047 = vmatprep.subr.msk.bf16.mxu1 %vm851_vm0, %v11537_v15  ;;  %v13114_v31 = vld [vmem:[%s13317_s10 + $0x9c] sm:$0xff]   ;;  %v11339_v3 = vld [vmem:[%s13317_s10 + $0x24] sm:$0xe] }
  0x90   : > { %v11374_v4 = vcombine.low %v13978_v58, %v13993_v35  ;;  %v3159_v56 = vrot.slane %v3157_v10, 4  ;;  %v14014_v39 = vcombine.low %v2355_v26, %v2365_v8  ;;  %v2369_v60 = vrot.slane %v2367_v23, 4 }
  0x91   : > { %v2372_v22 = vrot.slane %v2370_v12, 5  ;;  %v2376_v47 = vshll.u32 %v11253_v59, 16  ;;  %v2380_v32 = vshrl.u32 %v11253_v59, 16  ;;  %v2386_v30 = vshll.u32 %v13987_v45, 16 }
  0x92   : > { %v14020_v6 = vsel %vm13648_vm7, %v3159_v56, %v3160_v25  ;;  %v2391_v51 = vshrl.u32 %v11255_v24, 16  ;;  %12487 = vmatmul.mubr.msk.bf16.gmra.mxu0 %vm796_vm3, %v11146_v28  ;;  %v2394_v62 = vshll.u32 %v11255_v24, 16  ;;  %v2400_v9 = vshll.u32 %v13997_v43, 16  ;;  %v11340_v24 = vld [vmem:[%s13317_s10 + $0x30] sm:$0xe] }
  0x93   : > { %v11375_v11 = vcombine.low %v14005_v42, %v14020_v6  ;;  %v2373_v7 = vor.u32 %v2372_v22, %v2369_v60  ;;  %v2378_v52 = vrot.slane %v2376_v47, 5  ;;  %12490 = vmatprep.mubr.msk.bf16.mxu0 %vm796_vm3, %v11147_v49  ;;  %v2382_v38 = vrot.slane %v2380_v32, 4  ;;  %v11258_v60 = vld [vmem:[%s13317_s10 + $0x3c] sm:$0xf]  ;;  %v13115_v22 = vld [vmem:[%s13317_s10 + $0xa8] sm:$0xff]  }
  0x94   : > { %v2388_v10 = vrot.slane %v2386_v30, 5  ;;  %v2393_v25 = vrot.slane %v2391_v51, 4  ;;  %12529 = vmatmul.mubr.msk.bf16.gmra.mxu1 %vm796_vm3, %v13113_v20  ;;  %v2396_v28 = vrot.slane %v2394_v62, 5  ;;  %v2404_v26 = vshrl.u32 %v13997_v43, 16  ;;  %v14050_v51 = vld [vmem:[%s13317_s10 + $0x40] sm:$0xf] }
  0x95   : > { %v2374_v48 = vrot.slane %v2373_v7, 4  ;;  %v2410_v23 = vshll.u32 %v14008_v18, 16  ;;  %12532 = vmatprep.mubr.msk.bf16.mxu1 %vm796_vm3, %v13114_v31  ;;  %v2383_v21 = vor.u32 %v2382_v38, %v2378_v52  ;;  %v2402_v17 = vrot.slane %v2400_v9, 5  ;;  %v13116_v7 = vld [vmem:[%s13317_s10 + $0xb4] sm:$0xff]  }
  0x96   : > { %v11357_v49 = vrot.slane %v11339_v3, 9  ;;  %v3164_v12 = vrot.slane %v11253_v59, 5  ;;  %v2397_v56 = vor.u32 %v2396_v28, %v2393_v25  ;;  %v2406_v15 = vrot.slane %v2404_v26, 4  ;;  %v14053_v59 = vld [vmem:[%s13317_s10 + $0x44] sm:$0x1] }
  0x97   : > { %v2379_v8 = vsel %vm13353_vm4, %v2374_v48, %v2378_v52  ;;  %v2412_v20 = vrot.slane %v2410_v23, 5  ;;  %v2384_v47 = vrot.slane %v2383_v21, 4  ;;  %v3167_v30 = vrot.slane %v13987_v45, 5  ;;  %v11261_v25 = vld [vmem:[%s13317_s10 + $0x48] sm:$0xf] }
  0x98   : > { %v14046_v31 = vsel %vm13648_vm7, %v11357_v49, %v3164_v12  ;;  %v3166_v32 = vrot.slane %v3164_v12, 4  ;;  %v2398_v52 = vrot.slane %v2397_v56, 4  ;;  %v2407_v62 = vor.u32 %v2406_v15, %v2402_v17  ;;  %v11341_v15 = vld [vmem:[%s13317_s10 + $0x3c] sm:$0xe] }
  0x99   : > { %v11358_v3 = vrot.slane %v11340_v24, 9  ;;  %v3171_v38 = vrot.slane %v13997_v43, 5  ;;  %v2389_v9 = vsel %vm13353_vm4, %v2384_v47, %v2388_v10  ;;  %v3174_v45 = vrot.slane %v14008_v18, 5 }
  0x9a   : > { %v14062_v48 = vsel %vm13648_vm7, %v3166_v32, %v3167_v30  ;;  %v2415_v28 = vshrl.u32 %v11258_v60, 16  ;;  %12491 = vmatmul.mubr.msk.bf16.gmra.mxu0 %vm796_vm3, %v11148_v61  ;;  %v14069_v26 = vcombine.low %v2379_v8, %v2389_v9  ;;  %v2403_v43 = vsel %vm13353_vm4, %v2398_v52, %v2402_v17  ;;  %v11263_v8 = vld [vmem:[%s13317_s10 + $0x50] sm:$0x1]  ;;  %v13117_v32 = vld [vmem:[%s13317_s10 + $0xc0] sm:$0xff]  }
  0x9b   : > { %v2408_v23 = vrot.slane %v2407_v62, 4  ;;  %v11376_v10 = vcombine.low %v14046_v31, %v14062_v48  ;;  %12494 = vmatprep.mubr.msk.bf16.mxu0 %vm796_vm3, %v11149_v29  ;;  %v14081_v33 = vsel %vm13648_vm7, %v11358_v3, %v3171_v38  ;;  %v3173_v55 = vrot.slane %v3171_v38, 4  ;;  %v11262_v29 = vld [vmem:[%s13317_s10 + $0x4c] sm:$0xf]  ;;  %v11342_v3 = vld [vmem:[%s13317_s10 + $0x48] sm:$0xe] }
  0x9c   : > { %v2417_v61 = vrot.slane %v2415_v28, 4  ;;  %v2418_v18 = vshll.u32 %v11258_v60, 16  ;;  %12533 = vmatmul.mubr.msk.bf16.gmra.mxu1 %vm796_vm3, %v13115_v22  ;;  %v2424_v17 = vshll.u32 %v14050_v51, 16  ;;  %v2428_v13 = vshrl.u32 %v14050_v51, 16  ;;  %v13118_v38 = vld [vmem:[%s13317_s10 + $0xcc] sm:$0xff]  }
  0x9d   : > { %v2413_v21 = vsel %vm13353_vm4, %v2408_v23, %v2412_v20  ;;  %v2434_v27 = vshll.u32 %v14053_v59, 16  ;;  %12536 = vmatprep.mubr.msk.bf16.mxu1 %vm796_vm3, %v13116_v7  ;;  %v14095_v12 = vsel %vm13648_vm7, %v3173_v55, %v3174_v45  ;;  %v2439_v56 = vshrl.u32 %v11261_v25, 16 }
  0x9e   : > { %v14091_v49 = vcombine.low %v2403_v43, %v2413_v21  ;;  %v2420_v24 = vrot.slane %v2418_v18, 5  ;;  %v11377_v20 = vcombine.low %v14081_v33, %v14095_v12  ;;  %v2426_v60 = vrot.slane %v2424_v17, 5 }
  0x9f   : > { %v2430_v22 = vrot.slane %v2428_v13, 4  ;;  %v2436_v47 = vrot.slane %v2434_v27, 5  ;;  %v2441_v7 = vrot.slane %v2439_v56, 4  ;;  %v2442_v52 = vshll.u32 %v11261_v25, 16 }
  0xa0   : > { %v2421_v30 = vor.u32 %v2420_v24, %v2417_v61  ;;  %v2448_v62 = vshll.u32 %v11262_v29, 16  ;;  %v2452_v45 = vshrl.u32 %v11262_v29, 16  ;;  %v2458_v28 = vshll.u32 %v11263_v8, 16  ;;  %v11265_v24 = vld [vmem:[%s13317_s10 + $0x58] sm:$0xf] }
  0xa1   : > { %v2431_v9 = vor.u32 %v2430_v22, %v2426_v60  ;;  %v11359_v43 = vrot.slane %v11341_v15, 9  ;;  %v2444_v55 = vrot.slane %v2442_v52, 5  ;;  %v3178_v21 = vrot.slane %v14050_v51, 5 }
  0xa2   : > { %v2422_v23 = vrot.slane %v2421_v30, 4  ;;  %v2450_v18 = vrot.slane %v2448_v62, 5  ;;  %12495 = vmatmul.mubr.msk.bf16.gmra.mxu0 %vm796_vm3, %v11150_v41  ;;  %v2454_v61 = vrot.slane %v2452_v45, 4  ;;  %v2460_v17 = vrot.slane %v2458_v28, 5  ;;  %v11268_v62 = vld [vmem:[%s13317_s10 + $0x64] sm:$0xf] }
  0xa3   : > { %v2432_v25 = vrot.slane %v2431_v9, 4  ;;  %v3181_v13 = vrot.slane %v14053_v59, 5  ;;  %12498 = vmatprep.mubr.msk.bf16.mxu0 %vm796_vm3, %v11151_v50  ;;  %v2445_v27 = vor.u32 %v2444_v55, %v2441_v7  ;;  %v14118_v0 = vsel %vm13648_vm7, %v11359_v43, %v3178_v21  ;;  %v11264_v50 = vld [vmem:[%s13317_s10 + $0x54] sm:$0xf] }
  0xa4   : > { %v2427_v51 = vsel %vm13353_vm4, %v2422_v23, %v2426_v60  ;;  %v3180_v37 = vrot.slane %v3178_v21, 4  ;;  %12537 = vmatmul.mubr.msk.bf16.gmra.mxu1 %vm796_vm3, %v13117_v32  ;;  %v2455_v59 = vor.u32 %v2454_v61, %v2450_v18  ;;  %v11360_v34 = vrot.slane %v11342_v3, 9  ;;  %v14133_v32 = vld [vmem:[%s13317_s10 + $0x5c] sm:$0x1] }
  0xa5   : > { %v2437_v41 = vsel %vm13353_vm4, %v2432_v25, %v2436_v47  ;;  %v3185_v40 = vrot.slane %v11262_v29, 5  ;;  %12540 = vmatprep.mubr.msk.bf16.mxu1 %vm796_vm3, %v13118_v38  ;;  %v2446_v15 = vrot.slane %v2445_v27, 4  ;;  %v3188_v22 = vrot.slane %v11263_v8, 5  ;;  %v11267_v47 = vld [vmem:[%s13317_s10 + $0x60] sm:$0xf]  ;;  %v13119_v3 = vld [vmem:[%s13317_s10 + $0xd8] sm:$0xff]  }
  0xa6   : > { %v14126_v56 = vcombine.low %v2427_v51, %v2437_v41  ;;  %v14130_v60 = vsel %vm13648_vm7, %v3180_v37, %v3181_v13  ;;  %v2456_v30 = vrot.slane %v2455_v59, 4  ;;  %v2463_v8 = vshrl.u32 %v11264_v50, 16  ;;  %v11269_v13 = vld [vmem:[%s13317_s10 + $0x68] sm:$0x1]  ;;  %v11343_v51 = vld [vmem:[%s13317_s10 + $0x54] sm:$0xe] }
  0xa7   : > { %v11378_v7 = vcombine.low %v14118_v0, %v14130_v60  ;;  %v14140_v29 = vsel %vm13648_vm7, %v11360_v34, %v3185_v40  ;;  %v3187_v52 = vrot.slane %v3185_v40, 4  ;;  %v2451_v38 = vsel %vm13353_vm4, %v2446_v15, %v2450_v18  ;;  %v11279_v60 = vld [vmem:[%s13317_s10 + $0x90] sm:$0xf] }
  0xa8   : > { %v2466_v9 = vshll.u32 %v11264_v50, 16  ;;  %v2472_v45 = vshll.u32 %v11265_v24, 16  ;;  %v2461_v28 = vsel %vm13353_vm4, %v2456_v30, %v2460_v17  ;;  %v2476_v23 = vshrl.u32 %v11265_v24, 16 }
  0xa9   : > { %v14150_v43 = vsel %vm13648_vm7, %v3187_v52, %v3188_v22  ;;  %v2482_v55 = vshll.u32 %v14133_v32, 16  ;;  %v14153_v21 = vcombine.low %v2451_v38, %v2461_v28  ;;  %v2465_v61 = vrot.slane %v2463_v8, 4  ;;  %v11344_v22 = vld [vmem:[%s13317_s10 + $0x60] sm:$0xe]  ;;  %v11270_v52 = vld [vmem:[%s13317_s10 + $0x6c] sm:$0xf] }
  0xaa   : > { %v11379_v25 = vcombine.low %v14140_v29, %v14150_v43  ;;  %v2468_v18 = vrot.slane %v2466_v9, 5  ;;  %12499 = vmatmul.mubr.msk.bf16.gmra.mxu0 %vm796_vm3, %v11152_v46  ;;  %v2474_v17 = vrot.slane %v2472_v45, 5  ;;  %v2478_v27 = vrot.slane %v2476_v23, 4 }
  0xab   : > { %v2484_v37 = vrot.slane %v2482_v55, 5  ;;  %v2487_v41 = vshrl.u32 %v11267_v47, 16  ;;  %12502 = vmatprep.mubr.msk.bf16.mxu0 %vm796_vm3, %v11153_v2  ;;  %v2490_v34 = vshll.u32 %v11267_v47, 16  ;;  %v2496_v40 = vshll.u32 %v11268_v62, 16 }
  0xac   : > { %v2469_v59 = vor.u32 %v2468_v18, %v2465_v61  ;;  %v2500_v50 = vshrl.u32 %v11268_v62, 16  ;;  %12541 = vmatmul.mubr.msk.bf16.gmra.mxu1 %vm796_vm3, %v13119_v3  ;;  %v2479_v14 = vor.u32 %v2478_v27, %v2474_v17  ;;  %v2506_v15 = vshll.u32 %v11269_v13, 16 }
  0xad   : > { %v2489_v63 = vrot.slane %v2487_v41, 4  ;;  %v11361_v46 = vrot.slane %v11343_v51, 9  ;;  %12584 = vmatprep.mubr.msk.bf16.mxu1 %vm796_vm3, %v11374_v4  ;;  %v2492_v54 = vrot.slane %v2490_v34, 5  ;;  %v2498_v2 = vrot.slane %v2496_v40, 5  ;;  %v11271_v51 = vld [vmem:[%s13317_s10 + $0x70] sm:$0xf] }
  0xae   : > { %v2470_v53 = vrot.slane %v2469_v59, 4  ;;  %v2502_v30 = vrot.slane %v2500_v50, 4  ;;  %v2480_v47 = vrot.slane %v2479_v14, 4  ;;  %v2508_v38 = vrot.slane %v2506_v15, 5  ;;  %v14211_v34 = vld [vmem:[%s13317_s10 + $0x7c] sm:$0xf] }
  0xaf   : > { %v3192_v8 = vrot.slane %v11265_v24, 5  ;;  %v3195_v3 = vrot.slane %v14133_v32, 5  ;;  %v2493_v45 = vor.u32 %v2492_v54, %v2489_v63  ;;  %v11362_v58 = vrot.slane %v11344_v22, 9  ;;  %v14214_v40 = vld [vmem:[%s13317_s10 + $0x80] sm:$0x1] }
  0xb0   : > { %v2475_v9 = vsel %vm13353_vm4, %v2470_v53, %v2474_v17  ;;  %v2503_v28 = vor.u32 %v2502_v30, %v2498_v2  ;;  %v2485_v35 = vsel %vm13353_vm4, %v2480_v47, %v2484_v37  ;;  %v3199_v55 = vrot.slane %v11268_v62, 5  ;;  %v14199_v37 = vld [vmem:[%s13317_s10 + $0x74] sm:$0x1]  ;;  %v11345_v15 = vld [vmem:[%s13317_s10 + $0x6c] sm:$0xe] }
  0xb1   : > { %v14181_v4 = vsel %vm13648_vm7, %v11361_v46, %v3192_v8  ;;  %v3194_v23 = vrot.slane %v3192_v8, 4  ;;  %v14183_v24 = vcombine.low %v2475_v9, %v2485_v35  ;;  %v2494_v32 = vrot.slane %v2493_v45, 4  ;;  %v14241_v35 = vld [vmem:[%s18107_s1 + $0x10] sm:$0x3] }
  0xb2   : > { %v2504_v61 = vrot.slane %v2503_v28, 4  ;;  %v3202_v18 = vrot.slane %v11269_v13, 5  ;;  %12503 = vmatmul.mubr.msk.bf16.gmra.mxu0 %vm796_vm3, %v11154_v57  ;;  %v14196_v62 = vsel %vm13648_vm7, %v11362_v58, %v3199_v55  ;;  %v3201_v27 = vrot.slane %v3199_v55, 4  ;;  %v11273_v13 = vld [vmem:[%s13317_s10 + $0x78] sm:$0xf] }
  0xb3   : > { %v14192_v17 = vsel %vm13648_vm7, %v3194_v23, %v3195_v3  ;;  %v2511_v41 = vshrl.u32 %v11270_v52, 16  ;;  %12546 = vmatprep.mubr.msk.bf16.mxu0 %vm796_vm3, %v13982_v1  ;;  %v2499_v5 = vsel %vm13353_vm4, %v2494_v32, %v2498_v2  ;;  %v2514_v59 = vshll.u32 %v11270_v52, 16  ;;  %v11346_v3 = vld [vmem:[%s13317_s10 + $0x78] sm:$0xe] }
  0xb4   : > { %v2509_v16 = vsel %vm13353_vm4, %v2504_v61, %v2508_v38  ;;  %v11380_v57 = vcombine.low %v14181_v4, %v14192_v17  ;;  %12585 = vmatmul.mubr.msk.bf16.vlgmr.msra.gmra.mxu1 %vm796_vm3, %v11375_v11  ;;  %v14224_v50 = vsel %vm13648_vm7, %v3201_v27, %v3202_v18  ;;  %v2520_v63 = vshll.u32 %v11271_v51, 16  ;;  %v11276_v18 = vld [vmem:[%s13317_s10 + $0x84] sm:$0xf]  ;;  %v11282_v17 = vld [vmem:[%s13317_s10 + $0x9c] sm:$0xf] }
  0xb5   : > { %v14220_v1 = vcombine.low %v2499_v5, %v2509_v16  ;;  %v2513_v14 = vrot.slane %v2511_v41, 4  ;;  %12588 = vmatprep.mubr.msk.bf16.mxu1 %vm796_vm3, %v11376_v10  ;;  %v11381_v46 = vcombine.low %v14196_v62, %v14224_v50  ;;  %v2516_v42 = vrot.slane %v2514_v59, 5  ;;  %v11277_v16 = vld [vmem:[%s13317_s10 + $0x88] sm:$0xf] }
  0xb6   : > { %v2524_v6 = vshrl.u32 %v11271_v51, 16  ;;  %v2530_v11 = vshll.u32 %v14199_v37, 16  ;;  %v2522_v22 = vrot.slane %v2520_v63, 5  ;;  %v2535_v53 = vshrl.u32 %v11273_v13, 16 }
  0xb7   : > { %v2538_v54 = vshll.u32 %v11273_v13, 16  ;;  %v2544_v2 = vshll.u32 %v14211_v34, 16  ;;  %v2517_v30 = vor.u32 %v2516_v42, %v2513_v14  ;;  %v2548_v31 = vshrl.u32 %v14211_v34, 16 }
  0xb8   : > { %v2526_v52 = vrot.slane %v2524_v6, 4  ;;  %v2532_v47 = vrot.slane %v2530_v11, 5  ;;  %v2537_v48 = vrot.slane %v2535_v53, 4  ;;  %v2554_v8 = vshll.u32 %v14214_v40, 16 }
  0xb9   : > { %v2540_v10 = vrot.slane %v2538_v54, 5  ;;  %v2546_v38 = vrot.slane %v2544_v2, 5  ;;  %v2518_v9 = vrot.slane %v2517_v30, 4  ;;  %v2550_v28 = vrot.slane %v2548_v31, 4  ;;  %v11280_v54 = vld [vmem:[%s13317_s10 + $0x94] sm:$0xf] }
  0xba   : > { %v2527_v45 = vor.u32 %v2526_v52, %v2522_v22  ;;  %v11363_v58 = vrot.slane %v11345_v15, 9  ;;  %12547 = vmatmul.mubr.msk.bf16.vlgmr.msra.gmra.mxu0 %vm796_vm3, %v14014_v39  ;;  %v2556_v55 = vrot.slane %v2554_v8, 5  ;;  %v3206_v32 = vrot.slane %v11271_v51, 5  ;;  %v14300_v52 = vld [vmem:[%s13317_s10 + $0x98] sm:$0x1] }
  0xbb   : > { %v2541_v23 = vor.u32 %v2540_v10, %v2537_v48  ;;  %v3209_v61 = vrot.slane %v14199_v37, 5  ;;  %12621 = vmatpush3.bf16.msra.mxu0 %v13958_v44  ;;  %12550 = vmatprep.mubr.msk.bf16.mxu0 %vm796_vm3, %v14069_v26  ;;  %v2523_v27 = vsel %vm13353_vm4, %v2518_v9, %v2522_v22  ;;  %v2551_v13 = vor.u32 %v2550_v28, %v2546_v38  ;;  %v14263_v37 = vld [vmem:[%s13317_s10 + $0x8c] sm:$0x1] }
  0xbc   : > { %v2528_v41 = vrot.slane %v2527_v45, 4  ;;  %v11364_v5 = vrot.slane %v11346_v3, 9  ;;  %12589 = vmatmul.mubr.msk.bf16.gmra.mxu1 %vm796_vm3, %v11377_v20  ;;  %v14259_v44 = vsel %vm13648_vm7, %v11363_v58, %v3206_v32  ;;  %v3208_v51 = vrot.slane %v3206_v32, 4  ;;  %13048 = vmatprep.subr.msk.bf16.mxu0 %vm851_vm0, %v14241_v35  ;;  %v11347_v3 = vld [vmem:[%s13317_s10 + $0x84] sm:$0xe] }
  0xbd   : > { %v2542_v39 = vrot.slane %v2541_v23, 4  ;;  %v3213_v26 = vrot.slane %v14211_v34, 5  ;;  %12592 = vmatprep.mubr.msk.bf16.mxu1 %vm796_vm3, %v11378_v7  ;;  %v2552_v12 = vrot.slane %v2551_v13, 4  ;;  %v3216_v20 = vrot.slane %v14214_v40, 5  ;;  %v11348_v23 = vld [vmem:[%s13317_s10 + $0x90] sm:$0xe] }
  0xbe   : > { %v2533_v33 = vsel %vm13353_vm4, %v2528_v41, %v2532_v47  ;;  %v2559_v59 = vshrl.u32 %v11276_v18, 16  ;;  %v14280_v63 = vsel %vm13648_vm7, %v3208_v51, %v3209_v61  ;;  %v2562_v11 = vshll.u32 %v11276_v18, 16 }
  0xbf   : > { %v14274_v14 = vcombine.low %v2523_v27, %v2533_v33  ;;  %v2547_v34 = vsel %vm13353_vm4, %v2542_v39, %v2546_v38  ;;  %v14284_v0 = vsel %vm13648_vm7, %v11364_v5, %v3213_v26  ;;  %v2557_v7 = vsel %vm13353_vm4, %v2552_v12, %v2556_v55  ;;  %v11283_v12 = vld [vmem:[%s13317_s10 + $0xa0] sm:$0xf] }
  0xc0   : > { %v11382_v40 = vcombine.low %v14259_v44, %v14280_v63  ;;  %v3215_v15 = vrot.slane %v3213_v26, 4  ;;  %v2561_v42 = vrot.slane %v2559_v59, 4  ;;  %v14291_v6 = vcombine.low %v2547_v34, %v2557_v7  ;;  %v11285_v7 = vld [vmem:[%s13317_s10 + $0xa8] sm:$0xf] }
  0xc1   : > { %v2568_v22 = vshll.u32 %v11277_v16, 16  ;;  %v2572_v53 = vshrl.u32 %v11277_v16, 16  ;;  %v2578_v30 = vshll.u32 %v14263_v37, 16  ;;  %v2583_v47 = vshrl.u32 %v11279_v60, 16 }
  0xc2   : > { %v14296_v2 = vsel %vm13648_vm7, %v3215_v15, %v3216_v20  ;;  %v2586_v31 = vshll.u32 %v11279_v60, 16  ;;  %12551 = vmatmul.mubr.msk.bf16.gmra.mxu0 %vm796_vm3, %v14091_v49  ;;  %v2564_v10 = vrot.slane %v2562_v11, 5  ;;  %v2592_v58 = vshll.u32 %v11280_v54, 16  ;;  %v14337_v60 = vld [vmem:[%s13317_s10 + $0xa4] sm:$0x1] }
  0xc3   : > { %v11383_v48 = vcombine.low %v14284_v0, %v14296_v2  ;;  %v2570_v38 = vrot.slane %v2568_v22, 5  ;;  %v2574_v8 = vrot.slane %v2572_v53, 4  ;;  %12554 = vmatprep.mubr.msk.bf16.mxu0 %vm796_vm3, %v14126_v56  ;;  %v2580_v9 = vrot.slane %v2578_v30, 5  ;;  %v11286_v53 = vld [vmem:[%s13317_s10 + $0xac] sm:$0xf] }
  0xc4   : > { %v2585_v45 = vrot.slane %v2583_v47, 4  ;;  %v2588_v28 = vrot.slane %v2586_v31, 5  ;;  %12593 = vmatmul.mubr.msk.bf16.gmra.mxu1 %vm796_vm3, %v11379_v25  ;;  %v2565_v49 = vor.u32 %v2564_v10, %v2561_v42  ;;  %v2596_v32 = vshrl.u32 %v11280_v54, 16  ;;  %v14352_v10 = vld [vmem:[%s13317_s10 + $0xb0] sm:$0x1] }
  0xc5   : > { %v2575_v55 = vor.u32 %v2574_v8, %v2570_v38  ;;  %v2602_v61 = vshll.u32 %v14300_v52, 16  ;;  %12596 = vmatprep.mubr.msk.bf16.mxu1 %vm796_vm3, %v11380_v57  ;;  %v2594_v18 = vrot.slane %v2592_v58, 5  ;;  %v11365_v27 = vrot.slane %v11347_v3, 9  ;;  %v11289_v2 = vld [vmem:[%s13317_s10 + $0xb8] sm:$0xf] }
  0xc6   : > { %v2589_v56 = vor.u32 %v2588_v28, %v2585_v45  ;;  %v3220_v41 = vrot.slane %v11277_v16, 5  ;;  %v2566_v13 = vrot.slane %v2565_v49, 4  ;;  %v2598_v43 = vrot.slane %v2596_v32, 4 }
  0xc7   : > { %v2576_v29 = vrot.slane %v2575_v55, 4  ;;  %v2604_v25 = vrot.slane %v2602_v61, 5  ;;  %v3223_v4 = vrot.slane %v14263_v37, 5  ;;  %v11366_v33 = vrot.slane %v11348_v23, 9 }
  0xc8   : > { %v2590_v5 = vrot.slane %v2589_v56, 4  ;;  %v14321_v39 = vsel %vm13648_vm7, %v11365_v27, %v3220_v41  ;;  %v3222_v51 = vrot.slane %v3220_v41, 4  ;;  %v2571_v57 = vsel %vm13353_vm4, %v2566_v13, %v2570_v38  ;;  %v11350_v56 = vld [vmem:[%s13317_s10 + $0xa8] sm:$0xe] }
  0xc9   : > { %v2581_v16 = vsel %vm13353_vm4, %v2576_v29, %v2580_v9  ;;  %v2599_v26 = vor.u32 %v2598_v43, %v2594_v18  ;;  %v3227_v34 = vrot.slane %v11280_v54, 5  ;;  %v3230_v11 = vrot.slane %v14300_v52, 5 }
  0xca   : > { %v14330_v20 = vcombine.low %v2571_v57, %v2581_v16  ;;  %v2595_v59 = vsel %vm13353_vm4, %v2590_v5, %v2594_v18  ;;  %v3224_v37 = vsel %vm13648_vm7, %v3222_v51, %v3223_v4  ;;  %12555 = vmatmul.mubr.msk.bf16.gmra.mxu0 %vm796_vm3, %v14153_v21  ;;  %v2607_v22 = vshrl.u32 %v11282_v17, 16  ;;  %v11288_v57 = vld [vmem:[%s13317_s10 + $0xb4] sm:$0xf] }
  0xcb   : > { %v2600_v15 = vrot.slane %v2599_v26, 4  ;;  %v11384_v42 = vcombine.low %v14321_v39, %v3224_v37  ;;  %12558 = vmatprep.mubr.msk.bf16.mxu0 %vm796_vm3, %v14183_v24  ;;  %v14349_v54 = vsel %vm13648_vm7, %v11366_v33, %v3227_v34  ;;  %v3229_v30 = vrot.slane %v3227_v34, 4 }
  0xcc   : > { %v2610_v47 = vshll.u32 %v11282_v17, 16  ;;  %v2616_v31 = vshll.u32 %v11283_v12, 16  ;;  %12597 = vmatmul.mubr.msk.bf16.gmra.mxu1 %vm796_vm3, %v11381_v46  ;;  %v2609_v52 = vrot.slane %v2607_v22, 4  ;;  %v2620_v24 = vshrl.u32 %v11283_v12, 16  ;;  %v11349_v46 = vld [vmem:[%s13317_s10 + $0x9c] sm:$0xe] }
  0xcd   : > { %v2605_v21 = vsel %vm13353_vm4, %v2600_v15, %v2604_v25  ;;  %v2626_v38 = vshll.u32 %v14337_v60, 16  ;;  %12600 = vmatprep.mubr.msk.bf16.mxu1 %vm796_vm3, %v11382_v40  ;;  %v14369_v3 = vsel %vm13648_vm7, %v3229_v30, %v3230_v11  ;;  %v2631_v58 = vshrl.u32 %v11285_v7, 16  ;;  %v14412_v30 = vld [vmem:[%s13317_s10 + $0xc4] sm:$0xf] }
  0xce   : > { %v14365_v8 = vcombine.low %v2595_v59, %v2605_v21  ;;  %v2612_v62 = vrot.slane %v2610_v47, 5  ;;  %v2618_v50 = vrot.slane %v2616_v31, 5  ;;  %v11385_v9 = vcombine.low %v14349_v54, %v14369_v3 }
  0xcf   : > { %v2622_v45 = vrot.slane %v2620_v24, 4  ;;  %v2628_v28 = vrot.slane %v2626_v38, 5  ;;  %v2634_v44 = vshll.u32 %v11285_v7, 16  ;;  %v2640_v63 = vshll.u32 %v11286_v53, 16 }
  0xd0   : > { %v2613_v23 = vor.u32 %v2612_v62, %v2609_v52  ;;  %v2644_v40 = vshrl.u32 %v11286_v53, 16  ;;  %v2633_v55 = vrot.slane %v2631_v58, 4  ;;  %v2650_v32 = vshll.u32 %v14352_v10, 16 }
  0xd1   : > { %v2623_v49 = vor.u32 %v2622_v45, %v2618_v50  ;;  %v11367_v61 = vrot.slane %v11349_v46, 9  ;;  %v2636_v27 = vrot.slane %v2634_v44, 5  ;;  %v2642_v41 = vrot.slane %v2640_v63, 5 }
  0xd2   : > { %v2614_v18 = vrot.slane %v2613_v23, 4  ;;  %v2646_v13 = vrot.slane %v2644_v40, 4  ;;  %12559 = vmatmul.mubr.msk.bf16.gmra.mxu0 %vm796_vm3, %v14220_v1  ;;  %v2652_v43 = vrot.slane %v2650_v32, 5  ;;  %v3234_v25 = vrot.slane %v11283_v12, 5  ;;  %v11351_v23 = vld [vmem:[%s13317_s10 + $0xb4] sm:$0xe] }
  0xd3   : > { %v2624_v29 = vrot.slane %v2623_v49, 4  ;;  %v3237_v5 = vrot.slane %v14337_v60, 5  ;;  %12562 = vmatprep.mubr.msk.bf16.mxu0 %vm796_vm3, %v14274_v14  ;;  %v2637_v51 = vor.u32 %v2636_v27, %v2633_v55  ;;  %v11368_v17 = vrot.slane %v11350_v56, 9  ;;  %v14404_v60 = vld [vmem:[%s13317_s10 + $0xbc] sm:$0x1] }
  0xd4   : > { %v2619_v39 = vsel %vm13353_vm4, %v2614_v18, %v2618_v50  ;;  %v2647_v4 = vor.u32 %v2646_v13, %v2642_v41  ;;  %12601 = vmatmul.mubr.msk.bf16.gmra.mxu1 %vm796_vm3, %v11383_v48  ;;  %v3235_v14 = vsel %vm13648_vm7, %v11367_v61, %v3234_v25  ;;  %v3236_v16 = vrot.slane %v3234_v25, 4  ;;  %v14424_v50 = vld [vmem:[%s13317_s10 + $0xc8] sm:$0x1]  ;;  %v11352_v18 = vld [vmem:[%s13317_s10 + $0xc0] sm:$0xe] }
  0xd5   : > { %v2629_v1 = vsel %vm13353_vm4, %v2624_v29, %v2628_v28  ;;  %v3241_v26 = vrot.slane %v11286_v53, 5  ;;  %12604 = vmatprep.mubr.msk.bf16.mxu1 %vm796_vm3, %v11384_v42  ;;  %v2638_v12 = vrot.slane %v2637_v51, 4  ;;  %v3244_v0 = vrot.slane %v14352_v10, 5  ;;  %v11291_v53 = vld [vmem:[%s13317_s10 + $0xc0] sm:$0xf] }
  0xd6   : > { %v14393_v33 = vcombine.low %v2619_v39, %v2629_v1  ;;  %v2648_v59 = vrot.slane %v2647_v4, 4  ;;  %v3238_v48 = vsel %vm13648_vm7, %v3236_v16, %v3237_v5  ;;  %v2655_v7 = vshrl.u32 %v11288_v57, 16 }
  0xd7   : > { %v14401_v37 = vsel %vm13648_vm7, %v11368_v17, %v3241_v26  ;;  %v3243_v34 = vrot.slane %v3241_v26, 4  ;;  %v2643_v15 = vsel %vm13353_vm4, %v2638_v12, %v2642_v41  ;;  %v11386_v11 = vcombine.low %v3235_v14, %v3238_v48 }
  0xd8   : > { %v2653_v42 = vsel %vm13353_vm4, %v2648_v59, %v2652_v43  ;;  %v2658_v22 = vshll.u32 %v11288_v57, 16  ;;  %v2657_v10 = vrot.slane %v2655_v7, 4  ;;  %v2664_v21 = vshll.u32 %v11289_v2, 16 }
  0xd9   : > { %v14414_v47 = vcombine.low %v2643_v15, %v2653_v42  ;;  %v14418_v31 = vsel %vm13648_vm7, %v3243_v34, %v3244_v0  ;;  %v2668_v38 = vshrl.u32 %v11289_v2, 16  ;;  %v2674_v62 = vshll.u32 %v14404_v60, 16  ;;  %v14451_v0 = vld [vmem:[%s13317_s10 + $0xd0] sm:$0xf] }
  0xda   : > { %v11387_v52 = vcombine.low %v14401_v37, %v14418_v31  ;;  %v2660_v24 = vrot.slane %v2658_v22, 5  ;;  %12563 = vmatmul.mubr.msk.bf16.gmra.mxu0 %vm796_vm3, %v14291_v6  ;;  %v2666_v46 = vrot.slane %v2664_v21, 5  ;;  %v2679_v45 = vshrl.u32 %v11291_v53, 16 }
  0xdb   : > { %v2682_v28 = vshll.u32 %v11291_v53, 16  ;;  %v2688_v58 = vshll.u32 %v14412_v30, 16  ;;  %12566 = vmatprep.mubr.msk.bf16.mxu0 %vm796_vm3, %v14330_v20  ;;  %v2670_v63 = vrot.slane %v2668_v38, 4  ;;  %v2676_v40 = vrot.slane %v2674_v62, 5 }
  0xdc   : > { %v2661_v44 = vor.u32 %v2660_v24, %v2657_v10  ;;  %v2692_v49 = vshrl.u32 %v14412_v30, 16  ;;  %12605 = vmatmul.mubr.msk.bf16.gmra.mxu1 %vm796_vm3, %v11385_v9  ;;  %v12434_v6 = vpop.f32.mrf.mxu1  ;;  %v2681_v55 = vrot.slane %v2679_v45, 4  ;;  %v2698_v56 = vshll.u32 %v14424_v50, 16  ;;  %v11294_v9 = vld [vmem:[%s13317_s10 + $0xcc] sm:$0xf] }
  0xdd   : > { %v2684_v32 = vrot.slane %v2682_v28, 5  ;;  %v2690_v61 = vrot.slane %v2688_v58, 5  ;;  %12608 = vmatprep.mubr.msk.bf16.mxu1 %vm796_vm3, %v11386_v11  ;;  %v2671_v27 = vor.u32 %v2670_v63, %v2666_v46  ;;  %v11369_v13 = vrot.slane %v11351_v23, 9  ;;  %v14462_v11 = vld [vmem:[%s13317_s10 + $0xd4] sm:$0x1] }
  0xde   : > { %v2662_v20 = vrot.slane %v2661_v44, 4  ;;  %v2694_v41 = vrot.slane %v2692_v49, 4  ;;  %v1213_v29 = vpop.f32.mrf.mxu1  ;;  %v2700_v25 = vrot.slane %v2698_v56, 5  ;;  %v3248_v54 = vrot.slane %v11289_v2, 5  ;;  %v11297_v10 = vld [vmem:[%s13317_s10 + $0xd8] sm:$0xf] }
  0xdf   : > { %v2685_v43 = vor.u32 %v2684_v32, %v2681_v55  ;;  %v3251_v3 = vrot.slane %v14404_v60, 5  ;;  %v2672_v39 = vrot.slane %v2671_v27, 4  ;;  %v11370_v4 = vrot.slane %v11352_v18, 9  ;;  %v11353_v56 = vld [vmem:[%s13317_s10 + $0xcc] sm:$0xe] }
  0xe0   : > { %v2667_v5 = vsel %vm13353_vm4, %v2662_v20, %v2666_v46  ;;  %v2695_v51 = vor.u32 %v2694_v41, %v2690_v61  ;;  %v12435_v17 = vpop.f32.mrf.mxu1  ;;  %v3249_v1 = vsel %vm13648_vm7, %v11369_v13, %v3248_v54  ;;  %v3250_v14 = vrot.slane %v3248_v54, 4 }
  0xe1   : > { %v2686_v57 = vrot.slane %v2685_v43, 4  ;;  %v3255_v16 = vrot.slane %v14412_v30, 5  ;;  %v2677_v26 = vsel %vm13353_vm4, %v2672_v39, %v2676_v40  ;;  %v3258_v59 = vrot.slane %v14424_v50, 5  ;;  %v12396_v48 = vpop.f32.mrf.mxu0  ;;  %v14489_v40 = vld [vmem:[%s13317_s10 + $0xe0] sm:$0x1] }
  0xe2   : > { %v2696_v12 = vrot.slane %v2695_v51, 4  ;;  %v2703_v2 = vshrl.u32 %v11294_v9, 16  ;;  %12567 = vmatmul.mubr.msk.bf16.gmra.mxu0 %vm796_vm3, %v14365_v8  ;;  %v1216_v34 = vpop.f32.mrf.mxu1  ;;  %v11315_v60 = vcombine.low %v2667_v5, %v2677_v26  ;;  %v3252_v15 = vsel %vm13648_vm7, %v3250_v14, %v3251_v3 }
  0xe3   : > { %v2691_v7 = vsel %vm13353_vm4, %v2686_v57, %v2690_v61  ;;  %v3256_v42 = vsel %vm13648_vm7, %v11370_v4, %v3255_v16  ;;  %12570 = vmatprep.mubr.msk.bf16.mxu0 %vm796_vm3, %v14393_v33  ;;  %v14466_v22 = vadd.f32 %v12434_v6, %v12396_v48  ;;  %v11388_v53 = vcombine.low %v3249_v1, %v3252_v15  ;;  %v889_v21 = vpop.f32.mrf.mxu0 }
  0xe4   : > { %v2701_v8 = vsel %vm13353_vm4, %v2696_v12, %v2700_v25  ;;  %v3257_v30 = vrot.slane %v3255_v16, 4  ;;  %12609 = vmatmul.mubr.msk.bf16.gmra.mxu1 %vm796_vm3, %v11387_v52  ;;  %v12438_v24 = vpop.f32.mrf.mxu1  ;;  %v2705_v33 = vrot.slane %v2703_v2, 4  ;;  %v2706_v62 = vshll.u32 %v11294_v9, 16  ;;  %v14486_v52 = vld [vmem:[%s13317_s10 + $0xdc] sm:$0xf] }
  0xe5   : > { %v14475_v38 = vcombine.low %v2691_v7, %v2701_v8  ;;  %v2712_v50 = vshll.u32 %v14451_v0, 16  ;;  %v14478_v46 = vadd.f32 %v1213_v29, %v889_v21  ;;  %12612 = vmatprep.mubr.msk.bf16.mxu1 %vm796_vm3, %v11388_v53  ;;  %v2716_v37 = vshrl.u32 %v14451_v0, 16  ;;  %v12397_v28 = vpop.f32.mrf.mxu0  ;;  %v11354_v9 = vld [vmem:[%s13317_s10 + $0xd8] sm:$0xe] }
  0xe6   : > { %v3259_v45 = vsel %vm13648_vm7, %v3257_v30, %v3258_v59  ;;  %v2722_v31 = vshll.u32 %v14462_v11, 16  ;;  %v1229_v58 = vpop.f32.mrf.mxu1  ;;  %v2708_v44 = vrot.slane %v2706_v62, 5  ;;  %v2727_v49 = vshrl.u32 %v11297_v10, 16  ;;  %v11483_v62 = vld [vmem:[%s13317_s10 + $0x18] sm:$0xf] }
  0xe7   : > { %v11389_v23 = vcombine.low %v3256_v42, %v3259_v45  ;;  %v2714_v63 = vrot.slane %v2712_v50, 5  ;;  %v14491_v6 = vadd.f32 %v12435_v17, %v12397_v28  ;;  %v2718_v55 = vrot.slane %v2716_v37, 4  ;;  %v892_v18 = vpop.f32.mrf.mxu0  ;;  %v11484_v50 = vld [vmem:[%s13317_s10 + $0x1c] sm:$0xf] }
  0xe8   : > { %v2724_v32 = vrot.slane %v2722_v31, 5  ;;  %v2730_v61 = vshll.u32 %v11297_v10, 16  ;;  %v12439_v20 = vpop.f32.mrf.mxu1  ;;  %v2709_v27 = vor.u32 %v2708_v44, %v2705_v33  ;;  %v2729_v41 = vrot.slane %v2727_v49, 4  ;;  %v11486_v49 = vld [vmem:[%s13317_s10 + $0x24] sm:$0xf] }
  0xe9   : > { %v2736_v13 = vshll.u32 %v14486_v52, 16  ;;  %v2740_v29 = vshrl.u32 %v14486_v52, 16  ;;  %v14496_v43 = vadd.f32 %v1216_v34, %v892_v18  ;;  %v2719_v25 = vor.u32 %v2718_v55, %v2714_v63 }
  0xea   : > { %v2732_v54 = vrot.slane %v2730_v61, 5  ;;  %v2746_v3 = vshll.u32 %v14489_v40, 16  ;;  %12571 = vmatmul.mubr.msk.bf16.gmra.mxu0 %vm796_vm3, %v14414_v47  ;;  %v1232_v5 = vpop.f32.mrf.mxu1  ;;  %v2710_v39 = vrot.slane %v2709_v27, 4  ;;  %v11371_v17 = vrot.slane %v11353_v56, 9 }
  0xeb   : > { %v2738_v51 = vrot.slane %v2736_v13, 5  ;;  %v2742_v4 = vrot.slane %v2740_v29, 4  ;;  %12574 = vmatprep.mubr.msk.bf16.mxu0 %vm796_vm3, %v11315_v60  ;;  %v2720_v57 = vrot.slane %v2719_v25, 4  ;;  %v3262_v16 = vrot.slane %v14451_v0, 5  ;;  %v12400_v26 = vpop.f32.mrf.mxu0  ;;  %v14545_v25 = vld [vmem:[%s13317_s10 + $0x28] sm:$0xf] }
  0xec   : > { %v2733_v1 = vor.u32 %v2732_v54, %v2729_v41  ;;  %v2748_v14 = vrot.slane %v2746_v3, 5  ;;  %12613 = vmatmul.mubr.msk.bf16.gmra.mxu1 %vm796_vm3, %v11389_v23  ;;  %v2715_v12 = vsel %vm13353_vm4, %v2710_v39, %v2714_v63  ;;  %v3265_v47 = vrot.slane %v14462_v11, 5  ;;  %v11485_v23 = vld [vmem:[%s13317_s10 + $0x20] sm:$0x1] }
  0xed   : > { %v2743_v59 = vor.u32 %v2742_v4, %v2738_v51  ;;  %v11372_v2 = vrot.slane %v11354_v9, 9  ;;  %v14508_v48 = vadd.f32 %v12438_v24, %v12400_v26  ;;  %v2725_v34 = vsel %vm13353_vm4, %v2720_v57, %v2724_v32  ;;  %v905_v7 = vpop.f32.mrf.mxu0  ;;  %v12442_v42 = vpop.f32.mrf.mxu1  ;;  %v13178_v24 = vld [vmem:[%s18107_s1 + $0xe] sm:$0x3] }
  0xee   : > { %v2734_v60 = vrot.slane %v2733_v1, 4  ;;  %v3263_v0 = vsel %vm13648_vm7, %v11371_v17, %v3262_v16  ;;  %v11317_v15 = vcombine.low %v2715_v12, %v2725_v34  ;;  %v3264_v53 = vrot.slane %v3262_v16, 4  ;;  %v13120_v34 = vld [vmem:[%s13317_s10 + $0x18] sm:$0xff]  }
  0xef   : > { %v2744_v8 = vrot.slane %v2743_v59, 4  ;;  %v3269_v11 = vrot.slane %v14486_v52, 5  ;;  %v14515_v30 = vadd.f32 %v1229_v58, %v905_v7  ;;  %v3272_v21 = vrot.slane %v14489_v40, 5  ;;  %v12401_v45 = vpop.f32.mrf.mxu0  ;;  %v1245_v52 = vpop.f32.mrf.mxu1 }
  0xf0   : > { %v2739_v10 = vsel %vm13353_vm4, %v2734_v60, %v2738_v51  ;;  %v4596_v33 = vsel %vm851_vm0, %v13178_v24, 0  ;;  %v3266_v31 = vsel %vm13648_vm7, %v3264_v53, %v3265_v47  ;;  %v14533_v44 = vadd.f32 %v12439_v20, %v12401_v45  ;;  %v14548_v51 = vld [vmem:[%s13317_s10 + $0x2c] sm:$0x1] }
  0xf1   : > { %v2749_v37 = vsel %vm13353_vm4, %v2744_v8, %v2748_v14  ;;  %v3270_v28 = vsel %vm13648_vm7, %v11372_v2, %v3269_v11  ;;  %v3271_v58 = vrot.slane %v3269_v11, 4  ;;  %12659 = vmatpush3.bf16.msra.mxu1 %v4596_v33  ;;  %v11390_v40 = vcombine.low %v3263_v0, %v3266_v31  ;;  %v908_v55 = vpop.f32.mrf.mxu0  ;;  %v12443_v61 = vpop.f32.mrf.mxu1 }
  0xf2   : > { %v11318_v63 = vcombine.low %v2739_v10, %v2749_v37  ;;  %12575 = vmatmul.mubr.msk.bf16.gmra.mxu0 %vm796_vm3, %v14475_v38  ;;  %v4054_v56 = vshrl.u32 %v11483_v62, 16  ;;  %v4057_v18 = vshll.u32 %v11483_v62, 16  ;;  %v4063_v27 = vshll.u32 %v11484_v50, 16 }
  0xf3   : > { %v3273_v32 = vsel %vm13648_vm7, %v3271_v58, %v3272_v21  ;;  %v14540_v41 = vadd.f32 %v1232_v5, %v908_v55  ;;  %12578 = vmatprep.mubr.msk.bf16.mxu0 %vm796_vm3, %v11317_v15  ;;  %12616 = vmatprep.mubr.msk.bf16.mxu1 %vm796_vm3, %v11390_v40  ;;  %v4067_v13 = vshrl.u32 %v11484_v50, 16  ;;  %v4073_v29 = vshll.u32 %v11485_v23, 16  ;;  %v1248_v54 = vpop.f32.mrf.mxu1  ;;  %v11489_v15 = vld [vmem:[%s13317_s10 + $0x30] sm:$0xf]  ;;  %v11490_v50 = vld [vmem:[%s13317_s10 + $0x34] sm:$0xf] }
  0xf4   : > { %v11391_v20 = vcombine.low %v3270_v28, %v3273_v32  ;;  %v12404_v38 = vpop.f32.mrf.mxu0  ;;  %v4056_v3 = vrot.slane %v4054_v56, 4  ;;  %v4059_v9 = vrot.slane %v4057_v18, 5  ;;  %v4065_v39 = vrot.slane %v4063_v27, 5  ;;  %v11491_v58 = vld [vmem:[%s13317_s10 + $0x38] sm:$0x1] }
  0xf5   : > { %v4078_v4 = vshrl.u32 %v11486_v49, 16  ;;  %v14550_v5 = vadd.f32 %v12442_v42, %v12404_v38  ;;  %v4069_v17 = vrot.slane %v4067_v13, 4  ;;  %v4075_v57 = vrot.slane %v4073_v29, 5  ;;  %v11492_v55 = vld [vmem:[%s13317_s10 + $0x3c] sm:$0xf] }
  0xf6   : > { %12617 = vmatmul.mubr.msk.bf16.gmra.mxu1 %vm796_vm3, %v11391_v20  ;;  %v4081_v1 = vshll.u32 %v11486_v49, 16  ;;  %v921_v14 = vpop.f32.mrf.mxu0  ;;  %v12446_v16 = vpop.f32.mrf.mxu1  ;;  %v4060_v26 = vor.u32 %v4059_v9, %v4056_v3  ;;  %v4087_v59 = vshll.u32 %v14545_v25, 16  ;;  %v4091_v47 = vshrl.u32 %v14545_v25, 16  ;;  %v13121_v9 = vld [vmem:[%s13317_s10 + $0x24] sm:$0xff]  }
  0xf7   : > { %v4080_v12 = vrot.slane %v4078_v4, 4  ;;  %v14555_v2 = vadd.f32 %v1245_v52, %v921_v14  ;;  %v4070_v60 = vor.u32 %v4069_v17, %v4065_v39  ;;  %v4097_v7 = vshll.u32 %v14548_v51, 16 }
  0xf8   : > { %v4083_v0 = vrot.slane %v4081_v1, 5  ;;  %v12405_v42 = vpop.f32.mrf.mxu0  ;;  %v4061_v8 = vrot.slane %v4060_v26, 4  ;;  %v1261_v53 = vpop.f32.mrf.mxu1  ;;  %v4089_v11 = vrot.slane %v4087_v59, 5  ;;  %v4093_v10 = vrot.slane %v4091_v47, 4  ;;  %v13122_v26 = vld [vmem:[%s13317_s10 + $0x30] sm:$0xff]  }
  0xf9   : > { %v14560_v21 = vadd.f32 %v12443_v61, %v12405_v42  ;;  %v5120_v24 = vsel %vm851_vm0, %v14241_v35, 0  ;;  %v4071_v33 = vrot.slane %v4070_v60, 4  ;;  %v4099_v52 = vrot.slane %v4097_v7, 5  ;;  %v14586_v47 = vld [vmem:[%s13317_s10 + $0x44] sm:$0x1] }
  0xfa   : > { %v4084_v62 = vor.u32 %v4083_v0, %v4080_v12  ;;  %12579 = vmatmul.mubr.msk.bf16.gmra.mxu0 %vm796_vm3, %v11318_v63  ;;  %v924_v45 = vpop.f32.mrf.mxu0  ;;  %v4066_v37 = vsel %vm13353_vm4, %v4061_v8, %v4065_v39  ;;  %v4094_v31 = vor.u32 %v4093_v10, %v4089_v11  ;;  %v12447_v28 = vpop.f32.mrf.mxu1  ;;  %v4102_v23 = vshrl.u32 %v11489_v15, 16 }
  0xfb   : > { %v14569_v40 = vadd.f32 %v1248_v54, %v924_v45  ;;  %12622 = vmatprep.mubr.msk.bf16.mxu0 %vm796_vm3, %v13120_v34  ;;  %v4076_v35 = vsel %vm13353_vm4, %v4071_v33, %v4075_v57  ;;  %v4105_v63 = vshll.u32 %v11489_v15, 16  ;;  %v4111_v27 = vshll.u32 %v11490_v50, 16  ;;  %v11493_v54 = vld [vmem:[%s13317_s10 + $0x40] sm:$0xf]  ;;  %v11495_v34 = vld [vmem:[%s13317_s10 + $0x48] sm:$0xf] }
  0xfc   : > { %v4085_v49 = vrot.slane %v4084_v62, 4  ;;  %v11538_v32 = vcombine.low %v4066_v37, %v4076_v35  ;;  %v4095_v61 = vrot.slane %v4094_v31, 4  ;;  %v1264_v56 = vpop.f32.mrf.mxu1  ;;  %v4104_v18 = vrot.slane %v4102_v23, 4 }
  0xfd   : > { %v4107_v13 = vrot.slane %v4105_v63, 5  ;;  %v4115_v29 = vshrl.u32 %v11490_v50, 16  ;;  %v4121_v38 = vshll.u32 %v11491_v58, 16  ;;  %v4113_v4 = vrot.slane %v4111_v27, 5 }
  0xfe   : > { %v4090_v20 = vsel %vm13353_vm4, %v4085_v49, %v4089_v11  ;;  %v12408_v3 = vpop.f32.mrf.mxu0  ;;  %12660 = vmatprep.mubr.msk.bf16.mxu1 %vm796_vm3, %v11538_v32  ;;  %v4100_v39 = vsel %vm13353_vm4, %v4095_v61, %v4099_v52  ;;  %v4126_v17 = vshrl.u32 %v11492_v55, 16  ;;  %v4129_v57 = vshll.u32 %v11492_v55, 16  ;;  %v14595_v52 = vld [vmem:[%s13317_s10 + $0x4c] sm:$0xf] }
  0xff   : > { %v14582_v1 = vadd.f32 %v12446_v16, %v12408_v3  ;;  %v11539_v14 = vcombine.low %v4090_v20, %v4100_v39  ;;  %v4108_v12 = vor.u32 %v4107_v13, %v4104_v18  ;;  %v4117_v59 = vrot.slane %v4115_v29, 4  ;;  %v12450_v0 = vpop.f32.mrf.mxu1  ;;  %v14603_v18 = vld [vmem:[%s13317_s10 + $0x50] sm:$0x1]  ;;  %v13123_v3 = vld [vmem:[%s13317_s10 + $0x3c] sm:$0xff]  }
 0x100   : > { %v937_v60 = vpop.f32.mrf.mxu0  ;;  %v4123_v7 = vrot.slane %v4121_v38, 5  ;;  %v4128_v15 = vrot.slane %v4126_v17, 4  ;;  %v4131_v42 = vrot.slane %v4129_v57, 5  ;;  %v4135_v8 = vshll.u32 %v11493_v54, 16  ;;  %v11498_v38 = vld [vmem:[%s13317_s10 + $0x54] sm:$0xf] }
 0x101   : > { %v14589_v11 = vadd.f32 %v1261_v53, %v937_v60  ;;  %12661 = vmatmul.mubr.msk.bf16.vlgmr.msra.gmra.mxu1 %vm796_vm3, %v11539_v14  ;;  %v4109_v16 = vrot.slane %v4108_v12, 4  ;;  %v4118_v10 = vor.u32 %v4117_v59, %v4113_v4  ;;  %v4139_v33 = vshrl.u32 %v11493_v54, 16  ;;  %v1277_v50 = vpop.f32.mrf.mxu1  ;;  %v14616_v14 = vld [vmem:[%s13317_s10 + $0x58] sm:$0xf]  ;;  %v13124_v12 = vld [vmem:[%s13317_s10 + $0x48] sm:$0xff]  }
 0x102   : > { %12623 = vmatmul.mubr.msk.bf16.vlgmr.msra.gmra.mxu0 %vm796_vm3, %v13121_v9  ;;  %v12409_v62 = vpop.f32.mrf.mxu0  ;;  %v4132_v45 = vor.u32 %v4131_v42, %v4128_v15  ;;  %v4137_v37 = vrot.slane %v4135_v8, 5  ;;  %v4145_v31 = vshll.u32 %v14586_v47, 16  ;;  %v4150_v58 = vshrl.u32 %v11495_v34, 16 }
 0x103   : > { %12697 = vmatpush3.bf16.msra.mxu0 %v5120_v24  ;;  %v14597_v53 = vadd.f32 %v12447_v28, %v12409_v62  ;;  %12626 = vmatprep.mubr.msk.bf16.mxu0 %vm796_vm3, %v13122_v26  ;;  %v4114_v23 = vsel %vm13353_vm4, %v4109_v16, %v4113_v4  ;;  %v4119_v35 = vrot.slane %v4118_v10, 4  ;;  %v4141_v49 = vrot.slane %v4139_v33, 4  ;;  %v12451_v61 = vpop.f32.mrf.mxu1  ;;  %v14628_v62 = vld [vmem:[%s13317_s10 + $0x5c] sm:$0x1] }
 0x104   : > { %v940_v63 = vpop.f32.mrf.mxu0  ;;  %v4133_v55 = vrot.slane %v4132_v45, 4  ;;  %v4147_v32 = vrot.slane %v4145_v31, 5  ;;  %v4152_v27 = vrot.slane %v4150_v58, 4  ;;  %v4153_v24 = vshll.u32 %v11495_v34, 16 }
 0x105   : > { %v14605_v28 = vadd.f32 %v1264_v56, %v940_v63  ;;  %v4124_v20 = vsel %vm13353_vm4, %v4119_v35, %v4123_v7  ;;  %v4142_v13 = vor.u32 %v4141_v49, %v4137_v37  ;;  %v4159_v29 = vshll.u32 %v14595_v52, 16  ;;  %v1280_v4 = vpop.f32.mrf.mxu1 }
 0x106   : > { %v12412_v54 = vpop.f32.mrf.mxu0  ;;  %v11540_v9 = vcombine.low %v4114_v23, %v4124_v20  ;;  %v4138_v39 = vsel %vm13353_vm4, %v4133_v55, %v4137_v37  ;;  %v4155_v17 = vrot.slane %v4153_v24, 5  ;;  %v4163_v57 = vshrl.u32 %v14595_v52, 16  ;;  %v11501_v37 = vld [vmem:[%s13317_s10 + $0x60] sm:$0xf]  ;;  %v14638_v24 = vld [vmem:[%s13317_s10 + $0x64] sm:$0xf] }
 0x107   : > { %v14618_v56 = vadd.f32 %v12450_v0, %v12412_v54  ;;  %v4143_v26 = vrot.slane %v4142_v13, 4  ;;  %v4161_v59 = vrot.slane %v4159_v29, 5  ;;  %v4169_v34 = vshll.u32 %v14603_v18, 16 }
 0x108   : > { %12664 = vmatprep.mubr.msk.bf16.mxu1 %vm796_vm3, %v11540_v9  ;;  %v953_v60 = vpop.f32.mrf.mxu0  ;;  %v12454_v7 = vpop.f32.mrf.mxu1  ;;  %v4156_v15 = vor.u32 %v4155_v17, %v4152_v27  ;;  %v4165_v42 = vrot.slane %v4163_v57, 4  ;;  %v4174_v8 = vshrl.u32 %v11498_v38, 16  ;;  %v4177_v16 = vshll.u32 %v11498_v38, 16  ;;  %v14647_v17 = vld [vmem:[%s13317_s10 + $0x68] sm:$0x1] }
 0x109   : > { %v14623_v10 = vadd.f32 %v1277_v50, %v953_v60  ;;  %v4148_v0 = vsel %vm13353_vm4, %v4143_v26, %v4147_v32  ;;  %v4171_v33 = vrot.slane %v4169_v34, 5  ;;  %v4183_v45 = vshll.u32 %v14616_v14, 16  ;;  %v11504_v26 = vld [vmem:[%s13317_s10 + $0x6c] sm:$0xf] }
 0x10a   : > { %12627 = vmatmul.mubr.msk.bf16.gmra.mxu0 %vm796_vm3, %v13123_v3  ;;  %v11541_v31 = vcombine.low %v4138_v39, %v4148_v0  ;;  %v12413_v58 = vpop.f32.mrf.mxu0  ;;  %v4157_v23 = vrot.slane %v4156_v15, 4  ;;  %v4166_v35 = vor.u32 %v4165_v42, %v4161_v59  ;;  %v1293_v49 = vpop.f32.mrf.mxu1  ;;  %v4176_v63 = vrot.slane %v4174_v8, 4  ;;  %v13126_v0 = vld [vmem:[%s13317_s10 + $0x60] sm:$0xff]  }
 0x10b   : > { %v14633_v50 = vadd.f32 %v12451_v61, %v12413_v58  ;;  %12630 = vmatprep.mubr.msk.bf16.mxu0 %vm796_vm3, %v13124_v12  ;;  %v4179_v55 = vrot.slane %v4177_v16, 5  ;;  %v4185_v32 = vrot.slane %v4183_v45, 5  ;;  %v4187_v27 = vshrl.u32 %v14616_v14, 16  ;;  %v13125_v12 = vld [vmem:[%s13317_s10 + $0x54] sm:$0xff]  }
 0x10c   : > { %12665 = vmatmul.mubr.msk.bf16.gmra.mxu1 %vm796_vm3, %v11541_v31  ;;  %v956_v20 = vpop.f32.mrf.mxu0  ;;  %v4162_v13 = vsel %vm13353_vm4, %v4157_v23, %v4161_v59  ;;  %v4167_v29 = vrot.slane %v4166_v35, 4  ;;  %v4193_v61 = vshll.u32 %v14628_v62, 16  ;;  %v12455_v38 = vpop.f32.mrf.mxu1  ;;  %v4198_v54 = vshrl.u32 %v11501_v37, 16  ;;  %v14658_v35 = vld [vmem:[%s13317_s10 + $0x70] sm:$0xf] }
 0x10d   : > { %v14644_v3 = vadd.f32 %v1280_v4, %v956_v20  ;;  %v4180_v9 = vor.u32 %v4179_v55, %v4176_v63  ;;  %v4189_v39 = vrot.slane %v4187_v27, 4  ;;  %v4201_v57 = vshll.u32 %v11501_v37, 16 }
 0x10e   : > { %v4172_v34 = vsel %vm13353_vm4, %v4167_v29, %v4171_v33  ;;  %v4195_v59 = vrot.slane %v4193_v61, 5  ;;  %v1296_v60 = vpop.f32.mrf.mxu1  ;;  %v4200_v15 = vrot.slane %v4198_v54, 4  ;;  %v4207_v42 = vshll.u32 %v14638_v24, 16 }
 0x10f   : > { %v11542_v8 = vcombine.low %v4162_v13, %v4172_v34  ;;  %v4181_v16 = vrot.slane %v4180_v9, 4  ;;  %v4190_v4 = vor.u32 %v4189_v39, %v4185_v32  ;;  %v4203_v45 = vrot.slane %v4201_v57, 5  ;;  %v14667_v9 = vld [vmem:[%s13317_s10 + $0x74] sm:$0x1] }
 0x110   : > { %v12416_v31 = vpop.f32.mrf.mxu0  ;;  %v4209_v58 = vrot.slane %v4207_v42, 5  ;;  %v4211_v37 = vshrl.u32 %v14638_v24, 16  ;;  %v4217_v23 = vshll.u32 %v14647_v17, 16  ;;  %v4222_v33 = vshrl.u32 %v11504_v26, 16  ;;  %18144 = vst [vmem:[#allocation6_spill] sm:$0xff] %v14667_v9 }
 0x111   : > { %v14660_v63 = vadd.f32 %v12454_v7, %v12416_v31  ;;  %12668 = vmatprep.mubr.msk.bf16.mxu1 %vm796_vm3, %v11542_v8  ;;  %v4186_v55 = vsel %vm13353_vm4, %v4181_v16, %v4185_v32  ;;  %v4191_v27 = vrot.slane %v4190_v4, 4  ;;  %v4204_v20 = vor.u32 %v4203_v45, %v4200_v15  ;;  %v12458_v29 = vpop.f32.mrf.mxu1  ;;  %v11507_v15 = vld [vmem:[%s13317_s10 + $0x78] sm:$0xf] }
 0x112   : > { %12631 = vmatmul.mubr.msk.bf16.gmra.mxu0 %vm796_vm3, %v13125_v12  ;;  %v969_v13 = vpop.f32.mrf.mxu0  ;;  %v4213_v61 = vrot.slane %v4211_v37, 4  ;;  %v4219_v54 = vrot.slane %v4217_v23, 5  ;;  %v4224_v39 = vrot.slane %v4222_v33, 4  ;;  %v4225_v7 = vshll.u32 %v11504_v26, 16  ;;  %v13127_v33 = vld [vmem:[%s13317_s10 + $0x6c] sm:$0xff]  }
 0x113   : > { %v14669_v57 = vadd.f32 %v1293_v49, %v969_v13  ;;  %v4196_v34 = vsel %vm13353_vm4, %v4191_v27, %v4195_v59  ;;  %12634 = vmatprep.mubr.msk.bf16.mxu0 %vm796_vm3, %v13126_v0  ;;  %v4205_v32 = vrot.slane %v4204_v20, 4  ;;  %v4231_v12 = vshll.u32 %v14658_v35, 16  ;;  %v1309_v4 = vpop.f32.mrf.mxu1  ;;  %v14678_v49 = vld [vmem:[%s13317_s10 + $0x7c] sm:$0xf] }
 0x114   : > { %v11543_v42 = vcombine.low %v4186_v55, %v4196_v34  ;;  %v12417_v8 = vpop.f32.mrf.mxu0  ;;  %v4214_v16 = vor.u32 %v4213_v61, %v4209_v58  ;;  %v4227_v45 = vrot.slane %v4225_v7, 5  ;;  %v4235_v31 = vshrl.u32 %v14658_v35, 16  ;;  %v13128_v34 = vld [vmem:[%s13317_s10 + $0x78] sm:$0xff]  }
 0x115   : > { %18145 = vst [vmem:[#allocation7_spill] sm:$0xff] %v14669_v57  ;;  %v14680_v26 = vadd.f32 %v12455_v38, %v12417_v8  ;;  %v4210_v59 = vsel %vm13353_vm4, %v4205_v32, %v4209_v58  ;;  %v4233_v0 = vrot.slane %v4231_v12, 5  ;;  %v4241_v37 = vshll.u32 %v14667_v9, 16  ;;  %v12459_v13 = vpop.f32.mrf.mxu1  ;;  %v14691_v8 = vld [vmem:[%s13317_s10 + $0x80] sm:$0x1] }
 0x116   : > { %12669 = vmatmul.mubr.msk.bf16.gmra.mxu1 %vm796_vm3, %v11543_v42  ;;  %v972_v23 = vpop.f32.mrf.mxu0  ;;  %v4215_v55 = vrot.slane %v4214_v16, 4  ;;  %v4228_v27 = vor.u32 %v4227_v45, %v4224_v39  ;;  %v4237_v20 = vrot.slane %v4235_v31, 4  ;;  %v4246_v61 = vshrl.u32 %v11507_v15, 16  ;;  %18148 = vst [vmem:[#allocation10_spill] sm:$0xff] %v14691_v8 }
 0x117   : > { %18146 = vst [vmem:[#allocation8_spill] sm:$0xff] %v14680_v26  ;;  %v14687_v7 = vadd.f32 %v1296_v60, %v972_v23  ;;  %v4243_v38 = vrot.slane %v4241_v37, 5  ;;  %v4249_v58 = vshll.u32 %v11507_v15, 16  ;;  %v4255_v32 = vshll.u32 %v14678_v49, 16  ;;  %v1312_v45 = vpop.f32.mrf.mxu1  ;;  %v11510_v26 = vld [vmem:[%s13317_s10 + $0x84] sm:$0xf] }
 0x118   : > { %v12420_v12 = vpop.f32.mrf.mxu0  ;;  %v4220_v42 = vsel %vm13353_vm4, %v4215_v55, %v4219_v54  ;;  %v4229_v16 = vrot.slane %v4228_v27, 4  ;;  %v4238_v39 = vor.u32 %v4237_v20, %v4233_v0  ;;  %v4248_v31 = vrot.slane %v4246_v61, 4 }
 0x119   : > { %18147 = vst [vmem:[#allocation9_spill] sm:$0xff] %v14687_v7  ;;  %v14697_v57 = vadd.f32 %v12458_v29, %v12420_v12  ;;  %v11544_v60 = vcombine.low %v4210_v59, %v4220_v42  ;;  %v4251_v37 = vrot.slane %v4249_v58, 5  ;;  %v4257_v23 = vrot.slane %v4255_v32, 5  ;;  %v14700_v7 = vld [vmem:[%s13317_s10 + $0x88] sm:$0xf] }
 0x11a   : > { %18150 = vst [vmem:[#allocation12_spill] sm:$0xff] %v14700_v7  ;;  %12635 = vmatmul.mubr.msk.bf16.gmra.mxu0 %vm796_vm3, %v13127_v33  ;;  %v985_v15 = vpop.f32.mrf.mxu0  ;;  %v4234_v9 = vsel %vm13353_vm4, %v4229_v16, %v4233_v0  ;;  %v4239_v54 = vrot.slane %v4238_v39, 4  ;;  %v12462_v55 = vpop.f32.mrf.mxu1  ;;  %v4259_v27 = vshrl.u32 %v14678_v49, 16  ;;  %v4265_v29 = vshll.u32 %v14691_v8, 16  ;;  %v14712_v33 = vld [vmem:[%s13317_s10 + $0x8c] sm:$0x1] }
 0x11b   : > { %18149 = vst [vmem:[#allocation11_spill] sm:$0xff] %v14697_v57  ;;  %12672 = vmatprep.mubr.msk.bf16.mxu1 %vm796_vm3, %v11544_v60  ;;  %v14708_v59 = vadd.f32 %v1309_v4, %v985_v15  ;;  %12638 = vmatprep.mubr.msk.bf16.mxu0 %vm796_vm3, %v13128_v34  ;;  %v4252_v20 = vor.u32 %v4251_v37, %v4248_v31  ;;  %18152 = vst [vmem:[#allocation14_spill] sm:$0xff] %v14712_v33  ;;  %v4270_v61 = vshrl.u32 %v11510_v26, 16  ;;  %v11513_v4 = vld [vmem:[%s13317_s10 + $0x90] sm:$0xf] }
 0x11c   : > { %v4273_v58 = vshll.u32 %v11510_v26, 16  ;;  %v4244_v0 = vsel %vm13353_vm4, %v4239_v54, %v4243_v38  ;;  %v12421_v32 = vpop.f32.mrf.mxu0  ;;  %v4261_v12 = vrot.slane %v4259_v27, 4  ;;  %v4267_v42 = vrot.slane %v4265_v29, 5  ;;  %v1325_v16 = vpop.f32.mrf.mxu1  ;;  %v14723_v27 = vld [vmem:[%s13317_s10 + $0x94] sm:$0xf] }
 0x11d   : > { %18151 = vst [vmem:[#allocation13_spill] sm:$0xff] %v14708_v59  ;;  %v4279_v39 = vshll.u32 %v14700_v7, 16  ;;  %v11545_v60 = vcombine.low %v4234_v9, %v4244_v0  ;;  %v14718_v34 = vadd.f32 %v12459_v13, %v12421_v32  ;;  %v4253_v31 = vrot.slane %v4252_v20, 4  ;;  %v13129_v59 = vld [vmem:[%s13317_s10 + $0x84] sm:$0xff]   ;;  %18154 = vst [vmem:[#allocation16_spill] sm:$0xff] %v14723_v27  ;;  %v13130_v20 = vld [vmem:[%s13317_s10 + $0x90] sm:$0xff]  }
 0x11e   : > { %v4272_v37 = vrot.slane %v4270_v61, 4  ;;  %v988_v15 = vpop.f32.mrf.mxu0  ;;  %v4262_v26 = vor.u32 %v4261_v12, %v4257_v23  ;;  %v4275_v57 = vrot.slane %v4273_v58, 5  ;;  %v4283_v38 = vshrl.u32 %v14700_v7, 16  ;;  %v12463_v54 = vpop.f32.mrf.mxu1  ;;  %v14733_v7 = vld [vmem:[%s13317_s10 + $0x98] sm:$0x1] }
 0x11f   : > { %18153 = vst [vmem:[#allocation15_spill] sm:$0xff] %v14718_v34  ;;  %v4281_v8 = vrot.slane %v4279_v39, 5  ;;  %12673 = vmatmul.mubr.msk.bf16.gmra.mxu1 %vm796_vm3, %v11545_v60  ;;  %v14726_v29 = vadd.f32 %v1312_v45, %v988_v15  ;;  %v4258_v9 = vsel %vm13353_vm4, %v4253_v31, %v4257_v23  ;;  %v4289_v13 = vshll.u32 %v14712_v33, 16  ;;  %18156 = vst [vmem:[#allocation18_spill] sm:$0xff] %v14733_v7 }
 0x120   : > { %v4294_v61 = vshrl.u32 %v11513_v4, 16  ;;  %v4263_v0 = vrot.slane %v4262_v26, 4  ;;  %v4276_v58 = vor.u32 %v4275_v57, %v4272_v37  ;;  %v4285_v32 = vrot.slane %v4283_v38, 4  ;;  %v1328_v12 = vpop.f32.mrf.mxu1  ;;  %v11516_v38 = vld [vmem:[%s13317_s10 + $0x9c] sm:$0xf] }
 0x121   : > { %18155 = vst [vmem:[#allocation17_spill] sm:$0xff] %v14726_v29  ;;  %v4297_v39 = vshll.u32 %v11513_v4, 16  ;;  %v4291_v34 = vrot.slane %v4289_v13, 5  ;;  %v4303_v45 = vshll.u32 %v14723_v27, 16  ;;  %v4307_v15 = vshrl.u32 %v14723_v27, 16 }
 0x122   : > { %v4296_v60 = vrot.slane %v4294_v61, 4  ;;  %v12424_v23 = vpop.f32.mrf.mxu0  ;;  %12639 = vmatmul.mubr.msk.bf16.gmra.mxu0 %vm796_vm3, %v13129_v59  ;;  %v4268_v31 = vsel %vm13353_vm4, %v4263_v0, %v4267_v42  ;;  %v4277_v26 = vrot.slane %v4276_v58, 4  ;;  %v4286_v57 = vor.u32 %v4285_v32, %v4281_v8  ;;  %v14745_v27 = vld [vmem:[%s13317_s10 + $0xa0] sm:$0xf] }
 0x123   : > { %v4299_v37 = vrot.slane %v4297_v39, 5  ;;  %v14741_v4 = vadd.f32 %v12462_v55, %v12424_v23  ;;  %v11546_v13 = vcombine.low %v4258_v9, %v4268_v31  ;;  %12642 = vmatprep.mubr.msk.bf16.mxu0 %vm796_vm3, %v13130_v20  ;;  %v4305_v61 = vrot.slane %v4303_v45, 5  ;;  %v12466_v0 = vpop.f32.mrf.mxu1  ;;  %v14754_v20 = vld [vmem:[%s13317_s10 + $0xa4] sm:$0x1]  ;;  %v13131_v23 = vld [vmem:[%s13317_s10 + $0x9c] sm:$0xff]  }
 0x124   : > { %v4309_v29 = vrot.slane %v4307_v15, 4  ;;  %v1001_v33 = vpop.f32.mrf.mxu0  ;;  %v4282_v59 = vsel %vm13353_vm4, %v4277_v26, %v4281_v8  ;;  %v4287_v42 = vrot.slane %v4286_v57, 4  ;;  %v4313_v32 = vshll.u32 %v14733_v7, 16  ;;  %v14768_v7 = vld [vmem:[%s13317_s10 + $0xac] sm:$0xf] }
 0x125   : > { %18157 = vst [vmem:[#allocation19_spill] sm:$0xff] %v14741_v4  ;;  %v4300_v58 = vor.u32 %v4299_v37, %v4296_v60  ;;  %12676 = vmatprep.mubr.msk.bf16.mxu1 %vm796_vm3, %v11546_v13  ;;  %v14751_v55 = vadd.f32 %v1325_v16, %v1001_v33  ;;  %v4318_v39 = vshrl.u32 %v11516_v38, 16  ;;  %v4321_v45 = vshll.u32 %v11516_v38, 16  ;;  %v1341_v26 = vpop.f32.mrf.mxu1  ;;  %v11519_v37 = vld [vmem:[%s13317_s10 + $0xa8] sm:$0xf]  ;;  %18160 = vst [vmem:[#allocation22_spill] sm:$0xff] %v14768_v7 }
 0x126   : > { %v4310_v9 = vor.u32 %v4309_v29, %v4305_v61  ;;  %v4292_v15 = vsel %vm13353_vm4, %v4287_v42, %v4291_v34  ;;  %v12425_v8 = vpop.f32.mrf.mxu0  ;;  %v4315_v60 = vrot.slane %v4313_v32, 5  ;;  %v4327_v57 = vshll.u32 %v14745_v27, 16 }
 0x127   : > { %18158 = vst [vmem:[#allocation20_spill] sm:$0xff] %v14751_v55  ;;  %v4301_v31 = vrot.slane %v4300_v58, 4  ;;  %v11547_v33 = vcombine.low %v4282_v59, %v4292_v15  ;;  %v14761_v16 = vadd.f32 %v12463_v54, %v12425_v8  ;;  %v4320_v13 = vrot.slane %v4318_v39, 4  ;;  %v13132_v55 = vld [vmem:[%s13317_s10 + $0xa8] sm:$0xff]   ;;  %v12467_v32 = vpop.f32.mrf.mxu1 }
 0x128   : > { %v4311_v29 = vrot.slane %v4310_v9, 4  ;;  %v1004_v4 = vpop.f32.mrf.mxu0  ;;  %v4323_v34 = vrot.slane %v4321_v45, 5  ;;  %v4329_v42 = vrot.slane %v4327_v57, 5  ;;  %v4331_v58 = vshrl.u32 %v14745_v27, 16  ;;  %v14780_v57 = vld [vmem:[%s13317_s10 + $0xb0] sm:$0x1] }
 0x129   : > { %18159 = vst [vmem:[#allocation21_spill] sm:$0xff] %v14761_v16  ;;  %v4306_v38 = vsel %vm13353_vm4, %v4301_v31, %v4305_v61  ;;  %12677 = vmatmul.mubr.msk.bf16.gmra.mxu1 %vm796_vm3, %v11547_v33  ;;  %v14771_v54 = vadd.f32 %v1328_v12, %v1004_v4  ;;  %v4337_v9 = vshll.u32 %v14754_v20, 16  ;;  %v4342_v39 = vshrl.u32 %v11519_v37, 16  ;;  %v14777_v31 = vpop.f32.mrf.mxu1  ;;  %18163 = vst [vmem:[#allocation25_spill] sm:$0xff] %v14780_v57  ;;  %v11522_v33 = vld [vmem:[%s13317_s10 + $0xb4] sm:$0xf] }
 0x12a   : > { %v4316_v59 = vsel %vm13353_vm4, %v4311_v29, %v4315_v60  ;;  %v12428_v61 = vpop.f32.mrf.mxu0  ;;  %12643 = vmatmul.mubr.msk.bf16.gmra.mxu0 %vm796_vm3, %v13131_v23  ;;  %v4324_v15 = vor.u32 %v4323_v34, %v4320_v13  ;;  %v4333_v8 = vrot.slane %v4331_v58, 4  ;;  %18162 = vst [vmem:[#allocation24_spill] sm:$0xff] %v14777_v31  ;;  %v4345_v16 = vshll.u32 %v11519_v37, 16 }
 0x12b   : > { %18161 = vst [vmem:[#allocation23_spill] sm:$0xff] %v14771_v54  ;;  %v11548_v45 = vcombine.low %v4306_v38, %v4316_v59  ;;  %v14783_v12 = vadd.f32 %v12466_v0, %v12428_v61  ;;  %v4339_v4 = vrot.slane %v4337_v9, 5  ;;  %12646 = vmatprep.mubr.msk.bf16.mxu0 %vm796_vm3, %v13132_v55  ;;  %v4344_v60 = vrot.slane %v4342_v39, 4  ;;  %v12510_v37 = vpop.f32.mrf.mxu1  ;;  %v14793_v9 = vld [vmem:[%s13317_s10 + $0xb8] sm:$0xf] }
 0x12c   : > { %v4351_v29 = vshll.u32 %v14768_v7, 16  ;;  %v1017_v23 = vpop.f32.mrf.mxu0  ;;  %v4325_v13 = vrot.slane %v4324_v15, 4  ;;  %v4334_v38 = vor.u32 %v4333_v8, %v4329_v42  ;;  %v4347_v34 = vrot.slane %v4345_v16, 5  ;;  %18166 = vst [vmem:[#allocation28_spill] sm:$0xff] %v14793_v9  ;;  %v13133_v8 = vld [vmem:[%s13317_s10 + $0xb4] sm:$0xff]  }
 0x12d   : > { %18164 = vst [vmem:[#allocation26_spill] sm:$0xff] %v14783_v12  ;;  %12680 = vmatprep.mubr.msk.bf16.mxu1 %vm796_vm3, %v11548_v45  ;;  %v4355_v58 = vshrl.u32 %v14768_v7, 16  ;;  %v14789_v59 = vadd.f32 %v1341_v26, %v1017_v23  ;;  %v4361_v55 = vshll.u32 %v14780_v57, 16  ;;  %v4366_v39 = vshrl.u32 %v11522_v33, 16  ;;  %v2085_v12 = vpop.f32.mrf.mxu1  ;;  %v13134_v57 = vld [vmem:[%s13317_s10 + $0xc0] sm:$0xff]  }
 0x12e   : > { %v4353_v0 = vrot.slane %v4351_v29, 5  ;;  %v4330_v61 = vsel %vm13353_vm4, %v4325_v13, %v4329_v42  ;;  %v4335_v45 = vrot.slane %v4334_v38, 4  ;;  %v12429_v15 = vpop.f32.mrf.mxu0  ;;  %v4348_v16 = vor.u32 %v4347_v34, %v4344_v60  ;;  %v14801_v29 = vld [vmem:[%s13317_s10 + $0xbc] sm:$0x1] }
 0x12f   : > { %18165 = vst [vmem:[#allocation27_spill] sm:$0xff] %v14789_v59  ;;  %v4357_v31 = vrot.slane %v4355_v58, 4  ;;  %v14798_v54 = vadd.f32 %v12467_v32, %v12429_v15  ;;  %v4363_v26 = vrot.slane %v4361_v55, 5  ;;  %18168 = vst [vmem:[#allocation30_spill] sm:$0xff] %v14801_v29  ;;  %v4368_v23 = vrot.slane %v4366_v39, 4  ;;  %v12511_v34 = vpop.f32.mrf.mxu1 }
 0x130   : > { %v4369_v59 = vshll.u32 %v11522_v33, 16  ;;  %v4340_v7 = vsel %vm13353_vm4, %v4335_v45, %v4339_v4  ;;  %v14806_v42 = vpop.f32.mrf.mxu0  ;;  %v4349_v13 = vrot.slane %v4348_v16, 4  ;;  %v4375_v60 = vshll.u32 %v14793_v9, 16  ;;  %v11525_v58 = vld [vmem:[%s13317_s10 + $0xc0] sm:$0xf] }
 0x131   : > { %18167 = vst [vmem:[#allocation29_spill] sm:$0xff] %v14798_v54  ;;  %18169 = vst [vmem:[#allocation31_spill] sm:$0xff] %v14806_v42  ;;  %v4358_v38 = vor.u32 %v4357_v31, %v4353_v0  ;;  %v11549_v32 = vcombine.low %v4330_v61, %v4340_v7  ;;  %v4379_v55 = vshrl.u32 %v14793_v9, 16  ;;  %v14812_v54 = vld [vmem:[%s13317_s10 + $0xc4] sm:$0xf]  ;;  %v4385_v31 = vshll.u32 %v14801_v29, 16  ;;  %v14818_v16 = vpop.f32.mrf.mxu1 }
 0x132   : > { %v4371_v15 = vrot.slane %v4369_v59, 5  ;;  %v12472_v39 = vpop.f32.mrf.mxu0  ;;  %12647 = vmatmul.mubr.msk.bf16.gmra.mxu0 %vm796_vm3, %v13133_v8  ;;  %v4354_v33 = vsel %vm13353_vm4, %v4349_v13, %v4353_v0  ;;  %v4377_v45 = vrot.slane %v4375_v60, 5  ;;  %18170 = vst [vmem:[#allocation32_spill] sm:$0xff] %v14818_v16  ;;  %v4390_v8 = vshrl.u32 %v11525_v58, 16  ;;  %v13135_v9 = vld [vmem:[%s13317_s10 + $0xcc] sm:$0xff]  }
 0x133   : > { %v4359_v4 = vrot.slane %v4358_v38, 4  ;;  %12681 = vmatmul.mubr.msk.bf16.gmra.mxu1 %vm796_vm3, %v11549_v32  ;;  %v1831_v7 = vadd.f32 %v12472_v39, %v14466_v22  ;;  %v4381_v61 = vrot.slane %v4379_v55, 4  ;;  %12650 = vmatprep.mubr.msk.bf16.mxu0 %vm796_vm3, %v13134_v57  ;;  %v4387_v38 = vrot.slane %v4385_v31, 5  ;;  %v11528_v57 = vld [vmem:[%s13317_s10 + $0xcc] sm:$0xf] }
 0x134   : > { %v4372_v59 = vor.u32 %v4371_v15, %v4368_v23  ;;  %v1686_v13 = vpop.f32.mrf.mxu0  ;;  %v4393_v60 = vshll.u32 %v11525_v58, 16  ;;  %v4399_v16 = vshll.u32 %v14812_v54, 16  ;;  %v12514_v42 = vpop.f32.mrf.mxu1  ;;  %v14830_v15 = vld [vmem:[%s13317_s10 + $0xc8] sm:$0x1]  ;;  %vm5650_vm13 = vsmask.f32 256 }
 0x135   : > { %v4364_v0 = vsel %vm13353_vm4, %v4359_v4, %v4363_v26  ;;  %v1829_v29 = vadd.f32 %v1686_v13, %v14478_v46  ;;  %v14827_v22 = vadd.f32 %v12510_v37, %v1831_v7  ;;  %v4382_v55 = vor.u32 %v4381_v61, %v4377_v45  ;;  %vm15827_vm6 = vmand %vm5489_vm10, %vm5650_vm13 }
 0x136   : > { %v11550_v32 = vcombine.low %v4354_v33, %v4364_v0  ;;  %v4373_v23 = vrot.slane %v4372_v59, 4  ;;  %v12473_v39 = vpop.f32.mrf.mxu0  ;;  %v4392_v26 = vrot.slane %v4390_v8, 4  ;;  %v4395_v4 = vrot.slane %v4393_v60, 5  ;;  %v2101_v58 = vpop.f32.mrf.mxu1  ;;  %v13136_v59 = vld [vmem:[%s13317_s10 + $0xd8] sm:$0xff]  }
 0x137   : > { %18171 = vst [vmem:[#allocation33_spill] sm:$0xff] %v14827_v22  ;;  %v4401_v31 = vrot.slane %v4399_v16, 5  ;;  %v1832_v37 = vadd.f32 %v12473_v39, %v14491_v6  ;;  %v14838_v33 = vadd.f32 %v2085_v12, %v1829_v29  ;;  %v4403_v7 = vshrl.u32 %v14812_v54, 16  ;;  %v14849_v6 = vld [vmem:[%s13317_s10 + $0xd0] sm:$0xf] }
 0x138   : > { %12684 = vmatprep.mubr.msk.bf16.mxu1 %vm796_vm3, %v11550_v32  ;;  %v4378_v46 = vsel %vm13353_vm4, %v4373_v23, %v4377_v45  ;;  %v4383_v61 = vrot.slane %v4382_v55, 4  ;;  %v1689_v0 = vpop.f32.mrf.mxu0  ;;  %v4396_v8 = vor.u32 %v4395_v4, %v4392_v26  ;;  %v4409_v16 = vshll.u32 %v14830_v15, 16  ;;  %v12515_v60 = vpop.f32.mrf.mxu1  ;;  %v14856_v26 = vld [vmem:[%s13317_s10 + $0xd4] sm:$0x1] }
 0x139   : > { %18172 = vst [vmem:[#allocation34_spill] sm:$0xff] %v14838_v33  ;;  %v4414_v13 = vshrl.u32 %v11528_v57, 16  ;;  %v14844_v32 = vadd.f32 %v1689_v0, %v14496_v43  ;;  %v14846_v22 = vadd.f32 %v12511_v34, %v1832_v37  ;;  %v4405_v45 = vrot.slane %v4403_v7, 4 }
 0x13a   : > { %v4417_v12 = vshll.u32 %v11528_v57, 16  ;;  %v4388_v23 = vsel %vm13353_vm4, %v4383_v61, %v4387_v38  ;;  %v12476_v55 = vpop.f32.mrf.mxu0  ;;  %12651 = vmatmul.mubr.msk.bf16.gmra.mxu0 %vm796_vm3, %v13135_v9  ;;  %v4397_v39 = vrot.slane %v4396_v8, 4  ;;  %v14858_v4 = vpop.f32.mrf.mxu1  ;;  %v4411_v0 = vrot.slane %v4409_v16, 5  ;;  %v11531_v57 = vld [vmem:[%s13317_s10 + $0xd8] sm:$0xf] }
 0x13b   : > { %18173 = vst [vmem:[#allocation35_spill] sm:$0xff] %v14844_v32  ;;  %18174 = vst [vmem:[#allocation36_spill] sm:$0xff] %v14846_v22  ;;  %v4416_v43 = vrot.slane %v4414_v13, 4  ;;  %v11551_v34 = vcombine.low %v4378_v46, %v4388_v23  ;;  %v1835_v37 = vadd.f32 %v12476_v55, %v14508_v48  ;;  %v4406_v7 = vor.u32 %v4405_v45, %v4401_v31 }
 0x13c   : > { %18175 = vst [vmem:[#allocation37_spill] sm:$0xff] %v14858_v4  ;;  %12654 = vmatprep.mubr.msk.bf16.mxu0 %vm796_vm3, %v13136_v59  ;;  %v4402_v38 = vsel %vm13353_vm4, %v4397_v39, %v4401_v31  ;;  %v1702_v9 = vpop.f32.mrf.mxu0  ;;  %v4419_v61 = vrot.slane %v4417_v12, 5  ;;  %v4423_v8 = vshll.u32 %v14849_v6, 16  ;;  %v4427_v13 = vshrl.u32 %v14849_v6, 16  ;;  %v12518_v29 = vpop.f32.mrf.mxu1  ;;  %v13137_v12 = vld [vmem:[%s13317_s10 + $0xe4] sm:$0xff]  }
 0x13d   : > { %12685 = vmatmul.mubr.msk.bf16.gmra.mxu1 %vm796_vm3, %v11551_v34  ;;  %v4407_v48 = vrot.slane %v4406_v7, 4  ;;  %v1833_v46 = vadd.f32 %v1702_v9, %v14515_v30  ;;  %v14869_v59 = vadd.f32 %v12514_v42, %v1835_v37  ;;  %v4433_v16 = vshll.u32 %v14856_v26, 16  ;;  %v14874_v39 = vld [vmem:[%s13317_s10 + $0xdc] sm:$0xf]  ;;  %v14882_v37 = vld [vmem:[%s13317_s10 + $0xe0] sm:$0x1] }
 0x13e   : > { %v4420_v45 = vor.u32 %v4419_v61, %v4416_v43  ;;  %v4425_v31 = vrot.slane %v4423_v8, 5  ;;  %v4429_v23 = vrot.slane %v4427_v13, 4  ;;  %v12477_v55 = vpop.f32.mrf.mxu0  ;;  %v4438_v4 = vshrl.u32 %v11531_v57, 16  ;;  %v2117_v32 = vpop.f32.mrf.mxu1 }
 0x13f   : > { %18176 = vst [vmem:[#allocation38_spill] sm:$0xff] %v14869_v59  ;;  %v4412_v34 = vsel %vm13353_vm4, %v4407_v48, %v4411_v0  ;;  %v4435_v7 = vrot.slane %v4433_v16, 5  ;;  %v1836_v30 = vadd.f32 %v12477_v55, %v14533_v44  ;;  %v14879_v42 = vadd.f32 %v2101_v58, %v1833_v46  ;;  %v11534_v44 = vld [vmem:[%s13317_s10 + $0xe4] sm:$0xf]  ;;  %v14902_v55 = vld [vmem:[%s13317_s10 + $0xe8] sm:$0xf] }
 0x140   : > { %v11552_v43 = vcombine.low %v4402_v38, %v4412_v34  ;;  %v4421_v9 = vrot.slane %v4420_v45, 4  ;;  %v4430_v61 = vor.u32 %v4429_v23, %v4425_v31  ;;  %v1705_v8 = vpop.f32.mrf.mxu0  ;;  %v4440_v13 = vrot.slane %v4438_v4, 4  ;;  %v12519_v59 = vpop.f32.mrf.mxu1 }
 0x141   : > { %v14885_v22 = vadd.f32 %v1705_v8, %v14540_v41  ;;  %v14887_v33 = vadd.f32 %v12515_v60, %v1836_v30  ;;  %v4441_v0 = vshll.u32 %v11531_v57, 16  ;;  %v4447_v48 = vshll.u32 %v14874_v39, 16 }
 0x142   : > { %12688 = vmatprep.mubr.msk.bf16.mxu1 %vm796_vm3, %v11552_v43  ;;  %v4426_v58 = vsel %vm13353_vm4, %v4421_v9, %v4425_v31  ;;  %v4431_v38 = vrot.slane %v4430_v61, 4  ;;  %v12480_v46 = vpop.f32.mrf.mxu0  ;;  %12655 = vmatmul.mubr.msk.bf16.gmra.mxu0 %vm796_vm3, %v13137_v12  ;;  %v4451_v41 = vshrl.u32 %v14874_v39, 16  ;;  %v4457_v60 = vshll.u32 %v14882_v37, 16  ;;  %v14897_v4 = vpop.f32.mrf.mxu1  ;;  %v14907_v43 = vld [vmem:[%s13317_s10 + $0xec] sm:$0x1] }
 0x143   : > { %18177 = vst [vmem:[#allocation39_spill] sm:$0xff] %v14885_v22  ;;  %18178 = vst [vmem:[#allocation40_spill] sm:$0xff] %v14887_v33  ;;  %v1839_v16 = vadd.f32 %v12480_v46, %v14550_v5  ;;  %v4443_v45 = vrot.slane %v4441_v0, 5  ;;  %v4449_v23 = vrot.slane %v4447_v48, 5  ;;  %v4462_v9 = vshrl.u32 %v11534_v44, 16 }
 0x144   : > { %18179 = vst [vmem:[#allocation41_spill] sm:$0xff] %v14897_v4  ;;  %v4436_v31 = vsel %vm13353_vm4, %v4431_v38, %v4435_v7  ;;  %v4453_v34 = vrot.slane %v4451_v41, 4  ;;  %v4459_v30 = vrot.slane %v4457_v60, 5  ;;  %v1718_v12 = vpop.f32.mrf.mxu0  ;;  %v12522_v61 = vpop.f32.mrf.mxu1  ;;  %v4465_v46 = vshll.u32 %v11534_v44, 16  ;;  %v13179_v33 = vld [vmem:[%s13317_s10 + $0x1c] sm:$0xf] }
 0x145   : > { %v11553_v8 = vcombine.low %v4426_v58, %v4436_v31  ;;  %v4444_v4 = vor.u32 %v4443_v45, %v4440_v13  ;;  %v1837_v57 = vadd.f32 %v1718_v12, %v14555_v2  ;;  %v14910_v5 = vadd.f32 %v12518_v29, %v1839_v16  ;;  %v11574_v2 = vld [vmem:[%s13317_s10 + $0x18] sm:$0xe] }
 0x146   : > { %v4454_v0 = vor.u32 %v4453_v34, %v4449_v23  ;;  %v4464_v48 = vrot.slane %v4462_v9, 4  ;;  %v4471_v22 = vshll.u32 %v14902_v55, 16  ;;  %v12481_v7 = vpop.f32.mrf.mxu0  ;;  %v2133_v38 = vpop.f32.mrf.mxu1  ;;  %v4475_v60 = vshrl.u32 %v14902_v55, 16 }
 0x147   : > { %18180 = vst [vmem:[#allocation42_spill] sm:$0xff] %v14910_v5  ;;  %12689 = vmatmul.mubr.msk.bf16.gmra.mxu1 %vm796_vm3, %v11553_v8  ;;  %v4445_v41 = vrot.slane %v4444_v4, 4  ;;  %v4481_v58 = vshll.u32 %v14907_v43, 16  ;;  %v1840_v13 = vadd.f32 %v12481_v7, %v14560_v21  ;;  %v4467_v16 = vrot.slane %v4465_v46, 5  ;;  %v11575_v5 = vld [vmem:[%s13317_s10 + $0x24] sm:$0xe] }
 0x148   : > { %v4455_v29 = vrot.slane %v4454_v0, 4  ;;  %v4473_v45 = vrot.slane %v4471_v22, 5  ;;  %v14918_v31 = vadd.f32 %v2117_v32, %v1837_v57  ;;  %v1721_v44 = vpop.f32.mrf.mxu0  ;;  %v12523_v34 = vpop.f32.mrf.mxu1  ;;  %v4477_v4 = vrot.slane %v4475_v60, 4 }
 0x149   : > { %v4450_v12 = vsel %vm13353_vm4, %v4445_v41, %v4449_v23  ;;  %v4483_v9 = vrot.slane %v4481_v58, 5  ;;  %v14923_v8 = vadd.f32 %v1721_v44, %v14569_v40  ;;  %v4468_v0 = vor.u32 %v4467_v16, %v4464_v48  ;;  %v13180_v41 = vld [vmem:[%s13317_s10 + $0x20] sm:$0x1] }
 0x14a   : > { %18181 = vst [vmem:[#allocation43_spill] sm:$0xff] %v14918_v31  ;;  %v4460_v21 = vsel %vm13353_vm4, %v4455_v29, %v4459_v30  ;;  %v14928_v22 = vadd.f32 %v12519_v59, %v1840_v13  ;;  %v11592_v32 = vrot.slane %v11574_v2, 9  ;;  %v12484_v57 = vpop.f32.mrf.mxu0  ;;  %v14930_v46 = vpop.f32.mrf.mxu1  ;;  %v4478_v31 = vor.u32 %v4477_v4, %v4473_v45  ;;  %v11576_v4 = vld [vmem:[%s13317_s10 + $0x30] sm:$0xe] }
 0x14b   : > { %18182 = vst [vmem:[#allocation44_spill] sm:$0xff] %v14923_v8  ;;  %v11554_v7 = vcombine.low %v4450_v12, %v4460_v21  ;;  %v4885_v23 = vrot.slane %v13179_v33, 5  ;;  %v4888_v60 = vrot.slane %v13180_v41, 5  ;;  %v4469_v40 = vrot.slane %v4468_v0, 4 }
 0x14c   : > { %v1843_v58 = vadd.f32 %v12484_v57, %v14582_v1  ;;  %v11593_v44 = vrot.slane %v11575_v5, 9  ;;  %v1734_v8 = vpop.f32.mrf.mxu0  ;;  %v12526_v30 = vpop.f32.mrf.mxu1  ;;  %v4479_v59 = vrot.slane %v4478_v31, 4  ;;  %v18183_v2 = vrot.slane %v14545_v25, 5 }
 0x14d   : > { %12692 = vmatprep.mubr.msk.bf16.mxu1 %vm796_vm3, %v11554_v7  ;;  %v4886_v48 = vsel %vm13648_vm7, %v11592_v32, %v4885_v23  ;;  %v4887_v13 = vrot.slane %v4885_v23, 4  ;;  %v4474_v29 = vsel %vm13353_vm4, %v4469_v40, %v4473_v45  ;;  %v1841_v5 = vadd.f32 %v1734_v8, %v14589_v11 }
 0x14e   : > { %v4894_v33 = vrot.slane %v18183_v2, 4  ;;  %v18184_v16 = vmov %v18183_v2  ;;  %v14947_v12 = vadd.f32 %v12522_v61, %v1843_v58  ;;  %v12485_v31 = vpop.f32.mrf.mxu0  ;;  %v2149_v21 = vpop.f32.mrf.mxu1  ;;  %v4484_v0 = vsel %vm13353_vm4, %v4479_v59, %v4483_v9  ;;  %v11577_v61 = vld [vmem:[%s13317_s10 + $0x3c] sm:$0xe]  ;;  %v13181_v58 = vld [vmem:[%s13317_s10 + $0x34] sm:$0xf] }
 0x14f   : > { %v4893_v1 = vsel %vm13648_vm7, %v11593_v44, %v18184_v16  ;;  %v4889_v45 = vsel %vm13648_vm7, %v4887_v13, %v4888_v60  ;;  %v18185_v25 = vrot.slane %v14548_v51, 5  ;;  %v1844_v11 = vadd.f32 %v12485_v31, %v14597_v53  ;;  %v11578_v59 = vld [vmem:[%s13317_s10 + $0x48] sm:$0xe]  ;;  %v13182_v53 = vld [vmem:[%s13317_s10 + $0x38] sm:$0x1] }
 0x150   : > { %v11555_v8 = vcombine.low %v4474_v29, %v4484_v0  ;;  %v11611_v57 = vcombine.low %v4886_v48, %v4889_v45  ;;  %v14960_v23 = vadd.f32 %v2133_v38, %v1841_v5  ;;  %v1737_v9 = vpop.f32.mrf.mxu0  ;;  %v12527_v41 = vpop.f32.mrf.mxu1  ;;  %v11594_v51 = vrot.slane %v11576_v4, 9  ;;  %v13183_v2 = vld [vmem:[%s13317_s10 + $0x40] sm:$0xf] }
 0x151   : > { %v4896_v32 = vsel %vm13648_vm7, %v4894_v33, %v18185_v25  ;;  %v14963_v40 = vadd.f32 %v1737_v9, %v14605_v28  ;;  %v14965_v60 = vadd.f32 %v12523_v34, %v1844_v11  ;;  %v4899_v44 = vrot.slane %v13181_v58, 5 }
 0x152   : > { %v11612_v7 = vcombine.low %v4893_v1, %v4896_v32  ;;  %12693 = vmatmul.mubr.msk.bf16.gmra.mxu1 %vm796_vm3, %v11555_v8  ;;  %12698 = vmatprep.mubr.msk.bf16.mxu0 %vm796_vm3, %v11611_v57  ;;  %v4902_v48 = vrot.slane %v13182_v53, 5  ;;  %v12488_v38 = vpop.f32.mrf.mxu0  ;;  %v11595_v13 = vrot.slane %v11577_v61, 9  ;;  %v4906_v33 = vrot.slane %v13183_v2, 5  ;;  %v14974_v29 = vpop.f32.mrf.mxu1 }
 0x153   : > { %v4909_v28 = vrot.slane %v14586_v47, 5  ;;  %v4900_v34 = vsel %vm13648_vm7, %v11594_v51, %v4899_v44  ;;  %v4901_v16 = vrot.slane %v4899_v44, 4  ;;  %v1847_v1 = vadd.f32 %v12488_v38, %v14618_v56  ;;  %v11579_v47 = vld [vmem:[%s13317_s10 + $0x54] sm:$0xe]  ;;  %v11580_v56 = vld [vmem:[%s13317_s10 + $0x60] sm:$0xe] }
 0x154   : > { %12699 = vmatmul.mubr.msk.bf16.vlgmr.msra.gmra.mxu0 %vm796_vm3, %v11612_v7  ;;  %v4907_v5 = vsel %vm13648_vm7, %v11595_v13, %v4906_v33  ;;  %v4908_v31 = vrot.slane %v4906_v33, 4  ;;  %v1750_v4 = vpop.f32.mrf.mxu0  ;;  %v11596_v0 = vrot.slane %v11578_v59, 9  ;;  %v4913_v45 = vrot.slane %v14595_v52, 5  ;;  %v12530_v25 = vpop.f32.mrf.mxu1 }
 0x155   : > { %v4903_v32 = vsel %vm13648_vm7, %v4901_v16, %v4902_v48  ;;  %v1845_v11 = vadd.f32 %v1750_v4, %v14623_v10  ;;  %v14987_v61 = vadd.f32 %v12526_v30, %v1847_v1  ;;  %v4916_v8 = vrot.slane %v14603_v18, 5 }
 0x156   : > { %v11613_v57 = vcombine.low %v4900_v34, %v4903_v32  ;;  %v4910_v7 = vsel %vm13648_vm7, %v4908_v31, %v4909_v28  ;;  %v12489_v9 = vpop.f32.mrf.mxu0  ;;  %v4914_v52 = vsel %vm13648_vm7, %v11596_v0, %v4913_v45  ;;  %v4915_v51 = vrot.slane %v4913_v45, 4  ;;  %v2165_v58 = vpop.f32.mrf.mxu1  ;;  %v11581_v34 = vld [vmem:[%s13317_s10 + $0x6c] sm:$0xe] }
 0x157   : > { %v11614_v44 = vcombine.low %v4907_v5, %v4910_v7  ;;  %v1848_v59 = vadd.f32 %v12489_v9, %v14633_v50  ;;  %v14996_v10 = vadd.f32 %v2149_v21, %v1845_v11  ;;  %v11597_v30 = vrot.slane %v11579_v47, 9  ;;  %v18186_v47 = vld [vmem:[#allocation6_spill] sm:$0xff] }
 0x158   : > { %12702 = vmatprep.mubr.msk.bf16.mxu0 %vm796_vm3, %v11613_v57  ;;  %v1753_v18 = vpop.f32.mrf.mxu0  ;;  %v4917_v53 = vsel %vm13648_vm7, %v4915_v51, %v4916_v8  ;;  %v4920_v48 = vrot.slane %v14616_v14, 5  ;;  %v4923_v38 = vrot.slane %v14628_v62, 5  ;;  %v12531_v13 = vpop.f32.mrf.mxu1  ;;  %v11598_v2 = vrot.slane %v11580_v56, 9  ;;  %v11582_v14 = vld [vmem:[%s13317_s10 + $0x78] sm:$0xe]  ;;  %v18187_v8 = vld [vmem:[#allocation7_spill] sm:$0xff] }
 0x159   : > { %v15004_v33 = vadd.f32 %v1753_v18, %v14644_v3  ;;  %v15006_v50 = vadd.f32 %v12527_v41, %v1848_v59  ;;  %v11615_v21 = vcombine.low %v4914_v52, %v4917_v53  ;;  %v4927_v28 = vrot.slane %v14638_v24, 5  ;;  %v18188_v18 = vld [vmem:[#allocation8_spill] sm:$0xff] }
 0x15a   : > { %v12492_v16 = vpop.f32.mrf.mxu0  ;;  %v4922_v1 = vrot.slane %v4920_v48, 4  ;;  %v4930_v5 = vrot.slane %v14647_v17, 5  ;;  %v15011_v31 = vpop.f32.mrf.mxu1  ;;  %v4921_v3 = vsel %vm13648_vm7, %v11597_v30, %v4920_v48  ;;  %v11599_v0 = vrot.slane %v11581_v34, 9 }
 0x15b   : > { %v1851_v62 = vadd.f32 %v12492_v16, %v14660_v63  ;;  %v4928_v41 = vsel %vm13648_vm7, %v11598_v2, %v4927_v28  ;;  %v4929_v24 = vrot.slane %v4927_v28, 4  ;;  %v4934_v45 = vrot.slane %v14658_v35, 5  ;;  %v11583_v63 = vld [vmem:[%s13317_s10 + $0x84] sm:$0xe] }
 0x15c   : > { %12703 = vmatmul.mubr.msk.bf16.gmra.mxu0 %vm796_vm3, %v11614_v44  ;;  %v4924_v4 = vsel %vm13648_vm7, %v4922_v1, %v4923_v38  ;;  %v1766_v17 = vpop.f32.mrf.mxu0  ;;  %v4937_v32 = vrot.slane %v18186_v47, 5  ;;  %v12534_v11 = vpop.f32.mrf.mxu1  ;;  %v11600_v9 = vrot.slane %v11582_v14, 9  ;;  %v4941_v35 = vrot.slane %v14678_v49, 5  ;;  %v18189_v38 = vld [vmem:[#allocation10_spill] sm:$0xff]  ;;  %v18190_v14 = vld [vmem:[#allocation12_spill] sm:$0xff] }
 0x15d   : > { %12706 = vmatprep.mubr.msk.bf16.mxu0 %vm796_vm3, %v11615_v21  ;;  %v1849_v56 = vadd.f32 %v1766_v17, %v18187_v8  ;;  %v15027_v57 = vadd.f32 %v12530_v25, %v1851_v62  ;;  %v4931_v7 = vsel %vm13648_vm7, %v4929_v24, %v4930_v5  ;;  %v11616_v52 = vcombine.low %v4921_v3, %v4924_v4  ;;  %v11584_v21 = vld [vmem:[%s13317_s10 + $0x90] sm:$0xe]  ;;  %v18191_v62 = vld [vmem:[#allocation9_spill] sm:$0xff]  ;;  %v18192_v24 = vld [vmem:[#allocation14_spill] sm:$0xff] }
 0x15e   : > { %v12493_v51 = vpop.f32.mrf.mxu0  ;;  %v11617_v44 = vcombine.low %v4928_v41, %v4931_v7  ;;  %v4936_v59 = vrot.slane %v4934_v45, 4  ;;  %v2181_v30 = vpop.f32.mrf.mxu1  ;;  %v4944_v2 = vrot.slane %v18189_v38, 5  ;;  %v11601_v25 = vrot.slane %v11583_v63, 9  ;;  %v11585_v17 = vld [vmem:[%s13317_s10 + $0x9c] sm:$0xe]  ;;  %v18193_v8 = vld [vmem:[#allocation11_spill] sm:$0xff] }
 0x15f   : > { %v1852_v53 = vadd.f32 %v12493_v51, %v18188_v18  ;;  %v15033_v48 = vadd.f32 %v2165_v58, %v1849_v56  ;;  %v4935_v34 = vsel %vm13648_vm7, %v11599_v0, %v4934_v45  ;;  %v4943_v5 = vrot.slane %v4941_v35, 4 }
 0x160   : > { %v1769_v28 = vpop.f32.mrf.mxu0  ;;  %v4938_v16 = vsel %vm13648_vm7, %v4936_v59, %v4937_v32  ;;  %v12535_v1 = vpop.f32.mrf.mxu1  ;;  %v4948_v49 = vrot.slane %v18190_v14, 5  ;;  %v4942_v41 = vsel %vm13648_vm7, %v11600_v9, %v4941_v35  ;;  %v4951_v4 = vrot.slane %v18192_v24, 5  ;;  %v18194_v9 = vld [vmem:[#allocation16_spill] sm:$0xff]  ;;  %v18197_v24 = vld [vmem:[#allocation15_spill] sm:$0xff] }
 0x161   : > { %v15043_v3 = vadd.f32 %v1769_v28, %v18191_v62  ;;  %v15045_v58 = vadd.f32 %v12531_v13, %v1852_v53  ;;  %v4945_v0 = vsel %vm13648_vm7, %v4943_v5, %v4944_v2  ;;  %v11602_v63 = vrot.slane %v11584_v21, 9  ;;  %v18195_v53 = vld [vmem:[#allocation18_spill] sm:$0xff]  ;;  %v18196_v28 = vld [vmem:[#allocation13_spill] sm:$0xff] }
 0x162   : > { %v12496_v47 = vpop.f32.mrf.mxu0  ;;  %v15053_v45 = vpop.f32.mrf.mxu1  ;;  %v4950_v32 = vrot.slane %v4948_v49, 4  ;;  %v11618_v56 = vcombine.low %v4935_v34, %v4938_v16  ;;  %v15059_v7 = vsel %vm13648_vm7, %v11601_v25, %v4948_v49  ;;  %v4955_v51 = vrot.slane %v18194_v9, 5  ;;  %v11586_v21 = vld [vmem:[%s13317_s10 + $0xa8] sm:$0xe]  ;;  %v11587_v16 = vld [vmem:[%s13317_s10 + $0xb4] sm:$0xe] }
 0x163   : > { %v1855_v13 = vadd.f32 %v12496_v47, %v18193_v8  ;;  %v11619_v35 = vcombine.low %v4942_v41, %v4945_v0  ;;  %v4958_v38 = vrot.slane %v18195_v53, 5  ;;  %v11603_v2 = vrot.slane %v11585_v17, 9  ;;  %v18198_v0 = vld [vmem:[#allocation22_spill] sm:$0xff]  ;;  %v11588_v53 = vld [vmem:[%s13317_s10 + $0xc0] sm:$0xe] }
 0x164   : > { %12707 = vmatmul.mubr.msk.bf16.gmra.mxu0 %vm796_vm3, %v11616_v52  ;;  %v1782_v59 = vpop.f32.mrf.mxu0  ;;  %v12538_v18 = vpop.f32.mrf.mxu1  ;;  %v4962_v52 = vrot.slane %v14745_v27, 5  ;;  %v15071_v25 = vsel %vm13648_vm7, %v4950_v32, %v4951_v4  ;;  %v4957_v62 = vrot.slane %v4955_v51, 4  ;;  %v11604_v47 = vrot.slane %v11586_v21, 9 }
 0x165   : > { %12710 = vmatprep.mubr.msk.bf16.mxu0 %vm796_vm3, %v11617_v44  ;;  %v1853_v5 = vadd.f32 %v1782_v59, %v18196_v28  ;;  %v15067_v34 = vadd.f32 %v12534_v11, %v1855_v13  ;;  %v15075_v44 = vsel %vm13648_vm7, %v11602_v63, %v4955_v51  ;;  %v4965_v11 = vrot.slane %v14754_v20, 5  ;;  %v18199_v51 = vld [vmem:[#allocation25_spill] sm:$0xff] }
 0x166   : > { %v12497_v14 = vpop.f32.mrf.mxu0  ;;  %v2197_v49 = vpop.f32.mrf.mxu1  ;;  %v15080_v27 = vsel %vm13648_vm7, %v11603_v2, %v4962_v52  ;;  %v4964_v41 = vrot.slane %v4962_v52, 4  ;;  %v4969_v32 = vrot.slane %v18198_v0, 5  ;;  %v15089_v13 = vsel %vm13648_vm7, %v4957_v62, %v4958_v38  ;;  %v18200_v2 = vld [vmem:[#allocation17_spill] sm:$0xff]  ;;  %v18201_v62 = vld [vmem:[#allocation28_spill] sm:$0xff] }
 0x167   : > { %v1856_v17 = vadd.f32 %v12497_v14, %v18197_v24  ;;  %v15084_v4 = vadd.f32 %v2181_v30, %v1853_v5  ;;  %v4972_v59 = vrot.slane %v18199_v51, 5  ;;  %v11605_v20 = vrot.slane %v11587_v16, 9 }
 0x168   : > { %v1785_v63 = vpop.f32.mrf.mxu0  ;;  %v12539_v8 = vpop.f32.mrf.mxu1  ;;  %v15093_v9 = vsel %vm13648_vm7, %v4964_v41, %v4965_v11  ;;  %v11620_v21 = vcombine.low %v15059_v7, %v15071_v25  ;;  %v15110_v14 = vsel %vm13648_vm7, %v11604_v47, %v4969_v32  ;;  %v4971_v16 = vrot.slane %v4969_v32, 4  ;;  %v18202_v11 = vld [vmem:[#allocation30_spill] sm:$0xff] }
 0x169   : > { %v15098_v30 = vadd.f32 %v1785_v63, %v18200_v2  ;;  %v15100_v52 = vadd.f32 %v12535_v1, %v1856_v17  ;;  %v4976_v41 = vrot.slane %v18201_v62, 5  ;;  %v4979_v24 = vrot.slane %v18202_v11, 5  ;;  %v18203_v1 = vld [vmem:[#allocation19_spill] sm:$0xff]  ;;  %v11589_v63 = vld [vmem:[%s13317_s10 + $0xcc] sm:$0xe] }
 0x16a   : > { %v12500_v28 = vpop.f32.mrf.mxu0  ;;  %v15106_v5 = vpop.f32.mrf.mxu1  ;;  %v11621_v7 = vcombine.low %v15075_v44, %v15089_v13  ;;  %v11606_v25 = vrot.slane %v11588_v53, 9  ;;  %v4983_v0 = vrot.slane %v14812_v54, 5  ;;  %v15123_v51 = vsel %vm13648_vm7, %v4971_v16, %v4972_v59  ;;  %v18204_v44 = vld [vmem:[#allocation20_spill] sm:$0xff] }
 0x16b   : > { %v1859_v17 = vadd.f32 %v12500_v28, %v18203_v1  ;;  %v4978_v2 = vrot.slane %v4976_v41, 4  ;;  %v4986_v28 = vrot.slane %v14830_v15, 5  ;;  %v11590_v59 = vld [vmem:[%s13317_s10 + $0xd8] sm:$0xe]  ;;  %v4990_v11 = vrot.slane %v14849_v6, 5 }
 0x16c   : > { %12711 = vmatmul.mubr.msk.bf16.gmra.mxu0 %vm796_vm3, %v11618_v56  ;;  %v1798_v47 = vpop.f32.mrf.mxu0  ;;  %v12542_v32 = vpop.f32.mrf.mxu1  ;;  %v15127_v56 = vsel %vm13648_vm7, %v11605_v20, %v4976_v41  ;;  %v15137_v53 = vsel %vm13648_vm7, %v11606_v25, %v4983_v0  ;;  %v4985_v15 = vrot.slane %v4983_v0, 4  ;;  %v11607_v41 = vrot.slane %v11589_v63, 9 }
 0x16d   : > { %12714 = vmatprep.mubr.msk.bf16.mxu0 %vm796_vm3, %v11619_v35  ;;  %v1857_v13 = vadd.f32 %v1798_v47, %v18204_v44  ;;  %v15131_v54 = vadd.f32 %v12538_v18, %v1859_v17  ;;  %v15142_v20 = vsel %vm13648_vm7, %v4978_v2, %v4979_v24  ;;  %v18205_v18 = vld [vmem:[#allocation21_spill] sm:$0xff]  ;;  %v4993_v25 = vrot.slane %v14856_v26, 5 }
 0x16e   : > { %v12501_v16 = vpop.f32.mrf.mxu0  ;;  %v2213_v62 = vpop.f32.mrf.mxu1  ;;  %v11591_v44 = vld [vmem:[%s13317_s10 + $0xe4] sm:$0xe]  ;;  %v15154_v24 = vsel %vm13648_vm7, %v4985_v15, %v4986_v28  ;;  %v15158_v0 = vsel %vm13648_vm7, %v11607_v41, %v4990_v11  ;;  %v4992_v6 = vrot.slane %v4990_v11, 4  ;;  %v11608_v63 = vrot.slane %v11590_v59, 9 }
 0x16f   : > { %v1860_v1 = vadd.f32 %v12501_v16, %v18205_v18  ;;  %v15146_v17 = vadd.f32 %v2197_v49, %v1857_v13  ;;  %v18206_v49 = vld [vmem:[#allocation23_spill] sm:$0xff]  ;;  %v11625_v26 = vcombine.low %v15137_v53, %v15154_v24  ;;  %v4997_v16 = vrot.slane %v14874_v39, 5 }
 0x170   : > { %v1801_v35 = vpop.f32.mrf.mxu0  ;;  %v12543_v38 = vpop.f32.mrf.mxu1  ;;  %v15172_v28 = vsel %vm13648_vm7, %v4992_v6, %v4993_v25  ;;  %v5000_v15 = vrot.slane %v14882_v37, 5  ;;  %v11609_v59 = vrot.slane %v11591_v44, 9  ;;  %v11684_v44 = vld [vmem:[%s18109_s3 + $0x4] sm:$0xf]  ;;  %v18208_v24 = vld [vmem:[#allocation27_spill] sm:$0xff] }
 0x171   : > { %v15161_v2 = vadd.f32 %v1801_v35, %v18206_v49  ;;  %v15163_v13 = vadd.f32 %v12539_v8, %v1860_v1  ;;  %v5004_v35 = vrot.slane %v14902_v55, 5  ;;  %v18207_v8 = vld [vmem:[#allocation26_spill] sm:$0xff]  ;;  %v11626_v53 = vcombine.low %v15158_v0, %v15172_v28  ;;  %13049 = vmatprep.subr.msk.bf16.mxu1 %vm6687_vm8, %v11684_v44 }
 0x172   : > { %v12504_v18 = vpop.f32.mrf.mxu0  ;;  %v15168_v47 = vpop.f32.mrf.mxu1  ;;  %v15182_v39 = vsel %vm13648_vm7, %v11608_v63, %v4997_v16  ;;  %v4999_v25 = vrot.slane %v4997_v16, 4  ;;  %vm5651_vm14 = vsmask.f32 4368 }
 0x173   : > { %v1863_v41 = vadd.f32 %v12504_v18, %v18207_v8  ;;  %v15187_v37 = vsel %vm13648_vm7, %v11609_v59, %v5004_v35  ;;  %v5006_v55 = vrot.slane %v5004_v35, 4  ;;  %v18209_v18 = vld [vmem:[#allocation29_spill] sm:$0xff]  ;;  %vm15821_vm5 = vmor %vm5650_vm13, %vm5651_vm14 }
 0x174   : > { %12715 = vmatmul.mubr.msk.bf16.gmra.mxu0 %vm796_vm3, %v11620_v21  ;;  %v1814_v11 = vpop.f32.mrf.mxu0  ;;  %v12586_v1 = vpop.f32.mrf.mxu1  ;;  %v5007_v21 = vrot.slane %v14907_v43, 5  ;;  %v5001_v49 = vsel %vm13648_vm7, %v4999_v25, %v5000_v15  ;;  %v6689_v43 = vsel %vm6687_vm8, %v11684_v44, 0 }
 0x175   : > { %12718 = vmatprep.mubr.msk.bf16.mxu0 %vm796_vm3, %v11621_v7  ;;  %v1861_v0 = vadd.f32 %v1814_v11, %v18208_v24  ;;  %v15194_v6 = vadd.f32 %v12542_v32, %v1863_v41  ;;  %v11627_v32 = vcombine.low %v15182_v39, %v5001_v49  ;;  %12735 = vmatpush3.bf16.msra.mxu1 %v6689_v43  ;;  %v18213_v24 = vld [vmem:[#allocation34_spill] sm:$0xff] }
 0x176   : > { %v12505_v7 = vpop.f32.mrf.mxu0  ;;  %v3421_v63 = vpop.f32.mrf.mxu1  ;;  %v5008_v16 = vsel %vm13648_vm7, %v5006_v55, %v5007_v21  ;;  %v18210_v55 = vcombine.low %v15080_v27, %v15093_v9  ;;  %v18212_v39 = vcombine.low %v15110_v14, %v15123_v51 }
 0x177   : > { %v1864_v28 = vadd.f32 %v12505_v7, %v18209_v18  ;;  %v15203_v59 = vadd.f32 %v2213_v62, %v1861_v0  ;;  %v11628_v35 = vcombine.low %v15187_v37, %v5008_v16  ;;  %v18211_v62 = vld [vmem:[#allocation33_spill] sm:$0xff]  ;;  %v18214_v16 = vld [vmem:[#allocation36_spill] sm:$0xff] }
 0x178   : > { %v15207_v8 = vpop.f32.mrf.mxu0  ;;  %v12587_v41 = vpop.f32.mrf.mxu1 }
 0x179   : > { %v15209_v15 = vadd.f32 %v12543_v38, %v1864_v28 }
 0x17a   : > { %v12548_v11 = vpop.f32.mrf.mxu0  ;;  %v15211_v25 = vpop.f32.mrf.mxu1 }
 0x17b   : > { %v3042_v21 = vadd.f32 %v12548_v11, %v18211_v62  ;;  %v18216_v11 = vcombine.low %v15127_v56, %v15142_v20 }
 0x17c   : > { %12719 = vmatmul.mubr.msk.bf16.gmra.mxu0 %vm796_vm3, %v18210_v55  ;;  %v2897_v37 = vpop.f32.mrf.mxu0  ;;  %v12590_v44 = vpop.f32.mrf.mxu1 }
 0x17d   : > { %12722 = vmatprep.mubr.msk.bf16.mxu0 %vm796_vm3, %v18212_v39  ;;  %v3040_v38 = vadd.f32 %v2897_v37, %v18213_v24  ;;  %v15223_v0 = vadd.f32 %v12586_v1, %v3042_v21  ;;  %v18217_v1 = vld [vmem:[#allocation38_spill] sm:$0xff]  ;;  %v18218_v24 = vld [vmem:[#allocation40_spill] sm:$0xff] }
 0x17e   : > { %v12549_v7 = vpop.f32.mrf.mxu0  ;;  %v3437_v49 = vpop.f32.mrf.mxu1 }
 0x17f   : > { %v3043_v43 = vadd.f32 %v12549_v7, %v18214_v16  ;;  %v15226_v27 = vadd.f32 %v3421_v63, %v3040_v38 }
 0x180   : > { %v15228_v9 = vpop.f32.mrf.mxu0  ;;  %v12591_v18 = vpop.f32.mrf.mxu1 }
 0x181   : > { %v15230_v28 = vadd.f32 %v12587_v41, %v3043_v43 }
 0x182   : > { %v12552_v14 = vpop.f32.mrf.mxu0  ;;  %v15232_v51 = vpop.f32.mrf.mxu1 }
 0x183   : > { %18215 = vst [vmem:[#allocation6_spill] sm:$0xff] %v15232_v51  ;;  %v3046_v55 = vadd.f32 %v12552_v14, %v18217_v1  ;;  %v18221_v1 = vld [vmem:[#allocation43_spill] sm:$0xff] }
 0x184   : > { %12723 = vmatmul.mubr.msk.bf16.gmra.mxu0 %vm796_vm3, %v18216_v11  ;;  %v2913_v62 = vpop.f32.mrf.mxu0  ;;  %v12594_v63 = vpop.f32.mrf.mxu1 }
 0x185   : > { %12726 = vmatprep.mubr.msk.bf16.mxu0 %vm796_vm3, %v11625_v26  ;;  %v3044_v21 = vadd.f32 %v2913_v62, %v14879_v42  ;;  %v15241_v39 = vadd.f32 %v12590_v44, %v3046_v55  ;;  %v18220_v26 = vld [vmem:[#allocation42_spill] sm:$0xff] }
 0x186   : > { %v12553_v41 = vpop.f32.mrf.mxu0  ;;  %v3453_v37 = vpop.f32.mrf.mxu1 }
 0x187   : > { %v3047_v38 = vadd.f32 %v12553_v41, %v18218_v24  ;;  %v15244_v7 = vadd.f32 %v3437_v49, %v3044_v21 }
 0x188   : > { %v15246_v16 = vpop.f32.mrf.mxu0  ;;  %v12595_v56 = vpop.f32.mrf.mxu1 }
 0x189   : > { %v15248_v20 = vadd.f32 %v12591_v18, %v3047_v38 }
 0x18a   : > { %v12556_v43 = vpop.f32.mrf.mxu0  ;;  %v15250_v14 = vpop.f32.mrf.mxu1 }
 0x18b   : > { %18219 = vst [vmem:[#allocation7_spill] sm:$0xff] %v15250_v14  ;;  %v3050_v42 = vadd.f32 %v12556_v43, %v18220_v26 }
 0x18c   : > { %12727 = vmatmul.mubr.msk.bf16.gmra.mxu0 %vm796_vm3, %v11626_v53  ;;  %v2929_v44 = vpop.f32.mrf.mxu0  ;;  %v12598_v11 = vpop.f32.mrf.mxu1 }
 0x18d   : > { %12730 = vmatprep.mubr.msk.bf16.mxu0 %vm796_vm3, %v11627_v32  ;;  %v3048_v55 = vadd.f32 %v2929_v44, %v18221_v1  ;;  %v15256_v49 = vadd.f32 %v12594_v63, %v3050_v42 }
 0x18e   : > { %v12557_v62 = vpop.f32.mrf.mxu0  ;;  %v3469_v21 = vpop.f32.mrf.mxu1 }
 0x18f   : > { %v3051_v18 = vadd.f32 %v12557_v62, %v14928_v22  ;;  %v15259_v41 = vadd.f32 %v3453_v37, %v3048_v55 }
 0x190   : > { %v15261_v24 = vpop.f32.mrf.mxu0  ;;  %v12599_v38 = vpop.f32.mrf.mxu1 }
 0x191   : > { %v15263_v53 = vadd.f32 %v12595_v56, %v3051_v18 }
 0x192   : > { %v12560_v43 = vpop.f32.mrf.mxu0  ;;  %v15265_v26 = vpop.f32.mrf.mxu1 }
 0x193   : > { %18222 = vst [vmem:[#allocation8_spill] sm:$0xff] %v15265_v26  ;;  %v3054_v32 = vadd.f32 %v12560_v43, %v14947_v12 }
 0x194   : > { %12731 = vmatmul.mubr.msk.bf16.gmra.mxu0 %vm796_vm3, %v11628_v35  ;;  %v2945_v63 = vpop.f32.mrf.mxu0  ;;  %v12602_v42 = vpop.f32.mrf.mxu1 }
 0x195   : > { %v3052_v44 = vadd.f32 %v2945_v63, %v14960_v23  ;;  %v15270_v1 = vadd.f32 %v12598_v11, %v3054_v32  ;;  %v18126_v23 = vmov 0  }
 0x196   : > { %v12561_v22 = vpop.f32.mrf.mxu0  ;;  %v3485_v37 = vpop.f32.mrf.mxu1  ;;  %5491 = vst.msk [vmem:[#allocation2 + $0xc] sm:$0xf] %vm5486_vm9, %v18126_v23  ;;  %5487 = vst.msk [vmem:[#allocation2] sm:$0xf] %vm5486_vm9, %v18126_v23 }
 0x197   : > { %v3055_v55 = vadd.f32 %v12561_v22, %v14965_v60  ;;  %v15273_v62 = vadd.f32 %v3469_v21, %v3052_v44  ;;  %5488 = vst.msk [vmem:[#allocation2 + $0x4] sm:$0xf] %vm5486_vm9, %v18126_v23  ;;  %5492 = vst.msk [vmem:[#allocation2 + $0x10] sm:$0xf] %vm5486_vm9, %v18126_v23 }
 0x198   : > { %v15275_v56 = vpop.f32.mrf.mxu0  ;;  %v12603_v18 = vpop.f32.mrf.mxu1  ;;  %5494 = vst.msk [vmem:[#allocation2 + $0x18] sm:$0xf] %vm5486_vm9, %v18126_v23  ;;  %5495 = vst.msk [vmem:[#allocation2 + $0x1c] sm:$0xf] %vm5486_vm9, %v18126_v23 }
 0x199   : > { %v15277_v36 = vadd.f32 %v12599_v38, %v3055_v55  ;;  %5497 = vst.msk [vmem:[#allocation2 + $0x24] sm:$0xf] %vm5486_vm9, %v18126_v23  ;;  %5498 = vst.msk [vmem:[#allocation2 + $0x28] sm:$0xf] %vm5486_vm9, %v18126_v23 }
 0x19a   : > { %v12564_v35 = vpop.f32.mrf.mxu0  ;;  %v15279_v19 = vpop.f32.mrf.mxu1  ;;  %5500 = vst.msk [vmem:[#allocation2 + $0x30] sm:$0xf] %vm5486_vm9, %v18126_v23  ;;  %5501 = vst.msk [vmem:[#allocation2 + $0x34] sm:$0xf] %vm5486_vm9, %v18126_v23 }
 0x19b   : > { %18223 = vst [vmem:[#allocation10_spill] sm:$0xff] %v15279_v19  ;;  %v3058_v12 = vadd.f32 %v12564_v35, %v14987_v61  ;;  %5503 = vst.msk [vmem:[#allocation2 + $0x3c] sm:$0xf] %vm5486_vm9, %v18126_v23 }
 0x19c   : > { %5504 = vst.msk [vmem:[#allocation2 + $0x40] sm:$0xf] %vm5486_vm9, %v18126_v23  ;;  %5506 = vst.msk [vmem:[#allocation2 + $0x48] sm:$0xf] %vm5486_vm9, %v18126_v23  ;;  %v2961_v60 = vpop.f32.mrf.mxu0  ;;  %v12606_v61 = vpop.f32.mrf.mxu1 }
 0x19d   : > { %5507 = vst.msk [vmem:[#allocation2 + $0x4c] sm:$0xf] %vm5486_vm9, %v18126_v23  ;;  %5509 = vst.msk [vmem:[#allocation2 + $0x54] sm:$0xf] %vm5486_vm9, %v18126_v23  ;;  %v3056_v11 = vadd.f32 %v2961_v60, %v14996_v10  ;;  %v15355_v21 = vadd.f32 %v12602_v42, %v3058_v12  ;;  %v18225_v12 = vmov 0  }
 0x19e   : > { %5510 = vst.msk [vmem:[#allocation2 + $0x58] sm:$0xf] %vm5486_vm9, %v18126_v23  ;;  %5512 = vst.msk [vmem:[#allocation2 + $0x60] sm:$0xf] %vm5486_vm9, %v18126_v23  ;;  %v12565_v38 = vpop.f32.mrf.mxu0  ;;  %v3501_v43 = vpop.f32.mrf.mxu1 }
 0x19f   : > { %5513 = vst.msk [vmem:[#allocation2 + $0x64] sm:$0xf] %vm5486_vm9, %v18126_v23  ;;  %5515 = vst.msk [vmem:[#allocation2 + $0x6c] sm:$0xf] %vm5486_vm9, %v18126_v23  ;;  %v3059_v32 = vadd.f32 %v12565_v38, %v15006_v50  ;;  %v15358_v63 = vadd.f32 %v3485_v37, %v3056_v11 }
 0x1a0   : > { %5516 = vst.msk [vmem:[#allocation2 + $0x70] sm:$0xf] %vm5486_vm9, %v18126_v23  ;;  %5518 = vst.msk [vmem:[#allocation2 + $0x78] sm:$0xf] %vm5486_vm9, %v18126_v23  ;;  %v15360_v44 = vpop.f32.mrf.mxu0  ;;  %v12607_v22 = vpop.f32.mrf.mxu1 }
 0x1a1   : > { %5519 = vst.msk [vmem:[#allocation2 + $0x7c] sm:$0xf] %vm5486_vm9, %v18126_v23  ;;  %5521 = vst.msk [vmem:[#allocation2 + $0x84] sm:$0xf] %vm5486_vm9, %v18126_v23  ;;  %v15362_v55 = vadd.f32 %v12603_v18, %v3059_v32 }
 0x1a2   : > { %5522 = vst.msk [vmem:[#allocation2 + $0x88] sm:$0xf] %vm5486_vm9, %v18126_v23  ;;  %5524 = vst.msk [vmem:[#allocation2 + $0x90] sm:$0xf] %vm5486_vm9, %v18126_v23  ;;  %v12568_v35 = vpop.f32.mrf.mxu0  ;;  %v15364_v19 = vpop.f32.mrf.mxu1 }
 0x1a3   : > { %5525 = vst.msk [vmem:[#allocation2 + $0x94] sm:$0xf] %vm5486_vm9, %v18126_v23  ;;  %5527 = vst.msk [vmem:[#allocation2 + $0x9c] sm:$0xf] %vm5486_vm9, %v18126_v23 }
 0x1a4   : > { %5528 = vst.msk [vmem:[#allocation2 + $0xa0] sm:$0xf] %vm5486_vm9, %v18126_v23  ;;  %5530 = vst.msk [vmem:[#allocation2 + $0xa8] sm:$0xf] %vm5486_vm9, %v18126_v23  ;;  %v2977_v10 = vpop.f32.mrf.mxu0  ;;  %v12610_v42 = vpop.f32.mrf.mxu1 }
 0x1a5   : > { %5531 = vst.msk [vmem:[#allocation2 + $0xac] sm:$0xf] %vm5486_vm9, %v18126_v23  ;;  %5533 = vst.msk [vmem:[#allocation2 + $0xb4] sm:$0xf] %vm5486_vm9, %v18126_v23  ;;  %v3060_v50 = vadd.f32 %v2977_v10, %v15033_v48 }
 0x1a6   : > { %5534 = vst.msk [vmem:[#allocation2 + $0xb8] sm:$0xf] %vm5486_vm9, %v18126_v23  ;;  %5536 = vst.msk [vmem:[#allocation2 + $0xc0] sm:$0xf] %vm5486_vm9, %v18126_v23  ;;  %v12569_v37 = vpop.f32.mrf.mxu0  ;;  %v3517_v18 = vpop.f32.mrf.mxu1 }
 0x1a7   : > { %5537 = vst.msk [vmem:[#allocation2 + $0xc4] sm:$0xf] %vm5486_vm9, %v18126_v23  ;;  %5539 = vst.msk [vmem:[#allocation2 + $0xcc] sm:$0xf] %vm5486_vm9, %v18126_v23  ;;  %v3063_v60 = vadd.f32 %v12569_v37, %v15045_v58  ;;  %v15407_v11 = vadd.f32 %v3501_v43, %v3060_v50 }
 0x1a8   : > { %5540 = vst.msk [vmem:[#allocation2 + $0xd0] sm:$0xf] %vm5486_vm9, %v18126_v23  ;;  %18224 = vst [vmem:[#allocation12_spill] sm:$0xff] %v15364_v19  ;;  %v3062_v23 = vadd.f32 %v12568_v35, %v15027_v57  ;;  %v15409_v38 = vpop.f32.mrf.mxu0  ;;  %v12611_v32 = vpop.f32.mrf.mxu1 }
 0x1a9   : > { %5493 = vst.msk [vmem:[#allocation2 + $0x14] sm:$0x1] %vm5489_vm10, %v18225_v12  ;;  %5490 = vst.msk [vmem:[#allocation2 + $0x8] sm:$0x1] %vm5489_vm10, %v18225_v12  ;;  %v15411_v35 = vadd.f32 %v12607_v22, %v3063_v60 }
 0x1aa   : > { %5496 = vst.msk [vmem:[#allocation2 + $0x20] sm:$0x1] %vm5489_vm10, %v18225_v12  ;;  %5499 = vst.msk [vmem:[#allocation2 + $0x2c] sm:$0x1] %vm5489_vm10, %v18225_v12  ;;  %v15404_v57 = vadd.f32 %v12606_v61, %v3062_v23  ;;  %v12572_v19 = vpop.f32.mrf.mxu0  ;;  %v15413_v26 = vpop.f32.mrf.mxu1 }
 0x1ab   : > { %5502 = vst.msk [vmem:[#allocation2 + $0x38] sm:$0x1] %vm5489_vm10, %v18225_v12  ;;  %5505 = vst.msk [vmem:[#allocation2 + $0x44] sm:$0x1] %vm5489_vm10, %v18225_v12 }
 0x1ac   : > { %5508 = vst.msk [vmem:[#allocation2 + $0x50] sm:$0x1] %vm5489_vm10, %v18225_v12  ;;  %5511 = vst.msk [vmem:[#allocation2 + $0x5c] sm:$0x1] %vm5489_vm10, %v18225_v12  ;;  %v2993_v14 = vpop.f32.mrf.mxu0  ;;  %v12614_v48 = vpop.f32.mrf.mxu1 }
 0x1ad   : > { %5514 = vst.msk [vmem:[#allocation2 + $0x68] sm:$0x1] %vm5489_vm10, %v18225_v12  ;;  %5517 = vst.msk [vmem:[#allocation2 + $0x74] sm:$0x1] %vm5489_vm10, %v18225_v12  ;;  %v3064_v23 = vadd.f32 %v2993_v14, %v15084_v4 }
 0x1ae   : > { %5520 = vst.msk [vmem:[#allocation2 + $0x80] sm:$0x1] %vm5489_vm10, %v18225_v12  ;;  %5523 = vst.msk [vmem:[#allocation2 + $0x8c] sm:$0x1] %vm5489_vm10, %v18225_v12  ;;  %v12573_v10 = vpop.f32.mrf.mxu0  ;;  %v3533_v58 = vpop.f32.mrf.mxu1 }
 0x1af   : > { %5526 = vst.msk [vmem:[#allocation2 + $0x98] sm:$0x1] %vm5489_vm10, %v18225_v12  ;;  %5529 = vst.msk [vmem:[#allocation2 + $0xa4] sm:$0x1] %vm5489_vm10, %v18225_v12  ;;  %v3067_v43 = vadd.f32 %v12573_v10, %v15100_v52  ;;  %v15420_v50 = vadd.f32 %v3517_v18, %v3064_v23 }
 0x1b0   : > { %5532 = vst.msk [vmem:[#allocation2 + $0xb0] sm:$0x1] %vm5489_vm10, %v18225_v12  ;;  %5535 = vst.msk [vmem:[#allocation2 + $0xbc] sm:$0x1] %vm5489_vm10, %v18225_v12  ;;  %v15422_v37 = vpop.f32.mrf.mxu0  ;;  %v12615_v22 = vpop.f32.mrf.mxu1 }
 0x1b1   : > { %5538 = vst.msk [vmem:[#allocation2 + $0xc8] sm:$0x1] %vm5489_vm10, %v18225_v12  ;;  %5541 = vst.msk [vmem:[#allocation2 + $0xd4] sm:$0x1] %vm5489_vm10, %v18225_v12  ;;  %v3066_v12 = vadd.f32 %v12572_v19, %v15067_v34  ;;  %v15424_v60 = vadd.f32 %v12611_v32, %v3067_v43 }
 0x1b2   : > { %18226 = vst [vmem:[#allocation9_spill] sm:$0xff] %v15413_v26  ;;  %v12576_v26 = vpop.f32.mrf.mxu0  ;;  %v15426_v51 = vpop.f32.mrf.mxu1 }
 0x1b3   : > { %v15417_v61 = vadd.f32 %v12610_v42, %v3066_v12  ;;  %18227 = vst [vmem:[#allocation14_spill] sm:$0xff] %v15426_v51  ;;  %v3070_v19 = vadd.f32 %v12576_v26, %v15131_v54 }
 0x1b4   : > { %v3009_v34 = vpop.f32.mrf.mxu0 }
 0x1b5   : > { %v3068_v4 = vadd.f32 %v3009_v34, %v15146_v17  ;;  %v15430_v14 = vadd.f32 %v12614_v48, %v3070_v19 }
 0x1b6   : > { %v12618_v42 = vpop.f32.mrf.mxu1  ;;  %v12577_v12 = vpop.f32.mrf.mxu0 }
 0x1b7   : > { %v3071_v52 = vadd.f32 %v12577_v12, %v15163_v13  ;;  %v15433_v18 = vadd.f32 %v3533_v58, %v3068_v4 }
 0x1b8   : > { %v3549_v23 = vpop.f32.mrf.mxu1  ;;  %v15435_v10 = vpop.f32.mrf.mxu0 }
 0x1b9   : > { %v15437_v32 = vadd.f32 %v12615_v22, %v3071_v52 }
 0x1ba   : > { %v12619_v43 = vpop.f32.mrf.mxu1  ;;  %v12580_v51 = vpop.f32.mrf.mxu0 }
 0x1bb   : > { %v3074_v54 = vadd.f32 %v12580_v51, %v15194_v6 }
 0x1bc   : > { %v3025_v26 = vpop.f32.mrf.mxu0  ;;  %v15443_v19 = vpop.f32.mrf.mxu1 }
 0x1bd   : > { %v3072_v17 = vadd.f32 %v3025_v26, %v15203_v59  ;;  %v15441_v48 = vadd.f32 %v12618_v42, %v3074_v54 }
 0x1be   : > { %v12581_v34 = vpop.f32.mrf.mxu0 }
 0x1bf   : > { %v3075_v13 = vadd.f32 %v12581_v34, %v15209_v15  ;;  %v15446_v58 = vadd.f32 %v3549_v23, %v3072_v17  ;;  %v11765_v34 = vld [vmem:[%s18109_s3 + $0x8] sm:$0xf] }
 0x1c0   : > { %v15448_v4 = vpop.f32.mrf.mxu0  ;;  %13051 = vmatprep.subr.msk.bf16.mxu0 %vm6687_vm8, %v11765_v34 }
 0x1c1   : > { %v15450_v22 = vadd.f32 %v12619_v43, %v3075_v13  ;;  %v15452_v12 = vpop.f32.mrf.mxu1 }
 0x1c2   : > { %v12624_v52 = vpop.f32.mrf.mxu0 }
 0x1c3   : > { %v15455_v6 = vadd.f32 %v12624_v52, %v15223_v0  ;;  %v15457_v59 = vpop.f32.mrf.mxu1 }
 0x1c4   : > { %v3820_v51 = vpop.f32.mrf.mxu0 }
 0x1c5   : > { %v15460_v42 = vadd.f32 %v3820_v51, %v15226_v27  ;;  %v15462_v54 = vpop.f32.mrf.mxu1 }
 0x1c6   : > { %18228 = vst [vmem:[#allocation11_spill] sm:$0xff] %v15462_v54  ;;  %v12625_v15 = vpop.f32.mrf.mxu0 }
 0x1c7   : > { %v15465_v23 = vadd.f32 %v12625_v15, %v15230_v28  ;;  %v15469_v26 = vpop.f32.mrf.mxu1  ;;  %v7403_v28 = vsel %vm6687_vm8, %v11765_v34, 0 }
 0x1c8   : > { %v15467_v43 = vpop.f32.mrf.mxu0  ;;  %18229 = vst [vmem:[#allocation16_spill] sm:$0xff] %v15469_v26  ;;  %12803 = vmatpush3.bf16.msra.mxu0 %v7403_v28 }
 0x1ca   : > { %v12628_v17 = vpop.f32.mrf.mxu0 }
 0x1cb   : > { %v15472_v0 = vadd.f32 %v12628_v17, %v15241_v39 }
 0x1cc   : > { %v3836_v27 = vpop.f32.mrf.mxu0  ;;  %v15477_v13 = vpop.f32.mrf.mxu1 }
 0x1cd   : > { %18230 = vst [vmem:[#allocation18_spill] sm:$0xff] %v15472_v0  ;;  %18231 = vst [vmem:[#allocation13_spill] sm:$0xff] %v15477_v13  ;;  %v15482_v52 = vadd.f32 %v3836_v27, %v15244_v7 }
 0x1ce   : > { %v12629_v51 = vpop.f32.mrf.mxu0  ;;  %v15484_v15 = vpop.f32.mrf.mxu1 }
 0x1cf   : > { %v15487_v39 = vadd.f32 %v12629_v51, %v15248_v20 }
 0x1d0   : > { %v15489_v17 = vpop.f32.mrf.mxu0  ;;  %v15491_v0 = vpop.f32.mrf.mxu1 }
 0x1d1   : > { %18232 = vst [vmem:[#allocation15_spill] sm:$0xff] %v15487_v39  ;;  %18233 = vst [vmem:[#allocation22_spill] sm:$0xff] %v15491_v0 }
 0x1d2   : > { %v12632_v26 = vpop.f32.mrf.mxu0  ;;  %v15493_v13 = vpop.f32.mrf.mxu1 }
 0x1d3   : > { %18234 = vst [vmem:[#allocation25_spill] sm:$0xff] %v15493_v13  ;;  %v15496_v54 = vadd.f32 %v12632_v26, %v15256_v49 }
 0x1d4   : > { %v3852_v34 = vpop.f32.mrf.mxu0 }
 0x1d5   : > { %v15499_v7 = vadd.f32 %v3852_v34, %v15259_v41 }
 0x1d6   : > { %v15501_v27 = vpop.f32.mrf.mxu1  ;;  %v12633_v28 = vpop.f32.mrf.mxu0 }
 0x1d7   : > { %18235 = vst [vmem:[#allocation17_spill] sm:$0xff] %v15499_v7  ;;  %18236 = vst [vmem:[#allocation28_spill] sm:$0xff] %v15501_v27  ;;  %v15504_v20 = vadd.f32 %v12633_v28, %v15263_v53 }
 0x1d8   : > { %v15506_v51 = vpop.f32.mrf.mxu1  ;;  %v15508_v39 = vpop.f32.mrf.mxu0 }
 0x1d9   : > { %18237 = vst [vmem:[#allocation30_spill] sm:$0xff] %v15504_v20  ;;  %18238 = vst [vmem:[#allocation19_spill] sm:$0xff] %v15506_v51 }
 0x1da   : > { %v15510_v0 = vpop.f32.mrf.mxu1  ;;  %v12636_v13 = vpop.f32.mrf.mxu0 }
 0x1db   : > { %18239 = vst [vmem:[#allocation20_spill] sm:$0xff] %v15510_v0  ;;  %v15513_v49 = vadd.f32 %v12636_v13, %v15270_v1 }
 0x1dc   : > { %v15515_v26 = vpop.f32.mrf.mxu1  ;;  %v3868_v41 = vpop.f32.mrf.mxu0 }
 0x1dd   : > { %18240 = vst [vmem:[#allocation21_spill] sm:$0xff] %v15513_v49  ;;  %v15518_v34 = vadd.f32 %v3868_v41, %v15273_v62 }
 0x1de   : > { %v12637_v7 = vpop.f32.mrf.mxu0 }
 0x1df   : > { %18241 = vst [vmem:[#allocation23_spill] sm:$0xff] %v15518_v34  ;;  %v15520_v27 = vpop.f32.mrf.mxu1  ;;  %v15523_v53 = vadd.f32 %v12637_v7, %v15277_v36 }
 0x1e0   : > { %v15525_v28 = vpop.f32.mrf.mxu0 }
 0x1e1   : > { %18242 = vst [vmem:[#allocation26_spill] sm:$0xff] %v15523_v53  ;;  %v15527_v20 = vpop.f32.mrf.mxu1 }
 0x1e2   : > { %18243 = vst [vmem:[#allocation27_spill] sm:$0xff] %v15527_v20  ;;  %v12640_v0 = vpop.f32.mrf.mxu0 }
 0x1e3   : > { %v15529_v51 = vpop.f32.mrf.mxu1  ;;  %v15532_v1 = vadd.f32 %v12640_v0, %v15355_v21  ;;  %v15554_v0 = vld [vmem:[%s18109_s3] sm:$0xf] }
 0x1e4   : > { %v3884_v13 = vpop.f32.mrf.mxu0  ;;  %18249 = vst [vmem:[#allocation40_spill] sm:$0xff] %v15554_v0  ;;  %13050 = vmatprep.subr.msk.bf16.mxu1 %vm6687_vm8, %v15554_v0 }
 0x1e5   : > { %v15534_v49 = vpop.f32.mrf.mxu1  ;;  %v15537_v62 = vadd.f32 %v3884_v13, %v15358_v63 }
 0x1e6   : > { %v12641_v41 = vpop.f32.mrf.mxu0 }
 0x1e7   : > { %18244 = vst [vmem:[#allocation29_spill] sm:$0xff] %v15537_v62  ;;  %v15540_v36 = vadd.f32 %v12641_v41, %v15362_v55 }
 0x1e8   : > { %v15542_v7 = vpop.f32.mrf.mxu0 }
 0x1e9   : > { %18245 = vst [vmem:[#allocation33_spill] sm:$0xff] %v15540_v36  ;;  %v15544_v53 = vpop.f32.mrf.mxu1 }
 0x1ea   : > { %18246 = vst [vmem:[#allocation34_spill] sm:$0xff] %v15544_v53  ;;  %v12644_v20 = vpop.f32.mrf.mxu0 }
 0x1eb   : > { %v15546_v34 = vpop.f32.mrf.mxu1  ;;  %v15549_v21 = vadd.f32 %v12644_v20, %v15404_v57 }
 0x1ec   : > { %18247 = vst [vmem:[#allocation36_spill] sm:$0xff] %v15546_v34  ;;  %v3900_v63 = vpop.f32.mrf.mxu0 }
 0x1ed   : > { %18248 = vst [vmem:[#allocation38_spill] sm:$0xff] %v15549_v21  ;;  %v15558_v55 = vpop.f32.mrf.mxu1  ;;  %v15561_v13 = vadd.f32 %v3900_v63, %v15407_v11 }
 0x1ee   : > { %v12645_v41 = vpop.f32.mrf.mxu0 }
 0x1ef   : > { %18250 = vst [vmem:[#allocation42_spill] sm:$0xff] %v15561_v13  ;;  %v15563_v36 = vpop.f32.mrf.mxu1  ;;  %v15566_v57 = vadd.f32 %v12645_v41, %v15411_v35 }
 0x1f0   : > { %18251 = vst [vmem:[#allocation43_spill] sm:$0xff] %v15563_v36  ;;  %v15568_v20 = vpop.f32.mrf.mxu0 }
 0x1f1   : > { %18252 = vst [vmem:[#allocation45_spill] sm:$0xff] %v15566_v57 }
 0x1f2   : > { %v12648_v21 = vpop.f32.mrf.mxu0 }
 0x1f3   : > { %v15570_v34 = vpop.f32.mrf.mxu1  ;;  %v15573_v62 = vadd.f32 %v12648_v21, %v15417_v61 }
 0x1f4   : > { %18253 = vst [vmem:[#allocation46_spill] sm:$0xff] %v15570_v34  ;;  %v3916_v0 = vpop.f32.mrf.mxu0 }
 0x1f5   : > { %18254 = vst [vmem:[#allocation47_spill] sm:$0xff] %v15573_v62  ;;  %v15575_v53 = vpop.f32.mrf.mxu1  ;;  %v15578_v11 = vadd.f32 %v3916_v0, %v15420_v50 }
 0x1f6   : > { %18255 = vst [vmem:[#allocation48_spill] sm:$0xff] %v15575_v53  ;;  %v12649_v63 = vpop.f32.mrf.mxu0  ;;  %v18270_v53 = vld [vmem:[#allocation32_spill] sm:$0xff] }
 0x1f7   : > { %18256 = vst [vmem:[#allocation49_spill] sm:$0xff] %v15578_v11  ;;  %v15580_v13 = vpop.f32.mrf.mxu1  ;;  %v15583_v35 = vadd.f32 %v12649_v63, %v15424_v60 }
 0x1f8   : > { %18257 = vst [vmem:[#allocation50_spill] sm:$0xff] %v15580_v13  ;;  %v15585_v41 = vpop.f32.mrf.mxu0  ;;  %v18268_v13 = vld [vmem:[#allocation24_spill] sm:$0xff] }
 0x1f9   : > { %18258 = vst [vmem:[#allocation51_spill] sm:$0xff] %v15583_v35  ;;  %v15587_v57 = vpop.f32.mrf.mxu1 }
 0x1fa   : > { %18259 = vst [vmem:[#allocation52_spill] sm:$0xff] %v15587_v57  ;;  %v12652_v34 = vpop.f32.mrf.mxu0  ;;  %v18267_v57 = vld [vmem:[#allocation31_spill] sm:$0xff] }
 0x1fb   : > { %v15590_v61 = vadd.f32 %v12652_v34, %v15430_v14  ;;  %v1345_v14 = vadd.f32 %v18268_v13, %v18267_v57 }
 0x1fc   : > { %v3932_v21 = vpop.f32.mrf.mxu0 }
 0x1fd   : > { %18260 = vst [vmem:[#allocation53_spill] sm:$0xff] %v15590_v61  ;;  %v15592_v62 = vpop.f32.mrf.mxu1  ;;  %v15595_v50 = vadd.f32 %v3932_v21, %v15433_v18  ;;  %v18269_v61 = vld [vmem:[#allocation35_spill] sm:$0xff] }
 0x1fe   : > { %18261 = vst [vmem:[#allocation54_spill] sm:$0xff] %v15592_v62  ;;  %v12653_v0 = vpop.f32.mrf.mxu0  ;;  %v2229_v62 = vadd.f32 %v18270_v53, %v18269_v61  ;;  %v18271_v21 = vld [vmem:[#allocation39_spill] sm:$0xff]  ;;  %v2241_v53 = vadd.f32 %v14930_v46, %v14963_v40  ;;  %v2249_v61 = vadd.f32 %v15011_v31, %v15043_v3 }
 0x1ff   : > { %18262 = vst [vmem:[#allocation55_spill] sm:$0xff] %v15595_v50  ;;  %v15597_v11 = vpop.f32.mrf.mxu1  ;;  %v15600_v60 = vadd.f32 %v12653_v0, %v15437_v32  ;;  %v18272_v50 = vld [vmem:[#allocation37_spill] sm:$0xff]  ;;  %v1862_v0 = vadd.f32 %v15207_v8, %v1345_v14 }
 0x200   : > { %18263 = vst [vmem:[#allocation56_spill] sm:$0xff] %v15597_v11  ;;  %v15602_v63 = vpop.f32.mrf.mxu0  ;;  %v2233_v32 = vadd.f32 %v18272_v50, %v18271_v21  ;;  %v18273_v11 = vld [vmem:[#allocation44_spill] sm:$0xff]  ;;  %v3041_v13 = vadd.f32 %v15228_v9, %v2229_v62  ;;  %v2257_v9 = vadd.f32 %v15106_v5, %v15161_v2  ;;  %v3061_v3 = vadd.f32 %v15409_v38, %v2249_v61  ;;  %v18275_v2 = vld [vmem:[#allocation6_spill] sm:$0xff]  ;;  %v18280_v14 = vld [vmem:[#allocation9_spill] sm:$0xff] }
 0x201   : > { %18264 = vst [vmem:[#allocation57_spill] sm:$0xff] %v15600_v60  ;;  %18265 = vst [vmem:[#allocation58_spill] sm:$0xff] %v15602_v63  ;;  %v15604_v35 = vpop.f32.mrf.mxu1  ;;  %v2261_v40 = vadd.f32 %v15168_v47, %v1862_v0  ;;  %v18281_v21 = vld [vmem:[#allocation14_spill] sm:$0xff] }
 0x202   : > { %18266 = vst [vmem:[#allocation59_spill] sm:$0xff] %v15604_v35  ;;  %v12656_v34 = vpop.f32.mrf.mxu0  ;;  %v18274_v35 = vld [vmem:[#allocation41_spill] sm:$0xff]  ;;  %v3045_v8 = vadd.f32 %v15246_v16, %v2233_v32  ;;  %v3565_v31 = vadd.f32 %v15211_v25, %v3041_v13  ;;  %v4775_v13 = vadd.f32 %v15457_v59, %v15460_v42  ;;  %v18287_v59 = vld [vmem:[#allocation22_spill] sm:$0xff] }
 0x203   : > { %v15610_v36 = vpop.f32.mrf.mxu1  ;;  %v15613_v18 = vadd.f32 %v12656_v34, %v15441_v48  ;;  %v2237_v63 = vadd.f32 %v18274_v35, %v18273_v11  ;;  %v2245_v48 = vadd.f32 %v14974_v29, %v15004_v33  ;;  %v2253_v11 = vadd.f32 %v15053_v45, %v15098_v30 }
 0x204   : > { %v3948_v60 = vpop.f32.mrf.mxu0  ;;  %v3053_v29 = vadd.f32 %v15275_v56, %v2241_v53  ;;  %v3069_v30 = vadd.f32 %v15435_v10, %v2257_v9  ;;  %v3569_v16 = vadd.f32 %v18275_v2, %v3045_v8  ;;  %v3964_v56 = vadd.f32 %v15467_v43, %v3565_v31  ;;  %v18283_v8 = vld [vmem:[#allocation16_spill] sm:$0xff]  ;;  %v18285_v9 = vld [vmem:[#allocation13_spill] sm:$0xff]  ;;  %v18291_v31 = vld [vmem:[#allocation19_spill] sm:$0xff] }
 0x205   : > { %v15622_v57 = vadd.f32 %v3948_v60, %v15446_v58  ;;  %v3049_v58 = vadd.f32 %v15261_v24, %v2237_v63  ;;  %v3057_v33 = vadd.f32 %v15360_v44, %v2245_v48  ;;  %v3065_v45 = vadd.f32 %v15422_v37, %v2253_v11  ;;  %v18277_v44 = vld [vmem:[#allocation8_spill] sm:$0xff]  ;;  %v18278_v60 = vld [vmem:[#allocation10_spill] sm:$0xff] }
 0x206   : > { %v12657_v50 = vpop.f32.mrf.mxu0  ;;  %v3073_v24 = vadd.f32 %v15448_v4, %v2261_v40  ;;  %v3577_v25 = vadd.f32 %v18277_v44, %v3053_v29  ;;  %v3968_v37 = vadd.f32 %v15489_v17, %v3569_v16  ;;  %v18279_v63 = vld [vmem:[#allocation12_spill] sm:$0xff]  ;;  %v3593_v32 = vadd.f32 %v18281_v21, %v3069_v30  ;;  %v18282_v17 = vld [vmem:[#allocation11_spill] sm:$0xff]  ;;  %v18284_v11 = vld [vmem:[#allocation18_spill] sm:$0xff] }
 0x207   : > { %v15636_v62 = vpop.f32.mrf.mxu1  ;;  %v15639_v46 = vadd.f32 %v12657_v50, %v15450_v22  ;;  %v18276_v22 = vld [vmem:[#allocation7_spill] sm:$0xff]  ;;  %v3581_v38 = vadd.f32 %v18278_v60, %v3057_v33  ;;  %v3585_v10 = vadd.f32 %v18279_v63, %v3061_v3  ;;  %v3589_v34 = vadd.f32 %v18280_v14, %v3065_v45  ;;  %v18290_v33 = vld [vmem:[#allocation17_spill] sm:$0xff] }
 0x208   : > { %v3573_v47 = vadd.f32 %v18276_v22, %v3049_v58  ;;  %v3597_v0 = vadd.f32 %v15443_v19, %v3073_v24  ;;  %v4777_v43 = vadd.f32 %v15452_v12, %v15455_v6  ;;  %v3976_v53 = vadd.f32 %v15525_v28, %v3577_v25  ;;  %v3951_v12 = vpop.f32.mrf.mxu0  ;;  %v18286_v6 = vld [vmem:[#allocation15_spill] sm:$0xff]  ;;  %v18288_v28 = vld [vmem:[#allocation25_spill] sm:$0xff] }
 0x209   : > { %v15648_v5 = vpop.f32.mrf.mxu1  ;;  %v4778_v61 = vadd.f32 %v18282_v17, %v15465_v23  ;;  %v15672_v50 = vadd.f32 %v18283_v8, %v3964_v56  ;;  %v15680_v19 = vadd.f32 %v15484_v15, %v15482_v52  ;;  %v15684_v42 = vadd.f32 %v18287_v59, %v18286_v6  ;;  %v18289_v23 = vld [vmem:[#allocation28_spill] sm:$0xff]  ;;  %v18292_v52 = vld [vmem:[#allocation30_spill] sm:$0xff]  ;;  %v18294_v16 = vld [vmem:[#allocation21_spill] sm:$0xff] }
 0x20a   : > { %v3972_v4 = vadd.f32 %v15508_v39, %v3573_v47  ;;  %v15676_v39 = vadd.f32 %v18285_v9, %v18284_v11  ;;  %v15687_v58 = vadd.f32 %v18288_v28, %v3968_v37  ;;  %v15691_v40 = vadd.f32 %v18289_v23, %v15496_v54  ;;  %v18293_v15 = vld [vmem:[#allocation20_spill] sm:$0xff]  ;;  %v18295_v54 = vld [vmem:[#allocation23_spill] sm:$0xff]  ;;  %v18297_v47 = vld [vmem:[#allocation26_spill] sm:$0xff] }
 0x20b   : > { %v15654_v35 = vpop.f32.mrf.mxu1  ;;  %v3980_v29 = vadd.f32 %v15542_v7, %v3581_v38  ;;  %v15696_v3 = vadd.f32 %v18291_v31, %v18290_v33  ;;  %v15700_v45 = vadd.f32 %v18293_v15, %v18292_v52  ;;  %v3984_v2 = vadd.f32 %v15568_v20, %v3585_v10  ;;  %v18296_v22 = vld [vmem:[#allocation27_spill] sm:$0xff]  ;;  %v18299_v20 = vld [vmem:[#allocation29_spill] sm:$0xff]  ;;  %v18300_v38 = vld [vmem:[#allocation36_spill] sm:$0xff] }
 0x20c   : > { %v15703_v30 = vadd.f32 %v15515_v26, %v3972_v4  ;;  %v15708_v24 = vadd.f32 %v15520_v27, %v18294_v16  ;;  %v15712_v7 = vadd.f32 %v18296_v22, %v18295_v54  ;;  %v15716_v56 = vadd.f32 %v15529_v51, %v18297_v47  ;;  %v18298_v26 = vld [vmem:[#allocation34_spill] sm:$0xff]  ;;  %v18301_v37 = vld [vmem:[#allocation33_spill] sm:$0xff]  ;;  %v18302_v14 = vld [vmem:[#allocation43_spill] sm:$0xff] }
 0x20d   : > { %v4747_v48 = vpop.f32.mrf.mxu1  ;;  %v15719_v44 = vadd.f32 %v15534_v49, %v3976_v53  ;;  %v15723_v60 = vadd.f32 %v18298_v26, %v15532_v1  ;;  %v15727_v27 = vadd.f32 %v18300_v38, %v18299_v20  ;;  %v15731_v63 = vadd.f32 %v15558_v55, %v18301_v37  ;;  %v15737_v49 = vld [vmem:[%s18108_s2] ss:$0 sm:$0xff]  ;;  %v18303_v1 = vld [vmem:[#allocation38_spill] sm:$0xff]  ;;  %v18305_v11 = vld [vmem:[#allocation40_spill] sm:$0xff] }
 0x20e   : > { %v3988_v10 = vadd.f32 %v15585_v41, %v3589_v34  ;;  %v15740_v21 = vadd.f32 %v18302_v14, %v3980_v29  ;;  %v18304_v4 = vld [vmem:[#allocation46_spill] sm:$0xff]  ;;  %v15748_v55 = vsel %vm6687_vm8, %v18305_v11, 0  ;;  %v18307_v34 = vld [vmem:[#allocation48_spill] sm:$0xff]  ;;  %v18308_v6 = vld [vmem:[#allocation45_spill] sm:$0xff] }
 0x20f   : > { %v15744_v53 = vadd.f32 %v18304_v4, %v18303_v1  ;;  %v18306_v41 = vld [vmem:[#allocation42_spill] sm:$0xff]  ;;  %v18310_v23 = vld [vmem:[#allocation52_spill] sm:$0xff]  ;;  %v18314_v54 = vld [vmem:[#allocation49_spill] sm:$0xff]  ;;  %v3996_v4 = vadd.f32 %v3951_v12, %v3597_v0 }
 0x210   : > { %v15752_v9 = vadd.f32 %v18307_v34, %v18306_v41  ;;  %v18309_v59 = vld [vmem:[#allocation50_spill] sm:$0xff]  ;;  %v15759_v29 = vadd.f32 %v18310_v23, %v3984_v2  ;;  %v18315_v22 = vld [vmem:[#allocation56_spill] sm:$0xff]  ;;  %v18316_v37 = vld [vmem:[#allocation51_spill] sm:$0xff] }
 0x211   : > { %v15756_v28 = vadd.f32 %v18309_v59, %v18308_v6  ;;  %v18311_v33 = vld [vmem:[#allocation58_spill] sm:$0xff]  ;;  %v15768_v47 = vadd.f32 %v18315_v22, %v18314_v54  ;;  %v18318_v14 = vld [vmem:[#allocation53_spill] sm:$0xff] }
 0x212   : > { %v12694_v25 = vpop.f32.mrf.mxu1  ;;  %v3992_v31 = vadd.f32 %v18311_v33, %v3593_v32  ;;  %v18313_v15 = vld [vmem:[#allocation54_spill] sm:$0xff]  ;;  %v15776_v32 = vadd.f32 %v15610_v36, %v3988_v10  ;;  %v15780_v1 = vadd.f32 %v15636_v62, %v18318_v14  ;;  %v18320_v59 = vld [vmem:[#allocation57_spill] sm:$0xff] }
 0x213   : > { %v15789_v36 = vadd.f32 %v15654_v35, %v18320_v59  ;;  %v15794_v62 = vadd.f32 %v12694_v25, %v15613_v18 }
 0x214   : > { %v12700_v51 = vpop.f32.mrf.mxu0  ;;  %v4760_v17 = vpop.f32.mrf.mxu1  ;;  %v15791_v10 = vadd.f32 %v4747_v48, %v3992_v31 }
 0x215   : > { %v5301_v8 = vadd.f32 %v12700_v51, %v4777_v43  ;;  %v18312_v43 = vld [vmem:[#allocation47_spill] sm:$0xff] }
 0x216   : > { %v5156_v52 = vpop.f32.mrf.mxu0  ;;  %v15764_v16 = vadd.f32 %v18313_v15, %v18312_v43  ;;  %v12695_v26 = vpop.f32.mrf.mxu1  ;;  %v18317_v51 = vld [vmem:[#allocation59_spill] sm:$0xff] }
 0x217   : > { %v5344_v20 = vadd.f32 %v15737_v49, %v5301_v8  ;;  %v5299_v38 = vadd.f32 %v5156_v52, %v4775_v13  ;;  %v15773_v2 = vadd.f32 %v18317_v51, %v18316_v37  ;;  %v18319_v13 = vld [vmem:[#allocation55_spill] sm:$0xff]  ;;  %v15798_v52 = vadd.f32 %v4760_v17, %v15622_v57  ;;  %v6025_v37 = vld [vmem:[#allocation2 + $0xc] sm:$0xf] }
 0x218   : > { %v12701_v11 = vpop.f32.mrf.mxu0  ;;  %v15785_v8 = vadd.f32 %v15648_v5, %v18319_v13  ;;  %v4763_v12 = vpop.f32.mrf.mxu1  ;;  %v15801_v5 = vadd.f32 %v12695_v26, %v15639_v46 }
 0x219   : > { %vm5380_vm12 = vcmp.ge.f32.partialorder %v5344_v20, 0.0  ;;  %v5416_v41 = vmul.f32 0.2, %v5344_v20  ;;  %v5342_v34 = vadd.f32 %v15737_v49, %v5299_v38  ;;  %v5302_v6 = vadd.f32 %v12701_v11, %v4778_v61 }
 0x21a   : > { %v5159_v0 = vpop.f32.mrf.mxu0  ;;  %v15805_v15 = vadd.f32 %v4763_v12, %v3996_v4  ;;  %v6016_v12 = vld [vmem:[#allocation2] sm:$0xf] }
 0x21b   : > { %v5452_v23 = vsel %vm5380_vm12, %v5344_v20, %v5416_v41  ;;  %vm5378_vm15 = vcmp.ge.f32.partialorder %v5342_v34, 0.0  ;;  %v5414_v61 = vmul.f32 0.2, %v5342_v34  ;;  %v5345_v33 = vadd.f32 %v15737_v49, %v5302_v6 }
 0x21c   : > { %v12034_v35 = vpack.c.bf16 %v5452_v23, %v5452_v23  ;;  %v5300_v48 = vadd.f32 %v5159_v0, %v15672_v50  ;;  %v12704_v31 = vpop.f32.mrf.mxu0 }
 0x21d   : > { %v5450_v43 = vsel %vm5378_vm15, %v5342_v34, %v5414_v61  ;;  %vm5381_vm0 = vcmp.ge.f32.partialorder %v5345_v33, 0.0  ;;  %v5417_v18 = vmul.f32 0.2, %v5345_v33  ;;  %v5305_v25 = vadd.f32 %v12704_v31, %v15676_v39 }
 0x21e   : > { %v5671_v54 = vshrl.u32 %v12034_v35, 16  ;;  %v12032_v22 = vpack.c.bf16 %v5450_v43, %v5450_v43  ;;  %v5343_v20 = vadd.f32 %v15737_v49, %v5300_v48  ;;  %v5172_v57 = vpop.f32.mrf.mxu0  ;;  %v5674_v17 = vshll.u32 %v12034_v35, 16 }
 0x21f   : > { %v5453_v38 = vsel %vm5381_vm0, %v5345_v33, %v5417_v18  ;;  %v5348_v46 = vadd.f32 %v15737_v49, %v5305_v25  ;;  %v5303_v26 = vadd.f32 %v5172_v57, %v15680_v19 }
 0x220   : > { %v5673_v50 = vrot.slane %v5671_v54, 7  ;;  %v5654_v51 = vshrl.u32 %v12032_v22, 16  ;;  %v5657_v14 = vshll.u32 %v12032_v22, 16  ;;  %v12035_v11 = vpack.c.bf16 %v5453_v38, %v5453_v38  ;;  %v12705_v41 = vpop.f32.mrf.mxu0 }
 0x221   : > { %vm5379_vm2 = vcmp.ge.f32.partialorder %v5343_v20, 0.0  ;;  %v5415_v4 = vmul.f32 0.2, %v5343_v20  ;;  %vm5384_vm3 = vcmp.ge.f32.partialorder %v5348_v46, 0.0  ;;  %v5420_v34 = vmul.f32 0.2, %v5348_v46 }
 0x222   : > { %v5676_v6 = vor.u32 %v5674_v17, %v5673_v50  ;;  %v5677_v13 = vrot.slane %v5673_v50, 4  ;;  %v5656_v59 = vrot.slane %v5654_v51, 7  ;;  %v5679_v19 = vshrl.u32 %v12035_v11, 16  ;;  %v5175_v0 = vpop.f32.mrf.mxu0 }
 0x223   : > { %v5682_v23 = vshll.u32 %v12035_v11, 16  ;;  %v5451_v61 = vsel %vm5379_vm2, %v5343_v20, %v5415_v4  ;;  %v5456_v33 = vsel %vm5384_vm3, %v5348_v46, %v5420_v34  ;;  %v5346_v35 = vadd.f32 %v15737_v49, %v5303_v26  ;;  %v6029_v20 = vld [vmem:[#allocation2 + $0x14] sm:$0x1] }
 0x224   : > { %v6026_v48 = vsel %vm15812_vm1, %v5676_v6, %v6025_v37  ;;  %v5659_v31 = vor.u32 %v5657_v14, %v5656_v59  ;;  %v5660_v43 = vrot.slane %v5656_v59, 4  ;;  %v5681_v25 = vrot.slane %v5679_v19, 7  ;;  %v12708_v54 = vpop.f32.mrf.mxu0 }
 0x225   : > { %6027 = vst [vmem:[#allocation2 + $0xc] sm:$0xf] %v6026_v48  ;;  %v12033_v57 = vpack.c.bf16 %v5451_v61, %v5451_v61  ;;  %v12038_v17 = vpack.c.bf16 %v5456_v33, %v5456_v33  ;;  %vm5382_vm11 = vcmp.ge.f32.partialorder %v5346_v35, 0.0  ;;  %v5418_v38 = vmul.f32 0.2, %v5346_v35 }
 0x226   : > { %v6017_v46 = vsel %vm15812_vm1, %v5659_v31, %v6016_v12  ;;  %v5684_v26 = vor.u32 %v5682_v23, %v5681_v25  ;;  %v5686_v50 = vrot.slane %v5681_v25, 4  ;;  %v5306_v37 = vadd.f32 %v12705_v41, %v15684_v42  ;;  %v5188_v51 = vpop.f32.mrf.mxu0  ;;  %v6022_v41 = vld [vmem:[#allocation2 + $0x8] sm:$0x1]  ;;  %v6039_v25 = vld [vmem:[#allocation2 + $0x24] sm:$0xf] }
 0x227   : > { %6018 = vst [vmem:[#allocation2] sm:$0xf] %v6017_v46  ;;  %v5662_v14 = vshrl.u32 %v12033_v57, 16  ;;  %v5665_v11 = vshll.u32 %v12033_v57, 16  ;;  %v5705_v4 = vshrl.u32 %v12038_v17, 16  ;;  %v5708_v34 = vshll.u32 %v12038_v17, 16 }
 0x228   : > { %v18327_v6 = vmov 0   ;;  %v5685_v59 = vsel %vm15821_vm5, %v5677_v13, %v5684_v26  ;;  %v6030_v19 = vsel %vm15827_vm6, %v5686_v50, %v6029_v20  ;;  %v5454_v12 = vsel %vm5382_vm11, %v5346_v35, %v5418_v38  ;;  %v12709_v61 = vpop.f32.mrf.mxu0 }
 0x229   : > { %6148 = vst.msk [vmem:[#allocation2] sm:$0xf] %vm5486_vm9, %v18327_v6  ;;  %v5349_v23 = vadd.f32 %v15737_v49, %v5306_v37  ;;  %6028 = vst.msk [vmem:[#allocation2 + $0x10] sm:$0xf] %vm5486_vm9, %v5685_v59  ;;  %v5664_v42 = vrot.slane %v5662_v14, 7  ;;  %v5707_v33 = vrot.slane %v5705_v4, 7  ;;  %v12036_v48 = vpack.c.bf16 %v5454_v12, %v5454_v12 }
 0x22a   : > { %6031 = vst [vmem:[#allocation2 + $0x14] sm:$0x1] %v6030_v19  ;;  %v5304_v31 = vadd.f32 %v5175_v0, %v15687_v58  ;;  %v5309_v13 = vadd.f32 %v12708_v54, %v15691_v40  ;;  %v5307_v20 = vadd.f32 %v5188_v51, %v15696_v3  ;;  %v5191_v35 = vpop.f32.mrf.mxu0 }
 0x22b   : > { %vm5385_vm12 = vcmp.ge.f32.partialorder %v5349_v23, 0.0  ;;  %v5421_v57 = vmul.f32 0.2, %v5349_v23  ;;  %v5667_v17 = vor.u32 %v5665_v11, %v5664_v42  ;;  %v5669_v38 = vrot.slane %v5664_v42, 4 }
 0x22c   : > { %v5710_v46 = vor.u32 %v5708_v34, %v5707_v33  ;;  %v5711_v26 = vrot.slane %v5707_v33, 4  ;;  %v5688_v50 = vshrl.u32 %v12036_v48, 16  ;;  %v5691_v37 = vshll.u32 %v12036_v48, 16  ;;  %v12712_v54 = vpop.f32.mrf.mxu0 }
 0x22d   : > { %v5457_v14 = vsel %vm5385_vm12, %v5349_v23, %v5421_v57  ;;  %v5347_v4 = vadd.f32 %v15737_v49, %v5304_v31  ;;  %v5668_v58 = vsel %vm15821_vm5, %v5660_v43, %v5667_v17  ;;  %v6023_v0 = vsel %vm15827_vm6, %v5669_v38, %v6022_v41  ;;  %v6032_v43 = vld [vmem:[#allocation2 + $0x18] sm:$0xf]  ;;  %v6043_v17 = vld [vmem:[#allocation2 + $0x2c] sm:$0x1] }
 0x22e   : > { %v6040_v40 = vsel %vm15812_vm1, %v5710_v46, %v6039_v25  ;;  %v12039_v3 = vpack.c.bf16 %v5457_v14, %v5457_v14  ;;  %6019 = vst.msk [vmem:[#allocation2 + $0x4] sm:$0xf] %vm5486_vm9, %v5668_v58  ;;  %6024 = vst [vmem:[#allocation2 + $0x8] sm:$0x1] %v6023_v0  ;;  %v5690_v51 = vrot.slane %v5688_v50, 7  ;;  %v5352_v34 = vadd.f32 %v15737_v49, %v5309_v13  ;;  %v5204_v57 = vpop.f32.mrf.mxu0 }
 0x22f   : > { %6041 = vst [vmem:[#allocation2 + $0x24] sm:$0xf] %v6040_v40  ;;  %vm5383_vm13 = vcmp.ge.f32.partialorder %v5347_v4, 0.0  ;;  %v5419_v11 = vmul.f32 0.2, %v5347_v4  ;;  %v5350_v12 = vadd.f32 %v15737_v49, %v5307_v20  ;;  %v5310_v23 = vadd.f32 %v12709_v61, %v15700_v45 }
 0x230   : > { %6149 = vst.msk [vmem:[#allocation2 + $0x4] sm:$0xf] %vm5486_vm9, %v18327_v6  ;;  %v5713_v59 = vshrl.u32 %v12039_v3, 16  ;;  %v5716_v19 = vshll.u32 %v12039_v3, 16  ;;  %v5693_v42 = vor.u32 %v5691_v37, %v5690_v51  ;;  %v5694_v41 = vrot.slane %v5690_v51, 4 }
 0x231   : > { %6150 = vst.msk [vmem:[#allocation2 + $0x8] sm:$0x1] %vm5489_vm10, %v18327_v6  ;;  %v5455_v33 = vsel %vm5383_vm13, %v5347_v4, %v5419_v11  ;;  %vm5388_vm14 = vcmp.ge.f32.partialorder %v5352_v34, 0.0  ;;  %v5424_v25 = vmul.f32 0.2, %v5352_v34  ;;  %vm5386_vm15 = vcmp.ge.f32.partialorder %v5350_v12, 0.0  ;;  %v12713_v11 = vpop.f32.mrf.mxu0 }
 0x232   : > { %v5715_v48 = vrot.slane %v5713_v59, 7  ;;  %v12037_v31 = vpack.c.bf16 %v5455_v33, %v5455_v33  ;;  %v6033_v13 = vsel %vm15812_vm1, %v5693_v42, %v6032_v43  ;;  %v5422_v38 = vmul.f32 0.2, %v5350_v12 }
 0x233   : > { %v5353_v46 = vadd.f32 %v15737_v49, %v5310_v23  ;;  %v5308_v20 = vadd.f32 %v5191_v35, %v15703_v30  ;;  %6034 = vst [vmem:[#allocation2 + $0x18] sm:$0xf] %v6033_v13  ;;  %v5460_v14 = vsel %vm5388_vm14, %v5352_v34, %v5424_v25  ;;  %v6036_v30 = vld [vmem:[#allocation2 + $0x20] sm:$0x1]  ;;  %v5313_v59 = vadd.f32 %v12712_v54, %v15708_v24  ;;  %v6053_v24 = vld [vmem:[#allocation2 + $0x3c] sm:$0xf] }
 0x234   : > { %v5718_v45 = vor.u32 %v5716_v19, %v5715_v48  ;;  %v5720_v61 = vrot.slane %v5715_v48, 4  ;;  %v5696_v50 = vshrl.u32 %v12037_v31, 16  ;;  %v5699_v37 = vshll.u32 %v12037_v31, 16 }
 0x235   : > { %v5458_v4 = vsel %vm5386_vm15, %v5350_v12, %v5422_v38  ;;  %vm5389_vm0 = vcmp.ge.f32.partialorder %v5353_v46, 0.0  ;;  %v5425_v58 = vmul.f32 0.2, %v5353_v46  ;;  %v12042_v51 = vpack.c.bf16 %v5460_v14, %v5460_v14  ;;  %v5207_v38 = vpop.f32.mrf.mxu0 }
 0x236   : > { %v5719_v0 = vsel %vm15821_vm5, %v5711_v26, %v5718_v45  ;;  %v6044_v40 = vsel %vm15827_vm6, %v5720_v61, %v6043_v17  ;;  %v5698_v3 = vrot.slane %v5696_v50, 7  ;;  %v12040_v35 = vpack.c.bf16 %v5458_v4, %v5458_v4 }
 0x237   : > { %6042 = vst.msk [vmem:[#allocation2 + $0x28] sm:$0xf] %vm5486_vm9, %v5719_v0  ;;  %6045 = vst [vmem:[#allocation2 + $0x2c] sm:$0x1] %v6044_v40  ;;  %v5461_v43 = vsel %vm5389_vm0, %v5353_v46, %v5425_v58  ;;  %v5351_v34 = vadd.f32 %v15737_v49, %v5308_v20  ;;  %v5739_v23 = vshrl.u32 %v12042_v51, 16  ;;  %v5742_v26 = vshll.u32 %v12042_v51, 16 }
 0x238   : > { %v5701_v19 = vor.u32 %v5699_v37, %v5698_v3  ;;  %v5703_v12 = vrot.slane %v5698_v3, 4  ;;  %v5722_v42 = vshrl.u32 %v12040_v35, 16  ;;  %v5725_v33 = vshll.u32 %v12040_v35, 16  ;;  %v6046_v37 = vld [vmem:[#allocation2 + $0x30] sm:$0xf] }
 0x239   : > { %v12043_v48 = vpack.c.bf16 %v5461_v43, %v5461_v43  ;;  %vm5387_vm2 = vcmp.ge.f32.partialorder %v5351_v34, 0.0  ;;  %v5741_v13 = vrot.slane %v5739_v23, 7  ;;  %v5423_v17 = vmul.f32 0.2, %v5351_v34  ;;  %v6057_v51 = vld [vmem:[#allocation2 + $0x44] sm:$0x1]  ;;  %v12716_v43 = vpop.f32.mrf.mxu0 }
 0x23a   : > { %v5702_v31 = vsel %vm15821_vm5, %v5694_v41, %v5701_v19  ;;  %v6037_v25 = vsel %vm15827_vm6, %v5703_v12, %v6036_v30  ;;  %v5724_v54 = vrot.slane %v5722_v42, 7  ;;  %v5356_v45 = vadd.f32 %v15737_v49, %v5313_v59 }
 0x23b   : > { %6035 = vst.msk [vmem:[#allocation2 + $0x1c] sm:$0xf] %vm5486_vm9, %v5702_v31  ;;  %6038 = vst [vmem:[#allocation2 + $0x20] sm:$0x1] %v6037_v25  ;;  %v5747_v46 = vshrl.u32 %v12043_v48, 16  ;;  %v5750_v20 = vshll.u32 %v12043_v48, 16  ;;  %v5744_v61 = vor.u32 %v5742_v26, %v5741_v13  ;;  %v5459_v41 = vsel %vm5387_vm2, %v5351_v34, %v5423_v17 }
 0x23c   : > { %v5745_v50 = vrot.slane %v5741_v13, 4  ;;  %v5311_v14 = vadd.f32 %v5204_v57, %v15712_v7  ;;  %v5727_v4 = vor.u32 %v5725_v33, %v5724_v54  ;;  %v5728_v58 = vrot.slane %v5724_v54, 4  ;;  %v6050_v31 = vld [vmem:[#allocation2 + $0x38] sm:$0x1]  ;;  %v5220_v54 = vpop.f32.mrf.mxu0 }
 0x23d   : > { %v5749_v0 = vrot.slane %v5747_v46, 7  ;;  %v12041_v40 = vpack.c.bf16 %v5459_v41, %v5459_v41  ;;  %v6054_v3 = vsel %vm15812_vm1, %v5744_v61, %v6053_v24  ;;  %vm5392_vm3 = vcmp.ge.f32.partialorder %v5356_v45, 0.0 }
 0x23e   : > { %v5428_v30 = vmul.f32 0.2, %v5356_v45  ;;  %v5354_v35 = vadd.f32 %v15737_v49, %v5311_v14  ;;  %6055 = vst [vmem:[#allocation2 + $0x3c] sm:$0xf] %v6054_v3  ;;  %v6047_v59 = vsel %vm15812_vm1, %v5727_v4, %v6046_v37  ;;  %v5314_v13 = vadd.f32 %v12713_v11, %v15716_v56 }
 0x23f   : > { %v5752_v34 = vor.u32 %v5750_v20, %v5749_v0  ;;  %v5754_v19 = vrot.slane %v5749_v0, 4  ;;  %v5730_v7 = vshrl.u32 %v12041_v40, 16  ;;  %6048 = vst [vmem:[#allocation2 + $0x30] sm:$0xf] %v6047_v59  ;;  %v5733_v57 = vshll.u32 %v12041_v40, 16 }
 0x240   : > { %v5464_v12 = vsel %vm5392_vm3, %v5356_v45, %v5428_v30  ;;  %vm5390_vm11 = vcmp.ge.f32.partialorder %v5354_v35, 0.0  ;;  %v5426_v23 = vmul.f32 0.2, %v5354_v35  ;;  %v5312_v17 = vadd.f32 %v5207_v38, %v15719_v44 }
 0x241   : > { %v5753_v26 = vsel %vm15821_vm5, %v5745_v50, %v5752_v34  ;;  %v6058_v42 = vsel %vm15827_vm6, %v5754_v19, %v6057_v51  ;;  %v5732_v33 = vrot.slane %v5730_v7, 7  ;;  %v12046_v48 = vpack.c.bf16 %v5464_v12, %v5464_v12 }
 0x242   : > { %6056 = vst.msk [vmem:[#allocation2 + $0x40] sm:$0xf] %vm5486_vm9, %v5753_v26  ;;  %6059 = vst [vmem:[#allocation2 + $0x44] sm:$0x1] %v6058_v42  ;;  %v5462_v25 = vsel %vm5390_vm11, %v5354_v35, %v5426_v23  ;;  %v5317_v24 = vadd.f32 %v12716_v43, %v15723_v60  ;;  %v5357_v37 = vadd.f32 %v15737_v49, %v5314_v13  ;;  %v6067_v60 = vld [vmem:[#allocation2 + $0x54] sm:$0xf]  ;;  %v12717_v35 = vpop.f32.mrf.mxu0 }
 0x243   : > { %v5735_v46 = vor.u32 %v5733_v57, %v5732_v33  ;;  %v5737_v20 = vrot.slane %v5732_v33, 4  ;;  %v5773_v45 = vshrl.u32 %v12046_v48, 16  ;;  %v5776_v61 = vshll.u32 %v12046_v48, 16  ;;  %v15905_v33 = vld [vmem:[#allocation2] sm:$0xe] }
 0x244   : > { %v12044_v50 = vpack.c.bf16 %v5462_v25, %v5462_v25  ;;  %v5355_v41 = vadd.f32 %v15737_v49, %v5312_v17  ;;  %v5360_v14 = vadd.f32 %v15737_v49, %v5317_v24  ;;  %v5315_v11 = vadd.f32 %v5220_v54, %v15727_v27  ;;  %v6060_v27 = vld [vmem:[#allocation2 + $0x48] sm:$0xf]  ;;  %v5223_v13 = vpop.f32.mrf.mxu0  ;;  %v6071_v24 = vld [vmem:[#allocation2 + $0x5c] sm:$0x1] }
 0x245   : > { %v5736_v4 = vsel %vm15821_vm5, %v5728_v58, %v5735_v46  ;;  %v6051_v56 = vsel %vm15827_vm6, %v5737_v20, %v6050_v31  ;;  %v5775_v44 = vrot.slane %v5773_v45, 7  ;;  %vm5393_vm12 = vcmp.ge.f32.partialorder %v5357_v37, 0.0 }
 0x246   : > { %6049 = vst.msk [vmem:[#allocation2 + $0x34] sm:$0xf] %vm5486_vm9, %v5736_v4  ;;  %6052 = vst [vmem:[#allocation2 + $0x38] sm:$0x1] %v6051_v56  ;;  %v5756_v38 = vshrl.u32 %v12044_v50, 16  ;;  %v5759_v0 = vshll.u32 %v12044_v50, 16  ;;  %v5358_v57 = vadd.f32 %v15737_v49, %v5315_v11 }
 0x247   : > { %v5429_v40 = vmul.f32 0.2, %v5357_v37  ;;  %v5778_v3 = vor.u32 %v5776_v61, %v5775_v44  ;;  %v5779_v51 = vrot.slane %v5775_v44, 4  ;;  %vm5391_vm13 = vcmp.ge.f32.partialorder %v5355_v41, 0.0  ;;  %v6064_v61 = vld [vmem:[#allocation2 + $0x50] sm:$0x1] }
 0x248   : > { %v5427_v30 = vmul.f32 0.2, %v5355_v41  ;;  %v5758_v58 = vrot.slane %v5756_v38, 7  ;;  %vm5396_vm14 = vcmp.ge.f32.partialorder %v5360_v14, 0.0  ;;  %v5432_v59 = vmul.f32 0.2, %v5360_v14 }
 0x249   : > { %v5465_v43 = vsel %vm5393_vm12, %v5357_v37, %v5429_v40  ;;  %v6068_v34 = vsel %vm15812_vm1, %v5778_v3, %v6067_v60  ;;  %vm5394_vm15 = vcmp.ge.f32.partialorder %v5358_v57, 0.0  ;;  %v5430_v20 = vmul.f32 0.2, %v5358_v57  ;;  %v6081_v4 = vld [vmem:[#allocation2 + $0x6c] sm:$0xf] }
 0x24a   : > { %v12047_v19 = vpack.c.bf16 %v5465_v43, %v5465_v43  ;;  %v5463_v7 = vsel %vm5391_vm13, %v5355_v41, %v5427_v30  ;;  %6069 = vst [vmem:[#allocation2 + $0x54] sm:$0xf] %v6068_v34  ;;  %v5761_v12 = vor.u32 %v5759_v0, %v5758_v58  ;;  %v5762_v23 = vrot.slane %v5758_v58, 4 }
 0x24b   : > { %v12045_v26 = vpack.c.bf16 %v5463_v7, %v5463_v7  ;;  %v5468_v42 = vsel %vm5396_vm14, %v5360_v14, %v5432_v59  ;;  %v5318_v41 = vadd.f32 %v12717_v35, %v15731_v63  ;;  %v5466_v56 = vsel %vm5394_vm15, %v5358_v57, %v5430_v20  ;;  %v15916_v59 = vld [vmem:[#allocation2 + $0x10] sm:$0xf]  ;;  %v7145_v63 = vld [vmem:[#allocation2 + $0xc] sm:$0xe]  ;;  %v15926_v7 = vld [vmem:[#allocation2 + $0x8] sm:$0x1] }
 0x24c   : > { %v5781_v48 = vshrl.u32 %v12047_v19, 16  ;;  %v5784_v31 = vshll.u32 %v12047_v19, 16  ;;  %v12050_v25 = vpack.c.bf16 %v5468_v42, %v5468_v42  ;;  %v6061_v17 = vsel %vm15812_vm1, %v5761_v12, %v6060_v27  ;;  %v15924_v19 = vld [vmem:[#allocation2 + $0x4] sm:$0xf]  ;;  %v12720_v42 = vpop.f32.mrf.mxu0 }
 0x24d   : > { %v5764_v54 = vshrl.u32 %v12045_v26, 16  ;;  %v5767_v46 = vshll.u32 %v12045_v26, 16  ;;  %6062 = vst [vmem:[#allocation2 + $0x48] sm:$0xf] %v6061_v17  ;;  %v5316_v44 = vadd.f32 %v5223_v13, %v15740_v21  ;;  %v11749_v60 = vrot.slane %v15905_v33, 9 }
 0x24e   : > { %v5783_v45 = vrot.slane %v5781_v48, 7  ;;  %v5807_v50 = vshrl.u32 %v12050_v25, 16  ;;  %v5810_v37 = vshll.u32 %v12050_v25, 16  ;;  %v12048_v40 = vpack.c.bf16 %v5466_v56, %v5466_v56  ;;  %v6074_v17 = vld [vmem:[#allocation2 + $0x60] sm:$0xf] }
 0x24f   : > { %v5766_v14 = vrot.slane %v5764_v54, 7  ;;  %v5361_v58 = vadd.f32 %v15737_v49, %v5318_v41  ;;  %v5359_v43 = vadd.f32 %v15737_v49, %v5316_v44  ;;  %vm6638_vm0 = vcmask 64512  }
 0x250   : > { %v5786_v11 = vor.u32 %v5784_v31, %v5783_v45  ;;  %v5788_v38 = vrot.slane %v5783_v45, 4  ;;  %v15912_v0 = vrot.slane %v5807_v50, 7  ;;  %v5790_v12 = vshrl.u32 %v12048_v40, 16 }
 0x251   : > { %v5769_v3 = vor.u32 %v5767_v46, %v5766_v14  ;;  %v5771_v30 = vrot.slane %v5766_v14, 4  ;;  %v5793_v26 = vshll.u32 %v12048_v40, 16  ;;  %vm5397_vm2 = vcmp.ge.f32.partialorder %v5361_v58, 0.0 }
 0x252   : > { %v5787_v35 = vsel %vm15821_vm5, %v5779_v51, %v5786_v11  ;;  %v6072_v21 = vsel %vm15827_vm6, %v5788_v38, %v6071_v24  ;;  %v5812_v34 = vor.u32 %v5810_v37, %v15912_v0  ;;  %v5813_v27 = vrot.slane %v15912_v0, 4 }
 0x253   : > { %6070 = vst.msk [vmem:[#allocation2 + $0x58] sm:$0xf] %vm5486_vm9, %v5787_v35  ;;  %6073 = vst [vmem:[#allocation2 + $0x5c] sm:$0x1] %v6072_v21  ;;  %v5770_v57 = vsel %vm15821_vm5, %v5762_v23, %v5769_v3  ;;  %v6065_v51 = vsel %vm15827_vm6, %v5771_v30, %v6064_v61  ;;  %v5433_v48 = vmul.f32 0.2, %v5361_v58  ;;  %v5321_v54 = vadd.f32 %v12720_v42, %v15744_v53  ;;  %v5236_v30 = vpop.f32.mrf.mxu0 }
 0x254   : > { %6063 = vst.msk [vmem:[#allocation2 + $0x4c] sm:$0xf] %vm5486_vm9, %v5770_v57  ;;  %6066 = vst [vmem:[#allocation2 + $0x50] sm:$0x1] %v6065_v51  ;;  %v6082_v33 = vsel %vm15812_vm1, %v5812_v34, %v6081_v4  ;;  %vm5395_vm3 = vcmp.ge.f32.partialorder %v5359_v43, 0.0  ;;  %v5792_v31 = vrot.slane %v5790_v12, 7  ;;  %v5319_v42 = vadd.f32 %v5236_v30, %v15752_v9 }
 0x255   : > { %6083 = vst [vmem:[#allocation2 + $0x6c] sm:$0xf] %v6082_v33  ;;  %v5431_v25 = vmul.f32 0.2, %v5359_v43  ;;  %v7194_v23 = vrot.slane %v15924_v19, 5  ;;  %v7197_v13 = vrot.slane %v15926_v7, 5  ;;  %v5469_v24 = vsel %vm5397_vm2, %v5361_v58, %v5433_v48 }
 0x256   : > { %v11750_v46 = vrot.slane %v7145_v63, 9  ;;  %v7201_v20 = vrot.slane %v15916_v59, 5  ;;  %v5795_v45 = vor.u32 %v5793_v26, %v5792_v31  ;;  %v5796_v61 = vrot.slane %v5792_v31, 4  ;;  %v15945_v53 = vld [vmem:[#allocation2 + $0x14] sm:$0x1] }
 0x257   : > { %v12051_v50 = vpack.c.bf16 %v5469_v24, %v5469_v24  ;;  %v5467_v37 = vsel %vm5395_vm3, %v5359_v43, %v5431_v25  ;;  %v7195_v4 = vsel %vm13648_vm7, %v11749_v60, %v7194_v23  ;;  %v7196_v56 = vrot.slane %v7194_v23, 4  ;;  %v6155_v58 = vld [vmem:[#allocation2] sm:$0xf]  ;;  %v6085_v51 = vld [vmem:[#allocation2 + $0x74] sm:$0x1] }
 0x258   : > { %v12049_v41 = vpack.c.bf16 %v5467_v37, %v5467_v37  ;;  %v5364_v44 = vadd.f32 %v15737_v49, %v5321_v54  ;;  %v6075_v11 = vsel %vm15812_vm1, %v5795_v45, %v6074_v17  ;;  %v7202_v3 = vsel %vm13648_vm7, %v11750_v46, %v7201_v20  ;;  %v6078_v25 = vld [vmem:[#allocation2 + $0x68] sm:$0x1] }
 0x259   : > { %v5815_v38 = vshrl.u32 %v12051_v50, 16  ;;  %v5818_v40 = vshll.u32 %v12051_v50, 16  ;;  %6076 = vst [vmem:[#allocation2 + $0x60] sm:$0xf] %v6075_v11  ;;  %v7198_v60 = vsel %vm13648_vm7, %v7196_v56, %v7197_v13  ;;  %v7203_v57 = vrot.slane %v7201_v20, 4 }
 0x25a   : > { %v5798_v43 = vshrl.u32 %v12049_v41, 16  ;;  %v5801_v63 = vshll.u32 %v12049_v41, 16  ;;  %vm5400_vm11 = vcmp.ge.f32.partialorder %v5364_v44, 0.0  ;;  %v11766_v21 = vcombine.low %v7195_v4, %v7198_v60  ;;  %v6157_v20 = vld [vmem:[#allocation2 + $0xc] sm:$0xf] }
 0x25b   : > { %v5817_v35 = vrot.slane %v5815_v38, 7  ;;  %v5436_v34 = vmul.f32 0.2, %v5364_v44  ;;  %v7204_v26 = vrot.slane %v15945_v53, 5  ;;  %v6205_v33 = vshrl.u32 %v6155_v58, 16 }
 0x25c   : > { %v5800_v12 = vrot.slane %v5798_v43, 7  ;;  %12804 = vmatprep.mubr.msk.bf16.mxu0 %vm6638_vm0, %v11766_v21  ;;  %v6208_v17 = vshll.u32 %v6155_v58, 16  ;;  %v5362_v37 = vadd.f32 %v15737_v49, %v5319_v42  ;;  %v6224_v30 = vshll.u32 %v15926_v7, 16  ;;  %v6095_v58 = vld [vmem:[#allocation2 + $0x84] sm:$0xf] }
 0x25d   : > { %v5820_v48 = vor.u32 %v5818_v40, %v5817_v35  ;;  %v5822_v31 = vrot.slane %v5817_v35, 4  ;;  %v5472_v23 = vsel %vm5400_vm11, %v5364_v44, %v5436_v34  ;;  %v7205_v46 = vsel %vm13648_vm7, %v7203_v57, %v7204_v26  ;;  %v12721_v44 = vpop.f32.mrf.mxu0 }
 0x25e   : > { %v5803_v13 = vor.u32 %v5801_v63, %v5800_v12  ;;  %v5805_v24 = vrot.slane %v5800_v12, 4  ;;  %v12054_v54 = vpack.c.bf16 %v5472_v23, %v5472_v23  ;;  %v11767_v50 = vcombine.low %v7202_v3, %v7205_v46 }
 0x25f   : > { %v5821_v9 = vsel %vm15821_vm5, %v5813_v27, %v5820_v48  ;;  %v6086_v45 = vsel %vm15827_vm6, %v5822_v31, %v6085_v51  ;;  %vm5398_vm12 = vcmp.ge.f32.partialorder %v5362_v37, 0.0  ;;  %v5434_v27 = vmul.f32 0.2, %v5362_v37 }
 0x260   : > { %6084 = vst.msk [vmem:[#allocation2 + $0x70] sm:$0xf] %vm5486_vm9, %v5821_v9  ;;  %6087 = vst [vmem:[#allocation2 + $0x74] sm:$0x1] %v6086_v45  ;;  %v5804_v41 = vsel %vm15821_vm5, %v5796_v61, %v5803_v13  ;;  %v6079_v4 = vsel %vm15827_vm6, %v5805_v24, %v6078_v25  ;;  %v5841_v56 = vshrl.u32 %v12054_v54, 16  ;;  %v5844_v0 = vshll.u32 %v12054_v54, 16  ;;  %12805 = vmatmul.mubr.msk.bf16.vlgmr.msra.gmra.mxu0 %vm6638_vm0, %v11767_v50  ;;  %v5239_v25 = vpop.f32.mrf.mxu0 }
 0x261   : > { %6077 = vst.msk [vmem:[#allocation2 + $0x64] sm:$0xf] %vm5486_vm9, %v5804_v41  ;;  %6080 = vst [vmem:[#allocation2 + $0x68] sm:$0x1] %v6079_v4  ;;  %v6207_v11 = vrot.slane %v6205_v33, 4  ;;  %v6210_v38 = vrot.slane %v6208_v17, 5  ;;  %v5470_v43 = vsel %vm5398_vm12, %v5362_v37, %v5434_v27  ;;  %v5322_v60 = vadd.f32 %v12721_v44, %v15756_v28 }
 0x262   : > { %v15970_v40 = vrot.slane %v5841_v56, 7  ;;  %v6214_v3 = vshll.u32 %v15924_v19, 16  ;;  %v6218_v61 = vshrl.u32 %v15924_v19, 16  ;;  %v6229_v35 = vshrl.u32 %v6157_v20, 16  ;;  %v6088_v28 = vld [vmem:[#allocation2 + $0x78] sm:$0xf] }
 0x263   : > { %v6211_v63 = vor.u32 %v6210_v38, %v6207_v11  ;;  %v12052_v57 = vpack.c.bf16 %v5470_v43, %v5470_v43  ;;  %v6226_v42 = vrot.slane %v6224_v30, 5  ;;  %v5365_v33 = vadd.f32 %v15737_v49, %v5322_v60  ;;  %v7146_v50 = vld [vmem:[#allocation2 + $0x18] sm:$0xe]  ;;  %v15991_v44 = vld [vmem:[#allocation2 + $0x20] sm:$0x1] }
 0x264   : > { %v5846_v21 = vor.u32 %v5844_v0, %v15970_v40  ;;  %v5847_v34 = vrot.slane %v15970_v40, 4  ;;  %v6216_v51 = vrot.slane %v6214_v3, 5  ;;  %v6220_v26 = vrot.slane %v6218_v61, 4  ;;  %v15989_v0 = vld [vmem:[#allocation2 + $0x1c] sm:$0xf] }
 0x265   : > { %v6212_v12 = vrot.slane %v6211_v63, 4  ;;  %v5824_v7 = vshrl.u32 %v12052_v57, 16  ;;  %v5827_v48 = vshll.u32 %v12052_v57, 16  ;;  %v6231_v31 = vrot.slane %v6229_v35, 4 }
 0x266   : > { %v6096_v19 = vsel %vm15812_vm1, %v5846_v21, %v6095_v58  ;;  %v6221_v13 = vor.u32 %v6220_v26, %v6216_v51  ;;  %vm5401_vm13 = vcmp.ge.f32.partialorder %v5365_v33, 0.0  ;;  %v5437_v24 = vmul.f32 0.2, %v5365_v33  ;;  %v12724_v58 = vpop.f32.mrf.mxu0 }
 0x267   : > { %6097 = vst [vmem:[#allocation2 + $0x84] sm:$0xf] %v6096_v19  ;;  %v6217_v17 = vsel %vm13353_vm4, %v6212_v12, %v6216_v51  ;;  %v15983_v54 = vrot.slane %v5824_v7, 7  ;;  %v6232_v46 = vshll.u32 %v6157_v20, 16  ;;  %v6238_v9 = vshll.u32 %v15916_v59, 16 }
 0x268   : > { %v6242_v45 = vshrl.u32 %v15916_v59, 16  ;;  %v6222_v37 = vrot.slane %v6221_v13, 4  ;;  %v5473_v41 = vsel %vm5401_vm13, %v5365_v33, %v5437_v24  ;;  %v6248_v4 = vshll.u32 %v15945_v53, 16  ;;  %v6099_v12 = vld [vmem:[#allocation2 + $0x8c] sm:$0x1] }
 0x269   : > { %v5320_v56 = vadd.f32 %v5239_v25, %v15759_v29  ;;  %v5829_v27 = vor.u32 %v5827_v48, %v15983_v54  ;;  %v5830_v11 = vrot.slane %v15983_v54, 4  ;;  %v12055_v20 = vpack.c.bf16 %v5473_v41, %v5473_v41  ;;  %v7147_v13 = vld [vmem:[#allocation2 + $0x24] sm:$0xe] }
 0x26a   : > { %v6234_v38 = vrot.slane %v6232_v46, 5  ;;  %v6227_v59 = vsel %vm13353_vm4, %v6222_v37, %v6226_v42  ;;  %v6240_v3 = vrot.slane %v6238_v9, 5  ;;  %v6244_v61 = vrot.slane %v6242_v45, 4  ;;  %v16011_v45 = vld [vmem:[#allocation2 + $0x28] sm:$0xf] }
 0x26b   : > { %v6250_v30 = vrot.slane %v6248_v4, 5  ;;  %v6089_v29 = vsel %vm15812_vm1, %v5829_v27, %v6088_v28  ;;  %v11685_v53 = vcombine.low %v6217_v17, %v6227_v59  ;;  %v5849_v43 = vshrl.u32 %v12055_v20, 16  ;;  %v16019_v27 = vld [vmem:[#allocation2 + $0x2c] sm:$0x1] }
 0x26c   : > { %v5852_v63 = vshll.u32 %v12055_v20, 16  ;;  %6090 = vst [vmem:[#allocation2 + $0x78] sm:$0xf] %v6089_v29  ;;  %v6235_v60 = vor.u32 %v6234_v38, %v6231_v31  ;;  %v6245_v35 = vor.u32 %v6244_v61, %v6240_v3  ;;  %v5363_v21 = vadd.f32 %v15737_v49, %v5320_v56  ;;  %v5252_v20 = vpop.f32.mrf.mxu0 }
 0x26d   : > { %v11751_v57 = vrot.slane %v7146_v50, 9  ;;  %12736 = vmatprep.mubr.msk.bf16.mxu1 %vm6638_vm0, %v11685_v53  ;;  %v5851_v51 = vrot.slane %v5849_v43, 7  ;;  %v7208_v26 = vrot.slane %v15989_v0, 5  ;;  %v7211_v42 = vrot.slane %v15991_v44, 5  ;;  %v6159_v50 = vld [vmem:[#allocation2 + $0x18] sm:$0xf] }
 0x26e   : > { %v5325_v33 = vadd.f32 %v12724_v58, %v15764_v16  ;;  %v6236_v19 = vrot.slane %v6235_v60, 4  ;;  %v6246_v7 = vrot.slane %v6245_v35, 4  ;;  %vm5399_vm14 = vcmp.ge.f32.partialorder %v5363_v21, 0.0 }
 0x26f   : > { %v5435_v48 = vmul.f32 0.2, %v5363_v21  ;;  %v5854_v25 = vor.u32 %v5852_v63, %v5851_v51  ;;  %v5856_v31 = vrot.slane %v5851_v51, 4  ;;  %v7209_v28 = vsel %vm13648_vm7, %v11751_v57, %v7208_v26  ;;  %v6092_v57 = vld [vmem:[#allocation2 + $0x80] sm:$0x1] }
 0x270   : > { %v7210_v17 = vrot.slane %v7208_v26, 4  ;;  %v6241_v24 = vsel %vm13353_vm4, %v6236_v19, %v6240_v3  ;;  %v6251_v46 = vsel %vm13353_vm4, %v6246_v7, %v6250_v30  ;;  %v5368_v16 = vadd.f32 %v15737_v49, %v5325_v33 }
 0x271   : > { %v5471_v9 = vsel %vm5399_vm14, %v5363_v21, %v5435_v48  ;;  %v5855_v37 = vsel %vm15821_vm5, %v5847_v34, %v5854_v25  ;;  %v6100_v41 = vsel %vm15827_vm6, %v5856_v31, %v6099_v12  ;;  %v11686_v4 = vcombine.low %v6241_v24, %v6251_v46  ;;  %v11831_v21 = vld [vmem:[%s18109_s3 + $0x10] sm:$0xf]  ;;  %v6109_v24 = vld [vmem:[#allocation2 + $0x9c] sm:$0xf] }
 0x272   : > { %v12053_v56 = vpack.c.bf16 %v5471_v9, %v5471_v9  ;;  %6098 = vst.msk [vmem:[#allocation2 + $0x88] sm:$0xf] %vm5486_vm9, %v5855_v37  ;;  %6101 = vst [vmem:[#allocation2 + $0x8c] sm:$0x1] %v6100_v41  ;;  %v7212_v49 = vsel %vm13648_vm7, %v7210_v17, %v7211_v42  ;;  %vm5404_vm15 = vcmp.ge.f32.partialorder %v5368_v16, 0.0  ;;  %v11752_v40 = vrot.slane %v7147_v13, 9  ;;  %13053 = vmatprep.subr.msk.bf16.mxu0 %vm6687_vm8, %v11831_v21  ;;  %v12725_v9 = vpop.f32.mrf.mxu0 }
 0x273   : > { %v5440_v38 = vmul.f32 0.2, %v5368_v16  ;;  %12737 = vmatmul.mubr.msk.bf16.vlgmr.msra.gmra.mxu1 %vm6638_vm0, %v11686_v4  ;;  %v11768_v3 = vcombine.low %v7209_v28, %v7212_v49  ;;  %v7215_v61 = vrot.slane %v16011_v45, 5  ;;  %v7218_v58 = vrot.slane %v16019_v27, 5  ;;  %v11798_v21 = vld [vmem:[%s18109_s3 + $0xc] sm:$0xf] }
 0x274   : > { %v5832_v34 = vshrl.u32 %v12053_v56, 16  ;;  %v5835_v59 = vshll.u32 %v12053_v56, 16  ;;  %12769 = vmatpush3.bf16.msra.mxu1 %v15748_v55  ;;  %v5323_v29 = vadd.f32 %v5252_v20, %v15768_v47  ;;  %v6253_v53 = vshrl.u32 %v6159_v50, 16  ;;  %v16038_v55 = vld [vmem:[%s18108_s2] ss:$0 sm:$0xff] }
 0x275   : > { %v5476_v30 = vsel %vm5404_vm15, %v5368_v16, %v5440_v38  ;;  %12808 = vmatprep.mubr.msk.bf16.mxu0 %vm6638_vm0, %v11768_v3  ;;  %v7216_v60 = vsel %vm13648_vm7, %v11752_v40, %v7215_v61  ;;  %v7217_v35 = vrot.slane %v7215_v61, 4  ;;  %v6256_v12 = vshll.u32 %v6159_v50, 16  ;;  %v6161_v16 = vld [vmem:[#allocation2 + $0x24] sm:$0xf]  ;;  %13052 = vmatprep.subr.msk.bf16.mxu1 %vm6687_vm8, %v11798_v21  ;;  %v16286_v18 = vld [vmem:[#allocation2 + $0x78] sm:$0xf] }
 0x276   : > { %v5834_v43 = vrot.slane %v5832_v34, 7  ;;  %v12058_v63 = vpack.c.bf16 %v5476_v30, %v5476_v30  ;;  %v5366_v47 = vadd.f32 %v16038_v55, %v5323_v29  ;;  %v6255_v51 = vrot.slane %v6253_v53, 4  ;;  %v6102_v30 = vld [vmem:[#allocation2 + $0x90] sm:$0xf] }
 0x277   : > { %v6262_v26 = vshll.u32 %v15989_v0, 16  ;;  %v7219_v48 = vsel %vm13648_vm7, %v7217_v35, %v7218_v58  ;;  %v6258_v31 = vrot.slane %v6256_v12, 5  ;;  %v6266_v54 = vshrl.u32 %v15989_v0, 16  ;;  %v7148_v35 = vld [vmem:[#allocation2 + $0x30] sm:$0xe]  ;;  %v5255_v12 = vpop.f32.mrf.mxu0 }
 0x278   : > { %v5837_v42 = vor.u32 %v5835_v59, %v5834_v43  ;;  %v5839_v33 = vrot.slane %v5834_v43, 4  ;;  %v5875_v19 = vshrl.u32 %v12058_v63, 16  ;;  %v5878_v7 = vshll.u32 %v12058_v63, 16 }
 0x279   : > { %vm5402_vm2 = vcmp.ge.f32.partialorder %v5366_v47, 0.0  ;;  %v5438_v25 = vmul.f32 0.2, %v5366_v47  ;;  %v11769_v46 = vcombine.low %v7216_v60, %v7219_v48  ;;  %v6259_v37 = vor.u32 %v6258_v31, %v6255_v51 }
 0x27a   : > { %v5838_v28 = vsel %vm15821_vm5, %v5830_v11, %v5837_v42  ;;  %v6093_v17 = vsel %vm15827_vm6, %v5839_v33, %v6092_v57  ;;  %v16051_v13 = vrot.slane %v5875_v19, 7  ;;  %v6264_v41 = vrot.slane %v6262_v26, 5 }
 0x27b   : > { %6091 = vst.msk [vmem:[#allocation2 + $0x7c] sm:$0xf] %vm5486_vm9, %v5838_v28  ;;  %6094 = vst [vmem:[#allocation2 + $0x80] sm:$0x1] %v6093_v17  ;;  %v5474_v50 = vsel %vm5402_vm2, %v5366_v47, %v5438_v25  ;;  %12809 = vmatmul.mubr.msk.bf16.gmra.mxu0 %vm6638_vm0, %v11769_v46  ;;  %v6272_v20 = vshll.u32 %v15991_v44, 16  ;;  %v6260_v49 = vrot.slane %v6259_v37, 4  ;;  %v5326_v40 = vadd.f32 %v12725_v9, %v15773_v2 }
 0x27c   : > { %v5880_v4 = vor.u32 %v5878_v7, %v16051_v13  ;;  %v5881_v11 = vrot.slane %v16051_v13, 4  ;;  %v12056_v56 = vpack.c.bf16 %v5474_v50, %v5474_v50  ;;  %v6268_v38 = vrot.slane %v6266_v54, 4  ;;  %v16080_v28 = vld [vmem:[#allocation2 + $0x38] sm:$0x1]  ;;  %v7149_v54 = vld [vmem:[#allocation2 + $0x3c] sm:$0xe] }
 0x27d   : > { %v6277_v34 = vshrl.u32 %v6161_v16, 16  ;;  %v6274_v0 = vrot.slane %v6272_v20, 5  ;;  %v6265_v58 = vsel %vm13353_vm4, %v6260_v49, %v6264_v41  ;;  %v5369_v53 = vadd.f32 %v16038_v55, %v5326_v40 }
 0x27e   : > { %v6110_v59 = vsel %vm15812_vm1, %v5880_v4, %v6109_v24  ;;  %v5858_v3 = vshrl.u32 %v12056_v56, 16  ;;  %v5861_v61 = vshll.u32 %v12056_v56, 16  ;;  %v6269_v29 = vor.u32 %v6268_v38, %v6264_v41  ;;  %v12728_v41 = vpop.f32.mrf.mxu0  ;;  %v6113_v38 = vld [vmem:[#allocation2 + $0xa4] sm:$0x1] }
 0x27f   : > { %6111 = vst [vmem:[#allocation2 + $0x9c] sm:$0xf] %v6110_v59  ;;  %v6279_v44 = vrot.slane %v6277_v34, 4  ;;  %v6280_v63 = vshll.u32 %v6161_v16, 16  ;;  %v6286_v2 = vshll.u32 %v16011_v45, 16  ;;  %v6290_v60 = vshrl.u32 %v16011_v45, 16 }
 0x280   : > { %v16065_v43 = vrot.slane %v5858_v3, 7  ;;  %v6270_v57 = vrot.slane %v6269_v29, 4  ;;  %vm5405_vm3 = vcmp.ge.f32.partialorder %v5369_v53, 0.0  ;;  %v5441_v47 = vmul.f32 0.2, %v5369_v53 }
 0x281   : > { %v6296_v51 = vshll.u32 %v16019_v27, 16  ;;  %v6282_v33 = vrot.slane %v6280_v63, 5  ;;  %v6288_v19 = vrot.slane %v6286_v2, 5  ;;  %v16076_v45 = vld [vmem:[#allocation2 + $0x34] sm:$0xf]  ;;  %v6292_v25 = vrot.slane %v6290_v60, 4 }
 0x282   : > { %v5863_v26 = vor.u32 %v5861_v61, %v16065_v43  ;;  %v5864_v42 = vrot.slane %v16065_v43, 4  ;;  %v6275_v7 = vsel %vm13353_vm4, %v6270_v57, %v6274_v0  ;;  %v5477_v48 = vsel %vm5405_vm3, %v5369_v53, %v5441_v47  ;;  %v6163_v2 = vld [vmem:[#allocation2 + $0x30] sm:$0xf] }
 0x283   : > { %v6298_v31 = vrot.slane %v6296_v51, 5  ;;  %v11687_v17 = vcombine.low %v6265_v58, %v6275_v7  ;;  %v12059_v24 = vpack.c.bf16 %v5477_v48, %v5477_v48  ;;  %v6283_v46 = vor.u32 %v6282_v33, %v6279_v44  ;;  %v16096_v58 = vld [vmem:[#allocation2 + $0x44] sm:$0x1] }
 0x284   : > { %v6103_v27 = vsel %vm15812_vm1, %v5863_v26, %v6102_v30  ;;  %v6293_v9 = vor.u32 %v6292_v25, %v6288_v19  ;;  %v5324_v16 = vadd.f32 %v5255_v12, %v15776_v32  ;;  %v11753_v50 = vrot.slane %v7148_v35, 9  ;;  %v16094_v30 = vld [vmem:[#allocation2 + $0x40] sm:$0xf]  ;;  %v5268_v26 = vpop.f32.mrf.mxu0 }
 0x285   : > { %6104 = vst [vmem:[#allocation2 + $0x90] sm:$0xf] %v6103_v27  ;;  %v7222_v37 = vrot.slane %v16076_v45, 5  ;;  %12740 = vmatprep.mubr.msk.bf16.mxu1 %vm6638_vm0, %v11687_v17  ;;  %v5883_v4 = vshrl.u32 %v12059_v24, 16  ;;  %v5886_v56 = vshll.u32 %v12059_v24, 16  ;;  %v6284_v20 = vrot.slane %v6283_v46, 4 }
 0x286   : > { %v7225_v49 = vrot.slane %v16080_v28, 5  ;;  %v6294_v40 = vrot.slane %v6293_v9, 4  ;;  %v5367_v34 = vadd.f32 %v16038_v55, %v5324_v16  ;;  %v5329_v0 = vadd.f32 %v12728_v41, %v15780_v1  ;;  %v6106_v46 = vld [vmem:[#allocation2 + $0x98] sm:$0x1] }
 0x287   : > { %v7223_v59 = vsel %vm13648_vm7, %v11753_v50, %v7222_v37  ;;  %v7224_v32 = vrot.slane %v7222_v37, 4  ;;  %v5885_v3 = vrot.slane %v5883_v4, 7  ;;  %v6289_v61 = vsel %vm13353_vm4, %v6284_v20, %v6288_v19 }
 0x288   : > { %v11754_v29 = vrot.slane %v7149_v54, 9  ;;  %v6299_v53 = vsel %vm13353_vm4, %v6294_v40, %v6298_v31  ;;  %vm5403_vm11 = vcmp.ge.f32.partialorder %v5367_v34, 0.0  ;;  %v5439_v44 = vmul.f32 0.2, %v5367_v34 }
 0x289   : > { %v7226_v63 = vsel %vm13648_vm7, %v7224_v32, %v7225_v49  ;;  %v5888_v60 = vor.u32 %v5886_v56, %v5885_v3  ;;  %v5890_v35 = vrot.slane %v5885_v3, 4  ;;  %v11688_v21 = vcombine.low %v6289_v61, %v6299_v53  ;;  %v12729_v3 = vpop.f32.mrf.mxu0  ;;  %v6165_v53 = vld [vmem:[#allocation2 + $0x3c] sm:$0xf] }
 0x28a   : > { %v11770_v57 = vcombine.low %v7223_v59, %v7226_v63  ;;  %v5475_v47 = vsel %vm5403_vm11, %v5367_v34, %v5439_v44  ;;  %v5372_v1 = vadd.f32 %v16038_v55, %v5329_v0  ;;  %v7229_v51 = vrot.slane %v16094_v30, 5 }
 0x28b   : > { %v7232_v12 = vrot.slane %v16096_v58, 5  ;;  %v5889_v33 = vsel %vm15821_vm5, %v5881_v11, %v5888_v60  ;;  %v6114_v19 = vsel %vm15827_vm6, %v5890_v35, %v6113_v38  ;;  %12741 = vmatmul.mubr.msk.bf16.gmra.mxu1 %vm6638_vm0, %v11688_v21  ;;  %v12057_v7 = vpack.c.bf16 %v5475_v47, %v5475_v47 }
 0x28c   : > { %12812 = vmatprep.mubr.msk.bf16.mxu0 %vm6638_vm0, %v11770_v57  ;;  %v6301_v48 = vshrl.u32 %v6163_v2, 16  ;;  %6112 = vst.msk [vmem:[#allocation2 + $0xa0] sm:$0xf] %vm5486_vm9, %v5889_v33  ;;  %6115 = vst [vmem:[#allocation2 + $0xa4] sm:$0x1] %v6114_v19  ;;  %vm5408_vm12 = vcmp.ge.f32.partialorder %v5372_v1, 0.0  ;;  %v7230_v13 = vsel %vm13648_vm7, %v11754_v29, %v7229_v51  ;;  %v5327_v17 = vadd.f32 %v5268_v26, %v15785_v8 }
 0x28d   : > { %v5444_v25 = vmul.f32 0.2, %v5372_v1  ;;  %v7231_v31 = vrot.slane %v7229_v51, 4  ;;  %v5866_v27 = vshrl.u32 %v12057_v7, 16  ;;  %v5869_v11 = vshll.u32 %v12057_v7, 16 }
 0x28e   : > { %v6303_v24 = vrot.slane %v6301_v48, 4  ;;  %v6304_v50 = vshll.u32 %v6163_v2, 16  ;;  %v6310_v37 = vshll.u32 %v16076_v45, 16  ;;  %v5370_v56 = vadd.f32 %v16038_v55, %v5327_v17  ;;  %v6123_v2 = vld [vmem:[#allocation2 + $0xb4] sm:$0xf] }
 0x28f   : > { %v5480_v9 = vsel %vm5408_vm12, %v5372_v1, %v5444_v25  ;;  %v7233_v16 = vsel %vm13648_vm7, %v7231_v31, %v7232_v12  ;;  %v5868_v41 = vrot.slane %v5866_v27, 7  ;;  %v6314_v38 = vshrl.u32 %v16076_v45, 16 }
 0x290   : > { %v12062_v54 = vpack.c.bf16 %v5480_v9, %v5480_v9  ;;  %v11771_v4 = vcombine.low %v7230_v13, %v7233_v16  ;;  %v6306_v20 = vrot.slane %v6304_v50, 5  ;;  %v6312_v49 = vrot.slane %v6310_v37, 5  ;;  %v6116_v9 = vld [vmem:[#allocation2 + $0xa8] sm:$0xf] }
 0x291   : > { %v6320_v8 = vshll.u32 %v16080_v28, 16  ;;  %v5871_v40 = vor.u32 %v5869_v11, %v5868_v41  ;;  %v5873_v34 = vrot.slane %v5868_v41, 4  ;;  %vm5406_vm13 = vcmp.ge.f32.partialorder %v5370_v56, 0.0 }
 0x292   : > { %v5909_v59 = vshrl.u32 %v12062_v54, 16  ;;  %v5912_v32 = vshll.u32 %v12062_v54, 16  ;;  %12813 = vmatmul.mubr.msk.bf16.gmra.mxu0 %vm6638_vm0, %v11771_v4  ;;  %v5442_v61 = vmul.f32 0.2, %v5370_v56  ;;  %v6307_v0 = vor.u32 %v6306_v20, %v6303_v24  ;;  %v7150_v54 = vld [vmem:[#allocation2 + $0x48] sm:$0xe] }
 0x293   : > { %v6316_v29 = vrot.slane %v6314_v38, 4  ;;  %v5872_v44 = vsel %vm15821_vm5, %v5864_v42, %v5871_v40  ;;  %v6107_v45 = vsel %vm15827_vm6, %v5873_v34, %v6106_v46  ;;  %v6322_v63 = vrot.slane %v6320_v8, 5  ;;  %v16152_v38 = vld [vmem:[#allocation2 + $0x4c] sm:$0xf]  ;;  %v7151_v8 = vld [vmem:[#allocation2 + $0x54] sm:$0xe] }
 0x294   : > { %v16130_v28 = vrot.slane %v5909_v59, 7  ;;  %6105 = vst.msk [vmem:[#allocation2 + $0x94] sm:$0xf] %vm5486_vm9, %v5872_v44  ;;  %6108 = vst [vmem:[#allocation2 + $0x98] sm:$0x1] %v6107_v45  ;;  %v5478_v60 = vsel %vm5406_vm13, %v5370_v56, %v5442_v61  ;;  %v6308_v35 = vrot.slane %v6307_v0, 4  ;;  %v5330_v57 = vadd.f32 %v12729_v3, %v15789_v36  ;;  %v5271_v36 = vpop.f32.mrf.mxu0 }
 0x295   : > { %v6317_v21 = vor.u32 %v6316_v29, %v6312_v49  ;;  %v12060_v42 = vpack.c.bf16 %v5478_v60, %v5478_v60  ;;  %v6325_v1 = vshrl.u32 %v6165_v53, 16  ;;  %v6328_v33 = vshll.u32 %v6165_v53, 16  ;;  %v16159_v29 = vld [vmem:[#allocation2 + $0x58] sm:$0xf] }
 0x296   : > { %v5914_v43 = vor.u32 %v5912_v32, %v16130_v28  ;;  %v5915_v47 = vrot.slane %v16130_v28, 4  ;;  %v6313_v51 = vsel %vm13353_vm4, %v6308_v35, %v6312_v49  ;;  %v5373_v26 = vadd.f32 %v16038_v55, %v5330_v57 }
 0x297   : > { %v6318_v12 = vrot.slane %v6317_v21, 4  ;;  %v5892_v7 = vshrl.u32 %v12060_v42, 16  ;;  %v5895_v48 = vshll.u32 %v12060_v42, 16  ;;  %v6327_v25 = vrot.slane %v6325_v1, 4  ;;  %v6127_v21 = vld [vmem:[#allocation2 + $0xbc] sm:$0x1] }
 0x298   : > { %v6124_v19 = vsel %vm15812_vm1, %v5914_v43, %v6123_v2  ;;  %vm5409_vm14 = vcmp.ge.f32.partialorder %v5373_v26, 0.0  ;;  %v5445_v31 = vmul.f32 0.2, %v5373_v26  ;;  %v6330_v27 = vrot.slane %v6328_v33, 5 }
 0x299   : > { %6125 = vst [vmem:[#allocation2 + $0xb4] sm:$0xf] %v6124_v19  ;;  %v6323_v13 = vsel %vm13353_vm4, %v6318_v12, %v6322_v63  ;;  %v16143_v11 = vrot.slane %v5892_v7, 7  ;;  %v6334_v24 = vshll.u32 %v16094_v30, 16  ;;  %v6338_v46 = vshrl.u32 %v16094_v30, 16 }
 0x29a   : > { %v11689_v17 = vcombine.low %v6313_v51, %v6323_v13  ;;  %v5481_v16 = vsel %vm5409_vm14, %v5373_v26, %v5445_v31  ;;  %v6331_v50 = vor.u32 %v6330_v27, %v6327_v25  ;;  %v6344_v37 = vshll.u32 %v16096_v58, 16  ;;  %v16155_v58 = vld [vmem:[#allocation2 + $0x50] sm:$0x1]  ;;  %v16169_v19 = vld [vmem:[#allocation2 + $0x5c] sm:$0x1] }
 0x29b   : > { %v5328_v41 = vadd.f32 %v5271_v36, %v15791_v10  ;;  %v5897_v4 = vor.u32 %v5895_v48, %v16143_v11  ;;  %v5898_v56 = vrot.slane %v16143_v11, 4  ;;  %v12063_v20 = vpack.c.bf16 %v5481_v16, %v5481_v16  ;;  %v12732_v10 = vpop.f32.mrf.mxu0 }
 0x29c   : > { %12744 = vmatprep.mubr.msk.bf16.mxu1 %vm6638_vm0, %v11689_v17  ;;  %v6336_v49 = vrot.slane %v6334_v24, 5  ;;  %v6332_v30 = vrot.slane %v6331_v50, 4  ;;  %v6340_v40 = vrot.slane %v6338_v46, 4  ;;  %v6346_v34 = vrot.slane %v6344_v37, 5  ;;  %v6167_v24 = vld [vmem:[#allocation2 + $0x48] sm:$0xf] }
 0x29d   : > { %v5371_v59 = vadd.f32 %v16038_v55, %v5328_v41  ;;  %v6117_v32 = vsel %vm15812_vm1, %v5897_v4, %v6116_v9  ;;  %v5917_v3 = vshrl.u32 %v12063_v20, 16  ;;  %v5920_v61 = vshll.u32 %v12063_v20, 16  ;;  %v5284_v17 = vpop.f32.mrf.mxu0  ;;  %v6120_v41 = vld [vmem:[#allocation2 + $0xb0] sm:$0x1] }
 0x29e   : > { %v11755_v0 = vrot.slane %v7150_v54, 9  ;;  %6118 = vst [vmem:[#allocation2 + $0xa8] sm:$0xf] %v6117_v32  ;;  %v6337_v53 = vsel %vm13353_vm4, %v6332_v30, %v6336_v49  ;;  %v6341_v44 = vor.u32 %v6340_v40, %v6336_v49  ;;  %v7236_v2 = vrot.slane %v16152_v38, 5 }
 0x29f   : > { %vm5407_vm15 = vcmp.ge.f32.partialorder %v5371_v59, 0.0  ;;  %v5443_v45 = vmul.f32 0.2, %v5371_v59  ;;  %v5919_v63 = vrot.slane %v5917_v3, 7  ;;  %v7239_v60 = vrot.slane %v16155_v58, 5 }
 0x2a0   : > { %v5333_v35 = vadd.f32 %v12732_v10, %v15794_v62  ;;  %v6342_v57 = vrot.slane %v6341_v44, 4  ;;  %v11756_v42 = vrot.slane %v7151_v8, 9  ;;  %v7243_v1 = vrot.slane %v16159_v29, 5 }
 0x2a1   : > { %v5479_v43 = vsel %vm5407_vm15, %v5371_v59, %v5443_v45  ;;  %v5922_v51 = vor.u32 %v5920_v61, %v5919_v63  ;;  %v5924_v12 = vrot.slane %v5919_v63, 4  ;;  %v7237_v33 = vsel %vm13648_vm7, %v11755_v0, %v7236_v2  ;;  %v12733_v61 = vpop.f32.mrf.mxu0  ;;  %v6169_v0 = vld [vmem:[#allocation2 + $0x54] sm:$0xf] }
 0x2a2   : > { %v12061_v26 = vpack.c.bf16 %v5479_v43, %v5479_v43  ;;  %v6347_v7 = vsel %vm13353_vm4, %v6342_v57, %v6346_v34  ;;  %v7238_v48 = vrot.slane %v7236_v2, 4  ;;  %v5376_v62 = vadd.f32 %v16038_v55, %v5333_v35  ;;  %v6137_v57 = vld [vmem:[#allocation2 + $0xcc] sm:$0xf] }
 0x2a3   : > { %v7244_v25 = vsel %vm13648_vm7, %v11756_v42, %v7243_v1  ;;  %v5923_v36 = vsel %vm15821_vm5, %v5915_v47, %v5922_v51  ;;  %v6128_v13 = vsel %vm15827_vm6, %v5924_v12, %v6127_v21  ;;  %v11690_v31 = vcombine.low %v6337_v53, %v6347_v7 }
 0x2a4   : > { %v5900_v27 = vshrl.u32 %v12061_v26, 16  ;;  %6126 = vst.msk [vmem:[#allocation2 + $0xb8] sm:$0xf] %vm5486_vm9, %v5923_v36  ;;  %6129 = vst [vmem:[#allocation2 + $0xbc] sm:$0x1] %v6128_v13  ;;  %v5903_v46 = vshll.u32 %v12061_v26, 16  ;;  %v7240_v9 = vsel %vm13648_vm7, %v7238_v48, %v7239_v60  ;;  %v5331_v4 = vadd.f32 %v5284_v17, %v15798_v52 }
 0x2a5   : > { %vm5412_vm2 = vcmp.ge.f32.partialorder %v5376_v62, 0.0  ;;  %v5448_v16 = vmul.f32 0.2, %v5376_v62  ;;  %12745 = vmatmul.mubr.msk.bf16.gmra.mxu1 %vm6638_vm0, %v11690_v31  ;;  %v11772_v47 = vcombine.low %v7237_v33, %v7240_v9  ;;  %v7245_v50 = vrot.slane %v7243_v1, 4  ;;  %v5287_v31 = vpop.f32.mrf.mxu0 }
 0x2a6   : > { %v5902_v28 = vrot.slane %v5900_v27, 7  ;;  %v7246_v37 = vrot.slane %v16169_v19, 5  ;;  %v6349_v20 = vshrl.u32 %v6167_v24, 16  ;;  %v6352_v49 = vshll.u32 %v6167_v24, 16 }
 0x2a7   : > { %v5484_v54 = vsel %vm5412_vm2, %v5376_v62, %v5448_v16  ;;  %12816 = vmatprep.mubr.msk.bf16.mxu0 %vm6638_vm0, %v11772_v47  ;;  %v5374_v10 = vadd.f32 %v16038_v55, %v5331_v4  ;;  %v6358_v60 = vshll.u32 %v16152_v38, 16  ;;  %v6362_v11 = vshrl.u32 %v16152_v38, 16  ;;  %v6130_v47 = vld [vmem:[#allocation2 + $0xc0] sm:$0xf] }
 0x2a8   : > { %v5905_v8 = vor.u32 %v5903_v46, %v5902_v28  ;;  %v5907_v30 = vrot.slane %v5902_v28, 4  ;;  %v12066_v40 = vpack.c.bf16 %v5484_v54, %v5484_v54  ;;  %v7247_v34 = vsel %vm13648_vm7, %v7245_v50, %v7246_v37 }
 0x2a9   : > { %v11773_v59 = vcombine.low %v7244_v25, %v7247_v34  ;;  %v6351_v32 = vrot.slane %v6349_v20, 4  ;;  %v6354_v3 = vrot.slane %v6352_v49, 5  ;;  %vm5410_vm3 = vcmp.ge.f32.partialorder %v5374_v10, 0.0 }
 0x2aa   : > { %v5906_v52 = vsel %vm15821_vm5, %v5898_v56, %v5905_v8  ;;  %v6121_v53 = vsel %vm15827_vm6, %v5907_v30, %v6120_v41  ;;  %v5943_v44 = vshrl.u32 %v12066_v40, 16  ;;  %v5946_v45 = vshll.u32 %v12066_v40, 16  ;;  %v16225_v30 = vld [vmem:[#allocation2 + $0x64] sm:$0xf]  ;;  %v7152_v40 = vld [vmem:[#allocation2 + $0x60] sm:$0xe] }
 0x2ab   : > { %6119 = vst.msk [vmem:[#allocation2 + $0xac] sm:$0xf] %vm5486_vm9, %v5906_v52  ;;  %6122 = vst [vmem:[#allocation2 + $0xb0] sm:$0x1] %v6121_v53  ;;  %12817 = vmatmul.mubr.msk.bf16.gmra.mxu0 %vm6638_vm0, %v11773_v59  ;;  %v5446_v63 = vmul.f32 0.2, %v5374_v10  ;;  %v6355_v2 = vor.u32 %v6354_v3, %v6351_v32  ;;  %v5334_v21 = vadd.f32 %v12733_v61, %v15801_v5 }
 0x2ac   : > { %v16201_v35 = vrot.slane %v5943_v44, 7  ;;  %v6368_v56 = vshll.u32 %v16155_v58, 16  ;;  %v6360_v1 = vrot.slane %v6358_v60, 5  ;;  %v6373_v51 = vshrl.u32 %v6169_v0, 16 }
 0x2ad   : > { %v5482_v43 = vsel %vm5410_vm3, %v5374_v10, %v5446_v63  ;;  %v6356_v42 = vrot.slane %v6355_v2, 4  ;;  %v6364_v7 = vrot.slane %v6362_v11, 4  ;;  %v5377_v38 = vadd.f32 %v16038_v55, %v5334_v21  ;;  %v16227_v10 = vld [vmem:[#allocation2 + $0x68] sm:$0x1]  ;;  %v16234_v63 = vld [vmem:[#allocation2 + $0x70] sm:$0xf] }
 0x2ae   : > { %v5948_v12 = vor.u32 %v5946_v45, %v16201_v35  ;;  %v5949_v26 = vrot.slane %v16201_v35, 4  ;;  %v12064_v33 = vpack.c.bf16 %v5482_v43, %v5482_v43  ;;  %v6370_v62 = vrot.slane %v6368_v56, 5  ;;  %v6141_v11 = vld [vmem:[#allocation2 + $0xd4] sm:$0x1]  ;;  %v6134_v35 = vld [vmem:[#allocation2 + $0xc8] sm:$0x1] }
 0x2af   : > { %v6361_v48 = vsel %vm13353_vm4, %v6356_v42, %v6360_v1  ;;  %v6375_v58 = vrot.slane %v6373_v51, 4  ;;  %v6365_v13 = vor.u32 %v6364_v7, %v6360_v1  ;;  %vm5413_vm11 = vcmp.ge.f32.partialorder %v5377_v38, 0.0 }
 0x2b0   : > { %v6138_v5 = vsel %vm15812_vm1, %v5948_v12, %v6137_v57  ;;  %v5926_v25 = vshrl.u32 %v12064_v33, 16  ;;  %v5929_v36 = vshll.u32 %v12064_v33, 16  ;;  %v5449_v27 = vmul.f32 0.2, %v5377_v38 }
 0x2b1   : > { %6139 = vst [vmem:[#allocation2 + $0xcc] sm:$0xf] %v6138_v5  ;;  %v6376_v17 = vshll.u32 %v6169_v0, 16  ;;  %v6382_v24 = vshll.u32 %v16159_v29, 16  ;;  %v6366_v9 = vrot.slane %v6365_v13, 4  ;;  %v6386_v16 = vshrl.u32 %v16159_v29, 16 }
 0x2b2   : > { %6152 = vst.msk [vmem:[#allocation2 + $0xcc] sm:$0xf] %vm5486_vm9, %v18327_v6  ;;  %v16216_v46 = vrot.slane %v5926_v25, 7  ;;  %v6392_v28 = vshll.u32 %v16169_v19, 16  ;;  %v5485_v50 = vsel %vm5413_vm11, %v5377_v38, %v5449_v27  ;;  %v5332_v54 = vadd.f32 %v5287_v31, %v15805_v15  ;;  %v7153_v0 = vld [vmem:[#allocation2 + $0x6c] sm:$0xe] }
 0x2b3   : > { %v6378_v37 = vrot.slane %v6376_v17, 5  ;;  %v6384_v41 = vrot.slane %v6382_v24, 5  ;;  %v6371_v49 = vsel %vm13353_vm4, %v6366_v9, %v6370_v62  ;;  %v12067_v8 = vpack.c.bf16 %v5485_v50, %v5485_v50  ;;  %v16246_v38 = vld [vmem:[#allocation2 + $0x60] sm:$0xf]  ;;  %v16254_v13 = vld [vmem:[#allocation2 + $0x6c] sm:$0xf] }
 0x2b4   : > { %v5931_v4 = vor.u32 %v5929_v36, %v16216_v46  ;;  %v5932_v20 = vrot.slane %v16216_v46, 4  ;;  %v11691_v29 = vcombine.low %v6361_v48, %v6371_v49  ;;  %v6388_v19 = vrot.slane %v6386_v16, 4  ;;  %v6197_v48 = vld [vmem:[#allocation2 + $0x74] sm:$0x1] }
 0x2b5   : > { %v6379_v34 = vor.u32 %v6378_v37, %v6375_v58  ;;  %v6394_v59 = vrot.slane %v6392_v28, 5  ;;  %v5951_v32 = vshrl.u32 %v12067_v8, 16  ;;  %v5954_v3 = vshll.u32 %v12067_v8, 16 }
 0x2b6   : > { %v6131_v15 = vsel %vm15812_vm1, %v5931_v4, %v6130_v47  ;;  %v5375_v61 = vadd.f32 %v16038_v55, %v5332_v54  ;;  %12748 = vmatprep.mubr.msk.bf16.mxu1 %vm6638_vm0, %v11691_v29  ;;  %v6389_v53 = vor.u32 %v6388_v19, %v6384_v41  ;;  %v11757_v44 = vrot.slane %v7152_v40, 9  ;;  %v7154_v19 = vld [vmem:[#allocation2 + $0x78] sm:$0xe] }
 0x2b7   : > { %6132 = vst [vmem:[#allocation2 + $0xc0] sm:$0xf] %v6131_v15  ;;  %v6380_v52 = vrot.slane %v6379_v34, 4  ;;  %v7250_v45 = vrot.slane %v16225_v30, 5  ;;  %v5953_v2 = vrot.slane %v5951_v32, 7  ;;  %v7253_v39 = vrot.slane %v16227_v10, 5 }
 0x2b8   : > { %vm5411_vm12 = vcmp.ge.f32.partialorder %v5375_v61, 0.0  ;;  %v5447_v60 = vmul.f32 0.2, %v5375_v61  ;;  %v6390_v56 = vrot.slane %v6389_v53, 4  ;;  %v11758_v51 = vrot.slane %v7153_v0, 9 }
 0x2b9   : > { %v6385_v55 = vsel %vm13353_vm4, %v6380_v52, %v6384_v41  ;;  %v7251_v21 = vsel %vm13648_vm7, %v11757_v44, %v7250_v45  ;;  %v7252_v57 = vrot.slane %v7250_v45, 4  ;;  %v5956_v43 = vor.u32 %v5954_v3, %v5953_v2  ;;  %v7155_v44 = vld [vmem:[#allocation2 + $0x84] sm:$0xe] }
 0x2ba   : > { %v5958_v42 = vrot.slane %v5953_v2, 4  ;;  %v5483_v1 = vsel %vm5411_vm12, %v5375_v61, %v5447_v60  ;;  %v6395_v12 = vsel %vm13353_vm4, %v6390_v56, %v6394_v59  ;;  %v7257_v62 = vrot.slane %v16234_v63, 5  ;;  %v16274_v61 = vld [vmem:[#allocation2 + $0x7c] sm:$0xf] }
 0x2bb   : > { %v12065_v33 = vpack.c.bf16 %v5483_v1, %v5483_v1  ;;  %v7254_v7 = vsel %vm13648_vm7, %v7252_v57, %v7253_v39  ;;  %v5957_v58 = vsel %vm15821_vm5, %v5949_v26, %v5956_v43  ;;  %v11692_v25 = vcombine.low %v6385_v55, %v6395_v12  ;;  %v6198_v39 = vld [vmem:[#allocation2 + $0x80] sm:$0x1]  ;;  %v6199_v1 = vld [vmem:[#allocation2 + $0x8c] sm:$0x1] }
 0x2bc   : > { %v6142_v5 = vsel %vm15827_vm6, %v5958_v42, %v6141_v11  ;;  %v11774_v36 = vcombine.low %v7251_v21, %v7254_v7  ;;  %6140 = vst.msk [vmem:[#allocation2 + $0xd0] sm:$0xf] %vm5486_vm9, %v5957_v58  ;;  %v7258_v17 = vsel %vm13648_vm7, %v11758_v51, %v7257_v62  ;;  %v7259_v24 = vrot.slane %v7257_v62, 4  ;;  %v16291_v42 = vld [vmem:[#allocation2 + $0x88] sm:$0xf] }
 0x2bd   : > { %6143 = vst [vmem:[#allocation2 + $0xd4] sm:$0x1] %v6142_v5  ;;  %v5934_v31 = vshrl.u32 %v12065_v33, 16  ;;  %v5937_v27 = vshll.u32 %v12065_v33, 16  ;;  %6153 = vst.msk [vmem:[#allocation2 + $0xd0] sm:$0xf] %vm5486_vm9, %v18327_v6  ;;  %12749 = vmatmul.mubr.msk.bf16.gmra.mxu1 %vm6638_vm0, %v11692_v25 }
 0x2be   : > { %6154 = vst.msk [vmem:[#allocation2 + $0xd4] sm:$0x1] %vm5489_vm10, %v18327_v6  ;;  %12820 = vmatprep.mubr.msk.bf16.mxu0 %vm6638_vm0, %v11774_v36  ;;  %v7260_v26 = vrot.slane %v6197_v48, 5  ;;  %v6397_v9 = vshrl.u32 %v16246_v38, 16  ;;  %v6400_v16 = vshll.u32 %v16246_v38, 16  ;;  %v6406_v28 = vshll.u32 %v16225_v30, 16 }
 0x2bf   : > { %v5936_v47 = vrot.slane %v5934_v31, 7  ;;  %v6410_v50 = vshrl.u32 %v16225_v30, 16  ;;  %v6416_v37 = vshll.u32 %v16227_v10, 16  ;;  %v6421_v41 = vshrl.u32 %v16254_v13, 16 }
 0x2c0   : > { %v7261_v6 = vsel %vm13648_vm7, %v7259_v24, %v7260_v26  ;;  %v6399_v54 = vrot.slane %v6397_v9, 4  ;;  %v6402_v4 = vrot.slane %v6400_v16, 5  ;;  %v6408_v49 = vrot.slane %v6406_v28, 5  ;;  %v16305_v26 = vld [vmem:[#allocation2 + $0x84] sm:$0xf] }
 0x2c1   : > { %v5939_v8 = vor.u32 %v5937_v27, %v5936_v47  ;;  %v5941_v40 = vrot.slane %v5936_v47, 4  ;;  %v11775_v29 = vcombine.low %v7258_v17, %v7261_v6  ;;  %v6412_v34 = vrot.slane %v6410_v50, 4 }
 0x2c2   : > { %v6403_v59 = vor.u32 %v6402_v4, %v6399_v54  ;;  %v6418_v15 = vrot.slane %v6416_v37, 5  ;;  %v6423_v32 = vrot.slane %v6421_v41, 4  ;;  %v6424_v3 = vshll.u32 %v16254_v13, 16  ;;  %v7156_v54 = vld [vmem:[#allocation2 + $0x90] sm:$0xe] }
 0x2c3   : > { %v5940_v10 = vsel %vm15821_vm5, %v5932_v20, %v5939_v8  ;;  %v6135_v0 = vsel %vm15827_vm6, %v5941_v40, %v6134_v35  ;;  %12821 = vmatmul.mubr.msk.bf16.gmra.mxu0 %vm6638_vm0, %v11775_v29  ;;  %v6413_v52 = vor.u32 %v6412_v34, %v6408_v49  ;;  %v6430_v53 = vshll.u32 %v16234_v63, 16 }
 0x2c4   : > { %6133 = vst.msk [vmem:[#allocation2 + $0xc4] sm:$0xf] %vm5486_vm9, %v5940_v10  ;;  %6136 = vst [vmem:[#allocation2 + $0xc8] sm:$0x1] %v6135_v0  ;;  %v6404_v45 = vrot.slane %v6403_v59, 4  ;;  %v6426_v2 = vrot.slane %v6424_v3, 5 }
 0x2c5   : > { %v6434_v60 = vshrl.u32 %v16234_v63, 16  ;;  %v6440_v46 = vshll.u32 %v6197_v48, 16  ;;  %v6414_v20 = vrot.slane %v6413_v52, 4  ;;  %v6432_v22 = vrot.slane %v6430_v53, 5  ;;  %v6200_v52 = vld [vmem:[#allocation2 + $0x98] sm:$0x1] }
 0x2c6   : > { %v11759_v11 = vrot.slane %v7154_v19, 9  ;;  %v7264_v55 = vrot.slane %v16274_v61, 5  ;;  %v6409_v56 = vsel %vm13353_vm4, %v6404_v45, %v6408_v49  ;;  %v6427_v21 = vor.u32 %v6426_v2, %v6423_v32  ;;  %v7157_v53 = vld [vmem:[#allocation2 + $0x9c] sm:$0xe] }
 0x2c7   : > { %v6436_v57 = vrot.slane %v6434_v60, 4  ;;  %v6442_v43 = vrot.slane %v6440_v46, 5  ;;  %v6419_v63 = vsel %vm13353_vm4, %v6414_v20, %v6418_v15  ;;  %v7267_v33 = vrot.slane %v6198_v39, 5  ;;  %v16317_v15 = vld [vmem:[#allocation2 + $0x94] sm:$0xf] }
 0x2c8   : > { %v7265_v51 = vsel %vm13648_vm7, %v11759_v11, %v7264_v55  ;;  %v7266_v12 = vrot.slane %v7264_v55, 4  ;;  %v11693_v7 = vcombine.low %v6409_v56, %v6419_v63  ;;  %v6428_v48 = vrot.slane %v6427_v21, 4  ;;  %v16324_v46 = vld [vmem:[#allocation2 + $0xa0] sm:$0xf]  ;;  %v6201_v55 = vld [vmem:[#allocation2 + $0xa4] sm:$0x1] }
 0x2c9   : > { %v6437_v62 = vor.u32 %v6436_v57, %v6432_v22  ;;  %v11760_v58 = vrot.slane %v7155_v44, 9  ;;  %v7271_v25 = vrot.slane %v16291_v42, 5  ;;  %v7274_v36 = vrot.slane %v6199_v1, 5 }
 0x2ca   : > { %v7268_v5 = vsel %vm13648_vm7, %v7266_v12, %v7267_v33  ;;  %v6445_v31 = vshrl.u32 %v16286_v18, 16  ;;  %12752 = vmatprep.mubr.msk.bf16.mxu1 %vm6638_vm0, %v11693_v7  ;;  %v6433_v27 = vsel %vm13353_vm4, %v6428_v48, %v6432_v22  ;;  %v6448_v35 = vshll.u32 %v16286_v18, 16  ;;  %v16331_v33 = vld [vmem:[#allocation2 + $0x90] sm:$0xf] }
 0x2cb   : > { %v6438_v17 = vrot.slane %v6437_v62, 4  ;;  %v11776_v24 = vcombine.low %v7265_v51, %v7268_v5  ;;  %v7272_v9 = vsel %vm13648_vm7, %v11760_v58, %v7271_v25  ;;  %v7273_v16 = vrot.slane %v7271_v25, 4 }
 0x2cc   : > { %v6447_v28 = vrot.slane %v6445_v31, 4  ;;  %v6454_v47 = vshll.u32 %v16274_v61, 16  ;;  %v6450_v37 = vrot.slane %v6448_v35, 5  ;;  %v6458_v41 = vshrl.u32 %v16274_v61, 16 }
 0x2cd   : > { %v6443_v50 = vsel %vm13353_vm4, %v6438_v17, %v6442_v43  ;;  %12824 = vmatprep.mubr.msk.bf16.mxu0 %vm6638_vm0, %v11776_v24  ;;  %v6464_v6 = vshll.u32 %v6198_v39, 16  ;;  %v7275_v49 = vsel %vm13648_vm7, %v7273_v16, %v7274_v36  ;;  %v6469_v40 = vshrl.u32 %v16305_v26, 16 }
 0x2ce   : > { %v11694_v4 = vcombine.low %v6433_v27, %v6443_v50  ;;  %v6456_v8 = vrot.slane %v6454_v47, 5  ;;  %v11777_v29 = vcombine.low %v7272_v9, %v7275_v49  ;;  %v6451_v34 = vor.u32 %v6450_v37, %v6447_v28  ;;  %v16348_v50 = vld [vmem:[#allocation2 + $0x9c] sm:$0xf] }
 0x2cf   : > { %v6460_v19 = vrot.slane %v6458_v41, 4  ;;  %v6466_v59 = vrot.slane %v6464_v6, 5  ;;  %v6471_v32 = vrot.slane %v6469_v40, 4  ;;  %v6472_v3 = vshll.u32 %v16305_v26, 16 }
 0x2d0   : > { %12753 = vmatmul.mubr.msk.bf16.gmra.mxu1 %vm6638_vm0, %v11694_v4  ;;  %v6478_v10 = vshll.u32 %v16291_v42, 16  ;;  %v6482_v0 = vshrl.u32 %v16291_v42, 16  ;;  %12825 = vmatmul.mubr.msk.bf16.gmra.mxu0 %vm6638_vm0, %v11777_v29  ;;  %v6452_v44 = vrot.slane %v6451_v34, 4  ;;  %v6488_v2 = vshll.u32 %v6199_v1, 16  ;;  %v7158_v29 = vld [vmem:[#allocation2 + $0xa8] sm:$0xe] }
 0x2d1   : > { %v6461_v45 = vor.u32 %v6460_v19, %v6456_v8  ;;  %v11761_v60 = vrot.slane %v7156_v54, 9  ;;  %v6474_v39 = vrot.slane %v6472_v3, 5  ;;  %v7278_v11 = vrot.slane %v16317_v15, 5  ;;  %v16358_v3 = vld [vmem:[#allocation2 + $0xac] sm:$0xf] }
 0x2d2   : > { %v6480_v20 = vrot.slane %v6478_v10, 5  ;;  %v6484_v22 = vrot.slane %v6482_v0, 4  ;;  %v6457_v56 = vsel %vm13353_vm4, %v6452_v44, %v6456_v8  ;;  %v6490_v57 = vrot.slane %v6488_v2, 5  ;;  %v7159_v10 = vld [vmem:[#allocation2 + $0xb4] sm:$0xe] }
 0x2d3   : > { %v6462_v21 = vrot.slane %v6461_v45, 4  ;;  %v7281_v43 = vrot.slane %v6200_v52, 5  ;;  %v6475_v63 = vor.u32 %v6474_v39, %v6471_v32  ;;  %v7279_v1 = vsel %vm13648_vm7, %v11761_v60, %v7278_v11  ;;  %v16362_v45 = vld [vmem:[#allocation2 + $0xb0] sm:$0x1] }
 0x2d4   : > { %v6485_v51 = vor.u32 %v6484_v22, %v6480_v20  ;;  %v7280_v12 = vrot.slane %v7278_v11, 4  ;;  %v11762_v48 = vrot.slane %v7157_v53, 9  ;;  %v7285_v62 = vrot.slane %v16324_v46, 5  ;;  %v16364_v22 = vld [vmem:[#allocation2 + $0xb8] sm:$0xf] }
 0x2d5   : > { %v6467_v7 = vsel %vm13353_vm4, %v6462_v21, %v6466_v59  ;;  %v7288_v58 = vrot.slane %v6201_v55, 5  ;;  %v6476_v25 = vrot.slane %v6475_v63, 4  ;;  %v6493_v35 = vshrl.u32 %v16331_v33, 16 }
 0x2d6   : > { %v11695_v5 = vcombine.low %v6457_v56, %v6467_v7  ;;  %v6486_v36 = vrot.slane %v6485_v51, 4  ;;  %v7282_v31 = vsel %vm13648_vm7, %v7280_v12, %v7281_v43  ;;  %v7286_v17 = vsel %vm13648_vm7, %v11762_v48, %v7285_v62  ;;  %v16370_v7 = vld [vmem:[#allocation2 + $0xbc] sm:$0x1] }
 0x2d7   : > { %v11778_v27 = vcombine.low %v7279_v1, %v7282_v31  ;;  %v7287_v24 = vrot.slane %v7285_v62, 4  ;;  %v6481_v9 = vsel %vm13353_vm4, %v6476_v25, %v6480_v20  ;;  %v6496_v28 = vshll.u32 %v16331_v33, 16 }
 0x2d8   : > { %12756 = vmatprep.mubr.msk.bf16.mxu1 %vm6638_vm0, %v11695_v5  ;;  %v6491_v16 = vsel %vm13353_vm4, %v6486_v36, %v6490_v57  ;;  %v6502_v47 = vshll.u32 %v16317_v15, 16  ;;  %v6495_v6 = vrot.slane %v6493_v35, 4  ;;  %v6506_v54 = vshrl.u32 %v16317_v15, 16 }
 0x2d9   : > { %v11696_v37 = vcombine.low %v6481_v9, %v6491_v16  ;;  %12828 = vmatprep.mubr.msk.bf16.mxu0 %vm6638_vm0, %v11778_v27  ;;  %v7289_v41 = vsel %vm13648_vm7, %v7287_v24, %v7288_v58  ;;  %v6498_v49 = vrot.slane %v6496_v28, 5  ;;  %v6512_v40 = vshll.u32 %v6200_v52, 16  ;;  %v7957_v58 = vld [vmem:[#allocation2 + $0xc] sm:$0xf]  ;;  %v7958_v27 = vld [vmem:[#allocation2 + $0x10] sm:$0xf] }
 0x2da   : > { %v11779_v4 = vcombine.low %v7286_v17, %v7289_v41  ;;  %v6504_v8 = vrot.slane %v6502_v47, 5  ;;  %v6508_v34 = vrot.slane %v6506_v54, 4  ;;  %v6517_v19 = vshrl.u32 %v16348_v50, 16 }
 0x2db   : > { %12757 = vmatmul.mubr.msk.bf16.gmra.mxu1 %vm6638_vm0, %v11696_v37  ;;  %v6520_v59 = vshll.u32 %v16348_v50, 16  ;;  %v6526_v32 = vshll.u32 %v16324_v46, 16  ;;  %v6499_v0 = vor.u32 %v6498_v49, %v6495_v6  ;;  %v6514_v53 = vrot.slane %v6512_v40, 5  ;;  %v7959_v37 = vld [vmem:[#allocation2 + $0x14] sm:$0x1] }
 0x2dc   : > { %12829 = vmatmul.mubr.msk.bf16.gmra.mxu0 %vm6638_vm0, %v11779_v4  ;;  %v6530_v44 = vshrl.u32 %v16324_v46, 16  ;;  %v6536_v52 = vshll.u32 %v6201_v55, 16  ;;  %v6509_v2 = vor.u32 %v6508_v34, %v6504_v8  ;;  %v6519_v60 = vrot.slane %v6517_v19, 4 }
 0x2dd   : > { %v6522_v39 = vrot.slane %v6520_v59, 5  ;;  %v6528_v20 = vrot.slane %v6526_v32, 5  ;;  %v6500_v11 = vrot.slane %v6499_v0, 4  ;;  %v11763_v57 = vrot.slane %v7158_v29, 9 }
 0x2de   : > { %v6532_v56 = vrot.slane %v6530_v44, 4  ;;  %v6538_v21 = vrot.slane %v6536_v52, 5  ;;  %v6510_v43 = vrot.slane %v6509_v2, 4  ;;  %v7292_v51 = vrot.slane %v16358_v3, 5 }
 0x2df   : > { %v6523_v63 = vor.u32 %v6522_v39, %v6519_v60  ;;  %v7295_v1 = vrot.slane %v16362_v45, 5  ;;  %v6505_v55 = vsel %vm13353_vm4, %v6500_v11, %v6504_v8  ;;  %v11764_v48 = vrot.slane %v7159_v10, 9  ;;  %v16387_v8 = vld [vmem:[#allocation2 + $0xa8] sm:$0xf]  ;;  %v16396_v60 = vld [vmem:[#allocation2 + $0xb4] sm:$0xf] }
 0x2e0   : > { %v6533_v12 = vor.u32 %v6532_v56, %v6528_v20  ;;  %v7299_v62 = vrot.slane %v16364_v22, 5  ;;  %v6515_v5 = vsel %vm13353_vm4, %v6510_v43, %v6514_v53  ;;  %v7293_v36 = vsel %vm13648_vm7, %v11763_v57, %v7292_v51 }
 0x2e1   : > { %v6524_v25 = vrot.slane %v6523_v63, 4  ;;  %v7294_v31 = vrot.slane %v7292_v51, 4  ;;  %v11697_v17 = vcombine.low %v6505_v55, %v6515_v5  ;;  %v7302_v47 = vrot.slane %v16370_v7, 5 }
 0x2e2   : > { %v6534_v24 = vrot.slane %v6533_v12, 4  ;;  %v7300_v35 = vsel %vm13648_vm7, %v11764_v48, %v7299_v62  ;;  %v7301_v9 = vrot.slane %v7299_v62, 4  ;;  %v8006_v41 = vshrl.u32 %v7957_v58, 16 }
 0x2e3   : > { %v6529_v16 = vsel %vm13353_vm4, %v6524_v25, %v6528_v20  ;;  %v7296_v28 = vsel %vm13648_vm7, %v7294_v31, %v7295_v1  ;;  %12760 = vmatprep.mubr.msk.bf16.mxu1 %vm6638_vm0, %v11697_v17  ;;  %v8009_v4 = vshll.u32 %v7957_v58, 16  ;;  %v8015_v49 = vshll.u32 %v7958_v27, 16 }
 0x2e4   : > { %v6539_v6 = vsel %vm13353_vm4, %v6534_v24, %v6538_v21  ;;  %v11780_v54 = vcombine.low %v7293_v36, %v7296_v28  ;;  %v7303_v29 = vsel %vm13648_vm7, %v7301_v9, %v7302_v47  ;;  %v8008_v34 = vrot.slane %v8006_v41, 4 }
 0x2e5   : > { %v11698_v40 = vcombine.low %v6529_v16, %v6539_v6  ;;  %v8019_v19 = vshrl.u32 %v7958_v27, 16  ;;  %v11781_v59 = vcombine.low %v7300_v35, %v7303_v29  ;;  %v8011_v32 = vrot.slane %v8009_v4, 5  ;;  %v7960_v27 = vld [vmem:[#allocation2 + $0x18] sm:$0xf]  ;;  %v7961_v16 = vld [vmem:[#allocation2 + $0x1c] sm:$0xf] }
 0x2e6   : > { %12832 = vmatprep.mubr.msk.bf16.mxu0 %vm6638_vm0, %v11780_v54  ;;  %v8017_v10 = vrot.slane %v8015_v49, 5  ;;  %v8025_v0 = vshll.u32 %v7959_v37, 16  ;;  %v6541_v44 = vshrl.u32 %v16387_v8, 16  ;;  %v6544_v52 = vshll.u32 %v16387_v8, 16  ;;  %v16413_v6 = vld [vmem:[%s18109_s3 + $0x18] sm:$0xf] }
 0x2e7   : > { %12761 = vmatmul.mubr.msk.bf16.gmra.mxu1 %vm6638_vm0, %v11698_v40  ;;  %v8021_v53 = vrot.slane %v8019_v19, 4  ;;  %v6550_v2 = vshll.u32 %v16358_v3, 16  ;;  %12833 = vmatmul.mubr.msk.bf16.gmra.mxu0 %vm6638_vm0, %v11781_v59  ;;  %v8012_v39 = vor.u32 %v8011_v32, %v8008_v34  ;;  %v6554_v11 = vshrl.u32 %v16358_v3, 16  ;;  %v13185_v49 = vld [vmem:[%s18109_s3 + $0x10] sm:$0xf] }
 0x2e8   : > { %v8027_v20 = vrot.slane %v8025_v0, 5  ;;  %v6560_v56 = vshll.u32 %v16362_v45, 16  ;;  %v6543_v57 = vrot.slane %v6541_v44, 4  ;;  %v6546_v43 = vrot.slane %v6544_v52, 5  ;;  %v7962_v29 = vld [vmem:[#allocation2 + $0x20] sm:$0x1] }
 0x2e9   : > { %v8022_v21 = vor.u32 %v8021_v53, %v8017_v10  ;;  %v6552_v63 = vrot.slane %v6550_v2, 5  ;;  %v8013_v51 = vrot.slane %v8012_v39, 4  ;;  %v6556_v1 = vrot.slane %v6554_v11, 4 }
 0x2ea   : > { %v6562_v55 = vrot.slane %v6560_v56, 5  ;;  %v6565_v12 = vshrl.u32 %v16396_v60, 16  ;;  %v6547_v62 = vor.u32 %v6546_v43, %v6543_v57  ;;  %v6568_v58 = vshll.u32 %v16396_v60, 16  ;;  %v16426_v56 = vld [vmem:[#allocation2 + $0x28] sm:$0xf] }
 0x2eb   : > { %v8023_v48 = vrot.slane %v8022_v21, 4  ;;  %v6574_v5 = vshll.u32 %v16364_v22, 16  ;;  %v8018_v25 = vsel %vm13353_vm4, %v8013_v51, %v8017_v10  ;;  %v6557_v36 = vor.u32 %v6556_v1, %v6552_v63  ;;  %v7963_v10 = vld [vmem:[#allocation2 + $0x24] sm:$0xf]  ;;  %v7965_v43 = vld [vmem:[#allocation2 + $0x2c] sm:$0x1] }
 0x2ec   : > { %v6567_v45 = vrot.slane %v6565_v12, 4  ;;  %v6578_v31 = vshrl.u32 %v16364_v22, 16  ;;  %v6548_v24 = vrot.slane %v6547_v62, 4  ;;  %v6570_v35 = vrot.slane %v6568_v58, 5 }
 0x2ed   : > { %v8028_v17 = vsel %vm13353_vm4, %v8023_v48, %v8027_v20  ;;  %v6576_v9 = vrot.slane %v6574_v5, 5  ;;  %v6558_v47 = vrot.slane %v6557_v36, 4  ;;  %v6584_v41 = vshll.u32 %v16370_v7, 16 }
 0x2ee   : > { %v11832_v28 = vcombine.low %v8018_v25, %v8028_v17  ;;  %v6580_v37 = vrot.slane %v6578_v31, 4  ;;  %v6553_v54 = vsel %vm13353_vm4, %v6548_v24, %v6552_v63  ;;  %v6571_v4 = vor.u32 %v6570_v35, %v6567_v45  ;;  %v7966_v17 = vld [vmem:[#allocation2 + $0x30] sm:$0xf] }
 0x2ef   : > { %v8488_v40 = vsel %vm6687_vm8, %v13185_v49, 0  ;;  %v8030_v34 = vshrl.u32 %v7960_v27, 16  ;;  %v6563_v7 = vsel %vm13353_vm4, %v6558_v47, %v6562_v55  ;;  %v6586_v59 = vrot.slane %v6584_v41, 5  ;;  %v13188_v47 = vld [vmem:[#allocation2 + $0x10] sm:$0xf] }
 0x2f0   : > { %12872 = vmatprep.mubr.msk.bf16.mxu0 %vm6638_vm0, %v11832_v28  ;;  %v6581_v19 = vor.u32 %v6580_v37, %v6576_v9  ;;  %12871 = vmatpush3.bf16.msra.mxu0 %v8488_v40  ;;  %v8033_v32 = vshll.u32 %v7960_v27, 16  ;;  %v11699_v0 = vcombine.low %v6553_v54, %v6563_v7  ;;  %v6572_v53 = vrot.slane %v6571_v4, 4  ;;  %v13189_v37 = vld [vmem:[#allocation2 + $0xc] sm:$0xf]  ;;  %v16436_v54 = vld [vmem:[#allocation2 + $0x34] sm:$0xf] }
 0x2f1   : > { %v8032_v44 = vrot.slane %v8030_v34, 4  ;;  %v8039_v52 = vshll.u32 %v7961_v16, 16  ;;  %13055 = vmatprep.subr.msk.bf16.mxu0 %vm6687_vm8, %v16413_v6  ;;  %v8043_v20 = vshrl.u32 %v7961_v16, 16  ;;  %v8049_v11 = vshll.u32 %v7962_v29, 16  ;;  %v13187_v16 = vld [vmem:[#allocation2] sm:$0xf] }
 0x2f2   : > { %v6582_v2 = vrot.slane %v6581_v19, 4  ;;  %v8035_v39 = vrot.slane %v8033_v32, 5  ;;  %12764 = vmatprep.mubr.msk.bf16.mxu1 %vm6638_vm0, %v11699_v0  ;;  %v6577_v21 = vsel %vm13353_vm4, %v6572_v53, %v6576_v9  ;;  %v8054_v63 = vshrl.u32 %v7963_v10, 16  ;;  %v13186_v9 = vld [vmem:[#allocation2 + $0x4] sm:$0xf] }
 0x2f3   : > { %v8041_v57 = vrot.slane %v8039_v52, 5  ;;  %v8057_v51 = vshll.u32 %v7963_v10, 16  ;;  %v8045_v12 = vrot.slane %v8043_v20, 4  ;;  %v8051_v48 = vrot.slane %v8049_v11, 5  ;;  %v13190_v7 = vld [vmem:[%s18109_s3 + $0xc] sm:$0xf] }
 0x2f4   : > { %v6587_v1 = vsel %vm13353_vm4, %v6582_v2, %v6586_v59  ;;  %v8036_v55 = vor.u32 %v8035_v39, %v8032_v44  ;;  %v8056_v58 = vrot.slane %v8054_v63, 4  ;;  %v8063_v25 = vshll.u32 %v16426_v56, 16  ;;  %v13191_v59 = vld [vmem:[#allocation2 + $0x1c] sm:$0xf]  ;;  %v13192_v32 = vld [vmem:[#allocation2 + $0x18] sm:$0xf] }
 0x2f5   : > { %v11700_v62 = vcombine.low %v6577_v21, %v6587_v1  ;;  %v8059_v5 = vrot.slane %v8057_v51, 5  ;;  %v8046_v45 = vor.u32 %v8045_v12, %v8041_v57  ;;  %v8067_v31 = vshrl.u32 %v16426_v56, 16  ;;  %v7968_v0 = vld [vmem:[#allocation2 + $0x38] sm:$0x1]  ;;  %v7969_v20 = vld [vmem:[#allocation2 + $0x3c] sm:$0xf] }
 0x2f6   : > { %v8037_v36 = vrot.slane %v8036_v55, 4  ;;  %v8073_v27 = vshll.u32 %v7965_v43, 16  ;;  %v8065_v35 = vrot.slane %v8063_v25, 5  ;;  %v11717_v28 = vcombine.low %v13187_v16, %v13186_v9  ;;  %v16448_v11 = vld [vmem:[#allocation2 + $0x40] sm:$0xf] }
 0x2f7   : > { %12765 = vmatmul.mubr.msk.bf16.gmra.mxu1 %vm6638_vm0, %v11700_v62  ;;  %v8060_v24 = vor.u32 %v8059_v5, %v8056_v58  ;;  %v11718_v41 = vcombine.low %v13189_v37, %v13188_v47  ;;  %v8047_v49 = vrot.slane %v8046_v45, 4  ;;  %v8069_v40 = vrot.slane %v8067_v31, 4  ;;  %v7971_v62 = vld [vmem:[#allocation2 + $0x44] sm:$0x1] }
 0x2f8   : > { %v8042_v4 = vsel %vm13353_vm4, %v8037_v36, %v8041_v57  ;;  %v8075_v29 = vrot.slane %v8073_v27, 5  ;;  %12770 = vmatprep.mubr.msk.bf16.mxu1 %vm6638_vm0, %v11717_v28  ;;  %v7762_v19 = vsel %vm6687_vm8, %v13190_v7, 0  ;;  %v11719_v10 = vcombine.low %v13192_v32, %v13191_v59  ;;  %v7972_v28 = vld [vmem:[#allocation2 + $0x48] sm:$0xf]  ;;  %v13194_v59 = vld [vmem:[#allocation2 + $0x24] sm:$0xf] }
 0x2f9   : > { %v8061_v34 = vrot.slane %v8060_v24, 4  ;;  %v8078_v53 = vshrl.u32 %v7966_v17, 16  ;;  %v8052_v44 = vsel %vm13353_vm4, %v8047_v49, %v8051_v48  ;;  %v8070_v52 = vor.u32 %v8069_v40, %v8065_v35  ;;  %v16465_v40 = vld [vmem:[#allocation2 + $0x4c] sm:$0xf]  ;;  %v13193_v7 = vld [vmem:[#allocation2 + $0x28] sm:$0xf] }
 0x2fa   : > { %v8081_v2 = vshll.u32 %v7966_v17, 16  ;;  %v8087_v39 = vshll.u32 %v16436_v54, 16  ;;  %v11833_v21 = vcombine.low %v8042_v4, %v8052_v44  ;;  %v8091_v63 = vshrl.u32 %v16436_v54, 16  ;;  %v16461_v17 = vld [vmem:[%s18109_s3 + $0x14] sm:$0xf] }
 0x2fb   : > { %v8066_v57 = vsel %vm13353_vm4, %v8061_v34, %v8065_v35  ;;  %v8080_v43 = vrot.slane %v8078_v53, 4  ;;  %v8071_v51 = vrot.slane %v8070_v52, 4  ;;  %v8097_v12 = vshll.u32 %v7968_v0, 16  ;;  %v13195_v32 = vld [vmem:[#allocation2 + $0x34] sm:$0xf] }
 0x2fc   : > { %v8083_v1 = vrot.slane %v8081_v2, 5  ;;  %v8089_v55 = vrot.slane %v8087_v39, 5  ;;  %12873 = vmatmul.mubr.msk.bf16.vlgmr.msra.gmra.mxu0 %vm6638_vm0, %v11833_v21  ;;  %v8093_v48 = vrot.slane %v8091_v63, 4  ;;  %v8102_v58 = vshrl.u32 %v7969_v20, 16  ;;  %v13196_v0 = vld [vmem:[#allocation2 + $0x30] sm:$0xf] }
 0x2fd   : > { %v8105_v5 = vshll.u32 %v7969_v20, 16  ;;  %v8111_v25 = vshll.u32 %v16448_v11, 16  ;;  %v8076_v36 = vsel %vm13353_vm4, %v8071_v51, %v8075_v29  ;;  %v8099_v31 = vrot.slane %v8097_v12, 5  ;;  %v7974_v52 = vld [vmem:[#allocation2 + $0x50] sm:$0x1] }
 0x2fe   : > { %v8084_v45 = vor.u32 %v8083_v1, %v8080_v43  ;;  %v8115_v27 = vshrl.u32 %v16448_v11, 16  ;;  %v11834_v24 = vcombine.low %v8066_v57, %v8076_v36  ;;  %v8094_v35 = vor.u32 %v8093_v48, %v8089_v55  ;;  %v7975_v43 = vld [vmem:[#allocation2 + $0x54] sm:$0xf]  ;;  %v16476_v48 = vld [vmem:[#allocation2 + $0x58] sm:$0xf] }
 0x2ff   : > { %12771 = vmatmul.mubr.msk.bf16.vlgmr.msra.gmra.mxu1 %vm6638_vm0, %v11718_v41  ;;  %v8104_v9 = vrot.slane %v8102_v58, 4  ;;  %v8107_v16 = vrot.slane %v8105_v5, 5  ;;  %v8113_v37 = vrot.slane %v8111_v25, 5  ;;  %v8121_v49 = vshll.u32 %v7971_v62, 16 }
 0x300   : > { %12837 = vmatpush3.bf16.msra.mxu1 %v7762_v19  ;;  %12774 = vmatprep.mubr.msk.bf16.mxu1 %vm6638_vm0, %v11719_v10  ;;  %v8085_v47 = vrot.slane %v8084_v45, 4  ;;  %v8117_v4 = vrot.slane %v8115_v27, 4  ;;  %v8095_v29 = vrot.slane %v8094_v35, 4  ;;  %v11720_v41 = vcombine.low %v13194_v59, %v13193_v7  ;;  %v16483_v45 = vld [vmem:[#allocation2 + $0x5c] sm:$0x1] }
 0x301   : > { %12876 = vmatprep.mubr.msk.bf16.mxu0 %vm6638_vm0, %v11834_v24  ;;  %v8108_v34 = vor.u32 %v8107_v16, %v8104_v9  ;;  %v11721_v53 = vcombine.low %v13196_v0, %v13195_v32  ;;  %13054 = vmatprep.subr.msk.bf16.mxu1 %vm6687_vm8, %v16461_v17  ;;  %v8123_v44 = vrot.slane %v8121_v49, 5  ;;  %v8126_v2 = vshrl.u32 %v7972_v28, 16  ;;  %v7978_v49 = vld [vmem:[#allocation2 + $0x60] sm:$0xf]  ;;  %v16491_v0 = vld [vmem:[#allocation2 + $0x64] sm:$0xf] }
 0x302   : > { %v8090_v19 = vsel %vm13353_vm4, %v8085_v47, %v8089_v55  ;;  %v8118_v10 = vor.u32 %v8117_v4, %v8113_v37  ;;  %v8100_v39 = vsel %vm13353_vm4, %v8095_v29, %v8099_v31  ;;  %v8129_v21 = vshll.u32 %v7972_v28, 16  ;;  %v13197_v59 = vld [vmem:[#allocation2 + $0x40] sm:$0xf] }
 0x303   : > { %v8109_v20 = vrot.slane %v8108_v34, 4  ;;  %v8135_v57 = vshll.u32 %v16465_v40, 16  ;;  %v11835_v63 = vcombine.low %v8090_v19, %v8100_v39  ;;  %v8128_v1 = vrot.slane %v8126_v2, 4 }
 0x304   : > { %v8119_v51 = vrot.slane %v8118_v10, 4  ;;  %v8139_v12 = vshrl.u32 %v16465_v40, 16  ;;  %v8131_v62 = vrot.slane %v8129_v21, 5  ;;  %v8145_v5 = vshll.u32 %v7974_v52, 16  ;;  %v13200_v52 = vld [vmem:[#allocation2 + $0x48] sm:$0xf] }
 0x305   : > { %v8114_v55 = vsel %vm13353_vm4, %v8109_v20, %v8113_v37  ;;  %v8137_v58 = vrot.slane %v8135_v57, 5  ;;  %12877 = vmatmul.mubr.msk.bf16.gmra.mxu0 %vm6638_vm0, %v11835_v63  ;;  %v8150_v31 = vshrl.u32 %v7975_v43, 16  ;;  %v8153_v27 = vshll.u32 %v7975_v43, 16  ;;  %v7980_v21 = vld [vmem:[#allocation2 + $0x68] sm:$0x1] }
 0x306   : > { %v8124_v25 = vsel %vm13353_vm4, %v8119_v51, %v8123_v44  ;;  %v8141_v36 = vrot.slane %v8139_v12, 4  ;;  %v8132_v35 = vor.u32 %v8131_v62, %v8128_v1  ;;  %v8147_v9 = vrot.slane %v8145_v5, 5  ;;  %v13199_v44 = vld [vmem:[#allocation2 + $0x4c] sm:$0xf] }
 0x307   : > { %v11836_v24 = vcombine.low %v8114_v55, %v8124_v25  ;;  %12775 = vmatmul.mubr.msk.bf16.gmra.mxu1 %vm6638_vm0, %v11720_v41  ;;  %v8159_v16 = vshll.u32 %v16476_v48, 16  ;;  %v8152_v47 = vrot.slane %v8150_v31, 4  ;;  %v8155_v37 = vrot.slane %v8153_v27, 5  ;;  %v13198_v41 = vld [vmem:[#allocation2 + $0x3c] sm:$0xf] }
 0x308   : > { %12778 = vmatprep.mubr.msk.bf16.mxu1 %vm6638_vm0, %v11721_v53  ;;  %v8142_v28 = vor.u32 %v8141_v36, %v8137_v58  ;;  %v8163_v4 = vshrl.u32 %v16476_v48, 16  ;;  %v8133_v29 = vrot.slane %v8132_v35, 4  ;;  %v8169_v7 = vshll.u32 %v16483_v45, 16  ;;  %v7981_v55 = vld [vmem:[#allocation2 + $0x6c] sm:$0xf] }
 0x309   : > { %12880 = vmatprep.mubr.msk.bf16.mxu0 %vm6638_vm0, %v11836_v24  ;;  %v8161_v34 = vrot.slane %v8159_v16, 5  ;;  %v11722_v32 = vcombine.low %v13198_v41, %v13197_v59  ;;  %v8156_v10 = vor.u32 %v8155_v37, %v8152_v47  ;;  %v11723_v2 = vcombine.low %v13200_v52, %v13199_v44  ;;  %v16499_v31 = vld [vmem:[#allocation2 + $0x70] sm:$0xf] }
 0x30a   : > { %v8143_v19 = vrot.slane %v8142_v28, 4  ;;  %v8165_v53 = vrot.slane %v8163_v4, 4  ;;  %v8138_v39 = vsel %vm13353_vm4, %v8133_v29, %v8137_v58  ;;  %v8171_v20 = vrot.slane %v8169_v7, 5  ;;  %v16505_v28 = vld [vmem:[#allocation2 + $0x74] sm:$0x1] }
 0x30b   : > { %v8174_v57 = vshrl.u32 %v7978_v49, 16  ;;  %v8177_v43 = vshll.u32 %v7978_v49, 16  ;;  %v8157_v51 = vrot.slane %v8156_v10, 4  ;;  %v8183_v12 = vshll.u32 %v16491_v0, 16 }
 0x30c   : > { %v8148_v63 = vsel %vm13353_vm4, %v8143_v19, %v8147_v9  ;;  %v8166_v1 = vor.u32 %v8165_v53, %v8161_v34  ;;  %v8187_v36 = vshrl.u32 %v16491_v0, 16  ;;  %v8193_v35 = vshll.u32 %v7980_v21, 16  ;;  %v7984_v19 = vld [vmem:[#allocation2 + $0x78] sm:$0xf] }
 0x30d   : > { %v11837_v62 = vcombine.low %v8138_v39, %v8148_v63  ;;  %v8176_v5 = vrot.slane %v8174_v57, 4  ;;  %v8179_v25 = vrot.slane %v8177_v43, 5  ;;  %v8162_v58 = vsel %vm13353_vm4, %v8157_v51, %v8161_v34  ;;  %v16513_v39 = vld [vmem:[#allocation2 + $0x7c] sm:$0xf]  ;;  %v13201_v21 = vld [vmem:[#allocation2 + $0x58] sm:$0xf] }
 0x30e   : > { %v8167_v27 = vrot.slane %v8166_v1, 4  ;;  %v8185_v24 = vrot.slane %v8183_v12, 5  ;;  %v8189_v16 = vrot.slane %v8187_v36, 4  ;;  %v8198_v47 = vshrl.u32 %v7981_v55, 16  ;;  %v13202_v57 = vld [vmem:[#allocation2 + $0x54] sm:$0xf] }
 0x30f   : > { %12881 = vmatmul.mubr.msk.bf16.gmra.mxu0 %vm6638_vm0, %v11837_v62  ;;  %12779 = vmatmul.mubr.msk.bf16.gmra.mxu1 %vm6638_vm0, %v11722_v32  ;;  %v8180_v9 = vor.u32 %v8179_v25, %v8176_v5  ;;  %v8201_v37 = vshll.u32 %v7981_v55, 16  ;;  %v8195_v49 = vrot.slane %v8193_v35, 5  ;;  %v8207_v29 = vshll.u32 %v16499_v31, 16  ;;  %v7986_v55 = vld [vmem:[#allocation2 + $0x80] sm:$0x1] }
 0x310   : > { %v8172_v4 = vsel %vm13353_vm4, %v8167_v27, %v8171_v20  ;;  %12782 = vmatprep.mubr.msk.bf16.mxu1 %vm6638_vm0, %v11723_v2  ;;  %v8211_v34 = vshrl.u32 %v16499_v31, 16  ;;  %v8190_v41 = vor.u32 %v8189_v16, %v8185_v24  ;;  %v8200_v32 = vrot.slane %v8198_v47, 4  ;;  %v7987_v27 = vld [vmem:[#allocation2 + $0x84] sm:$0xf] }
 0x311   : > { %v11838_v7 = vcombine.low %v8162_v58, %v8172_v4  ;;  %v8181_v59 = vrot.slane %v8180_v9, 4  ;;  %v8203_v10 = vrot.slane %v8201_v37, 5  ;;  %v8209_v53 = vrot.slane %v8207_v29, 5  ;;  %v16525_v4 = vld [vmem:[#allocation2 + $0x88] sm:$0xf] }
 0x312   : > { %v8213_v44 = vrot.slane %v8211_v34, 4  ;;  %v8217_v52 = vshll.u32 %v16505_v28, 16  ;;  %v8191_v20 = vrot.slane %v8190_v41, 4  ;;  %v11724_v43 = vcombine.low %v13202_v57, %v13201_v21  ;;  %v7989_v34 = vld [vmem:[#allocation2 + $0x8c] sm:$0x1] }
 0x313   : > { %12884 = vmatprep.mubr.msk.bf16.mxu0 %vm6638_vm0, %v11838_v7  ;;  %v8186_v2 = vsel %vm13353_vm4, %v8181_v59, %v8185_v24  ;;  %v11725_v63 = vcombine.low %v16246_v38, %v16225_v30  ;;  %v8204_v51 = vor.u32 %v8203_v10, %v8200_v32  ;;  %v8222_v62 = vshrl.u32 %v7984_v19, 16  ;;  %v7990_v21 = vld [vmem:[#allocation2 + $0x90] sm:$0xf] }
 0x314   : > { %v8214_v1 = vor.u32 %v8213_v44, %v8209_v53  ;;  %v8219_v12 = vrot.slane %v8217_v52, 5  ;;  %v8196_v5 = vsel %vm13353_vm4, %v8191_v20, %v8195_v49  ;;  %v8225_v25 = vshll.u32 %v7984_v19, 16 }
 0x315   : > { %v8231_v36 = vshll.u32 %v16513_v39, 16  ;;  %v8235_v58 = vshrl.u32 %v16513_v39, 16  ;;  %v11839_v24 = vcombine.low %v8186_v2, %v8196_v5  ;;  %v8205_v35 = vrot.slane %v8204_v51, 4  ;;  %v16539_v5 = vld [vmem:[#allocation2 + $0x94] sm:$0xf] }
 0x316   : > { %v8215_v9 = vrot.slane %v8214_v1, 4  ;;  %v8224_v16 = vrot.slane %v8222_v62, 4  ;;  %v8227_v30 = vrot.slane %v8225_v25, 5  ;;  %v8241_v37 = vshll.u32 %v7986_v55, 16  ;;  %v16541_v25 = vld [vmem:[#allocation2 + $0x98] sm:$0x1] }
 0x317   : > { %12783 = vmatmul.mubr.msk.bf16.gmra.mxu1 %vm6638_vm0, %v11724_v43  ;;  %v8233_v38 = vrot.slane %v8231_v36, 5  ;;  %v8237_v47 = vrot.slane %v8235_v58, 4  ;;  %12885 = vmatmul.mubr.msk.bf16.gmra.mxu0 %vm6638_vm0, %v11839_v24  ;;  %v8210_v49 = vsel %vm13353_vm4, %v8205_v35, %v8209_v53  ;;  %v8246_v7 = vshrl.u32 %v7987_v27, 16  ;;  %v7993_v35 = vld [vmem:[#allocation2 + $0x9c] sm:$0xf] }
 0x318   : > { %v8220_v29 = vsel %vm13353_vm4, %v8215_v9, %v8219_v12  ;;  %12786 = vmatprep.mubr.msk.bf16.mxu1 %vm6638_vm0, %v11725_v63  ;;  %v8249_v59 = vshll.u32 %v7987_v27, 16  ;;  %v8228_v32 = vor.u32 %v8227_v30, %v8224_v16  ;;  %v8243_v10 = vrot.slane %v8241_v37, 5  ;;  %v13203_v63 = vld [vmem:[#allocation2 + $0x70] sm:$0xf] }
 0x319   : > { %v11840_v41 = vcombine.low %v8210_v49, %v8220_v29  ;;  %v8238_v19 = vor.u32 %v8237_v47, %v8233_v38  ;;  %v8248_v44 = vrot.slane %v8246_v7, 4  ;;  %v8255_v2 = vshll.u32 %v16525_v4, 16 }
 0x31a   : > { %v8251_v52 = vrot.slane %v8249_v59, 5  ;;  %v8259_v20 = vshrl.u32 %v16525_v4, 16  ;;  %v8229_v53 = vrot.slane %v8228_v32, 4  ;;  %v8265_v43 = vshll.u32 %v7989_v34, 16 }
 0x31b   : > { %12888 = vmatprep.mubr.msk.bf16.mxu0 %vm6638_vm0, %v11840_v41  ;;  %v8239_v57 = vrot.slane %v8238_v19, 4  ;;  %v11726_v51 = vcombine.low %v16254_v13, %v13203_v63  ;;  %v8257_v12 = vrot.slane %v8255_v2, 5  ;;  %v11727_v62 = vcombine.low %v16286_v18, %v16274_v61  ;;  %v16557_v19 = vld [vmem:[#allocation2 + $0xa4] sm:$0x1]  ;;  %v7996_v63 = vld [vmem:[#allocation2 + $0xa8] sm:$0xf] }
 0x31c   : > { %v8252_v1 = vor.u32 %v8251_v52, %v8248_v44  ;;  %v8261_v55 = vrot.slane %v8259_v20, 4  ;;  %v8234_v36 = vsel %vm13353_vm4, %v8229_v53, %v8233_v38  ;;  %v8267_v27 = vrot.slane %v8265_v43, 5  ;;  %v16551_v38 = vld [vmem:[#allocation2 + $0xa0] sm:$0xf] }
 0x31d   : > { %v8244_v58 = vsel %vm13353_vm4, %v8239_v57, %v8243_v10  ;;  %v8270_v24 = vshrl.u32 %v7990_v21, 16  ;;  %v8273_v30 = vshll.u32 %v7990_v21, 16  ;;  %v8279_v18 = vshll.u32 %v16539_v5, 16 }
 0x31e   : > { %v11841_v13 = vcombine.low %v8234_v36, %v8244_v58  ;;  %v8253_v9 = vrot.slane %v8252_v1, 4  ;;  %v8262_v16 = vor.u32 %v8261_v55, %v8257_v12  ;;  %v8283_v47 = vshrl.u32 %v16539_v5, 16 }
 0x31f   : > { %12787 = vmatmul.mubr.msk.bf16.gmra.mxu1 %vm6638_vm0, %v11726_v51  ;;  %v8272_v61 = vrot.slane %v8270_v24, 4  ;;  %v8289_v37 = vshll.u32 %v16541_v25, 16  ;;  %v8275_v34 = vrot.slane %v8273_v30, 5  ;;  %v8294_v7 = vshrl.u32 %v7993_v35, 16 }
 0x320   : > { %12889 = vmatmul.mubr.msk.bf16.gmra.mxu0 %vm6638_vm0, %v11841_v13  ;;  %v8258_v49 = vsel %vm13353_vm4, %v8253_v9, %v8257_v12  ;;  %v8263_v29 = vrot.slane %v8262_v16, 4  ;;  %12790 = vmatprep.mubr.msk.bf16.mxu1 %vm6638_vm0, %v11727_v62  ;;  %v8281_v59 = vrot.slane %v8279_v18, 5  ;;  %v8285_v41 = vrot.slane %v8283_v47, 4  ;;  %v16566_v62 = vld [vmem:[#allocation2 + $0xac] sm:$0xf] }
 0x321   : > { %v8291_v32 = vrot.slane %v8289_v37, 5  ;;  %v8297_v10 = vshll.u32 %v7993_v35, 16  ;;  %v8276_v52 = vor.u32 %v8275_v34, %v8272_v61  ;;  %v8296_v2 = vrot.slane %v8294_v7, 4  ;;  %v16573_v9 = vld [vmem:[#allocation2 + $0xb0] sm:$0x1] }
 0x322   : > { %v8268_v44 = vsel %vm13353_vm4, %v8263_v29, %v8267_v27  ;;  %v8303_v20 = vshll.u32 %v16551_v38, 16  ;;  %v8286_v53 = vor.u32 %v8285_v41, %v8281_v59  ;;  %v8307_v43 = vshrl.u32 %v16551_v38, 16  ;;  %v7999_v47 = vld [vmem:[#allocation2 + $0xb4] sm:$0xf]  ;;  %v16581_v29 = vld [vmem:[#allocation2 + $0xb8] sm:$0xf] }
 0x323   : > { %v11842_v21 = vcombine.low %v8258_v49, %v8268_v44  ;;  %v8299_v57 = vrot.slane %v8297_v10, 5  ;;  %v8277_v51 = vrot.slane %v8276_v52, 4  ;;  %v8313_v12 = vshll.u32 %v16557_v19, 16  ;;  %v16587_v44 = vld [vmem:[#allocation2 + $0xbc] sm:$0x1] }
 0x324   : > { %v8305_v1 = vrot.slane %v8303_v20, 5  ;;  %v11728_v55 = vcombine.low %v16305_v26, %v16291_v42  ;;  %v8287_v36 = vrot.slane %v8286_v53, 4  ;;  %v8309_v27 = vrot.slane %v8307_v43, 4 }
 0x325   : > { %12892 = vmatprep.mubr.msk.bf16.mxu0 %vm6638_vm0, %v11842_v21  ;;  %v8300_v58 = vor.u32 %v8299_v57, %v8296_v2  ;;  %v11729_v24 = vcombine.low %v16331_v33, %v16317_v15  ;;  %v8282_v35 = vsel %vm13353_vm4, %v8277_v51, %v8281_v59  ;;  %v8315_v13 = vrot.slane %v8313_v12, 5  ;;  %v8002_v12 = vld [vmem:[#allocation2 + $0xc0] sm:$0xf] }
 0x326   : > { %v8318_v16 = vshrl.u32 %v7996_v63, 16  ;;  %v8321_v30 = vshll.u32 %v7996_v63, 16  ;;  %v8292_v42 = vsel %vm13353_vm4, %v8287_v36, %v8291_v32  ;;  %v8310_v61 = vor.u32 %v8309_v27, %v8305_v1 }
 0x327   : > { %v8301_v26 = vrot.slane %v8300_v58, 4  ;;  %12791 = vmatmul.mubr.msk.bf16.gmra.mxu1 %vm6638_vm0, %v11728_v55  ;;  %v8327_v18 = vshll.u32 %v16566_v62, 16  ;;  %v11843_v37 = vcombine.low %v8282_v35, %v8292_v42  ;;  %v8331_v49 = vshrl.u32 %v16566_v62, 16 }
 0x328   : > { %12794 = vmatprep.mubr.msk.bf16.mxu1 %vm6638_vm0, %v11729_v24  ;;  %v8320_v15 = vrot.slane %v8318_v16, 4  ;;  %v8323_v33 = vrot.slane %v8321_v30, 5  ;;  %v8311_v7 = vrot.slane %v8310_v61, 4  ;;  %v8337_v41 = vshll.u32 %v16573_v9, 16  ;;  %v16594_v24 = vld [vmem:[#allocation2 + $0xc4] sm:$0xf] }
 0x329   : > { %v8306_v34 = vsel %vm13353_vm4, %v8301_v26, %v8305_v1  ;;  %v8329_v59 = vrot.slane %v8327_v18, 5  ;;  %12893 = vmatmul.mubr.msk.bf16.gmra.mxu0 %vm6638_vm0, %v11843_v37  ;;  %v8333_v10 = vrot.slane %v8331_v49, 4  ;;  %v8342_v52 = vshrl.u32 %v7999_v47, 16  ;;  %v16603_v18 = vld [vmem:[#allocation2 + $0xc8] sm:$0x1] }
 0x32a   : > { %v8324_v32 = vor.u32 %v8323_v33, %v8320_v15  ;;  %v8345_v2 = vshll.u32 %v7999_v47, 16  ;;  %v8316_v20 = vsel %vm13353_vm4, %v8311_v7, %v8315_v13  ;;  %v8339_v21 = vrot.slane %v8337_v41, 5 }
 0x32b   : > { %v8351_v53 = vshll.u32 %v16581_v29, 16  ;;  %v8355_v57 = vshrl.u32 %v16581_v29, 16  ;;  %v11844_v43 = vcombine.low %v8306_v34, %v8316_v20  ;;  %v8334_v51 = vor.u32 %v8333_v10, %v8329_v59 }
 0x32c   : > { %v8325_v63 = vrot.slane %v8324_v32, 4  ;;  %v8344_v1 = vrot.slane %v8342_v52, 4  ;;  %v8347_v55 = vrot.slane %v8345_v2, 5  ;;  %v8361_v27 = vshll.u32 %v16587_v44, 16  ;;  %v11995_v32 = vld [vmem:[%s18109_s3 + $0x20] sm:$0xf] }
 0x32d   : > { %v8353_v36 = vrot.slane %v8351_v53, 5  ;;  %v8357_v58 = vrot.slane %v8355_v57, 4  ;;  %12896 = vmatprep.mubr.msk.bf16.mxu0 %vm6638_vm0, %v11844_v43  ;;  %v8335_v13 = vrot.slane %v8334_v51, 4  ;;  %v11730_v16 = vcombine.low %v16348_v50, %v16324_v46 }
 0x32e   : > { %v8330_v35 = vsel %vm13353_vm4, %v8325_v63, %v8329_v59  ;;  %v11731_v30 = vcombine.low %v16387_v8, %v16358_v3  ;;  %v8348_v42 = vor.u32 %v8347_v55, %v8344_v1  ;;  %v8363_v61 = vrot.slane %v8361_v27, 5  ;;  %v13147_v1 = vld [vmem:[#allocation2 + $0xc] sm:$0xff]   ;;  %v16639_v27 = vld [vmem:[%s18109_s3 + $0x1c] sm:$0xf] }
 0x32f   : > { %v8358_v26 = vor.u32 %v8357_v58, %v8353_v36  ;;  %v8366_v47 = vshrl.u32 %v8002_v12, 16  ;;  %v8340_v37 = vsel %vm13353_vm4, %v8335_v13, %v8339_v21  ;;  %12795 = vmatmul.mubr.msk.bf16.gmra.mxu1 %vm6638_vm0, %v11730_v16  ;;  %v8369_v15 = vshll.u32 %v8002_v12, 16  ;;  %v13150_v58 = vld [vmem:[#allocation2 + $0x18] sm:$0xff]   ;;  %v13149_v16 = vld [vmem:[#allocation2 + $0x30] sm:$0xff]  }
 0x330   : > { %v8375_v33 = vshll.u32 %v16594_v24, 16  ;;  %v8379_v49 = vshrl.u32 %v16594_v24, 16  ;;  %v11845_v46 = vcombine.low %v8330_v35, %v8340_v37  ;;  %v8349_v50 = vrot.slane %v8348_v42, 4  ;;  %12798 = vmatprep.mubr.msk.bf16.mxu1 %vm6638_vm0, %v11731_v30  ;;  %v13148_v35 = vld [vmem:[#allocation2 + $0x24] sm:$0xff]   ;;  %v13154_v30 = vld [vmem:[#allocation2 + $0x30] sm:$0xff]   ;;  %v13155_v42 = vld [vmem:[#allocation2 + $0x3c] sm:$0xff]  }
 0x331   : > { %v8359_v34 = vrot.slane %v8358_v26, 4  ;;  %v8368_v3 = vrot.slane %v8366_v47, 4  ;;  %v8371_v8 = vrot.slane %v8369_v15, 5  ;;  %v8385_v41 = vshll.u32 %v16603_v18, 16  ;;  %v13153_v47 = vld [vmem:[#allocation2 + $0x48] sm:$0xff]  }
 0x332   : > { %v8377_v7 = vrot.slane %v8375_v33, 5  ;;  %v8381_v59 = vrot.slane %v8379_v49, 4  ;;  %12897 = vmatmul.mubr.msk.bf16.gmra.mxu0 %vm6638_vm0, %v11845_v46  ;;  %v8354_v10 = vsel %vm13353_vm4, %v8349_v50, %v8353_v36  ;;  %v9317_v2 = vsel %vm6687_vm8, %v16413_v6, 0  ;;  %v13145_v36 = vld [vmem:[#allocation2 + $0x18] sm:$0xff]   ;;  %v13158_v15 = vld [vmem:[#allocation2 + $0x48] sm:$0xff]  }
 0x333   : > { %v8364_v52 = vsel %vm13353_vm4, %v8359_v34, %v8363_v61  ;;  %v8372_v21 = vor.u32 %v8371_v8, %v8368_v3  ;;  %12939 = vmatpush3.bf16.msra.mxu0 %v9317_v2  ;;  %v8387_v63 = vrot.slane %v8385_v41, 5  ;;  %v11732_v51 = vcombine.low %v16396_v60, %v16364_v22  ;;  %v13151_v60 = vld [vmem:[#allocation2 + $0x24] sm:$0xff]   ;;  %v13152_v61 = vld [vmem:[#allocation2 + $0x3c] sm:$0xff]   ;;  %v13159_v33 = vld [vmem:[#allocation2 + $0x54] sm:$0xff]   ;;  %v16659_v49 = vpop.f32.mrf.mxu1 }
 0x334   : > { %v11846_v20 = vcombine.low %v8354_v10, %v8364_v52  ;;  %v8382_v53 = vor.u32 %v8381_v59, %v8377_v7  ;;  %13057 = vmatprep.subr.msk.bf16.mxu0 %vm6687_vm8, %v11995_v32  ;;  %v8958_v22 = vsel %vm6687_vm8, %v16461_v17, 0  ;;  %v10513_v13 = vsel %vm6687_vm8, %v11995_v32, 0  ;;  %v16648_v17 = vpop.f32.mrf.mxu0  ;;  %18333 = vst [vmem:[#allocation32_spill] sm:$0xff] %v16659_v49  ;;  %v13156_v50 = vld [vmem:[#allocation2 + $0x54] sm:$0xff]   ;;  %v13157_v34 = vld [vmem:[#allocation2 + $0x60] sm:$0xff]   ;;  %v13163_v59 = vld [vmem:[#allocation2 + $0x6c] sm:$0xff]  }
 0x335   : > { %v8373_v57 = vrot.slane %v8372_v21, 4  ;;  %18330 = vst [vmem:[#allocation31_spill] sm:$0xff] %v16648_v17  ;;  %v16666_v3 = vpop.f32.mrf.mxu1  ;;  %v13160_v10 = vld [vmem:[#allocation2 + $0x6c] sm:$0xff]   ;;  %v13161_v52 = vld [vmem:[#allocation2 + $0x78] sm:$0xff]   ;;  %v16947_v17 = vld [vmem:[#allocation2 + $0x94] sm:$0xf] }
 0x336   : > { %12900 = vmatprep.mubr.msk.bf16.mxu0 %vm6638_vm0, %v11846_v20  ;;  %v8383_v43 = vrot.slane %v8382_v53, 4  ;;  %v16651_v26 = vpop.f32.mrf.mxu0  ;;  %18335 = vst [vmem:[#allocation37_spill] sm:$0xff] %v16666_v3  ;;  %v13166_v21 = vld [vmem:[#allocation2 + $0x78] sm:$0xff]   ;;  %v8694_v53 = vld [vmem:[#allocation2 + $0x90] sm:$0xe] }
 0x337   : > { %v8378_v12 = vsel %vm13353_vm4, %v8373_v57, %v8377_v7  ;;  %12799 = vmatmul.mubr.msk.bf16.gmra.mxu1 %vm6638_vm0, %v11732_v51  ;;  %18331 = vst [vmem:[#allocation24_spill] sm:$0xff] %v16651_v26  ;;  %v13162_v7 = vld [vmem:[#allocation2 + $0x60] sm:$0xff]   ;;  %v16671_v41 = vpop.f32.mrf.mxu1  ;;  %v16900_v26 = vld [vmem:[#allocation2 + $0x7c] sm:$0xf] }
 0x338   : > { %v8388_v6 = vsel %vm13353_vm4, %v8383_v43, %v8387_v63  ;;  %12838 = vmatprep.mubr.msk.bf16.mxu1 %vm6638_vm0, %v13147_v1  ;;  %v16656_v37 = vpop.f32.mrf.mxu0  ;;  %18337 = vst [vmem:[#allocation41_spill] sm:$0xff] %v16671_v41  ;;  %v13167_v57 = vld [vmem:[#allocation2 + $0x84] sm:$0xff]   ;;  %v8826_v43 = vrot.slane %v16539_v5, 5  ;;  %v17007_v41 = vld [vmem:[#allocation2 + $0xac] sm:$0xf] }
 0x339   : > { %v11847_v55 = vcombine.low %v8378_v12, %v8388_v6  ;;  %18332 = vst [vmem:[#allocation35_spill] sm:$0xff] %v16656_v37  ;;  %v16678_v2 = vpop.f32.mrf.mxu1  ;;  %v13164_v1 = vld [vmem:[#allocation2 + $0x84] sm:$0xff]   ;;  %v11875_v12 = vrot.slane %v8694_v53, 9  ;;  %v13168_v53 = vld [vmem:[#allocation2 + $0x9c] sm:$0xff]  }
 0x33a   : > { %v16661_v46 = vpop.f32.mrf.mxu0  ;;  %18339 = vst [vmem:[#allocation7_spill] sm:$0xff] %v16678_v2  ;;  %v8828_v6 = vrot.slane %v8826_v43, 4  ;;  %v8691_v2 = vld [vmem:[#allocation2 + $0x6c] sm:$0xe]  ;;  %v17028_v49 = vld [vmem:[#allocation2 + $0xc4] sm:$0xf] }
 0x33b   : > { %12901 = vmatmul.mubr.msk.bf16.gmra.mxu0 %vm6638_vm0, %v11847_v55  ;;  %18334 = vst [vmem:[#allocation39_spill] sm:$0xff] %v16661_v46  ;;  %v8829_v55 = vrot.slane %v16541_v25, 5  ;;  %v16694_v5 = vsel %vm13648_vm7, %v11875_v12, %v8826_v43  ;;  %v13169_v43 = vld [vmem:[#allocation2 + $0xa8] sm:$0xff]   ;;  %v8763_v25 = vrot.slane %v16426_v56, 5  ;;  %18384 = vst [vmem:[#allocation59_spill] sm:$0xff] %v17028_v49 }
 0x33c   : > { %12940 = vmatprep.mubr.msk.bf16.mxu0 %vm6638_vm0, %v13145_v36  ;;  %v16668_v8 = vpop.f32.mrf.mxu0  ;;  %v8695_v36 = vld [vmem:[#allocation2 + $0x9c] sm:$0xe]  ;;  %v16819_v46 = vld [vmem:[#allocation2 + $0x4c] sm:$0xf] }
 0x33d   : > { %18336 = vst [vmem:[#allocation44_spill] sm:$0xff] %v16668_v8  ;;  %v13208_v8 = vld [vmem:[#allocation2 + $0x2c] sm:$0x1] }
 0x33e   : > { %v16673_v32 = vpop.f32.mrf.mxu0 }
 0x33f   : > { %12839 = vmatmul.mubr.msk.bf16.vlgmr.msra.gmra.mxu1 %vm6638_vm0, %v13150_v58  ;;  %18338 = vst [vmem:[#allocation6_spill] sm:$0xff] %v16673_v32  ;;  %v13165_v58 = vld [vmem:[#allocation2 + $0x90] sm:$0xff]  }
 0x340   : > { %12905 = vmatpush3.bf16.msra.mxu1 %v8958_v22  ;;  %12842 = vmatprep.mubr.msk.bf16.mxu1 %vm6638_vm0, %v13151_v60  ;;  %v16680_v20 = vpop.f32.mrf.mxu0  ;;  %v8833_v22 = vrot.slane %v16551_v38, 5  ;;  %v16698_v60 = vsel %vm13648_vm7, %v8828_v6, %v8829_v55  ;;  %v11876_v38 = vrot.slane %v8695_v36, 9  ;;  %v8854_v6 = vrot.slane %v16594_v24, 5 }
 0x341   : > { %13056 = vmatprep.subr.msk.bf16.mxu1 %vm6687_vm8, %v16639_v27  ;;  %18340 = vst [vmem:[#allocation8_spill] sm:$0xff] %v16680_v20 }
 0x342   : > { %v16686_v51 = vpop.f32.mrf.mxu0 }
 0x343   : > { %12941 = vmatmul.mubr.msk.bf16.vlgmr.msra.gmra.mxu0 %vm6638_vm0, %v13148_v35  ;;  %18342 = vst [vmem:[#allocation12_spill] sm:$0xff] %v16686_v51 }
 0x344   : > { %12944 = vmatprep.mubr.msk.bf16.mxu0 %vm6638_vm0, %v13149_v16  ;;  %13007 = vmatpush3.bf16.msra.mxu0 %v10513_v13  ;;  %v8835_v16 = vrot.slane %v8833_v22, 4 }
 0x347   : > { %12843 = vmatmul.mubr.msk.bf16.gmra.mxu1 %vm6638_vm0, %v13154_v30  ;;  %v8836_v30 = vrot.slane %v16557_v19, 5 }
 0x348   : > { %12846 = vmatprep.mubr.msk.bf16.mxu1 %vm6638_vm0, %v13155_v42  ;;  %v8696_v42 = vld [vmem:[#allocation2 + $0xa8] sm:$0xe] }
 0x34b   : > { %12945 = vmatmul.mubr.msk.bf16.gmra.mxu0 %vm6638_vm0, %v13152_v61  ;;  %v16684_v63 = vpop.f32.mrf.mxu1  ;;  %v13170_v61 = vld [vmem:[#allocation2 + $0x90] sm:$0xff]  }
 0x34c   : > { %12948 = vmatprep.mubr.msk.bf16.mxu0 %vm6638_vm0, %v13153_v47  ;;  %18341 = vst [vmem:[#allocation10_spill] sm:$0xff] %v16684_v63  ;;  %v16710_v47 = vsel %vm13648_vm7, %v11876_v38, %v8833_v22  ;;  %v13204_v22 = vld [vmem:[#allocation2 + $0x10] sm:$0xf]  ;;  %v8794_v63 = vrot.slane %v16483_v45, 5 }
 0x34d   : > { %v16701_v35 = vpop.f32.mrf.mxu1  ;;  %v8749_v38 = vrot.slane %v13204_v22, 5  ;;  %v13205_v22 = vld [vmem:[#allocation2 + $0x14] sm:$0x1] }
 0x34e   : > { %18343 = vst [vmem:[#allocation9_spill] sm:$0xff] %v16701_v35 }
 0x34f   : > { %12847 = vmatmul.mubr.msk.bf16.gmra.mxu1 %vm6638_vm0, %v13158_v15  ;;  %v16714_v15 = vsel %vm13648_vm7, %v8835_v16, %v8836_v30 }
 0x350   : > { %12850 = vmatprep.mubr.msk.bf16.mxu1 %vm6638_vm0, %v13159_v33  ;;  %v8840_v33 = vrot.slane %v16566_v62, 5  ;;  %v8847_v62 = vrot.slane %v16581_v29, 5  ;;  %v8850_v29 = vrot.slane %v16587_v44, 5 }
 0x352   : > { %v16703_v13 = vpop.f32.mrf.mxu0  ;;  %v8849_v36 = vrot.slane %v8847_v62, 4 }
 0x353   : > { %12949 = vmatmul.mubr.msk.bf16.gmra.mxu0 %vm6638_vm0, %v13156_v50  ;;  %18344 = vst [vmem:[#allocation14_spill] sm:$0xff] %v16703_v13  ;;  %v13171_v50 = vld [vmem:[#allocation2 + $0x9c] sm:$0xff]   ;;  %v16796_v13 = vld [vmem:[#allocation2 + $0x2c] sm:$0x1] }
 0x354   : > { %12952 = vmatprep.mubr.msk.bf16.mxu0 %vm6638_vm0, %v13157_v34  ;;  %v16722_v19 = vpop.f32.mrf.mxu0  ;;  %v16754_v44 = vsel %vm13648_vm7, %v8849_v36, %v8850_v29  ;;  %v13173_v36 = vld [vmem:[#allocation2 + $0xc0] sm:$0xff]   ;;  %v16783_v34 = vld [vmem:[#allocation2 + $0x34] sm:$0xf]  ;;  %v10314_v32 = vrot.slane %v16796_v13, 5 }
 0x355   : > { %18346 = vst [vmem:[#allocation16_spill] sm:$0xff] %v16722_v19  ;;  %v16775_v29 = vld [vmem:[#allocation2 + $0x20] sm:$0x1]  ;;  %v10318_v56 = vrot.slane %v16783_v34, 5 }
 0x356   : > { %v16745_v30 = vpop.f32.mrf.mxu0 }
 0x357   : > { %12851 = vmatmul.mubr.msk.bf16.gmra.mxu1 %vm6638_vm0, %v13162_v7  ;;  %v16720_v7 = vpop.f32.mrf.mxu1  ;;  %18348 = vst [vmem:[#allocation13_spill] sm:$0xff] %v16745_v30 }
 0x358   : > { %12854 = vmatprep.mubr.msk.bf16.mxu1 %vm6638_vm0, %v13163_v59  ;;  %18345 = vst [vmem:[#allocation11_spill] sm:$0xff] %v16720_v7  ;;  %v11877_v59 = vrot.slane %v8696_v42, 9  ;;  %v8856_v42 = vrot.slane %v8854_v6, 4 }
 0x359   : > { %v16743_v16 = vpop.f32.mrf.mxu1 }
 0x35a   : > { %18347 = vst [vmem:[#allocation18_spill] sm:$0xff] %v16743_v16  ;;  %v10240_v16 = vld [vmem:[#allocation2 + $0x30] sm:$0xe] }
 0x35b   : > { %12953 = vmatmul.mubr.msk.bf16.gmra.mxu0 %vm6638_vm0, %v13160_v10  ;;  %v8842_v10 = vrot.slane %v8840_v33, 4 }
 0x35c   : > { %12956 = vmatprep.mubr.msk.bf16.mxu0 %vm6638_vm0, %v13161_v52  ;;  %v8843_v52 = vrot.slane %v16573_v9, 5 }
 0x35e   : > { %v16733_v12 = vsel %vm13648_vm7, %v8842_v10, %v8843_v52 }
 0x35f   : > { %12855 = vmatmul.mubr.msk.bf16.gmra.mxu1 %vm6638_vm0, %v13166_v21  ;;  %v8697_v21 = vld [vmem:[#allocation2 + $0xb4] sm:$0xe] }
 0x360   : > { %12858 = vmatprep.mubr.msk.bf16.mxu1 %vm6638_vm0, %v13167_v57  ;;  %v8698_v57 = vld [vmem:[#allocation2 + $0xc0] sm:$0xe]  ;;  %v11878_v55 = vrot.slane %v8697_v21, 9 }
 0x361   : > { %v11879_v24 = vrot.slane %v8698_v57, 9 }
 0x363   : > { %12957 = vmatmul.mubr.msk.bf16.gmra.mxu0 %vm6638_vm0, %v13164_v1  ;;  %v16729_v1 = vsel %vm13648_vm7, %v11877_v59, %v8840_v33  ;;  %v16750_v33 = vsel %vm13648_vm7, %v11878_v55, %v8847_v62  ;;  %v16760_v10 = vsel %vm13648_vm7, %v11879_v24, %v8854_v6  ;;  %v8751_v62 = vrot.slane %v8749_v38, 4  ;;  %v13172_v55 = vld [vmem:[#allocation2 + $0xb4] sm:$0xff]   ;;  %v8683_v6 = vld [vmem:[#allocation2 + $0xc] sm:$0xe] }
 0x364   : > { %12960 = vmatprep.mubr.msk.bf16.mxu0 %vm6638_vm0, %v13165_v58  ;;  %v16741_v58 = vld [vmem:[#allocation2 + $0x1c] sm:$0xf]  ;;  %v8752_v24 = vrot.slane %v13205_v22, 5  ;;  %v11864_v9 = vrot.slane %v8683_v6, 9 }
 0x365   : > { %v10304_v21 = vrot.slane %v16741_v58, 5  ;;  %v16770_v57 = vpop.f32.mrf.mxu1 }
 0x366   : > { %18349 = vst [vmem:[#allocation15_spill] sm:$0xff] %v16770_v57  ;;  %v8750_v6 = vsel %vm13648_vm7, %v11864_v9, %v8749_v38  ;;  %v10239_v38 = vld [vmem:[#allocation2 + $0x24] sm:$0xe] }
 0x367   : > { %12859 = vmatmul.mubr.msk.bf16.gmra.mxu1 %vm6638_vm0, %v13170_v61  ;;  %v8857_v61 = vrot.slane %v16603_v18, 5  ;;  %v13175_v18 = vld [vmem:[#allocation2 + $0xb4] sm:$0xff]  }
 0x368   : > { %12862 = vmatprep.mubr.msk.bf16.mxu1 %vm6638_vm0, %v13171_v50  ;;  %v13174_v50 = vld [vmem:[#allocation2 + $0xa8] sm:$0xff]  }
 0x369   : > { %v16764_v52 = vsel %vm13648_vm7, %v8856_v42, %v8857_v61  ;;  %v16777_v42 = vld [vmem:[#allocation2 + $0x28] sm:$0xf]  ;;  %v10238_v61 = vld [vmem:[#allocation2 + $0x18] sm:$0xe] }
 0x36a   : > { %v10311_v30 = vrot.slane %v16777_v42, 5  ;;  %v11979_v19 = vrot.slane %v10238_v61, 9 }
 0x36b   : > { %12961 = vmatmul.mubr.msk.bf16.gmra.mxu0 %vm6638_vm0, %v13168_v53  ;;  %v13206_v53 = vld [vmem:[#allocation2 + $0x1c] sm:$0xf] }
 0x36c   : > { %12964 = vmatprep.mubr.msk.bf16.mxu0 %vm6638_vm0, %v13169_v43  ;;  %v16772_v43 = vpop.f32.mrf.mxu0  ;;  %v8756_v59 = vrot.slane %v13206_v53, 5  ;;  %v13177_v53 = vld [vmem:[#allocation2 + $0xc0] sm:$0xff]   ;;  %v10305_v9 = vsel %vm13648_vm7, %v11979_v19, %v10304_v21 }
 0x36d   : > { %18350 = vst [vmem:[#allocation22_spill] sm:$0xff] %v16772_v43  ;;  %v16786_v43 = vpop.f32.mrf.mxu1 }
 0x36e   : > { %18351 = vst [vmem:[#allocation25_spill] sm:$0xff] %v16786_v43  ;;  %v16788_v22 = vpop.f32.mrf.mxu0  ;;  %v8758_v51 = vrot.slane %v8756_v59, 4  ;;  %v8765_v43 = vrot.slane %v8763_v25, 4 }
 0x36f   : > { %12863 = vmatmul.mubr.msk.bf16.gmra.mxu1 %vm6638_vm0, %v13174_v50  ;;  %v10306_v50 = vrot.slane %v10304_v21, 4  ;;  %18352 = vst [vmem:[#allocation28_spill] sm:$0xff] %v16788_v22  ;;  %v8684_v22 = vld [vmem:[#allocation2 + $0x18] sm:$0xe]  ;;  %v16800_v20 = vpop.f32.mrf.mxu1  ;;  %v16813_v21 = vld [vmem:[#allocation2 + $0x40] sm:$0xf] }
 0x370   : > { %12866 = vmatprep.mubr.msk.bf16.mxu1 %vm6638_vm0, %v13175_v18  ;;  %v8753_v18 = vsel %vm13648_vm7, %v8751_v62, %v8752_v24  ;;  %18353 = vst [vmem:[#allocation17_spill] sm:$0xff] %v16800_v20  ;;  %v16802_v61 = vpop.f32.mrf.mxu0  ;;  %v8766_v20 = vrot.slane %v13208_v8, 5  ;;  %v11865_v7 = vrot.slane %v8684_v22, 9  ;;  %v8777_v8 = vrot.slane %v16448_v11, 5 }
 0x371   : > { %v11881_v24 = vcombine.low %v8750_v6, %v8753_v18  ;;  %18354 = vst [vmem:[#allocation19_spill] sm:$0xff] %v16802_v61  ;;  %v13207_v18 = vld [vmem:[#allocation2 + $0x20] sm:$0x1]  ;;  %v8685_v6 = vld [vmem:[#allocation2 + $0x24] sm:$0xe]  ;;  %v10320_v61 = vrot.slane %v10318_v56, 4 }
 0x372   : > { %v16824_v22 = vpop.f32.mrf.mxu0 }
 0x373   : > { %12965 = vmatmul.mubr.msk.bf16.gmra.mxu0 %vm6638_vm0, %v13172_v55  ;;  %v10307_v55 = vrot.slane %v16775_v29, 5  ;;  %18356 = vst [vmem:[#allocation20_spill] sm:$0xff] %v16824_v22 }
 0x374   : > { %12968 = vmatprep.mubr.msk.bf16.mxu0 %vm6638_vm0, %v13173_v36  ;;  %v13176_v36 = vld [vmem:[#allocation2 + $0xcc] sm:$0xff]  }
 0x375   : > { %v10308_v62 = vsel %vm13648_vm7, %v10306_v50, %v10307_v55  ;;  %v10313_v50 = vrot.slane %v10311_v30, 4  ;;  %v8759_v55 = vrot.slane %v13207_v18, 5  ;;  %v8767_v18 = vsel %vm13648_vm7, %v8765_v43, %v8766_v20 }
 0x376   : > { %v11996_v57 = vcombine.low %v10305_v9, %v10308_v62  ;;  %v11980_v62 = vrot.slane %v10239_v38, 9  ;;  %v11866_v9 = vrot.slane %v8685_v6, 9  ;;  %v10043_v20 = vsel %vm6687_vm8, %v16639_v27, 0 }
 0x377   : > { %12867 = vmatmul.mubr.msk.bf16.gmra.mxu1 %vm6638_vm0, %v13177_v53  ;;  %v16808_v53 = vld [vmem:[#allocation2 + $0x38] sm:$0x1]  ;;  %v8760_v19 = vsel %vm13648_vm7, %v8758_v51, %v8759_v55  ;;  %v10315_v51 = vsel %vm13648_vm7, %v10313_v50, %v10314_v32  ;;  %v11981_v55 = vrot.slane %v10240_v16, 9  ;;  %v10325_v43 = vrot.slane %v16813_v21, 5 }
 0x378   : > { %12906 = vmatprep.mubr.msk.bf16.mxu1 %vm6638_vm0, %v11881_v24  ;;  %v8770_v24 = vrot.slane %v16436_v54, 5  ;;  %v10321_v54 = vrot.slane %v16808_v53, 5  ;;  %v8764_v11 = vsel %vm13648_vm7, %v11866_v9, %v8763_v25  ;;  %v10332_v32 = vrot.slane %v16819_v46, 5  ;;  %v16844_v25 = vpop.f32.mrf.mxu0 }
 0x379   : > { %v11883_v22 = vcombine.low %v8764_v11, %v8767_v18  ;;  %v10312_v50 = vsel %vm13648_vm7, %v11980_v62, %v10311_v30  ;;  %v8779_v27 = vrot.slane %v8777_v8, 4  ;;  %18358 = vst [vmem:[#allocation23_spill] sm:$0xff] %v16844_v25  ;;  %v16849_v18 = vld [vmem:[#allocation2 + $0x44] sm:$0x1]  ;;  %v8687_v62 = vld [vmem:[#allocation2 + $0x3c] sm:$0xe] }
 0x37a   : > { %v10322_v6 = vsel %vm13648_vm7, %v10320_v61, %v10321_v54  ;;  %v8772_v16 = vrot.slane %v8770_v24, 4  ;;  %v11997_v9 = vcombine.low %v10312_v50, %v10315_v51  ;;  %v10319_v61 = vsel %vm13648_vm7, %v11981_v55, %v10318_v56  ;;  %v13209_v54 = vld [vmem:[#allocation2 + $0x38] sm:$0x1]  ;;  %v16851_v11 = vld [vmem:[#allocation2 + $0x50] sm:$0x1] }
 0x37b   : > { %12969 = vmatmul.mubr.msk.bf16.gmra.mxu0 %vm6638_vm0, %v13176_v36  ;;  %v16822_v36 = vpop.f32.mrf.mxu1  ;;  %v8773_v30 = vrot.slane %v13209_v54, 5  ;;  %v10334_v51 = vrot.slane %v10332_v32, 4  ;;  %v8784_v55 = vrot.slane %v16465_v40, 5  ;;  %v10335_v40 = vrot.slane %v16851_v11, 5 }
 0x37c   : > { %13008 = vmatprep.mubr.msk.bf16.mxu0 %vm6638_vm0, %v11996_v57  ;;  %18355 = vst [vmem:[#allocation30_spill] sm:$0xff] %v16822_v36  ;;  %v8757_v57 = vsel %vm13648_vm7, %v11865_v7, %v8756_v59  ;;  %v10241_v7 = vld [vmem:[#allocation2 + $0x3c] sm:$0xe]  ;;  %v8686_v59 = vld [vmem:[#allocation2 + $0x30] sm:$0xe] }
 0x37d   : > { %v11882_v38 = vcombine.low %v8757_v57, %v8760_v19  ;;  %v16842_v19 = vpop.f32.mrf.mxu1  ;;  %v11998_v57 = vcombine.low %v10319_v61, %v10322_v6  ;;  %v10242_v36 = vld [vmem:[#allocation2 + $0x48] sm:$0xe]  ;;  %v11867_v50 = vrot.slane %v8686_v59, 9  ;;  %v8774_v56 = vsel %vm13648_vm7, %v8772_v16, %v8773_v30 }
 0x37e   : > { %18357 = vst [vmem:[#allocation21_spill] sm:$0xff] %v16842_v19  ;;  %v13210_v19 = vld [vmem:[#allocation2 + $0x44] sm:$0x1]  ;;  %v11868_v6 = vrot.slane %v8687_v62, 9  ;;  %v11982_v16 = vrot.slane %v10241_v7, 9  ;;  %v11983_v30 = vrot.slane %v10242_v36, 9  ;;  %v10336_v7 = vsel %vm13648_vm7, %v10334_v51, %v10335_v40 }
 0x37f   : > { %12907 = vmatmul.mubr.msk.bf16.vlgmr.msra.gmra.mxu1 %vm6638_vm0, %v11882_v38  ;;  %v10327_v38 = vrot.slane %v10325_v43, 4  ;;  %v8780_v35 = vrot.slane %v13210_v19, 5  ;;  %v16863_v19 = vld [vmem:[#allocation2 + $0x64] sm:$0xf]  ;;  %v16866_v59 = vpop.f32.mrf.mxu1  ;;  %v8786_v37 = vrot.slane %v8784_v55, 4 }
 0x380   : > { %12973 = vmatpush3.bf16.msra.mxu1 %v10043_v20  ;;  %12910 = vmatprep.mubr.msk.bf16.mxu1 %vm6638_vm0, %v11883_v22  ;;  %v16856_v22 = vld [vmem:[#allocation2 + $0x58] sm:$0xf]  ;;  %v10328_v20 = vrot.slane %v16849_v18, 5  ;;  %18359 = vst [vmem:[#allocation27_spill] sm:$0xff] %v16866_v59  ;;  %v8688_v59 = vld [vmem:[#allocation2 + $0x48] sm:$0xe]  ;;  %v10333_v51 = vsel %vm13648_vm7, %v11983_v30, %v10332_v32 }
 0x381   : > { %v8781_v61 = vsel %vm13648_vm7, %v8779_v27, %v8780_v35  ;;  %v8778_v35 = vsel %vm13648_vm7, %v11868_v6, %v8777_v8  ;;  %v10243_v8 = vld [vmem:[#allocation2 + $0x54] sm:$0xe]  ;;  %v13211_v40 = vld [vmem:[#allocation2 + $0x50] sm:$0x1] }
 0x382   : > { %v10329_v62 = vsel %vm13648_vm7, %v10327_v38, %v10328_v20  ;;  %v11885_v36 = vcombine.low %v8778_v35, %v8781_v61  ;;  %v16886_v38 = vld [vmem:[#allocation2 + $0x5c] sm:$0x1]  ;;  %v16890_v20 = vpop.f32.mrf.mxu1  ;;  %v16895_v61 = vld [vmem:[#allocation2 + $0x68] sm:$0x1] }
 0x383   : > { %13009 = vmatmul.mubr.msk.bf16.vlgmr.msra.gmra.mxu0 %vm6638_vm0, %v11997_v9  ;;  %v8791_v9 = vrot.slane %v16476_v48, 5  ;;  %v16868_v54 = vpop.f32.mrf.mxu0  ;;  %v10339_v48 = vrot.slane %v16856_v22, 5  ;;  %18362 = vst [vmem:[#allocation29_spill] sm:$0xff] %v16890_v20  ;;  %v16930_v20 = vld [vmem:[#allocation2 + $0x80] sm:$0x1] }
 0x384   : > { %13012 = vmatprep.mubr.msk.bf16.mxu0 %vm6638_vm0, %v11998_v57  ;;  %18360 = vst [vmem:[#allocation26_spill] sm:$0xff] %v16868_v54  ;;  %v8771_v57 = vsel %vm13648_vm7, %v11867_v50, %v8770_v24  ;;  %v10346_v54 = vrot.slane %v16863_v19, 5  ;;  %v10326_v24 = vsel %vm13648_vm7, %v11982_v16, %v10325_v43  ;;  %v8787_v43 = vrot.slane %v13211_v40, 5  ;;  %v8689_v16 = vld [vmem:[#allocation2 + $0x54] sm:$0xe] }
 0x385   : > { %v11884_v25 = vcombine.low %v8771_v57, %v8774_v56  ;;  %v16878_v27 = vpop.f32.mrf.mxu0  ;;  %v8793_v50 = vrot.slane %v8791_v9, 4  ;;  %v16888_v56 = vld [vmem:[#allocation2 + $0x70] sm:$0xf]  ;;  %v11999_v6 = vcombine.low %v10326_v24, %v10329_v62  ;;  %v12000_v57 = vcombine.low %v10333_v51, %v10336_v7  ;;  %v10244_v62 = vld [vmem:[#allocation2 + $0x60] sm:$0xe] }
 0x386   : > { %18361 = vst [vmem:[#allocation34_spill] sm:$0xff] %v16878_v27  ;;  %v10341_v35 = vrot.slane %v10339_v48, 4  ;;  %v11869_v27 = vrot.slane %v8688_v59, 9  ;;  %v10348_v32 = vrot.slane %v10346_v54, 4  ;;  %v8788_v30 = vsel %vm13648_vm7, %v8786_v37, %v8787_v43 }
 0x387   : > { %12911 = vmatmul.mubr.msk.bf16.gmra.mxu1 %vm6638_vm0, %v11884_v25  ;;  %v16897_v25 = vpop.f32.mrf.mxu0  ;;  %v8798_v24 = vrot.slane %v16491_v0, 5  ;;  %v10342_v7 = vrot.slane %v16886_v38, 5  ;;  %v11870_v59 = vrot.slane %v8689_v16, 9  ;;  %v8795_v45 = vsel %vm13648_vm7, %v8793_v50, %v8794_v63  ;;  %v16924_v63 = vld [vmem:[#allocation2 + $0x74] sm:$0x1] }
 0x388   : > { %12914 = vmatprep.mubr.msk.bf16.mxu1 %vm6638_vm0, %v11885_v36  ;;  %18363 = vst [vmem:[#allocation36_spill] sm:$0xff] %v16897_v25  ;;  %v8805_v51 = vrot.slane %v16499_v31, 5  ;;  %v11984_v40 = vrot.slane %v10243_v8, 9  ;;  %v10349_v25 = vrot.slane %v16895_v61, 5  ;;  %v8785_v37 = vsel %vm13648_vm7, %v11869_v27, %v8784_v55  ;;  %v10245_v8 = vld [vmem:[#allocation2 + $0x6c] sm:$0xe] }
 0x389   : > { %v10360_v0 = vrot.slane %v16900_v26, 5  ;;  %v16918_v43 = vpop.f32.mrf.mxu0  ;;  %v10343_v16 = vsel %vm13648_vm7, %v10341_v35, %v10342_v7  ;;  %v11886_v36 = vcombine.low %v8785_v37, %v8788_v30  ;;  %v8792_v31 = vsel %vm13648_vm7, %v11870_v59, %v8791_v9  ;;  %v8690_v30 = vld [vmem:[#allocation2 + $0x60] sm:$0xe]  ;;  %v13212_v37 = vld [vmem:[#allocation2 + $0x68] sm:$0x1] }
 0x38a   : > { %18365 = vst [vmem:[#allocation43_spill] sm:$0xff] %v16918_v43  ;;  %v10350_v50 = vsel %vm13648_vm7, %v10348_v32, %v10349_v25  ;;  %v18366_v55 = vrot.slane %v16888_v56, 5  ;;  %v8800_v43 = vrot.slane %v8798_v24, 4  ;;  %v10340_v35 = vsel %vm13648_vm7, %v11984_v40, %v10339_v48 }
 0x38b   : > { %13013 = vmatmul.mubr.msk.bf16.gmra.mxu0 %vm6638_vm0, %v11999_v6  ;;  %v16912_v6 = vpop.f32.mrf.mxu1  ;;  %v8807_v7 = vrot.slane %v8805_v51, 4  ;;  %v12001_v32 = vcombine.low %v10340_v35, %v10343_v16  ;;  %v10356_v59 = vrot.slane %v16924_v63, 5  ;;  %v11986_v40 = vrot.slane %v10245_v8, 9 }
 0x38c   : > { %13016 = vmatprep.mubr.msk.bf16.mxu0 %vm6638_vm0, %v12000_v57  ;;  %18364 = vst [vmem:[#allocation33_spill] sm:$0xff] %v16912_v6  ;;  %v11985_v57 = vrot.slane %v10244_v62, 9  ;;  %v11887_v6 = vcombine.low %v8792_v31, %v8795_v45  ;;  %v10355_v27 = vrot.slane %v18366_v55, 4  ;;  %v10246_v62 = vld [vmem:[#allocation2 + $0x78] sm:$0xe]  ;;  %v10362_v45 = vrot.slane %v10360_v0, 4 }
 0x38d   : > { %v8801_v31 = vrot.slane %v13212_v37, 5  ;;  %v16941_v55 = vld [vmem:[#allocation2 + $0x88] sm:$0xf]  ;;  %v11871_v35 = vrot.slane %v8690_v30, 9  ;;  %v10247_v30 = vld [vmem:[#allocation2 + $0x84] sm:$0xe] }
 0x38e   : > { %v10347_v9 = vsel %vm13648_vm7, %v11985_v57, %v10346_v54  ;;  %v8808_v57 = vrot.slane %v16505_v28, 5  ;;  %v11872_v28 = vrot.slane %v8691_v2, 9 }
 0x38f   : > { %12915 = vmatmul.mubr.msk.bf16.gmra.mxu1 %vm6638_vm0, %v11886_v36  ;;  %v12002_v54 = vcombine.low %v10347_v9, %v10350_v50  ;;  %v10363_v36 = vrot.slane %v16930_v20, 5  ;;  %v8802_v37 = vsel %vm13648_vm7, %v8800_v43, %v8801_v31  ;;  %v8812_v50 = vrot.slane %v16513_v39, 5 }
 0x390   : > { %v16937_v25 = vpop.f32.mrf.mxu1  ;;  %12918 = vmatprep.mubr.msk.bf16.mxu1 %vm6638_vm0, %v11887_v6  ;;  %v16943_v48 = vpop.f32.mrf.mxu0  ;;  %v10357_v6 = vsel %vm13648_vm7, %v10355_v27, %v10356_v59  ;;  %v8809_v9 = vsel %vm13648_vm7, %v8807_v7, %v8808_v57  ;;  %v11987_v27 = vrot.slane %v10246_v62, 9  ;;  %v8799_v39 = vsel %vm13648_vm7, %v11871_v35, %v8798_v24  ;;  %v16979_v57 = vld [vmem:[#allocation2 + $0x8c] sm:$0x1]  ;;  %v10248_v59 = vld [vmem:[#allocation2 + $0x90] sm:$0xe] }
 0x391   : > { %18367 = vst [vmem:[#allocation38_spill] sm:$0xff] %v16937_v25  ;;  %18368 = vst [vmem:[#allocation46_spill] sm:$0xff] %v16943_v48  ;;  %v10367_v48 = vrot.slane %v16941_v55, 5  ;;  %v10364_v43 = vsel %vm13648_vm7, %v10362_v45, %v10363_v36  ;;  %v18373_v7 = vrot.slane %v16888_v56, 5  ;;  %v8806_v62 = vsel %vm13648_vm7, %v11872_v28, %v8805_v51  ;;  %v16981_v45 = vld [vmem:[#allocation2 + $0xa0] sm:$0xf] }
 0x392   : > { %v16949_v16 = vpop.f32.mrf.mxu1  ;;  %v16957_v8 = vpop.f32.mrf.mxu0  ;;  %18374 = vst [vmem:[#allocation50_spill] sm:$0xff] %v16981_v45  ;;  %v10361_v24 = vsel %vm13648_vm7, %v11987_v27, %v10360_v0  ;;  %v11889_v35 = vcombine.low %v8806_v62, %v8809_v9  ;;  %v16988_v51 = vld [vmem:[#allocation2 + $0x98] sm:$0x1]  ;;  %v18377_v28 = vrot.slane %v16525_v4, 5  ;;  %v10370_v0 = vrot.slane %v16979_v57, 5 }
 0x393   : > { %18369 = vst [vmem:[#allocation40_spill] sm:$0xff] %v16949_v16  ;;  %13017 = vmatmul.mubr.msk.bf16.gmra.mxu0 %vm6638_vm0, %v12001_v32  ;;  %18370 = vst [vmem:[#allocation42_spill] sm:$0xff] %v16957_v8  ;;  %v10354_v31 = vsel %vm13648_vm7, %v11986_v40, %v18373_v7  ;;  %v8692_v32 = vld [vmem:[#allocation2 + $0x78] sm:$0xe]  ;;  %v11988_v40 = vrot.slane %v10247_v30, 9  ;;  %v18378_v9 = vrot.slane %v16947_v17, 5 }
 0x394   : > { %13020 = vmatprep.mubr.msk.bf16.mxu0 %vm6638_vm0, %v12002_v54  ;;  %v16964_v16 = vpop.f32.mrf.mxu1  ;;  %v16971_v2 = vpop.f32.mrf.mxu0  ;;  %v11888_v54 = vcombine.low %v8799_v39, %v8802_v37  ;;  %v12003_v36 = vcombine.low %v10354_v31, %v10357_v6  ;;  %v10369_v37 = vrot.slane %v10367_v48, 4  ;;  %18376 = vst [vmem:[#allocation58_spill] sm:$0xff] %v16988_v51  ;;  %v8821_v39 = vrot.slane %v18377_v28, 4  ;;  %v9512_v6 = vld [vmem:[#allocation2 + $0x18] sm:$0xf] }
 0x395   : > { %18371 = vst [vmem:[#allocation48_spill] sm:$0xff] %v16964_v16  ;;  %18372 = vst [vmem:[#allocation45_spill] sm:$0xff] %v16971_v2  ;;  %v8814_v2 = vrot.slane %v8812_v50, 4  ;;  %v12004_v16 = vcombine.low %v10361_v24, %v10364_v43  ;;  %v10376_v27 = vrot.slane %v18378_v9, 4  ;;  %v13213_v7 = vld [vmem:[#allocation2 + $0x80] sm:$0x1]  ;;  %v10368_v62 = vsel %vm13648_vm7, %v11988_v40, %v10367_v48 }
 0x396   : > { %v16985_v8 = vpop.f32.mrf.mxu1  ;;  %v8815_v31 = vrot.slane %v13213_v7, 5  ;;  %v8693_v43 = vld [vmem:[#allocation2 + $0x84] sm:$0xe]  ;;  %v16997_v30 = vpop.f32.mrf.mxu0  ;;  %v11989_v24 = vrot.slane %v10248_v59, 9  ;;  %v11873_v28 = vrot.slane %v8692_v32, 9  ;;  %v10377_v9 = vrot.slane %v16988_v51, 5 }
 0x397   : > { %18375 = vst [vmem:[#allocation52_spill] sm:$0xff] %v16985_v8  ;;  %12919 = vmatmul.mubr.msk.bf16.gmra.mxu1 %vm6638_vm0, %v11888_v54  ;;  %v10381_v54 = vrot.slane %v16981_v45, 5  ;;  %18379 = vst [vmem:[#allocation47_spill] sm:$0xff] %v16997_v30  ;;  %v13214_v8 = vld [vmem:[#allocation2 + $0x8c] sm:$0x1]  ;;  %v9570_v30 = vshll.u32 %v16741_v58, 16 }
 0x398   : > { %12922 = vmatprep.mubr.msk.bf16.mxu1 %vm6638_vm0, %v11889_v35  ;;  %v8822_v25 = vrot.slane %v13214_v8, 5  ;;  %v17001_v35 = vld [vmem:[#allocation2 + $0xa4] sm:$0x1]  ;;  %v8816_v7 = vsel %vm13648_vm7, %v8814_v2, %v8815_v31  ;;  %v9574_v48 = vshrl.u32 %v16741_v58, 16  ;;  %v10371_v8 = vsel %vm13648_vm7, %v10369_v37, %v10370_v0  ;;  %v17020_v40 = vld [vmem:[#allocation2 + $0xb8] sm:$0xf] }
 0x399   : > { %18380 = vst [vmem:[#allocation54_spill] sm:$0xff] %v17001_v35  ;;  %v8813_v32 = vsel %vm13648_vm7, %v11873_v28, %v8812_v50  ;;  %v11874_v59 = vrot.slane %v8693_v43, 9  ;;  %v10378_v31 = vsel %vm13648_vm7, %v10376_v27, %v10377_v9  ;;  %v9561_v37 = vshrl.u32 %v9512_v6, 16  ;;  %v10250_v28 = vld [vmem:[#allocation2 + $0xa8] sm:$0xe] }
 0x39a   : > { %v8823_v2 = vsel %vm13648_vm7, %v8821_v39, %v8822_v25  ;;  %v9564_v0 = vshll.u32 %v9512_v6, 16  ;;  %v11890_v50 = vcombine.low %v8813_v32, %v8816_v7  ;;  %v18385_v43 = vrot.slane %v16525_v4, 5  ;;  %v17036_v51 = vld [vmem:[#allocation2 + $0xb0] sm:$0x1] }
 0x39b   : > { %13021 = vmatmul.mubr.msk.bf16.gmra.mxu0 %vm6638_vm0, %v12003_v36  ;;  %v17009_v3 = vpop.f32.mrf.mxu1  ;;  %v10249_v36 = vld [vmem:[#allocation2 + $0x9c] sm:$0xe]  ;;  %v10384_v39 = vrot.slane %v17001_v35, 5  ;;  %v10388_v27 = vrot.slane %v17007_v41, 5  ;;  %18386 = vst [vmem:[#allocation53_spill] sm:$0xff] %v17036_v51  ;;  %v17041_v45 = vrot.slane %v9570_v30, 5  ;;  %v12005_v7 = vcombine.low %v10368_v62, %v10371_v8 }
 0x39c   : > { %18381 = vst [vmem:[#allocation49_spill] sm:$0xff] %v17009_v3  ;;  %13024 = vmatprep.mubr.msk.bf16.mxu0 %vm6638_vm0, %v12004_v16  ;;  %v10383_v3 = vrot.slane %v10381_v54, 4  ;;  %v17026_v16 = vpop.f32.mrf.mxu0  ;;  %v8820_v25 = vsel %vm13648_vm7, %v11874_v59, %v18385_v43  ;;  %v9576_v6 = vrot.slane %v9574_v48, 4  ;;  %v18388_v4 = vrot.slane %v16947_v17, 5  ;;  %v9515_v43 = vld [vmem:[#allocation2 + $0x24] sm:$0xf] }
 0x39d   : > { %v17024_v58 = vpop.f32.mrf.mxu1  ;;  %18383 = vst [vmem:[#allocation51_spill] sm:$0xff] %v17026_v16  ;;  %v11891_v9 = vcombine.low %v8820_v25, %v8823_v2  ;;  %v11990_v59 = vrot.slane %v10249_v36, 9  ;;  %v10402_v2 = vrot.slane %v17028_v49, 5  ;;  %v17052_v16 = vld [vmem:[#allocation2 + $0xbc] sm:$0x1]  ;;  %v9563_v8 = vrot.slane %v9561_v37, 4 }
 0x39e   : > { %18382 = vst [vmem:[#allocation56_spill] sm:$0xff] %v17024_v58  ;;  %v10375_v32 = vsel %vm13648_vm7, %v11989_v24, %v18388_v4  ;;  %v10385_v30 = vsel %vm13648_vm7, %v10383_v3, %v10384_v39  ;;  %v10251_v62 = vld [vmem:[#allocation2 + $0xb4] sm:$0xe]  ;;  %v17054_v48 = vpop.f32.mrf.mxu0  ;;  %v11991_v36 = vrot.slane %v10250_v28, 9  ;;  %v10391_v4 = vrot.slane %v17036_v51, 5 }
 0x39f   : > { %v17038_v58 = vpop.f32.mrf.mxu1  ;;  %12923 = vmatmul.mubr.msk.bf16.gmra.mxu1 %vm6638_vm0, %v11890_v50  ;;  %v12006_v25 = vcombine.low %v10375_v32, %v10378_v31  ;;  %18389 = vst [vmem:[#allocation57_spill] sm:$0xff] %v17054_v48  ;;  %v10382_v24 = vsel %vm13648_vm7, %v11990_v59, %v10381_v54  ;;  %v10390_v50 = vrot.slane %v10388_v27, 4  ;;  %v10252_v31 = vld [vmem:[#allocation2 + $0xc0] sm:$0xe]  ;;  %v17062_v39 = vld [vmem:[#allocation2 + $0xc8] sm:$0x1]  ;;  %v9577_v37 = vor.u32 %v9576_v6, %v17041_v45 }
 0x3a0   : > { %18387 = vst [vmem:[#allocation55_spill] sm:$0xff] %v17038_v58  ;;  %12926 = vmatprep.mubr.msk.bf16.mxu1 %vm6638_vm0, %v11891_v9  ;;  %v9566_v58 = vrot.slane %v9564_v0, 5  ;;  %v18390_v9 = vrot.slane %v17020_v40, 5  ;;  %v9585_v0 = vshrl.u32 %v9515_v43, 16  ;;  %v9588_v48 = vshll.u32 %v9515_v43, 16 }
 0x3a1   : > { %v17064_v32 = vpop.f32.mrf.mxu1  ;;  %v12007_v54 = vcombine.low %v10382_v24, %v10385_v30  ;;  %v10389_v28 = vsel %vm13648_vm7, %v11991_v36, %v10388_v27  ;;  %v10404_v59 = vrot.slane %v10402_v2, 4  ;;  %v10398_v51 = vrot.slane %v17052_v16, 5  ;;  %v9518_v35 = vld [vmem:[#allocation2 + $0x30] sm:$0xf] }
 0x3a2   : > { %v10397_v3 = vrot.slane %v18390_v9, 4  ;;  %18391 = vst [vmem:[#allocation5_spill] sm:$0xff] %v17064_v32  ;;  %v17072_v9 = vpop.f32.mrf.mxu0  ;;  %v9567_v49 = vor.u32 %v9566_v58, %v9563_v8  ;;  %v9594_v32 = vshll.u32 %v16777_v42, 16  ;;  %v9598_v6 = vshrl.u32 %v16777_v42, 16 }
 0x3a3   : > { %13025 = vmatmul.mubr.msk.bf16.gmra.mxu0 %vm6638_vm0, %v12005_v7  ;;  %v9580_v7 = vshll.u32 %v16775_v29, 16  ;;  %18392 = vst [vmem:[#allocation4_spill] sm:$0xff] %v17072_v9  ;;  %v10392_v43 = vsel %vm13648_vm7, %v10390_v50, %v10391_v4  ;;  %v11993_v30 = vrot.slane %v10252_v31, 9  ;;  %v10405_v27 = vrot.slane %v17062_v39, 5 }
 0x3a4   : > { %13028 = vmatprep.mubr.msk.bf16.mxu0 %vm6638_vm0, %v12006_v25  ;;  %v11992_v25 = vrot.slane %v10251_v62, 9  ;;  %v17081_v29 = vsel %vm13648_vm7, %v10397_v3, %v10398_v51  ;;  %v9578_v36 = vrot.slane %v9577_v37, 4  ;;  %v9587_v58 = vrot.slane %v9585_v0, 4  ;;  %v17098_v3 = vpop.f32.mrf.mxu0  ;;  %v17102_v0 = vld [vmem:[#allocation2 + $0xd0] sm:$0xf] }
 0x3a5   : > { %v9590_v8 = vrot.slane %v9588_v48, 5  ;;  %v18393_v42 = vcombine.low %v16694_v5, %v16698_v60  ;;  %v17091_v62 = vsel %vm13648_vm7, %v10404_v59, %v10405_v27  ;;  %v9582_v50 = vrot.slane %v9580_v7, 5  ;;  %18395 = vst [vmem:[#allocation60_spill] sm:$0xff] %v17098_v3 }
 0x3a6   : > { %v9604_v4 = vshll.u32 %v16796_v13, 16  ;;  %v9609_v31 = vshrl.u32 %v9518_v35, 16  ;;  %v18394_v51 = vcombine.low %v16710_v47, %v16714_v15  ;;  %v9568_v48 = vrot.slane %v9567_v49, 4 }
 0x3a7   : > { %v17083_v24 = vpop.f32.mrf.mxu1  ;;  %12927 = vmatmul.mubr.msk.bf16.gmra.mxu1 %vm6638_vm0, %v18393_v42  ;;  %v17100_v37 = vrot.slane %v9594_v32, 5  ;;  %v9600_v5 = vrot.slane %v9598_v6, 4  ;;  %v9612_v60 = vshll.u32 %v9518_v35, 16  ;;  %v12008_v59 = vcombine.low %v10389_v28, %v10392_v43  ;;  %v9521_v43 = vld [vmem:[#allocation2 + $0x3c] sm:$0xf]  ;;  %v17123_v27 = vpop.f32.mrf.mxu0 }
 0x3a8   : > { %12930 = vmatprep.mubr.msk.bf16.mxu1 %vm6638_vm0, %v18394_v51  ;;  %v9618_v7 = vshll.u32 %v16783_v34, 16  ;;  %v9622_v13 = vshrl.u32 %v16783_v34, 16  ;;  %v18396_v47 = vrot.slane %v17020_v40, 5  ;;  %v10403_v49 = vsel %vm13648_vm7, %v11993_v30, %v10402_v2  ;;  %18397 = vst [vmem:[#allocation61_spill] sm:$0xff] %v17123_v27  ;;  %v9557_v27 = vld [vmem:[#allocation2 + $0xcc] sm:$0xf] }
 0x3a9   : > { %v17113_v32 = vpop.f32.mrf.mxu1  ;;  %v9583_v35 = vsel %vm13353_vm4, %v9578_v36, %v9582_v50  ;;  %v9591_v28 = vor.u32 %v9590_v8, %v9587_v58  ;;  %v17120_v6 = vrot.slane %v9604_v4, 5  ;;  %v9573_v2 = vsel %vm13353_vm4, %v9568_v48, %v17041_v45  ;;  %v17129_v8 = vld [vmem:[#allocation2 + $0xd4] sm:$0x1] }
 0x3aa   : > { %v10396_v15 = vsel %vm13648_vm7, %v11992_v25, %v18396_v47  ;;  %v10409_v25 = vrot.slane %v17102_v0, 5  ;;  %v9601_v30 = vor.u32 %v9600_v5, %v17100_v37  ;;  %v9611_v36 = vrot.slane %v9609_v31, 4  ;;  %v9524_v5 = vld [vmem:[#allocation2 + $0x48] sm:$0xf] }
 0x3ab   : > { %13029 = vmatmul.mubr.msk.bf16.gmra.mxu0 %vm6638_vm0, %v12007_v54  ;;  %v12009_v34 = vcombine.low %v10396_v15, %v17081_v29  ;;  %v12010_v54 = vcombine.low %v10403_v49, %v17091_v62  ;;  %v9614_v58 = vrot.slane %v9612_v60, 5  ;;  %v10253_v29 = vld [vmem:[#allocation2 + $0xcc] sm:$0xe]  ;;  %v11947_v42 = vcombine.low %v9573_v2, %v9583_v35  ;;  %v17134_v51 = vpop.f32.mrf.mxu1  ;;  %v17149_v49 = vpop.f32.mrf.mxu0  ;;  %v9527_v2 = vld [vmem:[#allocation2 + $0x54] sm:$0xf] }
 0x3ac   : > { %13032 = vmatprep.mubr.msk.bf16.mxu0 %vm6638_vm0, %v12008_v59  ;;  %v17131_v62 = vrot.slane %v9618_v7, 5  ;;  %v9624_v50 = vrot.slane %v9622_v13, 4  ;;  %v9628_v4 = vshll.u32 %v16808_v53, 16  ;;  %18398 = vst [vmem:[#allocation62_spill] sm:$0xff] %v17134_v51  ;;  %v17136_v59 = vrot.slane %v9591_v28, 4  ;;  %18401 = vst [vmem:[#allocation63_spill] sm:$0xff] %v17149_v49 }
 0x3ad   : > { %v9633_v47 = vshrl.u32 %v9521_v43, 16  ;;  %v9636_v15 = vshll.u32 %v9521_v43, 16  ;;  %v9642_v45 = vshll.u32 %v16813_v21, 16  ;;  %v18399_v31 = vcombine.low %v16729_v1, %v16733_v12 }
 0x3ae   : > { %v9646_v48 = vshrl.u32 %v16813_v21, 16  ;;  %v11994_v60 = vrot.slane %v10253_v29, 9  ;;  %v10411_v7 = vrot.slane %v10409_v25, 4  ;;  %v10412_v53 = vrot.slane %v17129_v8, 5 }
 0x3af   : > { %12931 = vmatmul.mubr.msk.bf16.gmra.mxu1 %vm6638_vm0, %v18399_v31  ;;  %v18400_v13 = vcombine.low %v16750_v33, %v16754_v44  ;;  %v9602_v35 = vrot.slane %v9601_v30, 4  ;;  %v9615_v28 = vor.u32 %v9614_v58, %v9611_v36  ;;  %v9666_v1 = vshll.u32 %v16819_v46, 16  ;;  %v17159_v33 = vpop.f32.mrf.mxu1 }
 0x3b0   : > { %v9670_v12 = vshrl.u32 %v16819_v46, 16  ;;  %v9625_v21 = vor.u32 %v9624_v50, %v17131_v62  ;;  %v17154_v43 = vrot.slane %v9628_v4, 5  ;;  %v9690_v29 = vshll.u32 %v16856_v22, 16 }
 0x3b1   : > { %12934 = vmatprep.mubr.msk.bf16.mxu1 %vm6638_vm0, %v18400_v13  ;;  %v9694_v31 = vshrl.u32 %v16856_v22, 16  ;;  %v9635_v44 = vrot.slane %v9633_v47, 4  ;;  %v9638_v30 = vrot.slane %v9636_v15, 5  ;;  %v17161_v36 = vrot.slane %v9642_v45, 5  ;;  %v17168_v22 = vpop.f32.mrf.mxu0 }
 0x3b2   : > { %v9657_v58 = vshrl.u32 %v9524_v5, 16  ;;  %v9648_v46 = vrot.slane %v9646_v48, 4  ;;  %v9660_v50 = vshll.u32 %v9524_v5, 16  ;;  %v10410_v4 = vsel %vm13648_vm7, %v11994_v60, %v10409_v25  ;;  %18402 = vst [vmem:[#allocation64_spill] sm:$0xff] %v17168_v22  ;;  %v9530_v48 = vld [vmem:[#allocation2 + $0x60] sm:$0xf] }
 0x3b3   : > { %13033 = vmatmul.mubr.msk.bf16.gmra.mxu0 %vm6638_vm0, %v12009_v34  ;;  %v10413_v13 = vsel %vm13648_vm7, %v10411_v7, %v10412_v53  ;;  %v17170_v34 = vrot.slane %v9666_v1, 5  ;;  %v9672_v49 = vrot.slane %v9670_v12, 4  ;;  %v9681_v47 = vshrl.u32 %v9527_v2, 16 }
 0x3b4   : > { %13036 = vmatprep.mubr.msk.bf16.mxu0 %vm6638_vm0, %v12010_v54  ;;  %v9684_v15 = vshll.u32 %v9527_v2, 16  ;;  %v9597_v54 = vsel %vm13353_vm4, %v17136_v59, %v17100_v37  ;;  %v9607_v45 = vsel %vm13353_vm4, %v9602_v35, %v17120_v6  ;;  %v17179_v25 = vrot.slane %v9690_v29, 5  ;;  %v17192_v29 = vpop.f32.mrf.mxu0 }
 0x3b5   : > { %v9696_v14 = vrot.slane %v9694_v31, 4  ;;  %v9616_v60 = vrot.slane %v9615_v28, 4  ;;  %v9626_v7 = vrot.slane %v9625_v21, 4  ;;  %v9652_v53 = vshll.u32 %v16849_v18, 16  ;;  %18404 = vst [vmem:[#allocation65_spill] sm:$0xff] %v17192_v29 }
 0x3b6   : > { %v12011_v1 = vcombine.low %v10410_v4, %v10413_v13  ;;  %v18403_v12 = vcombine.low %v16760_v10, %v16764_v52  ;;  %v9639_v37 = vor.u32 %v9638_v30, %v9635_v44  ;;  %v9649_v59 = vor.u32 %v9648_v46, %v17161_v36 }
 0x3b7   : > { %v17181_v5 = vpop.f32.mrf.mxu1  ;;  %v9659_v6 = vrot.slane %v9657_v58, 4  ;;  %v9662_v35 = vrot.slane %v9660_v50, 5  ;;  %v9673_v28 = vor.u32 %v9672_v49, %v17170_v34  ;;  %v9683_v18 = vrot.slane %v9681_v47, 4 }
 0x3b8   : > { %12935 = vmatmul.mubr.msk.bf16.gmra.mxu1 %vm6638_vm0, %v18403_v12  ;;  %v9686_v21 = vrot.slane %v9684_v15, 5  ;;  %v9705_v31 = vshrl.u32 %v9530_v48, 16  ;;  %v9697_v10 = vor.u32 %v9696_v14, %v17179_v25  ;;  %v9708_v52 = vshll.u32 %v9530_v48, 16 }
 0x3b9   : > { %12974 = vmatprep.mubr.msk.bf16.mxu1 %vm6638_vm0, %v11947_v42  ;;  %v17190_v2 = vpop.f32.mrf.mxu1  ;;  %v9714_v44 = vshll.u32 %v16863_v19, 16  ;;  %v9718_v30 = vshrl.u32 %v16863_v19, 16  ;;  %v11948_v46 = vcombine.low %v9597_v54, %v9607_v45  ;;  %v9621_v42 = vsel %vm13353_vm4, %v9616_v60, %v17131_v62  ;;  %v9533_v60 = vld [vmem:[#allocation2 + $0x6c] sm:$0xf] }
 0x3ba   : > { %v9654_v50 = vrot.slane %v9652_v53, 5  ;;  %v9676_v49 = vshll.u32 %v16851_v11, 16  ;;  %v9631_v4 = vsel %vm13353_vm4, %v9626_v7, %v17154_v43  ;;  %v9640_v13 = vrot.slane %v9639_v37, 4 }
 0x3bb   : > { %v17198_v58 = vpop.f32.mrf.mxu1  ;;  %13037 = vmatmul.mubr.msk.bf16.gmra.mxu0 %vm6638_vm0, %v12011_v1  ;;  %v9663_v47 = vor.u32 %v9662_v35, %v9659_v6  ;;  %v9700_v19 = vshll.u32 %v16886_v38, 16  ;;  %v9650_v45 = vrot.slane %v9649_v59, 4  ;;  %v9674_v14 = vrot.slane %v9673_v28, 4 }
 0x3bc   : > { %v17209_v15 = vpop.f32.mrf.mxu0  ;;  %v9687_v62 = vor.u32 %v9686_v21, %v9683_v18  ;;  %v9707_v48 = vrot.slane %v9705_v31, 4  ;;  %v9698_v11 = vrot.slane %v9697_v10, 4  ;;  %v9710_v53 = vrot.slane %v9708_v52, 5  ;;  %v9536_v21 = vld [vmem:[#allocation2 + $0x78] sm:$0xf] }
 0x3bd   : > { %18405 = vst [vmem:[#allocation66_spill] sm:$0xff] %v17209_v15  ;;  %v17211_v54 = vpop.f32.mrf.mxu1  ;;  %v17213_v1 = vrot.slane %v9714_v44, 5  ;;  %v9720_v12 = vrot.slane %v9718_v30, 4  ;;  %v11949_v7 = vcombine.low %v9621_v42, %v9631_v4  ;;  %v9678_v38 = vrot.slane %v9676_v49, 5 }
 0x3be   : > { %v17215_v29 = vpop.f32.mrf.mxu0  ;;  %v9738_v37 = vshll.u32 %v16888_v56, 16  ;;  %v9742_v6 = vshrl.u32 %v16888_v56, 16  ;;  %v9645_v59 = vsel %vm13353_vm4, %v9640_v13, %v17161_v36  ;;  %v9702_v35 = vrot.slane %v9700_v19, 5 }
 0x3bf   : > { %18406 = vst [vmem:[#allocation67_spill] sm:$0xff] %v17215_v29  ;;  %v17217_v43 = vpop.f32.mrf.mxu1  ;;  %v9729_v28 = vshrl.u32 %v9533_v60, 16  ;;  %v9732_v18 = vshll.u32 %v9533_v60, 16  ;;  %v9655_v52 = vsel %vm13353_vm4, %v9650_v45, %v9654_v50  ;;  %v9664_v56 = vrot.slane %v9663_v47, 4 }
 0x3c0   : > { %12975 = vmatmul.mubr.msk.bf16.vlgmr.msra.gmra.mxu1 %vm6638_vm0, %v11948_v46  ;;  %v17225_v31 = vpop.f32.mrf.mxu0  ;;  %v9679_v44 = vsel %vm13353_vm4, %v9674_v14, %v9678_v38  ;;  %v9688_v30 = vrot.slane %v9687_v62, 4  ;;  %v9703_v36 = vsel %vm13353_vm4, %v9698_v11, %v9702_v35  ;;  %v9711_v46 = vor.u32 %v9710_v53, %v9707_v48 }
 0x3c1   : > { %18407 = vst [vmem:[#allocation68_spill] sm:$0xff] %v17225_v31  ;;  %12978 = vmatprep.mubr.msk.bf16.mxu1 %vm6638_vm0, %v11949_v7  ;;  %v17228_v10 = vpop.f32.mrf.mxu1  ;;  %v9721_v42 = vor.u32 %v9720_v12, %v17213_v1  ;;  %v9724_v49 = vshll.u32 %v16895_v61, 16  ;;  %v17242_v19 = vrot.slane %v9738_v37, 5  ;;  %v9744_v50 = vrot.slane %v9742_v6, 4 }
 0x3c2   : > { %v17238_v4 = vpop.f32.mrf.mxu0  ;;  %v9753_v47 = vshrl.u32 %v9536_v21, 16  ;;  %v9756_v45 = vshll.u32 %v9536_v21, 16  ;;  %v9731_v60 = vrot.slane %v9729_v28, 4  ;;  %v9734_v14 = vrot.slane %v9732_v18, 5  ;;  %v9539_v28 = vld [vmem:[#allocation2 + $0x84] sm:$0xf] }
 0x3c3   : > { %18408 = vst [vmem:[#allocation69_spill] sm:$0xff] %v17238_v4  ;;  %v17240_v13 = vpop.f32.mrf.mxu1  ;;  %v9762_v62 = vshll.u32 %v16900_v26, 16  ;;  %v9766_v11 = vshrl.u32 %v16900_v26, 16  ;;  %v11950_v53 = vcombine.low %v9645_v59, %v9655_v52  ;;  %v9669_v61 = vsel %vm13353_vm4, %v9664_v56, %v17170_v34  ;;  %v9542_v4 = vld [vmem:[#allocation2 + $0x90] sm:$0xf] }
 0x3c4   : > { %v9693_v12 = vsel %vm13353_vm4, %v9688_v30, %v17179_v25  ;;  %v11951_v38 = vcombine.low %v9669_v61, %v9679_v44  ;;  %v9712_v6 = vrot.slane %v9711_v46, 4  ;;  %v9726_v35 = vrot.slane %v9724_v49, 5 }
 0x3c5   : > { %v17246_v48 = vpop.f32.mrf.mxu1  ;;  %v17254_v7 = vpop.f32.mrf.mxu0  ;;  %v11952_v37 = vcombine.low %v9693_v12, %v9703_v36  ;;  %v9722_v26 = vrot.slane %v9721_v42, 4  ;;  %v9745_v59 = vor.u32 %v9744_v50, %v17242_v19  ;;  %v9755_v21 = vrot.slane %v9753_v47, 4 }
 0x3c6   : > { %18409 = vst [vmem:[#allocation70_spill] sm:$0xff] %v17254_v7  ;;  %v9758_v52 = vrot.slane %v9756_v45, 5  ;;  %v9735_v25 = vor.u32 %v9734_v14, %v9731_v60  ;;  %v9748_v56 = vshll.u32 %v16924_v63, 16  ;;  %v17263_v44 = vrot.slane %v9762_v62, 5 }
 0x3c7   : > { %v17256_v18 = vpop.f32.mrf.mxu1  ;;  %v17259_v34 = vpop.f32.mrf.mxu0  ;;  %v9768_v30 = vrot.slane %v9766_v11, 4  ;;  %v9777_v46 = vshrl.u32 %v9539_v28, 16  ;;  %v9780_v42 = vshll.u32 %v9539_v28, 16  ;;  %v9786_v49 = vshll.u32 %v16941_v55, 16 }
 0x3c8   : > { %18410 = vst [vmem:[#allocation71_spill] sm:$0xff] %v17259_v34  ;;  %12979 = vmatmul.mubr.msk.bf16.gmra.mxu1 %vm6638_vm0, %v11950_v53  ;;  %v9790_v50 = vshrl.u32 %v16941_v55, 16  ;;  %v9801_v45 = vshrl.u32 %v9542_v4, 16  ;;  %v9804_v53 = vshll.u32 %v9542_v4, 16  ;;  %v9810_v60 = vshll.u32 %v16947_v17, 16 }
 0x3c9   : > { %12982 = vmatprep.mubr.msk.bf16.mxu1 %vm6638_vm0, %v11951_v38  ;;  %v17266_v36 = vpop.f32.mrf.mxu1  ;;  %v17270_v47 = vpop.f32.mrf.mxu0  ;;  %v9814_v63 = vshrl.u32 %v16947_v17, 16  ;;  %v9717_v62 = vsel %vm13353_vm4, %v9712_v6, %v17213_v1  ;;  %v9727_v11 = vsel %vm13353_vm4, %v9722_v26, %v9726_v35  ;;  %v9746_v61 = vrot.slane %v9745_v59, 4  ;;  %v9545_v59 = vld [vmem:[#allocation2 + $0x9c] sm:$0xf] }
 0x3ca   : > { %18411 = vst [vmem:[#allocation72_spill] sm:$0xff] %v17270_v47  ;;  %v9759_v12 = vor.u32 %v9758_v52, %v9755_v21  ;;  %v9736_v38 = vrot.slane %v9735_v25, 4  ;;  %v9750_v28 = vrot.slane %v9748_v56, 5  ;;  %v9769_v4 = vor.u32 %v9768_v30, %v17263_v44 }
 0x3cb   : > { %v17274_v14 = vpop.f32.mrf.mxu1  ;;  %v17281_v55 = vpop.f32.mrf.mxu0  ;;  %v9772_v47 = vshll.u32 %v16930_v20, 16  ;;  %v9779_v34 = vrot.slane %v9777_v46, 4  ;;  %v9782_v7 = vrot.slane %v9780_v42, 5  ;;  %v17287_v31 = vrot.slane %v9786_v49, 5 }
 0x3cc   : > { %18412 = vst [vmem:[#allocation73_spill] sm:$0xff] %v17281_v55  ;;  %v9792_v1 = vrot.slane %v9790_v50, 4  ;;  %v9803_v6 = vrot.slane %v9801_v45, 4  ;;  %v9806_v29 = vrot.slane %v9804_v53, 5  ;;  %v17289_v35 = vrot.slane %v9810_v60, 5 }
 0x3cd   : > { %v17285_v17 = vpop.f32.mrf.mxu1  ;;  %v9816_v26 = vrot.slane %v9814_v63, 4  ;;  %v11953_v25 = vcombine.low %v9717_v62, %v9727_v11  ;;  %v9751_v20 = vsel %vm13353_vm4, %v9746_v61, %v9750_v28  ;;  %v9760_v56 = vrot.slane %v9759_v12, 4 }
 0x3ce   : > { %v9741_v30 = vsel %vm13353_vm4, %v9736_v38, %v17242_v19  ;;  %v9770_v46 = vrot.slane %v9769_v4, 4  ;;  %v9783_v50 = vor.u32 %v9782_v7, %v9779_v34  ;;  %v9793_v45 = vor.u32 %v9792_v1, %v17287_v31  ;;  %v18416_v7 = vld [vmem:[#allocation50_spill] sm:$0xff] }
 0x3cf   : > { %v17291_v21 = vpop.f32.mrf.mxu0  ;;  %v17293_v52 = vpop.f32.mrf.mxu1  ;;  %v9825_v53 = vshrl.u32 %v9545_v59, 16  ;;  %v9828_v60 = vshll.u32 %v9545_v59, 16  ;;  %v11954_v63 = vcombine.low %v9741_v30, %v9751_v20  ;;  %v9774_v62 = vrot.slane %v9772_v47, 5  ;;  %v9548_v4 = vld [vmem:[#allocation2 + $0xa8] sm:$0xf] }
 0x3d0   : > { %18413 = vst [vmem:[#allocation74_spill] sm:$0xff] %v17291_v21  ;;  %12983 = vmatmul.mubr.msk.bf16.gmra.mxu1 %vm6638_vm0, %v11952_v37  ;;  %v9807_v11 = vor.u32 %v9806_v29, %v9803_v6  ;;  %v9817_v37 = vor.u32 %v9816_v26, %v17289_v35  ;;  %v9765_v12 = vsel %vm13353_vm4, %v9760_v56, %v17263_v44  ;;  %v9796_v38 = vshll.u32 %v16979_v57, 16  ;;  %v18417_v47 = vld [vmem:[#allocation58_spill] sm:$0xff] }
 0x3d1   : > { %v17301_v42 = vpop.f32.mrf.mxu0  ;;  %12986 = vmatprep.mubr.msk.bf16.mxu1 %vm6638_vm0, %v11953_v25  ;;  %v17304_v49 = vpop.f32.mrf.mxu1  ;;  %v9834_v34 = vshll.u32 %v18416_v7, 16  ;;  %v9838_v28 = vshrl.u32 %v18416_v7, 16  ;;  %v9775_v29 = vsel %vm13353_vm4, %v9770_v46, %v9774_v62  ;;  %v9820_v1 = vshll.u32 %v18417_v47, 16 }
 0x3d2   : > { %18414 = vst [vmem:[#allocation75_spill] sm:$0xff] %v17301_v42  ;;  %v9858_v6 = vshll.u32 %v17007_v41, 16  ;;  %v9862_v26 = vshrl.u32 %v17007_v41, 16  ;;  %v9784_v44 = vrot.slane %v9783_v50, 4  ;;  %v9794_v57 = vrot.slane %v9793_v45, 4 }
 0x3d3   : > { %v17308_v61 = vpop.f32.mrf.mxu0  ;;  %v17310_v19 = vpop.f32.mrf.mxu1  ;;  %v9827_v20 = vrot.slane %v9825_v53, 4  ;;  %v9830_v56 = vrot.slane %v9828_v60, 5  ;;  %v9808_v30 = vrot.slane %v9807_v11, 4  ;;  %v9818_v7 = vrot.slane %v9817_v37, 4  ;;  %v9551_v53 = vld [vmem:[#allocation2 + $0xb4] sm:$0xf] }
 0x3d4   : > { %18415 = vst [vmem:[#allocation76_spill] sm:$0xff] %v17308_v61  ;;  %v9849_v61 = vshrl.u32 %v9548_v4, 16  ;;  %v9852_v42 = vshll.u32 %v9548_v4, 16  ;;  %v11955_v46 = vcombine.low %v9765_v12, %v9775_v29  ;;  %v9798_v62 = vrot.slane %v9796_v38, 5  ;;  %v18420_v38 = vld [vmem:[#allocation54_spill] sm:$0xff] }
 0x3d5   : > { %v17323_v59 = vpop.f32.mrf.mxu0  ;;  %v17325_v25 = vpop.f32.mrf.mxu1  ;;  %v17329_v47 = vrot.slane %v9834_v34, 5  ;;  %v9840_v55 = vrot.slane %v9838_v28, 4  ;;  %v17334_v50 = vrot.slane %v9858_v6, 5  ;;  %v9864_v45 = vrot.slane %v9862_v26, 4 }
 0x3d6   : > { %18418 = vst [vmem:[#allocation50_spill] sm:$0xff] %v17323_v59  ;;  %v9822_v59 = vrot.slane %v9820_v1, 5  ;;  %v9789_v11 = vsel %vm13353_vm4, %v9784_v44, %v17287_v31  ;;  %v9799_v37 = vsel %vm13353_vm4, %v9794_v57, %v9798_v62  ;;  %v9831_v12 = vor.u32 %v9830_v56, %v9827_v20  ;;  %v9554_v20 = vld [vmem:[#allocation2 + $0xc0] sm:$0xf] }
 0x3d7   : > { %v17327_v21 = vpop.f32.mrf.mxu1  ;;  %v17331_v41 = vpop.f32.mrf.mxu0  ;;  %v9844_v34 = vshll.u32 %v18420_v38, 16  ;;  %v9813_v28 = vsel %vm13353_vm4, %v9808_v30, %v17289_v35  ;;  %v9851_v29 = vrot.slane %v9849_v61, 4  ;;  %v9854_v1 = vrot.slane %v9852_v42, 5  ;;  %v18423_v30 = vld [vmem:[#allocation59_spill] sm:$0xff] }
 0x3d8   : > { %18419 = vst [vmem:[#allocation58_spill] sm:$0xff] %v17331_v41  ;;  %12987 = vmatmul.mubr.msk.bf16.gmra.mxu1 %vm6638_vm0, %v11954_v63  ;;  %v9823_v4 = vsel %vm13353_vm4, %v9818_v7, %v9822_v59  ;;  %v9841_v31 = vor.u32 %v9840_v55, %v17329_v47  ;;  %v9873_v26 = vshrl.u32 %v9551_v53, 16  ;;  %v9882_v44 = vshll.u32 %v17020_v40, 16 }
 0x3d9   : > { %12990 = vmatprep.mubr.msk.bf16.mxu1 %vm6638_vm0, %v11955_v46  ;;  %v17337_v60 = vpop.f32.mrf.mxu1  ;;  %v17345_v63 = vpop.f32.mrf.mxu0  ;;  %v9886_v57 = vshrl.u32 %v17020_v40, 16  ;;  %v9865_v46 = vor.u32 %v9864_v45, %v17334_v50  ;;  %v9876_v35 = vshll.u32 %v9551_v53, 16  ;;  %v9906_v62 = vshll.u32 %v18423_v30, 16  ;;  %v18425_v40 = vld [vmem:[#allocation53_spill] sm:$0xff] }
 0x3da   : > { %18421 = vst [vmem:[#allocation54_spill] sm:$0xff] %v17345_v63  ;;  %v9910_v61 = vshrl.u32 %v18423_v30, 16  ;;  %v11956_v59 = vcombine.low %v9789_v11, %v9799_v37  ;;  %v11957_v7 = vcombine.low %v9813_v28, %v9823_v4  ;;  %v9832_v55 = vrot.slane %v9831_v12, 4 }
 0x3db   : > { %v17352_v6 = vpop.f32.mrf.mxu1  ;;  %v17357_v56 = vpop.f32.mrf.mxu0  ;;  %v9846_v38 = vrot.slane %v9844_v34, 5  ;;  %v9855_v41 = vor.u32 %v9854_v1, %v9851_v29  ;;  %v9868_v15 = vshll.u32 %v18425_v40, 16  ;;  %v9897_v22 = vshrl.u32 %v9554_v20, 16 }
 0x3dc   : > { %18422 = vst [vmem:[#allocation77_spill] sm:$0xff] %v17357_v56  ;;  %v9900_v56 = vshll.u32 %v9554_v20, 16  ;;  %v9842_v53 = vrot.slane %v9841_v31, 4  ;;  %v9875_v3 = vrot.slane %v9873_v26, 4  ;;  %v17369_v9 = vrot.slane %v9882_v44, 5 }
 0x3dd   : > { %v17362_v42 = vpop.f32.mrf.mxu1  ;;  %v17364_v63 = vpop.f32.mrf.mxu0  ;;  %v9888_v30 = vrot.slane %v9886_v57, 4  ;;  %v9866_v11 = vrot.slane %v9865_v46, 4  ;;  %v9878_v37 = vrot.slane %v9876_v35, 5  ;;  %v9908_v12 = vrot.slane %v9906_v62, 5 }
 0x3de   : > { %18424 = vst [vmem:[#allocation59_spill] sm:$0xff] %v17364_v63  ;;  %v9912_v34 = vrot.slane %v9910_v61, 4  ;;  %v9921_v4 = vshrl.u32 %v9557_v27, 16  ;;  %v9924_v29 = vshll.u32 %v9557_v27, 16  ;;  %v9930_v1 = vshll.u32 %v17102_v0, 16  ;;  %v18443_v63 = vld [vmem:[#allocation18_spill] sm:$0xff] }
 0x3df   : > { %v17367_v45 = vpop.f32.mrf.mxu1  ;;  %v9934_v31 = vshrl.u32 %v17102_v0, 16  ;;  %v9856_v44 = vrot.slane %v9855_v41, 4  ;;  %v9870_v57 = vrot.slane %v9868_v15, 5  ;;  %v9899_v20 = vrot.slane %v9897_v22, 4 }
 0x3e0   : > { %v17371_v51 = vpop.f32.mrf.mxu0  ;;  %12991 = vmatmul.mubr.msk.bf16.gmra.mxu1 %vm6638_vm0, %v11956_v59  ;;  %v9902_v59 = vrot.slane %v9900_v56, 5  ;;  %v9837_v35 = vsel %vm13353_vm4, %v9832_v55, %v17329_v47  ;;  %v9847_v62 = vsel %vm13353_vm4, %v9842_v53, %v9846_v38  ;;  %v9889_v27 = vor.u32 %v9888_v30, %v17369_v9 }
 0x3e1   : > { %18426 = vst [vmem:[#allocation53_spill] sm:$0xff] %v17371_v51  ;;  %12994 = vmatprep.mubr.msk.bf16.mxu1 %vm6638_vm0, %v11957_v7  ;;  %v17375_v28 = vpop.f32.mrf.mxu1  ;;  %v9871_v0 = vsel %vm13353_vm4, %v9866_v11, %v9870_v57  ;;  %v9879_v41 = vor.u32 %v9878_v37, %v9875_v3  ;;  %v9892_v22 = vshll.u32 %v17052_v16, 16  ;;  %v9913_v15 = vor.u32 %v9912_v34, %v9908_v12  ;;  %v18440_v51 = vld [vmem:[#allocation11_spill] sm:$0xff] }
 0x3e2   : > { %v17379_v26 = vpop.f32.mrf.mxu0  ;;  %v9923_v7 = vrot.slane %v9921_v4, 4  ;;  %v9926_v40 = vrot.slane %v9924_v29, 5  ;;  %v9936_v47 = vrot.slane %v9934_v31, 4  ;;  %v11958_v38 = vcombine.low %v9837_v35, %v9847_v62 }
 0x3e3   : > { %18427 = vst [vmem:[#allocation78_spill] sm:$0xff] %v17379_v26  ;;  %v17381_v46 = vpop.f32.mrf.mxu1  ;;  %v9932_v26 = vrot.slane %v9930_v1, 5  ;;  %v9861_v53 = vsel %vm13353_vm4, %v9856_v44, %v17334_v50  ;;  %v9903_v30 = vor.u32 %v9902_v59, %v9899_v20  ;;  %v9916_v11 = vshll.u32 %v17062_v39, 16 }
 0x3e4   : > { %v17389_v61 = vpop.f32.mrf.mxu0  ;;  %v11959_v16 = vcombine.low %v9861_v53, %v9871_v0  ;;  %v9890_v37 = vrot.slane %v9889_v27, 4  ;;  %v9894_v34 = vrot.slane %v9892_v22, 5  ;;  %v9914_v4 = vrot.slane %v9913_v15, 4 }
 0x3e5   : > { %18428 = vst [vmem:[#allocation79_spill] sm:$0xff] %v17389_v61  ;;  %v17394_v56 = vpop.f32.mrf.mxu1  ;;  %v9880_v1 = vrot.slane %v9879_v41, 4  ;;  %v9927_v31 = vor.u32 %v9926_v40, %v9923_v7  ;;  %v9937_v57 = vor.u32 %v9936_v47, %v9932_v26  ;;  %v9940_v50 = vshll.u32 %v17129_v8, 16  ;;  %v18437_v61 = vld [vmem:[#allocation9_spill] sm:$0xff] }
 0x3e6   : > { %v17396_v55 = vpop.f32.mrf.mxu0  ;;  %v9904_v39 = vrot.slane %v9903_v30, 4  ;;  %v9918_v20 = vrot.slane %v9916_v11, 5  ;;  %v9895_v35 = vsel %vm13353_vm4, %v9890_v37, %v9894_v34 }
 0x3e7   : > { %v17402_v3 = vpop.f32.mrf.mxu1  ;;  %v9885_v8 = vsel %vm13353_vm4, %v9880_v1, %v17369_v9  ;;  %v9928_v41 = vrot.slane %v9927_v31, 4  ;;  %v9938_v22 = vrot.slane %v9937_v57, 4  ;;  %v9942_v15 = vrot.slane %v9940_v50, 5 }
 0x3e8   : > { %12995 = vmatmul.mubr.msk.bf16.gmra.mxu1 %vm6638_vm0, %v11958_v38  ;;  %v9919_v27 = vsel %vm13353_vm4, %v9914_v4, %v9918_v20  ;;  %v11960_v40 = vcombine.low %v9885_v8, %v9895_v35  ;;  %v9909_v47 = vsel %vm13353_vm4, %v9904_v39, %v9908_v12  ;;  %v18429_v20 = vld [vmem:[#allocation32_spill] sm:$0xff] }
 0x3e9   : > { %12998 = vmatprep.mubr.msk.bf16.mxu1 %vm6638_vm0, %v11959_v16  ;;  %v17406_v29 = vpop.f32.mrf.mxu1  ;;  %v17409_v44 = vpop.f32.mrf.mxu0  ;;  %v11961_v38 = vcombine.low %v9909_v47, %v9919_v27  ;;  %v9933_v9 = vsel %vm13353_vm4, %v9928_v41, %v9932_v26  ;;  %v9943_v11 = vsel %vm13353_vm4, %v9938_v22, %v9942_v15  ;;  %v7026_v35 = vadd.f32 %v17217_v43, %v18429_v20  ;;  %v18431_v47 = vld [vmem:[#allocation41_spill] sm:$0xff] }
 0x3ea   : > { %v11962_v34 = vcombine.low %v9933_v9, %v9943_v11 }
 0x3eb   : > { %v17411_v59 = vpop.f32.mrf.mxu1  ;;  %v17415_v62 = vpop.f32.mrf.mxu0 }
 0x3ed   : > { %v17419_v0 = vpop.f32.mrf.mxu1  ;;  %v17424_v7 = vpop.f32.mrf.mxu0 }
 0x3ef   : > { %v17428_v53 = vpop.f32.mrf.mxu0  ;;  %v17430_v30 = vpop.f32.mrf.mxu1 }
 0x3f0   : > { %12999 = vmatmul.mubr.msk.bf16.gmra.mxu1 %vm6638_vm0, %v11960_v40 }
 0x3f1   : > { %13002 = vmatprep.mubr.msk.bf16.mxu1 %vm6638_vm0, %v11961_v38  ;;  %v17438_v16 = vpop.f32.mrf.mxu1  ;;  %v7029_v38 = vadd.f32 %v17240_v13, %v18431_v47 }
 0x3f2   : > { %v17440_v37 = vpop.f32.mrf.mxu0 }
 0x3f3   : > { %v17442_v12 = vpop.f32.mrf.mxu1 }
 0x3f4   : > { %v17444_v4 = vpop.f32.mrf.mxu0 }
 0x3f5   : > { %v7116_v1 = vpop.f32.mrf.mxu1 }
 0x3f6   : > { %v17446_v31 = vpop.f32.mrf.mxu0  ;;  %v17449_v57 = vadd.f32 %v7116_v1, %v17159_v33  ;;  %v18430_v33 = vld [vmem:[#allocation37_spill] sm:$0xff]  ;;  %v18433_v1 = vld [vmem:[#allocation7_spill] sm:$0xff] }
 0x3f7   : > { %v12800_v50 = vpop.f32.mrf.mxu1  ;;  %v7018_v22 = vadd.f32 %v17228_v10, %v18430_v33  ;;  %v7021_v10 = vadd.f32 %v17246_v48, %v18433_v1  ;;  %v18435_v33 = vld [vmem:[#allocation10_spill] sm:$0xff]  ;;  %v7034_v48 = vadd.f32 %v17266_v36, %v18437_v61  ;;  %v7037_v36 = vadd.f32 %v17285_v17, %v18443_v63 }
 0x3f8   : > { %13003 = vmatmul.mubr.msk.bf16.gmra.mxu1 %vm6638_vm0, %v11962_v34  ;;  %v17452_v23 = vpop.f32.mrf.mxu0  ;;  %v17455_v26 = vadd.f32 %v12800_v50, %v17181_v5  ;;  %v7042_v13 = vadd.f32 %v17256_v18, %v18435_v33  ;;  %v7045_v18 = vadd.f32 %v17274_v14, %v18440_v51 }
 0x3f9   : > { %v7129_v39 = vpop.f32.mrf.mxu1 }
 0x3fa   : > { %v17462_v8 = vadd.f32 %v7129_v39, %v17190_v2  ;;  %v18432_v2 = vld [vmem:[#allocation31_spill] sm:$0xff] }
 0x3fb   : > { %v17459_v27 = vpop.f32.mrf.mxu0  ;;  %v12801_v41 = vpop.f32.mrf.mxu1  ;;  %v7568_v11 = vadd.f32 %v18432_v2, %v7026_v35 }
 0x3fc   : > { %v17469_v40 = vadd.f32 %v12801_v41, %v17198_v58  ;;  %v18434_v58 = vld [vmem:[#allocation24_spill] sm:$0xff] }
 0x3fd   : > { %v17466_v15 = vpop.f32.mrf.mxu0  ;;  %v7132_v5 = vpop.f32.mrf.mxu1  ;;  %v7566_v20 = vadd.f32 %v18434_v58, %v7018_v22 }
 0x3fe   : > { %v17476_v43 = vadd.f32 %v7132_v5, %v17211_v54  ;;  %v18436_v5 = vld [vmem:[#allocation35_spill] sm:$0xff] }
 0x3ff   : > { %v17473_v9 = vpop.f32.mrf.mxu0  ;;  %v12840_v34 = vpop.f32.mrf.mxu1  ;;  %v7569_v35 = vadd.f32 %v18436_v5, %v7029_v38 }
 0x400   : > { %v17483_v39 = vadd.f32 %v12840_v34, %v7568_v11  ;;  %v18439_v34 = vld [vmem:[#allocation39_spill] sm:$0xff] }
 0x401   : > { %v17481_v50 = vpop.f32.mrf.mxu0  ;;  %v7798_v41 = vpop.f32.mrf.mxu1  ;;  %v7567_v22 = vadd.f32 %v18439_v34, %v7021_v10 }
 0x402   : > { %v17490_v54 = vadd.f32 %v7798_v41, %v7566_v20  ;;  %v18442_v41 = vld [vmem:[#allocation44_spill] sm:$0xff] }
 0x403   : > { %v17488_v47 = vpop.f32.mrf.mxu0  ;;  %v12841_v2 = vpop.f32.mrf.mxu1  ;;  %v7572_v38 = vadd.f32 %v18442_v41, %v7042_v13 }
 0x404   : > { %v17497_v11 = vadd.f32 %v12841_v2, %v7569_v35  ;;  %v18445_v2 = vld [vmem:[#allocation6_spill] sm:$0xff] }
 0x405   : > { %v17495_v1 = vpop.f32.mrf.mxu0  ;;  %v7801_v58 = vpop.f32.mrf.mxu1  ;;  %v7570_v10 = vadd.f32 %v18445_v2, %v7034_v48 }
 0x406   : > { %18438 = vst [vmem:[#allocation32_spill] sm:$0xff] %v17495_v1  ;;  %v17504_v20 = vadd.f32 %v7801_v58, %v7567_v22  ;;  %v18446_v1 = vld [vmem:[#allocation15_spill] sm:$0xff]  ;;  %v18448_v58 = vld [vmem:[#allocation8_spill] sm:$0xff] }
 0x407   : > { %v17502_v33 = vpop.f32.mrf.mxu0  ;;  %v12844_v5 = vpop.f32.mrf.mxu1  ;;  %v7058_v51 = vadd.f32 %v17293_v52, %v18446_v1  ;;  %v7573_v13 = vadd.f32 %v18448_v58, %v7045_v18 }
 0x408   : > { %18441 = vst [vmem:[#allocation37_spill] sm:$0xff] %v17502_v33  ;;  %v17511_v35 = vadd.f32 %v12844_v5, %v7572_v38  ;;  %v18449_v33 = vld [vmem:[#allocation25_spill] sm:$0xff]  ;;  %v18451_v5 = vld [vmem:[#allocation12_spill] sm:$0xff] }
 0x409   : > { %v17509_v61 = vpop.f32.mrf.mxu0  ;;  %v7814_v34 = vpop.f32.mrf.mxu1  ;;  %v7050_v17 = vadd.f32 %v17304_v49, %v18449_v33  ;;  %v7571_v48 = vadd.f32 %v18451_v5, %v7037_v36 }
 0x40a   : > { %18444 = vst [vmem:[#allocation41_spill] sm:$0xff] %v17509_v61  ;;  %v17518_v22 = vadd.f32 %v7814_v34, %v7570_v10  ;;  %v18452_v61 = vld [vmem:[#allocation17_spill] sm:$0xff]  ;;  %v18454_v34 = vld [vmem:[#allocation14_spill] sm:$0xff] }
 0x40b   : > { %v17516_v14 = vpop.f32.mrf.mxu0  ;;  %v12845_v41 = vpop.f32.mrf.mxu1  ;;  %v7061_v52 = vadd.f32 %v17310_v19, %v18452_v61  ;;  %v7576_v18 = vadd.f32 %v18454_v34, %v7058_v51 }
 0x40c   : > { %18447 = vst [vmem:[#allocation31_spill] sm:$0xff] %v17516_v14  ;;  %v17525_v38 = vadd.f32 %v12845_v41, %v7573_v13  ;;  %v18455_v14 = vld [vmem:[#allocation30_spill] sm:$0xff]  ;;  %v18457_v41 = vld [vmem:[#allocation16_spill] sm:$0xff] }
 0x40d   : > { %v17523_v63 = vpop.f32.mrf.mxu0  ;;  %v7817_v2 = vpop.f32.mrf.mxu1  ;;  %v7053_v49 = vadd.f32 %v17325_v25, %v18455_v14  ;;  %v7574_v36 = vadd.f32 %v18457_v41, %v7050_v17 }
 0x40e   : > { %18450 = vst [vmem:[#allocation7_spill] sm:$0xff] %v17523_v63  ;;  %v17532_v10 = vadd.f32 %v7817_v2, %v7571_v48  ;;  %v18458_v63 = vld [vmem:[#allocation21_spill] sm:$0xff] }
 0x40f   : > { %v17530_v1 = vpop.f32.mrf.mxu0  ;;  %v12848_v58 = vpop.f32.mrf.mxu1  ;;  %v7074_v19 = vadd.f32 %v17327_v21, %v18458_v63  ;;  %v18460_v2 = vld [vmem:[#allocation13_spill] sm:$0xff] }
 0x410   : > { %18453 = vst [vmem:[#allocation24_spill] sm:$0xff] %v17530_v1  ;;  %v17539_v13 = vadd.f32 %v12848_v58, %v7576_v18  ;;  %v7577_v51 = vadd.f32 %v18460_v2, %v7061_v52  ;;  %v18461_v1 = vld [vmem:[#allocation27_spill] sm:$0xff]  ;;  %v18463_v58 = vld [vmem:[#allocation22_spill] sm:$0xff] }
 0x411   : > { %v17537_v33 = vpop.f32.mrf.mxu0  ;;  %v7830_v5 = vpop.f32.mrf.mxu1  ;;  %v7066_v25 = vadd.f32 %v17337_v60, %v18461_v1  ;;  %v7575_v17 = vadd.f32 %v18463_v58, %v7053_v49 }
 0x412   : > { %18456 = vst [vmem:[#allocation10_spill] sm:$0xff] %v17537_v33  ;;  %v17546_v48 = vadd.f32 %v7830_v5, %v7574_v36  ;;  %v18464_v33 = vld [vmem:[#allocation29_spill] sm:$0xff]  ;;  %v18466_v5 = vld [vmem:[#allocation28_spill] sm:$0xff] }
 0x413   : > { %v17544_v61 = vpop.f32.mrf.mxu0  ;;  %v12849_v34 = vpop.f32.mrf.mxu1  ;;  %v7077_v21 = vadd.f32 %v17352_v6, %v18464_v33  ;;  %v7580_v52 = vadd.f32 %v18466_v5, %v7074_v19 }
 0x414   : > { %18459 = vst [vmem:[#allocation35_spill] sm:$0xff] %v17544_v61  ;;  %v17553_v18 = vadd.f32 %v12849_v34, %v7577_v51  ;;  %v18467_v61 = vld [vmem:[#allocation33_spill] sm:$0xff]  ;;  %v18469_v34 = vld [vmem:[#allocation19_spill] sm:$0xff] }
 0x415   : > { %v17551_v14 = vpop.f32.mrf.mxu0  ;;  %v7833_v41 = vpop.f32.mrf.mxu1  ;;  %v7069_v60 = vadd.f32 %v17362_v42, %v18467_v61  ;;  %v7578_v49 = vadd.f32 %v18469_v34, %v7066_v25 }
 0x416   : > { %18462 = vst [vmem:[#allocation9_spill] sm:$0xff] %v17551_v14  ;;  %v17560_v36 = vadd.f32 %v7833_v41, %v7575_v17  ;;  %v18470_v14 = vld [vmem:[#allocation38_spill] sm:$0xff]  ;;  %v18472_v41 = vld [vmem:[#allocation20_spill] sm:$0xff] }
 0x417   : > { %v17558_v63 = vpop.f32.mrf.mxu0  ;;  %v12852_v2 = vpop.f32.mrf.mxu1  ;;  %v7090_v6 = vadd.f32 %v17367_v45, %v18470_v14  ;;  %v7581_v19 = vadd.f32 %v18472_v41, %v7077_v21 }
 0x418   : > { %18465 = vst [vmem:[#allocation39_spill] sm:$0xff] %v17558_v63  ;;  %v17567_v51 = vadd.f32 %v12852_v2, %v7580_v52  ;;  %v18473_v63 = vld [vmem:[#allocation40_spill] sm:$0xff]  ;;  %v18475_v2 = vld [vmem:[#allocation23_spill] sm:$0xff] }
 0x419   : > { %v17565_v1 = vpop.f32.mrf.mxu0  ;;  %v7846_v58 = vpop.f32.mrf.mxu1  ;;  %v7082_v42 = vadd.f32 %v17375_v28, %v18473_v63  ;;  %v7579_v25 = vadd.f32 %v18475_v2, %v7069_v60 }
 0x41a   : > { %18468 = vst [vmem:[#allocation11_spill] sm:$0xff] %v17565_v1  ;;  %v17574_v17 = vadd.f32 %v7846_v58, %v7578_v49  ;;  %v18476_v1 = vld [vmem:[#allocation48_spill] sm:$0xff]  ;;  %v18478_v58 = vld [vmem:[#allocation26_spill] sm:$0xff] }
 0x41b   : > { %v17572_v33 = vpop.f32.mrf.mxu0  ;;  %v12853_v5 = vpop.f32.mrf.mxu1  ;;  %v7093_v45 = vadd.f32 %v17381_v46, %v18476_v1  ;;  %v7584_v21 = vadd.f32 %v18478_v58, %v7090_v6 }
 0x41c   : > { %18471 = vst [vmem:[#allocation44_spill] sm:$0xff] %v17572_v33  ;;  %v17581_v52 = vadd.f32 %v12853_v5, %v7581_v19  ;;  %v18479_v33 = vld [vmem:[#allocation52_spill] sm:$0xff]  ;;  %v18481_v5 = vld [vmem:[#allocation34_spill] sm:$0xff] }
 0x41d   : > { %v17579_v61 = vpop.f32.mrf.mxu0  ;;  %v7849_v34 = vpop.f32.mrf.mxu1  ;;  %v7085_v28 = vadd.f32 %v17394_v56, %v18479_v33  ;;  %v7582_v60 = vadd.f32 %v18481_v5, %v7082_v42 }
 0x41e   : > { %18474 = vst [vmem:[#allocation18_spill] sm:$0xff] %v17579_v61  ;;  %v17588_v49 = vadd.f32 %v7849_v34, %v7579_v25  ;;  %v18482_v61 = vld [vmem:[#allocation49_spill] sm:$0xff]  ;;  %v18485_v34 = vld [vmem:[#allocation36_spill] sm:$0xff] }
 0x41f   : > { %v17586_v14 = vpop.f32.mrf.mxu0  ;;  %v12856_v41 = vpop.f32.mrf.mxu1  ;;  %v7106_v46 = vadd.f32 %v17402_v3, %v18482_v61  ;;  %v7585_v6 = vadd.f32 %v18485_v34, %v7093_v45  ;;  %v18491_v34 = vld [vmem:[#allocation5_spill] sm:$0xff] }
 0x420   : > { %18477 = vst [vmem:[#allocation6_spill] sm:$0xff] %v17586_v14  ;;  %v17595_v19 = vadd.f32 %v12856_v41, %v7584_v21  ;;  %v18486_v14 = vld [vmem:[#allocation56_spill] sm:$0xff]  ;;  %v18487_v41 = vld [vmem:[#allocation43_spill] sm:$0xff] }
 0x421   : > { %v17593_v63 = vpop.f32.mrf.mxu0  ;;  %v7862_v2 = vpop.f32.mrf.mxu1  ;;  %v7098_v56 = vadd.f32 %v17406_v29, %v18486_v14  ;;  %v7583_v42 = vadd.f32 %v18487_v41, %v7085_v28 }
 0x422   : > { %18480 = vst [vmem:[#allocation15_spill] sm:$0xff] %v17593_v63  ;;  %v17602_v25 = vadd.f32 %v7862_v2, %v7582_v60  ;;  %v18488_v63 = vld [vmem:[#allocation55_spill] sm:$0xff]  ;;  %v18490_v2 = vld [vmem:[#allocation46_spill] sm:$0xff] }
 0x423   : > { %v17600_v1 = vpop.f32.mrf.mxu0  ;;  %v12857_v58 = vpop.f32.mrf.mxu1  ;;  %v7109_v3 = vadd.f32 %v17411_v59, %v18488_v63  ;;  %v7122_v59 = vadd.f32 %v17430_v30, %v17083_v24  ;;  %v18500_v30 = vld [vmem:[#allocation62_spill] sm:$0xff] }
 0x424   : > { %18483 = vst [vmem:[#allocation8_spill] sm:$0xff] %v17600_v1  ;;  %18484 = vst [vmem:[#allocation25_spill] sm:$0xff] %v17602_v25  ;;  %v17609_v21 = vadd.f32 %v12857_v58, %v7585_v6  ;;  %v7588_v1 = vadd.f32 %v18490_v2, %v7106_v46  ;;  %v7101_v25 = vadd.f32 %v17419_v0, %v18491_v34  ;;  %v18493_v6 = vld [vmem:[#allocation42_spill] sm:$0xff]  ;;  %v18495_v46 = vld [vmem:[#allocation45_spill] sm:$0xff] }
 0x425   : > { %v17607_v33 = vpop.f32.mrf.mxu0  ;;  %v7865_v5 = vpop.f32.mrf.mxu1  ;;  %v7586_v58 = vadd.f32 %v18493_v6, %v7098_v56  ;;  %v7125_v6 = vadd.f32 %v17442_v12, %v18500_v30  ;;  %v18511_v30 = vld [vmem:[#allocation60_spill] sm:$0xff] }
 0x426   : > { %v7942_v60 = vadd.f32 %v7865_v5, %v7583_v42  ;;  %v7589_v5 = vadd.f32 %v18495_v46, %v7109_v3 }
 0x427   : > { %v17614_v61 = vpop.f32.mrf.mxu0  ;;  %v12860_v45 = vpop.f32.mrf.mxu1 }
 0x428   : > { %18489 = vst [vmem:[#allocation12_spill] sm:$0xff] %v17614_v61  ;;  %v7947_v14 = vadd.f32 %v12860_v45, %v7588_v1  ;;  %v17623_v28 = vadd.f32 %v17396_v55, %v7942_v60  ;;  %v7114_v1 = vadd.f32 %v17438_v16, %v17113_v32  ;;  %v18498_v60 = vld [vmem:[#allocation47_spill] sm:$0xff] }
 0x429   : > { %v17619_v29 = vpop.f32.mrf.mxu0  ;;  %v7878_v41 = vpop.f32.mrf.mxu1  ;;  %v7587_v45 = vadd.f32 %v18498_v60, %v7101_v25  ;;  %v18505_v25 = vld [vmem:[#allocation57_spill] sm:$0xff]  ;;  %v18508_v60 = vld [vmem:[#allocation4_spill] sm:$0xff] }
 0x42a   : > { %18492 = vst [vmem:[#allocation17_spill] sm:$0xff] %v17619_v29  ;;  %v7945_v42 = vadd.f32 %v7878_v41, %v7586_v58  ;;  %v17631_v2 = vadd.f32 %v17409_v44, %v7947_v14  ;;  %v18502_v14 = vld [vmem:[#allocation51_spill] sm:$0xff] }
 0x42b   : > { %v17627_v63 = vpop.f32.mrf.mxu0  ;;  %v12861_v0 = vpop.f32.mrf.mxu1  ;;  %v7592_v58 = vadd.f32 %v18502_v14, %v7122_v59  ;;  %v7591_v14 = vadd.f32 %v18511_v30, %v17449_v57 }
 0x42c   : > { %18494 = vst [vmem:[#allocation14_spill] sm:$0xff] %v17627_v63  ;;  %18496 = vst [vmem:[#allocation30_spill] sm:$0xff] %v17631_v2  ;;  %v7948_v55 = vadd.f32 %v12861_v0, %v7589_v5  ;;  %v17639_v34 = vadd.f32 %v17415_v62, %v7945_v42  ;;  %v7590_v5 = vadd.f32 %v18505_v25, %v7114_v1 }
 0x42d   : > { %v17635_v56 = vpop.f32.mrf.mxu0  ;;  %v7881_v24 = vpop.f32.mrf.mxu1 }
 0x42e   : > { %18497 = vst [vmem:[#allocation16_spill] sm:$0xff] %v17635_v56  ;;  %18499 = vst [vmem:[#allocation21_spill] sm:$0xff] %v17639_v34  ;;  %v7946_v44 = vadd.f32 %v7881_v24, %v7587_v45  ;;  %v17647_v41 = vadd.f32 %v17424_v7, %v7948_v55  ;;  %v7593_v45 = vadd.f32 %v18508_v60, %v7125_v6 }
 0x42f   : > { %v17643_v3 = vpop.f32.mrf.mxu0  ;;  %v12864_v32 = vpop.f32.mrf.mxu1 }
 0x430   : > { %18501 = vst [vmem:[#allocation13_spill] sm:$0xff] %v17643_v3  ;;  %18503 = vst [vmem:[#allocation27_spill] sm:$0xff] %v17647_v41  ;;  %v7951_v46 = vadd.f32 %v12864_v32, %v7592_v58  ;;  %v17653_v62 = vadd.f32 %v17428_v53, %v7946_v44  ;;  %v18514_v32 = vld [vmem:[#allocation61_spill] sm:$0xff] }
 0x431   : > { %v17649_v16 = vpop.f32.mrf.mxu0  ;;  %v7894_v42 = vpop.f32.mrf.mxu1  ;;  %v7596_v6 = vadd.f32 %v18514_v32, %v17455_v26 }
 0x432   : > { %18504 = vst [vmem:[#allocation22_spill] sm:$0xff] %v17649_v16  ;;  %18506 = vst [vmem:[#allocation29_spill] sm:$0xff] %v17653_v62  ;;  %v7949_v12 = vadd.f32 %v7894_v42, %v7590_v5  ;;  %v17659_v59 = vadd.f32 %v17440_v37, %v7951_v46  ;;  %v18517_v42 = vld [vmem:[#allocation63_spill] sm:$0xff] }
 0x433   : > { %v17655_v0 = vpop.f32.mrf.mxu0  ;;  %v12865_v7 = vpop.f32.mrf.mxu1  ;;  %v7594_v57 = vadd.f32 %v18517_v42, %v17462_v8 }
 0x434   : > { %18507 = vst [vmem:[#allocation28_spill] sm:$0xff] %v17655_v0  ;;  %18509 = vst [vmem:[#allocation33_spill] sm:$0xff] %v17659_v59  ;;  %v7952_v24 = vadd.f32 %v12865_v7, %v7593_v45  ;;  %v17666_v1 = vadd.f32 %v17444_v4, %v7949_v12  ;;  %v18520_v7 = vld [vmem:[#allocation64_spill] sm:$0xff] }
 0x435   : > { %v17661_v55 = vpop.f32.mrf.mxu0  ;;  %v7897_v53 = vpop.f32.mrf.mxu1  ;;  %v7597_v26 = vadd.f32 %v18520_v7, %v17469_v40 }
 0x436   : > { %18510 = vst [vmem:[#allocation19_spill] sm:$0xff] %v17661_v55  ;;  %18512 = vst [vmem:[#allocation38_spill] sm:$0xff] %v17666_v1  ;;  %v7950_v58 = vadd.f32 %v7897_v53, %v7591_v14  ;;  %v17673_v37 = vadd.f32 %v17446_v31, %v7952_v24  ;;  %v18523_v53 = vld [vmem:[#allocation65_spill] sm:$0xff] }
 0x437   : > { %v17668_v44 = vpop.f32.mrf.mxu0  ;;  %v12868_v46 = vpop.f32.mrf.mxu1  ;;  %v7595_v8 = vadd.f32 %v18523_v53, %v17476_v43 }
 0x438   : > { %18513 = vst [vmem:[#allocation20_spill] sm:$0xff] %v17668_v44  ;;  %18515 = vst [vmem:[#allocation40_spill] sm:$0xff] %v17673_v37  ;;  %v7955_v5 = vadd.f32 %v12868_v46, %v7596_v6  ;;  %v17680_v4 = vadd.f32 %v17452_v23, %v7950_v58 }
 0x439   : > { %v17675_v25 = vpop.f32.mrf.mxu0  ;;  %v7910_v12 = vpop.f32.mrf.mxu1 }
 0x43a   : > { %18516 = vst [vmem:[#allocation23_spill] sm:$0xff] %v17675_v25  ;;  %18518 = vst [vmem:[#allocation48_spill] sm:$0xff] %v17680_v4  ;;  %v7953_v45 = vadd.f32 %v7910_v12, %v7594_v57  ;;  %v17687_v31 = vadd.f32 %v17459_v27, %v7955_v5 }
 0x43b   : > { %v17682_v60 = vpop.f32.mrf.mxu0  ;;  %v12869_v24 = vpop.f32.mrf.mxu1 }
 0x43c   : > { %18519 = vst [vmem:[#allocation26_spill] sm:$0xff] %v17682_v60  ;;  %18521 = vst [vmem:[#allocation52_spill] sm:$0xff] %v17687_v31  ;;  %v7956_v14 = vadd.f32 %v12869_v24, %v7597_v26  ;;  %v17694_v23 = vadd.f32 %v17466_v15, %v7953_v45 }
 0x43d   : > { %v17689_v30 = vpop.f32.mrf.mxu0  ;;  %v7913_v58 = vpop.f32.mrf.mxu1 }
 0x43e   : > { %18522 = vst [vmem:[#allocation34_spill] sm:$0xff] %v17689_v30  ;;  %18524 = vst [vmem:[#allocation49_spill] sm:$0xff] %v17694_v23  ;;  %v7954_v6 = vadd.f32 %v7913_v58, %v7595_v8  ;;  %v17699_v46 = vadd.f32 %v17473_v9, %v7956_v14 }
 0x43f   : > { %v17696_v32 = vpop.f32.mrf.mxu0  ;;  %v12908_v40 = vpop.f32.mrf.mxu1 }
 0x440   : > { %18525 = vst [vmem:[#allocation36_spill] sm:$0xff] %v17696_v32  ;;  %18526 = vst [vmem:[#allocation56_spill] sm:$0xff] %v17699_v46  ;;  %v17702_v27 = vadd.f32 %v17481_v50, %v7954_v6 }
 0x441   : > { %v17704_v5 = vpop.f32.mrf.mxu0  ;;  %v8994_v42 = vpop.f32.mrf.mxu1 }
 0x442   : > { %18527 = vst [vmem:[#allocation43_spill] sm:$0xff] %v17702_v27  ;;  %18528 = vst [vmem:[#allocation55_spill] sm:$0xff] %v17704_v5 }
 0x443   : > { %v12909_v57 = vpop.f32.mrf.mxu1  ;;  %v17706_v12 = vpop.f32.mrf.mxu0 }
 0x445   : > { %v8997_v43 = vpop.f32.mrf.mxu1  ;;  %v17708_v45 = vpop.f32.mrf.mxu0 }
 0x447   : > { %v12912_v15 = vpop.f32.mrf.mxu1  ;;  %v17712_v24 = vpop.f32.mrf.mxu0 }
 0x449   : > { %v9010_v7 = vpop.f32.mrf.mxu1  ;;  %v17718_v50 = vpop.f32.mrf.mxu0 }
 0x44b   : > { %v17710_v26 = vpop.f32.mrf.mxu1  ;;  %v17724_v58 = vpop.f32.mrf.mxu0 }
 0x44d   : > { %v17714_v9 = vpop.f32.mrf.mxu1  ;;  %v17730_v32 = vpop.f32.mrf.mxu0 }
 0x44f   : > { %v17716_v14 = vpop.f32.mrf.mxu1  ;;  %v17736_v60 = vpop.f32.mrf.mxu0 }
 0x451   : > { %v17720_v53 = vpop.f32.mrf.mxu1  ;;  %v17742_v25 = vpop.f32.mrf.mxu0 }
 0x453   : > { %v17722_v8 = vpop.f32.mrf.mxu1  ;;  %v17748_v4 = vpop.f32.mrf.mxu0 }
 0x455   : > { %v17726_v6 = vpop.f32.mrf.mxu1  ;;  %v17754_v0 = vpop.f32.mrf.mxu0 }
 0x456   : > { %18530 = vst [vmem:[#allocation5_spill] sm:$0xff] %v17754_v0  ;;  %v18548_v0 = vld [vmem:[#allocation71_spill] sm:$0xff] }
 0x457   : > { %v17728_v5 = vpop.f32.mrf.mxu1  ;;  %v17760_v59 = vpop.f32.mrf.mxu0 }
 0x458   : > { %18533 = vst [vmem:[#allocation47_spill] sm:$0xff] %v17760_v59 }
 0x459   : > { %v17732_v27 = vpop.f32.mrf.mxu1  ;;  %v17766_v56 = vpop.f32.mrf.mxu0 }
 0x45a   : > { %18536 = vst [vmem:[#allocation57_spill] sm:$0xff] %v17766_v56  ;;  %v18544_v56 = vld [vmem:[#allocation67_spill] sm:$0xff] }
 0x45b   : > { %v17734_v30 = vpop.f32.mrf.mxu1  ;;  %v17772_v41 = vpop.f32.mrf.mxu0  ;;  %v8651_v2 = vadd.f32 %v18544_v56, %v17490_v54  ;;  %v18551_v54 = vld [vmem:[#allocation73_spill] sm:$0xff] }
 0x45c   : > { %18539 = vst [vmem:[#allocation61_spill] sm:$0xff] %v17772_v41  ;;  %v18546_v41 = vld [vmem:[#allocation69_spill] sm:$0xff]  ;;  %v8656_v56 = vadd.f32 %v18551_v54, %v17532_v10 }
 0x45d   : > { %v17738_v46 = vpop.f32.mrf.mxu1  ;;  %v17780_v59 = vpop.f32.mrf.mxu0  ;;  %v8652_v61 = vadd.f32 %v18546_v41, %v17504_v20  ;;  %v18553_v20 = vld [vmem:[#allocation75_spill] sm:$0xff]  ;;  %v18559_v54 = vld [vmem:[#allocation77_spill] sm:$0xff] }
 0x45e   : > { %18543 = vst [vmem:[#allocation65_spill] sm:$0xff] %v17780_v59  ;;  %v9121_v59 = vadd.f32 %v8994_v42, %v8651_v2  ;;  %v8659_v41 = vadd.f32 %v18553_v20, %v17546_v48  ;;  %v18556_v2 = vld [vmem:[#allocation58_spill] sm:$0xff]  ;;  %v8666_v48 = vadd.f32 %v18559_v54, %v17581_v52  ;;  %v9126_v52 = vadd.f32 %v17714_v9, %v8656_v56  ;;  %v18567_v56 = vld [vmem:[#allocation41_spill] sm:$0xff]  ;;  %v18569_v54 = vld [vmem:[#allocation7_spill] sm:$0xff] }
 0x45f   : > { %v17740_v23 = vpop.f32.mrf.mxu1  ;;  %v8665_v42 = vadd.f32 %v18556_v2, %v17567_v51 }
 0x461   : > { %v17744_v31 = vpop.f32.mrf.mxu1 }
 0x463   : > { %v17746_v44 = vpop.f32.mrf.mxu1 }
 0x465   : > { %v17750_v55 = vpop.f32.mrf.mxu1 }
 0x467   : > { %v17752_v37 = vpop.f32.mrf.mxu1 }
 0x468   : > { %18529 = vst [vmem:[#allocation46_spill] sm:$0xff] %v17752_v37 }
 0x469   : > { %v17756_v16 = vpop.f32.mrf.mxu1 }
 0x46a   : > { %18531 = vst [vmem:[#allocation42_spill] sm:$0xff] %v17756_v16 }
 0x46b   : > { %v17758_v1 = vpop.f32.mrf.mxu1 }
 0x46c   : > { %18532 = vst [vmem:[#allocation45_spill] sm:$0xff] %v17758_v1  ;;  %v18542_v1 = vld [vmem:[#allocation66_spill] sm:$0xff] }
 0x46d   : > { %v17762_v3 = vpop.f32.mrf.mxu1  ;;  %v8653_v16 = vadd.f32 %v18542_v1, %v17483_v39  ;;  %v8655_v39 = vadd.f32 %v18548_v0, %v17518_v22  ;;  %v18555_v22 = vld [vmem:[#allocation50_spill] sm:$0xff] }
 0x46e   : > { %18534 = vst [vmem:[#allocation62_spill] sm:$0xff] %v17762_v3  ;;  %v8660_v0 = vadd.f32 %v18555_v22, %v17560_v36  ;;  %v18560_v36 = vld [vmem:[#allocation59_spill] sm:$0xff] }
 0x46f   : > { %v17764_v62 = vpop.f32.mrf.mxu1  ;;  %v8664_v22 = vadd.f32 %v18560_v36, %v17588_v49  ;;  %v18564_v49 = vld [vmem:[#allocation78_spill] sm:$0xff] }
 0x470   : > { %18535 = vst [vmem:[#allocation51_spill] sm:$0xff] %v17764_v62  ;;  %v9123_v62 = vadd.f32 %v12908_v40, %v8653_v16  ;;  %v18550_v16 = vld [vmem:[#allocation72_spill] sm:$0xff] }
 0x471   : > { %v17768_v63 = vpop.f32.mrf.mxu1  ;;  %v8658_v40 = vadd.f32 %v18550_v16, %v17525_v38  ;;  %v18558_v16 = vld [vmem:[#allocation54_spill] sm:$0xff] }
 0x472   : > { %18537 = vst [vmem:[#allocation4_spill] sm:$0xff] %v17768_v63  ;;  %v18545_v63 = vld [vmem:[#allocation68_spill] sm:$0xff] }
 0x473   : > { %v17770_v29 = vpop.f32.mrf.mxu1  ;;  %v9128_v2 = vadd.f32 %v17710_v26, %v8658_v40 }
 0x474   : > { %18538 = vst [vmem:[#allocation60_spill] sm:$0xff] %v17770_v29  ;;  %v8654_v29 = vadd.f32 %v18545_v63, %v17497_v11  ;;  %v18552_v11 = vld [vmem:[#allocation74_spill] sm:$0xff] }
 0x475   : > { %v17774_v34 = vpop.f32.mrf.mxu1  ;;  %v8661_v63 = vadd.f32 %v18552_v11, %v17539_v13  ;;  %v8663_v13 = vadd.f32 %v18558_v16, %v17574_v17  ;;  %v9482_v11 = vadd.f32 %v17488_v47, %v9123_v62  ;;  %v18562_v17 = vld [vmem:[#allocation32_spill] sm:$0xff] }
 0x476   : > { %18540 = vst [vmem:[#allocation63_spill] sm:$0xff] %v17774_v34  ;;  %v18547_v34 = vld [vmem:[#allocation70_spill] sm:$0xff]  ;;  %v9124_v10 = vadd.f32 %v12909_v57, %v8654_v29  ;;  %v9480_v16 = vadd.f32 %v18562_v17, %v9121_v59  ;;  %v18565_v59 = vld [vmem:[#allocation79_spill] sm:$0xff]  ;;  %v18570_v17 = vld [vmem:[#allocation24_spill] sm:$0xff] }
 0x477   : > { %v9131_v47 = vadd.f32 %v17716_v14, %v8661_v63  ;;  %v18566_v14 = vld [vmem:[#allocation37_spill] sm:$0xff] }
 0x478   : > { %v17776_v37 = vpop.f32.mrf.mxu1 }
 0x479   : > { %18541 = vst [vmem:[#allocation64_spill] sm:$0xff] %v17776_v37  ;;  %v8657_v37 = vadd.f32 %v18547_v34, %v17511_v35  ;;  %v18554_v35 = vld [vmem:[#allocation76_spill] sm:$0xff] }
 0x47a   : > { %v17782_v3 = vpop.f32.mrf.mxu1  ;;  %v8662_v34 = vadd.f32 %v18554_v35, %v17553_v18  ;;  %v9122_v18 = vadd.f32 %v8997_v43, %v8652_v61  ;;  %v9125_v35 = vadd.f32 %v9010_v7, %v8655_v39  ;;  %v9129_v61 = vadd.f32 %v17720_v53, %v8659_v41  ;;  %v18568_v41 = vld [vmem:[#allocation31_spill] sm:$0xff] }
 0x47b   : > { %v9127_v20 = vadd.f32 %v12912_v15, %v8657_v37  ;;  %v18563_v37 = vld [vmem:[#allocation25_spill] sm:$0xff]  ;;  %v17843_v7 = vadd.f32 %v18565_v59, %v17609_v21  ;;  %v9483_v53 = vadd.f32 %v18566_v14, %v9124_v10  ;;  %v9136_v14 = vadd.f32 %v17734_v30, %v8666_v48 }
 0x47c   : > { %v17794_v1 = vpop.f32.mrf.mxu1  ;;  %v17834_v43 = vadd.f32 %v18564_v49, %v18563_v37  ;;  %v9132_v39 = vadd.f32 %v17722_v8, %v8662_v34  ;;  %v9481_v63 = vadd.f32 %v18567_v56, %v9122_v18  ;;  %v9487_v37 = vadd.f32 %v18570_v17, %v9128_v2  ;;  %v18571_v8 = vld [vmem:[#allocation10_spill] sm:$0xff]  ;;  %v18573_v49 = vld [vmem:[#allocation9_spill] sm:$0xff] }
 0x47d   : > { %18549 = vst [vmem:[#allocation66_spill] sm:$0xff] %v17794_v1  ;;  %v17810_v1 = vpop.f32.mrf.mxu0  ;;  %v9485_v34 = vadd.f32 %v18571_v8, %v9126_v52  ;;  %v9135_v2 = vadd.f32 %v17728_v5, %v8665_v42  ;;  %v18575_v42 = vld [vmem:[#allocation11_spill] sm:$0xff]  ;;  %v18578_v8 = vld [vmem:[#allocation6_spill] sm:$0xff] }
 0x47e   : > { %v17812_v38 = vpop.f32.mrf.mxu1 }
 0x47f   : > { %18557 = vst [vmem:[#allocation67_spill] sm:$0xff] %v17812_v38  ;;  %v18561_v38 = vld [vmem:[#allocation53_spill] sm:$0xff]  ;;  %v17830_v62 = vpop.f32.mrf.mxu0 }
 0x480   : > { %v12976_v51 = vpop.f32.mrf.mxu1  ;;  %v17824_v29 = vadd.f32 %v18561_v38, %v17595_v19  ;;  %v17839_v19 = vld [vmem:[%s18110_s4] ss:$0 sm:$0xff]  ;;  %v9486_v38 = vadd.f32 %v18568_v41, %v9127_v20  ;;  %v17860_v20 = vadd.f32 %v18573_v49, %v9129_v61  ;;  %v18576_v41 = vld [vmem:[#allocation44_spill] sm:$0xff] }
 0x481   : > { %v10208_v57 = vadd.f32 %v12976_v51, %v9482_v11  ;;  %v9484_v11 = vadd.f32 %v18569_v54, %v9125_v35  ;;  %v17882_v54 = vadd.f32 %v18576_v41, %v9135_v2 }
 0x482   : > { %v10079_v15 = vpop.f32.mrf.mxu1  ;;  %v9139_v49 = vadd.f32 %v17740_v23, %v17824_v29 }
 0x483   : > { %v10678_v26 = vadd.f32 %v17706_v12, %v10208_v57  ;;  %v10206_v9 = vadd.f32 %v10079_v15, %v9480_v16  ;;  %v9130_v12 = vadd.f32 %v17726_v6, %v8660_v0  ;;  %v17855_v57 = vpop.f32.mrf.mxu0  ;;  %v18572_v16 = vld [vmem:[#allocation35_spill] sm:$0xff]  ;;  %v9133_v6 = vadd.f32 %v17732_v27, %v8663_v13 }
 0x484   : > { %v12977_v40 = vpop.f32.mrf.mxu1  ;;  %v9490_v18 = vadd.f32 %v18572_v16, %v9131_v47  ;;  %v17894_v16 = vadd.f32 %v18578_v8, %v9136_v14 }
 0x485   : > { %v10717_v36 = vadd.f32 %v17839_v19, %v10678_v26  ;;  %v10676_v51 = vadd.f32 %v17708_v45, %v10206_v9  ;;  %v10209_v21 = vadd.f32 %v12977_v40, %v9483_v53  ;;  %v18574_v26 = vld [vmem:[#allocation39_spill] sm:$0xff]  ;;  %v17871_v53 = vpop.f32.mrf.mxu0  ;;  %v17876_v13 = vadd.f32 %v18575_v42, %v9130_v12 }
 0x486   : > { %v10082_v10 = vpop.f32.mrf.mxu1  ;;  %v17867_v9 = vadd.f32 %v18574_v26, %v9132_v39 }
 0x487   : > { %vm10749_vm4 = vcmp.ge.f32.partialorder %v10717_v36, 0.0  ;;  %v10781_v35 = vmul.f32 0.2, %v10717_v36  ;;  %v10715_v15 = vadd.f32 %v17839_v19, %v10676_v51  ;;  %v10679_v45 = vadd.f32 %v17712_v24, %v10209_v21 }
 0x488   : > { %v10207_v0 = vadd.f32 %v10082_v10, %v9481_v63  ;;  %v12980_v59 = vpop.f32.mrf.mxu1 }
 0x489   : > { %v10813_v52 = vsel %vm10749_vm4, %v10717_v36, %v10781_v35  ;;  %vm10747_vm7 = vcmp.ge.f32.partialorder %v10715_v15, 0.0  ;;  %v10779_v47 = vmul.f32 0.2, %v10715_v15  ;;  %v10718_v61 = vadd.f32 %v17839_v19, %v10679_v45 }
 0x48a   : > { %10845 = vst.msk [vmem:[#allocation3 + $0x10] sm:$0xff] %vm6638_vm0, %v10813_v52  ;;  %v10677_v5 = vadd.f32 %v17718_v50, %v10207_v0  ;;  %v10212_v24 = vadd.f32 %v12980_v59, %v9486_v38  ;;  %v10095_v27 = vpop.f32.mrf.mxu1  ;;  %v18577_v50 = vld [vmem:[#allocation18_spill] sm:$0xff]  ;;  %v9134_v36 = vadd.f32 %v17738_v46, %v8664_v22 }
 0x48b   : > { %v10811_v39 = vsel %vm10747_vm7, %v10715_v15, %v10779_v47  ;;  %vm10750_vm8 = vcmp.ge.f32.partialorder %v10718_v61, 0.0  ;;  %v10782_v40 = vmul.f32 0.2, %v10718_v61  ;;  %v10210_v56 = vadd.f32 %v10095_v27, %v9484_v11  ;;  %v17889_v11 = vpop.f32.mrf.mxu0 }
 0x48c   : > { %10843 = vst.msk [vmem:[#allocation3] sm:$0xff] %vm6638_vm0, %v10811_v39  ;;  %v10716_v63 = vadd.f32 %v17839_v19, %v10677_v5  ;;  %v10682_v30 = vadd.f32 %v17724_v58, %v10212_v24  ;;  %v12981_v48 = vpop.f32.mrf.mxu1  ;;  %v17885_v38 = vadd.f32 %v18577_v50, %v9133_v6  ;;  %v9138_v5 = vadd.f32 %v17750_v55, %v17623_v28  ;;  %v18583_v28 = vld [vmem:[#allocation30_spill] sm:$0xff]  ;;  %v18585_v50 = vld [vmem:[#allocation21_spill] sm:$0xff] }
 0x48d   : > { %v10814_v51 = vsel %vm10750_vm8, %v10718_v61, %v10782_v40  ;;  %v10680_v21 = vadd.f32 %v17730_v32, %v10210_v56  ;;  %v10213_v17 = vadd.f32 %v12981_v48, %v9487_v37  ;;  %v9137_v37 = vadd.f32 %v17744_v31, %v17834_v43  ;;  %v17905_v29 = vpop.f32.mrf.mxu0  ;;  %v18579_v43 = vld [vmem:[#allocation15_spill] sm:$0xff]  ;;  %v18581_v56 = vld [vmem:[#allocation5_spill] sm:$0xff]  ;;  %v18584_v55 = vld [vmem:[#allocation46_spill] sm:$0xff] }
 0x48e   : > { %10846 = vst.msk [vmem:[#allocation3 + $0x18] sm:$0xff] %vm6638_vm0, %v10814_v51  ;;  %vm10748_vm9 = vcmp.ge.f32.partialorder %v10716_v63, 0.0  ;;  %v10780_v12 = vmul.f32 0.2, %v10716_v63  ;;  %v10721_v58 = vadd.f32 %v17839_v19, %v10682_v30  ;;  %v10098_v10 = vpop.f32.mrf.mxu1  ;;  %v17910_v59 = vadd.f32 %v18579_v43, %v9134_v36  ;;  %v18582_v30 = vld [vmem:[#allocation12_spill] sm:$0xff]  ;;  %v18586_v36 = vld [vmem:[#allocation42_spill] sm:$0xff] }
 0x48f   : > { %v10719_v46 = vadd.f32 %v17839_v19, %v10680_v21  ;;  %v10683_v32 = vadd.f32 %v17736_v60, %v10213_v17  ;;  %v10211_v22 = vadd.f32 %v10098_v10, %v9485_v34  ;;  %v9140_v60 = vadd.f32 %v17746_v44, %v17843_v7  ;;  %v18580_v7 = vld [vmem:[#allocation8_spill] sm:$0xff] }
 0x490   : > { %v10812_v35 = vsel %vm10748_vm9, %v10716_v63, %v10780_v12  ;;  %vm10753_vm10 = vcmp.ge.f32.partialorder %v10721_v58, 0.0  ;;  %v10785_v15 = vmul.f32 0.2, %v10721_v58  ;;  %v12984_v45 = vpop.f32.mrf.mxu1  ;;  %v17921_v14 = vadd.f32 %v17607_v33, %v9137_v37 }
 0x491   : > { %10844 = vst.msk [vmem:[#allocation3 + $0x8] sm:$0xff] %vm6638_vm0, %v10812_v35  ;;  %vm10751_vm1 = vcmp.ge.f32.partialorder %v10719_v46, 0.0  ;;  %v10783_v2 = vmul.f32 0.2, %v10719_v46  ;;  %v10722_v6 = vadd.f32 %v17839_v19, %v10683_v32  ;;  %v10681_v23 = vadd.f32 %v17742_v25, %v10211_v22  ;;  %v18588_v35 = vld [vmem:[#allocation57_spill] sm:$0xff] }
 0x492   : > { %v10817_v34 = vsel %vm10753_vm10, %v10721_v58, %v10785_v15  ;;  %v10216_v0 = vadd.f32 %v12984_v45, %v9490_v18  ;;  %v10111_v31 = vpop.f32.mrf.mxu1  ;;  %v17918_v18 = vadd.f32 %v18580_v7, %v9139_v49  ;;  %v17932_v48 = vadd.f32 %v18582_v30, %v9140_v60  ;;  %v18594_v30 = vld [vmem:[#allocation16_spill] sm:$0xff] }
 0x493   : > { %10849 = vst.msk [vmem:[#allocation3 + $0x30] sm:$0xff] %vm6638_vm0, %v10817_v34  ;;  %v10815_v26 = vsel %vm10751_vm1, %v10719_v46, %v10783_v2  ;;  %vm10754_vm5 = vcmp.ge.f32.partialorder %v10722_v6, 0.0  ;;  %v10786_v52 = vmul.f32 0.2, %v10722_v6  ;;  %v10720_v47 = vadd.f32 %v17839_v19, %v10681_v23  ;;  %v18590_v2 = vld [vmem:[#allocation45_spill] sm:$0xff] }
 0x494   : > { %10847 = vst.msk [vmem:[#allocation3 + $0x20] sm:$0xff] %vm6638_vm0, %v10815_v26  ;;  %v10686_v25 = vadd.f32 %v17748_v4, %v10216_v0  ;;  %v10214_v61 = vadd.f32 %v10111_v31, %v17860_v20  ;;  %v12985_v44 = vpop.f32.mrf.mxu1  ;;  %v17926_v4 = vpop.f32.mrf.mxu0  ;;  %v9143_v41 = vadd.f32 %v18584_v55, %v18583_v28  ;;  %v9141_v51 = vadd.f32 %v18586_v36, %v18585_v50  ;;  %v18595_v55 = vld [vmem:[#allocation29_spill] sm:$0xff]  ;;  %v18596_v50 = vld [vmem:[#allocation62_spill] sm:$0xff] }
 0x495   : > { %v10877_v24 = vld [vmem:[#allocation3 + $0x10] ss:$2 sm:$0xff]  ;;  %v10909_v27 = vld [vmem:[#allocation3 + $0x11] ss:$2 sm:$0xff]  ;;  %v10818_v42 = vsel %vm10754_vm5, %v10722_v6, %v10786_v52  ;;  %vm10752_vm6 = vcmp.ge.f32.partialorder %v10720_v47, 0.0  ;;  %v10217_v39 = vadd.f32 %v12985_v44, %v17867_v9  ;;  %v18597_v36 = vld [vmem:[#allocation65_spill] sm:$0xff] }
 0x496   : > { %10850 = vst.msk [vmem:[#allocation3 + $0x38] sm:$0xff] %vm6638_vm0, %v10818_v42  ;;  %v10784_v20 = vmul.f32 0.2, %v10720_v47  ;;  %v10725_v40 = vadd.f32 %v17839_v19, %v10686_v25  ;;  %v10684_v33 = vadd.f32 %v18581_v56, %v10214_v61  ;;  %v10114_v63 = vpop.f32.mrf.mxu1  ;;  %v18587_v9 = vld [vmem:[#allocation47_spill] sm:$0xff]  ;;  %v10939_v12 = vmax.f32 %v10877_v24, %v10909_v27  ;;  %v17946_v45 = vpop.f32.mrf.mxu0  ;;  %v18592_v42 = vld [vmem:[#allocation17_spill] sm:$0xff] }
 0x497   : > { %v10687_v21 = vadd.f32 %v18587_v9, %v10217_v39  ;;  %v10215_v17 = vadd.f32 %v10114_v63, %v17876_v13  ;;  %v18589_v13 = vld [vmem:[#allocation27_spill] sm:$0xff]  ;;  %v9497_v39 = vadd.f32 %v18592_v42, %v9138_v5  ;;  %v17974_v28 = vadd.f32 %v18594_v30, %v9141_v51  ;;  %v18605_v30 = vld [vmem:[#allocation40_spill] sm:$0xff] }
 0x498   : > { %v10875_v58 = vld [vmem:[#allocation3] ss:$2 sm:$0xff]  ;;  %v10907_v10 = vld [vmem:[#allocation3 + $0x1] ss:$2 sm:$0xff]  ;;  %v10816_v8 = vsel %vm10752_vm6, %v10720_v47, %v10784_v20  ;;  %vm10757_vm13 = vcmp.ge.f32.partialorder %v10725_v40, 0.0  ;;  %v10723_v49 = vadd.f32 %v17839_v19, %v10684_v33  ;;  %v12988_v46 = vpop.f32.mrf.mxu1  ;;  %v9144_v6 = vadd.f32 %v18590_v2, %v18589_v13  ;;  %v18593_v20 = vld [vmem:[#allocation14_spill] sm:$0xff]  ;;  %v17969_v56 = vpop.f32.mrf.mxu0 }
 0x499   : > { %v10938_v32 = vmax.f32 %v10875_v58, %v10907_v10  ;;  %10848 = vst.msk [vmem:[#allocation3 + $0x28] sm:$0xff] %vm6638_vm0, %v10816_v8  ;;  %v10789_v22 = vmul.f32 0.2, %v10725_v40  ;;  %v10726_v37 = vadd.f32 %v17839_v19, %v10687_v21  ;;  %v10685_v15 = vadd.f32 %v18588_v35, %v10215_v17  ;;  %v18591_v47 = vld [vmem:[#allocation61_spill] sm:$0xff]  ;;  %v18602_v13 = vld [vmem:[#allocation4_spill] sm:$0xff] }
 0x49a   : > { %vm10755_vm14 = vcmp.ge.f32.partialorder %v10723_v49, 0.0  ;;  %v10787_v23 = vmul.f32 0.2, %v10723_v49  ;;  %v10220_v60 = vadd.f32 %v12988_v46, %v17882_v54  ;;  %v10127_v34 = vpop.f32.mrf.mxu1  ;;  %v18598_v8 = vld [vmem:[#allocation13_spill] sm:$0xff] }
 0x49b   : > { %v10954_v0 = vmax.f32 %v10938_v32, %v10939_v12  ;;  %v10821_v31 = vsel %vm10757_vm13, %v10725_v40, %v10789_v22  ;;  %vm10758_vm15 = vcmp.ge.f32.partialorder %v10726_v37, 0.0  ;;  %v10790_v43 = vmul.f32 0.2, %v10726_v37 }
 0x49c   : > { %10853 = vst.msk [vmem:[#allocation3 + $0x50] sm:$0xff] %vm6638_vm0, %v10821_v31  ;;  %v10819_v26 = vsel %vm10755_vm14, %v10723_v49, %v10787_v23  ;;  %v10724_v52 = vadd.f32 %v17839_v19, %v10685_v15  ;;  %v10690_v25 = vadd.f32 %v18591_v47, %v10220_v60  ;;  %v10218_v61 = vadd.f32 %v10127_v34, %v17885_v38  ;;  %v12989_v44 = vpop.f32.mrf.mxu1  ;;  %v18601_v15 = vld [vmem:[#allocation38_spill] sm:$0xff] }
 0x49d   : > { %10962 = vst.msk [vmem:[%s17953_s9] sm:$0xff] %vm6638_vm0, %v10954_v0  ;;  %v10881_v7 = vld [vmem:[#allocation3 + $0x30] ss:$2 sm:$0xff]  ;;  %v10913_v54 = vld [vmem:[#allocation3 + $0x31] ss:$2 sm:$0xff]  ;;  %10851 = vst.msk [vmem:[#allocation3 + $0x40] sm:$0xff] %vm6638_vm0, %v10819_v26  ;;  %v10822_v24 = vsel %vm10758_vm15, %v10726_v37, %v10790_v43  ;;  %v10221_v27 = vadd.f32 %v12989_v44, %v17894_v16  ;;  %v17967_v40 = vadd.f32 %v18593_v20, %v9143_v41 }
 0x49e   : > { %10854 = vst.msk [vmem:[#allocation3 + $0x58] sm:$0xff] %vm6638_vm0, %v10822_v24  ;;  %vm10756_vm2 = vcmp.ge.f32.partialorder %v10724_v52, 0.0  ;;  %v10788_v38 = vmul.f32 0.2, %v10724_v52  ;;  %v10729_v33 = vadd.f32 %v17839_v19, %v10690_v25  ;;  %v10130_v63 = vpop.f32.mrf.mxu1  ;;  %v9142_v16 = vadd.f32 %v18596_v50, %v18595_v55  ;;  %v18600_v37 = vld [vmem:[#allocation51_spill] sm:$0xff]  ;;  %v18604_v20 = vld [vmem:[#allocation28_spill] sm:$0xff] }
 0x49f   : > { %v10688_v5 = vadd.f32 %v18597_v36, %v10218_v61  ;;  %v10691_v41 = vadd.f32 %v17810_v1, %v10221_v27  ;;  %v10219_v9 = vadd.f32 %v10130_v63, %v17910_v59  ;;  %v10941_v21 = vmax.f32 %v10881_v7, %v10913_v54  ;;  %v17987_v1 = vpop.f32.mrf.mxu0  ;;  %v18599_v59 = vld [vmem:[#allocation33_spill] sm:$0xff]  ;;  %v18603_v7 = vld [vmem:[#allocation22_spill] sm:$0xff]  ;;  %v18606_v55 = vld [vmem:[#allocation60_spill] sm:$0xff] }
 0x4a0   : > { %v10879_v17 = vld [vmem:[#allocation3 + $0x20] ss:$2 sm:$0xff]  ;;  %v10911_v12 = vld [vmem:[#allocation3 + $0x21] ss:$2 sm:$0xff]  ;;  %v10820_v58 = vsel %vm10756_vm2, %v10724_v52, %v10788_v38  ;;  %vm10761_vm3 = vcmp.ge.f32.partialorder %v10729_v33, 0.0  ;;  %v12992_v10 = vpop.f32.mrf.mxu1  ;;  %v17982_v49 = vadd.f32 %v18598_v8, %v9144_v6  ;;  %v9147_v35 = vadd.f32 %v18600_v37, %v18599_v59 }
 0x4a1   : > { %v10940_v51 = vmax.f32 %v10879_v17, %v10911_v12  ;;  %10852 = vst.msk [vmem:[#allocation3 + $0x48] sm:$0xff] %vm6638_vm0, %v10820_v58  ;;  %v10793_v46 = vmul.f32 0.2, %v10729_v33  ;;  %v10727_v32 = vadd.f32 %v17839_v19, %v10688_v5  ;;  %v10730_v22 = vadd.f32 %v17839_v19, %v10691_v41  ;;  %v18005_v24 = vpop.f32.mrf.mxu0 }
 0x4a2   : > { %v9145_v2 = vadd.f32 %v18602_v13, %v18601_v15  ;;  %v10689_v6 = vadd.f32 %v17830_v62, %v10219_v9  ;;  %v10224_v23 = vadd.f32 %v12992_v10, %v17918_v18  ;;  %v10143_v60 = vpop.f32.mrf.mxu1  ;;  %v18003_v54 = vadd.f32 %v18603_v7, %v9142_v16  ;;  %v18609_v10 = vld [vmem:[#allocation63_spill] sm:$0xff]  ;;  %v18614_v7 = vld [vmem:[#allocation49_spill] sm:$0xff] }
 0x4a3   : > { %v10955_v34 = vmax.f32 %v10940_v51, %v10941_v21  ;;  %v10825_v0 = vsel %vm10761_vm3, %v10729_v33, %v10793_v46  ;;  %vm10759_vm11 = vcmp.ge.f32.partialorder %v10727_v32, 0.0  ;;  %v10791_v31 = vmul.f32 0.2, %v10727_v32  ;;  %v18607_v21 = vld [vmem:[#allocation19_spill] sm:$0xff] }
 0x4a4   : > { %10857 = vst.msk [vmem:[#allocation3 + $0x70] sm:$0xff] %vm6638_vm0, %v10825_v0  ;;  %vm10762_vm12 = vcmp.ge.f32.partialorder %v10730_v22, 0.0  ;;  %v10794_v43 = vmul.f32 0.2, %v10730_v22  ;;  %v10728_v26 = vadd.f32 %v17839_v19, %v10689_v6  ;;  %v10694_v52 = vadd.f32 %v17855_v57, %v10224_v23  ;;  %v12993_v47 = vpop.f32.mrf.mxu1 }
 0x4a5   : > { %10963 = vst.msk [vmem:[%s17953_s9 + $0x8] sm:$0xff] %vm6638_vm0, %v10955_v34  ;;  %v10885_v25 = vld [vmem:[#allocation3 + $0x50] ss:$2 sm:$0xff]  ;;  %v10917_v62 = vld [vmem:[#allocation3 + $0x51] ss:$2 sm:$0xff]  ;;  %v10823_v61 = vsel %vm10759_vm11, %v10727_v32, %v10791_v31  ;;  %v10222_v18 = vadd.f32 %v10143_v60, %v17921_v14  ;;  %v10225_v44 = vadd.f32 %v12993_v47, %v17932_v48  ;;  %v18009_v38 = vadd.f32 %v18604_v20, %v9147_v35  ;;  %v18610_v60 = vld [vmem:[#allocation20_spill] sm:$0xff] }
 0x4a6   : > { %10855 = vst.msk [vmem:[#allocation3 + $0x60] sm:$0xff] %vm6638_vm0, %v10823_v61  ;;  %v10826_v27 = vsel %vm10762_vm12, %v10730_v22, %v10794_v43  ;;  %vm10760_vm4 = vcmp.ge.f32.partialorder %v10728_v26, 0.0  ;;  %v10792_v57 = vmul.f32 0.2, %v10728_v26  ;;  %v10146_v42 = vpop.f32.mrf.mxu1  ;;  %v10733_v14 = vadd.f32 %v17839_v19, %v10694_v52  ;;  %v18611_v31 = vld [vmem:[#allocation52_spill] sm:$0xff] }
 0x4a7   : > { %10858 = vst.msk [vmem:[#allocation3 + $0x78] sm:$0xff] %vm6638_vm0, %v10826_v27  ;;  %v10692_v48 = vadd.f32 %v17871_v53, %v10222_v18  ;;  %v10695_v33 = vadd.f32 %v17889_v11, %v10225_v44  ;;  %v10223_v63 = vadd.f32 %v10146_v42, %v9497_v39  ;;  %v9148_v50 = vadd.f32 %v18606_v55, %v18605_v30  ;;  %v18022_v11 = vpop.f32.mrf.mxu0  ;;  %v18608_v39 = vld [vmem:[#allocation48_spill] sm:$0xff]  ;;  %v18613_v18 = vld [vmem:[#allocation23_spill] sm:$0xff] }
 0x4a8   : > { %v10943_v16 = vmax.f32 %v10885_v25, %v10917_v62  ;;  %v10883_v36 = vld [vmem:[#allocation3 + $0x40] ss:$2 sm:$0xff]  ;;  %v10915_v5 = vld [vmem:[#allocation3 + $0x41] ss:$2 sm:$0xff]  ;;  %v10824_v41 = vsel %vm10760_vm4, %v10728_v26, %v10792_v57  ;;  %v12996_v9 = vpop.f32.mrf.mxu1  ;;  %v18018_v17 = vadd.f32 %v18607_v21, %v9145_v2  ;;  %vm10765_vm7 = vcmp.ge.f32.partialorder %v10733_v14, 0.0 }
 0x4a9   : > { %v10942_v12 = vmax.f32 %v10883_v36, %v10915_v5  ;;  %10856 = vst.msk [vmem:[#allocation3 + $0x68] sm:$0xff] %vm6638_vm0, %v10824_v41  ;;  %v10797_v58 = vmul.f32 0.2, %v10733_v14  ;;  %v10731_v53 = vadd.f32 %v17839_v19, %v10692_v48  ;;  %v9146_v8 = vadd.f32 %v18609_v10, %v18608_v39  ;;  %v13035_v0 = vpop.f32.mrf.mxu0  ;;  %v18612_v43 = vld [vmem:[#allocation64_spill] sm:$0xff] }
 0x4aa   : > { %v10734_v51 = vadd.f32 %v17839_v19, %v10695_v33  ;;  %v10693_v46 = vadd.f32 %v17905_v29, %v10223_v63  ;;  %v10228_v32 = vadd.f32 %v12996_v9, %v17967_v40  ;;  %v10159_v22 = vpop.f32.mrf.mxu1  ;;  %v9507_v34 = vadd.f32 %v18610_v60, %v9148_v50  ;;  %v18616_v50 = vld [vmem:[#allocation66_spill] sm:$0xff] }
 0x4ab   : > { %v10956_v59 = vmax.f32 %v10942_v12, %v10943_v16  ;;  %v10829_v37 = vsel %vm10765_vm7, %v10733_v14, %v10797_v58  ;;  %vm10763_vm8 = vcmp.ge.f32.partialorder %v10731_v53, 0.0  ;;  %v10795_v35 = vmul.f32 0.2, %v10731_v53  ;;  %v10648_v55 = vpop.f32.mrf.mxu0 }
 0x4ac   : > { %10861 = vst.msk [vmem:[#allocation3 + $0x90] sm:$0xff] %vm6638_vm0, %v10829_v37  ;;  %vm10766_vm9 = vcmp.ge.f32.partialorder %v10734_v51, 0.0  ;;  %v10798_v15 = vmul.f32 0.2, %v10734_v51  ;;  %v10732_v13 = vadd.f32 %v17839_v19, %v10693_v46  ;;  %v10698_v2 = vadd.f32 %v17926_v4, %v10228_v32  ;;  %v12997_v6 = vpop.f32.mrf.mxu1  ;;  %v18618_v37 = vld [vmem:[#allocation34_spill] sm:$0xff] }
 0x4ad   : > { %10964 = vst.msk [vmem:[%s17953_s9 + $0x10] sm:$0xff] %vm6638_vm0, %v10956_v59  ;;  %v10827_v23 = vsel %vm10763_vm8, %v10731_v53, %v10795_v35  ;;  %v10226_v29 = vadd.f32 %v10159_v22, %v17974_v28  ;;  %v10229_v40 = vadd.f32 %v12997_v6, %v17982_v49  ;;  %v9151_v26 = vadd.f32 %v18612_v43, %v18611_v31  ;;  %v13038_v10 = vpop.f32.mrf.mxu0  ;;  %v18621_v43 = vld [vmem:[#allocation36_spill] sm:$0xff] }
 0x4ae   : > { %v10889_v52 = vld [vmem:[#allocation3 + $0x70] ss:$2 sm:$0xff]  ;;  %v10921_v47 = vld [vmem:[#allocation3 + $0x71] ss:$2 sm:$0xff]  ;;  %10859 = vst.msk [vmem:[#allocation3 + $0x80] sm:$0xff] %vm6638_vm0, %v10827_v23  ;;  %v10830_v25 = vsel %vm10766_vm9, %v10734_v51, %v10798_v15  ;;  %vm10764_vm10 = vcmp.ge.f32.partialorder %v10732_v13, 0.0  ;;  %v10737_v4 = vadd.f32 %v17839_v19, %v10698_v2  ;;  %v10162_v62 = vpop.f32.mrf.mxu1  ;;  %v9505_v44 = vadd.f32 %v18613_v18, %v9146_v8 }
 0x4af   : > { %10862 = vst.msk [vmem:[#allocation3 + $0x98] sm:$0xff] %vm6638_vm0, %v10830_v25  ;;  %v10796_v28 = vmul.f32 0.2, %v10732_v13  ;;  %v10696_v49 = vadd.f32 %v17946_v45, %v10226_v29  ;;  %v10699_v61 = vadd.f32 %v17969_v56, %v10229_v40  ;;  %v9149_v27 = vadd.f32 %v17782_v3, %v18614_v7  ;;  %v18615_v56 = vld [vmem:[#allocation56_spill] sm:$0xff]  ;;  %v18617_v51 = vld [vmem:[#allocation26_spill] sm:$0xff]  ;;  %v18620_v15 = vld [vmem:[#allocation67_spill] sm:$0xff] }
 0x4b0   : > { %v10945_v57 = vmax.f32 %v10889_v52, %v10921_v47  ;;  %v10887_v42 = vld [vmem:[#allocation3 + $0x60] ss:$2 sm:$0xff]  ;;  %v10919_v20 = vld [vmem:[#allocation3 + $0x61] ss:$2 sm:$0xff]  ;;  %vm10769_vm1 = vcmp.ge.f32.partialorder %v10737_v4, 0.0  ;;  %v10227_v14 = vadd.f32 %v10162_v62, %v18003_v54  ;;  %v13000_v48 = vpop.f32.mrf.mxu1  ;;  %v9152_v16 = vadd.f32 %v18616_v50, %v18615_v56 }
 0x4b1   : > { %v10944_v33 = vmax.f32 %v10887_v42, %v10919_v20  ;;  %v10828_v63 = vsel %vm10764_vm10, %v10732_v13, %v10796_v28  ;;  %v10801_v30 = vmul.f32 0.2, %v10737_v4  ;;  %v10735_v45 = vadd.f32 %v17839_v19, %v10696_v49 }
 0x4b2   : > { %10860 = vst.msk [vmem:[#allocation3 + $0x88] sm:$0xff] %vm6638_vm0, %v10828_v63  ;;  %v10738_v3 = vadd.f32 %v17839_v19, %v10699_v61  ;;  %v10697_v36 = vadd.f32 %v17987_v1, %v10227_v14  ;;  %v10232_v54 = vadd.f32 %v13000_v48, %v18009_v38  ;;  %v10175_v5 = vpop.f32.mrf.mxu1  ;;  %v9510_v46 = vadd.f32 %v18617_v51, %v9151_v26 }
 0x4b3   : > { %v10957_v41 = vmax.f32 %v10944_v33, %v10945_v57  ;;  %v10833_v9 = vsel %vm10769_vm1, %v10737_v4, %v10801_v30  ;;  %vm10767_vm5 = vcmp.ge.f32.partialorder %v10735_v45, 0.0  ;;  %v10799_v21 = vmul.f32 0.2, %v10735_v45 }
 0x4b4   : > { %10865 = vst.msk [vmem:[#allocation3 + $0xb0] sm:$0xff] %vm6638_vm0, %v10833_v9  ;;  %vm10770_vm6 = vcmp.ge.f32.partialorder %v10738_v3, 0.0  ;;  %v10802_v12 = vmul.f32 0.2, %v10738_v3  ;;  %v10736_v58 = vadd.f32 %v17839_v19, %v10697_v36  ;;  %v10702_v53 = vadd.f32 %v18005_v24, %v10232_v54  ;;  %v13001_v39 = vpop.f32.mrf.mxu1  ;;  %v18619_v24 = vld [vmem:[#allocation43_spill] sm:$0xff] }
 0x4b5   : > { %10965 = vst.msk [vmem:[%s17953_s9 + $0x18] sm:$0xff] %vm6638_vm0, %v10957_v41  ;;  %v10831_v1 = vsel %vm10767_vm5, %v10735_v45, %v10799_v21  ;;  %v10230_v38 = vadd.f32 %v10175_v5, %v18018_v17  ;;  %v10233_v8 = vadd.f32 %v13001_v39, %v9507_v34  ;;  %v9508_v35 = vadd.f32 %v18618_v37, %v9149_v27  ;;  %v10661_v34 = vpop.f32.mrf.mxu0  ;;  %v18622_v45 = vld [vmem:[#allocation55_spill] sm:$0xff] }
 0x4b6   : > { %10863 = vst.msk [vmem:[#allocation3 + $0xa0] sm:$0xff] %vm6638_vm0, %v10831_v1  ;;  %v10834_v32 = vsel %vm10770_vm6, %v10738_v3, %v10802_v12  ;;  %vm10768_vm13 = vcmp.ge.f32.partialorder %v10736_v58, 0.0  ;;  %v10741_v22 = vadd.f32 %v17839_v19, %v10702_v53  ;;  %v10178_v59 = vpop.f32.mrf.mxu1  ;;  %v9150_v13 = vadd.f32 %v18620_v15, %v18619_v24  ;;  %v10893_v2 = vld [vmem:[#allocation3 + $0x90] ss:$2 sm:$0xff]  ;;  %v10925_v6 = vld [vmem:[#allocation3 + $0x91] ss:$2 sm:$0xff] }
 0x4b7   : > { %10866 = vst.msk [vmem:[#allocation3 + $0xb8] sm:$0xff] %vm6638_vm0, %v10834_v32  ;;  %v10800_v17 = vmul.f32 0.2, %v10736_v58  ;;  %v10700_v23 = vadd.f32 %v18022_v11, %v10230_v38  ;;  %v10703_v29 = vadd.f32 %v13035_v0, %v10233_v8  ;;  %v10231_v60 = vadd.f32 %v10178_v59, %v9505_v44  ;;  %v13039_v20 = vpop.f32.mrf.mxu0 }
 0x4b8   : > { %vm10773_vm14 = vcmp.ge.f32.partialorder %v10741_v22, 0.0  ;;  %v10805_v40 = vmul.f32 0.2, %v10741_v22  ;;  %v13004_v31 = vpop.f32.mrf.mxu1  ;;  %v9511_v26 = vadd.f32 %v18621_v43, %v9152_v16  ;;  %v10947_v49 = vmax.f32 %v10893_v2, %v10925_v6 }
 0x4b9   : > { %v10891_v52 = vld [vmem:[#allocation3 + $0x80] ss:$2 sm:$0xff]  ;;  %v10923_v47 = vld [vmem:[#allocation3 + $0x81] ss:$2 sm:$0xff]  ;;  %v10832_v25 = vsel %vm10768_vm13, %v10736_v58, %v10800_v17  ;;  %v10739_v4 = vadd.f32 %v17839_v19, %v10700_v23  ;;  %v10742_v62 = vadd.f32 %v17839_v19, %v10703_v29  ;;  %v10236_v28 = vadd.f32 %v13004_v31, %v9510_v46  ;;  %v10664_v12 = vpop.f32.mrf.mxu0 }
 0x4ba   : > { %v10946_v61 = vmax.f32 %v10891_v52, %v10923_v47  ;;  %10864 = vst.msk [vmem:[#allocation3 + $0xa8] sm:$0xff] %vm6638_vm0, %v10832_v25  ;;  %v10837_v11 = vsel %vm10773_vm14, %v10741_v22, %v10805_v40  ;;  %v10701_v0 = vadd.f32 %v10648_v55, %v10231_v60  ;;  %v10191_v18 = vpop.f32.mrf.mxu1  ;;  %v9509_v55 = vadd.f32 %v18622_v45, %v9150_v13 }
 0x4bb   : > { %10869 = vst.msk [vmem:[#allocation3 + $0xd0] sm:$0xff] %vm6638_vm0, %v10837_v11  ;;  %vm10771_vm15 = vcmp.ge.f32.partialorder %v10739_v4, 0.0  ;;  %v10803_v44 = vmul.f32 0.2, %v10739_v4  ;;  %vm10774_vm2 = vcmp.ge.f32.partialorder %v10742_v62, 0.0  ;;  %v10706_v42 = vadd.f32 %v13038_v10, %v10236_v28 }
 0x4bc   : > { %v10806_v7 = vmul.f32 0.2, %v10742_v62  ;;  %v10958_v27 = vmax.f32 %v10946_v61, %v10947_v49  ;;  %v10740_v57 = vadd.f32 %v17839_v19, %v10701_v0  ;;  %v10234_v14 = vadd.f32 %v10191_v18, %v9508_v35  ;;  %v13005_v48 = vpop.f32.mrf.mxu1 }
 0x4bd   : > { %v10835_v33 = vsel %vm10771_vm15, %v10739_v4, %v10803_v44  ;;  %v10237_v30 = vadd.f32 %v13005_v48, %v9511_v26  ;;  %v10745_v16 = vadd.f32 %v17839_v19, %v10706_v42 }
 0x4be   : > { %v10838_v63 = vsel %vm10774_vm2, %v10742_v62, %v10806_v7  ;;  %10966 = vst.msk [vmem:[%s17953_s9 + $0x20] sm:$0xff] %vm6638_vm0, %v10958_v27  ;;  %v10897_v56 = vld [vmem:[#allocation3 + $0xb0] ss:$2 sm:$0xff]  ;;  %v10929_v50 = vld [vmem:[#allocation3 + $0xb1] ss:$2 sm:$0xff]  ;;  %10867 = vst.msk [vmem:[#allocation3 + $0xc0] sm:$0xff] %vm6638_vm0, %v10835_v33  ;;  %v10704_v3 = vadd.f32 %v10661_v34, %v10234_v14  ;;  %v10194_v36 = vpop.f32.mrf.mxu1 }
 0x4bf   : > { %10870 = vst.msk [vmem:[#allocation3 + $0xd8] sm:$0xff] %vm6638_vm0, %v10838_v63  ;;  %vm10772_vm3 = vcmp.ge.f32.partialorder %v10740_v57, 0.0  ;;  %v10804_v54 = vmul.f32 0.2, %v10740_v57  ;;  %v10707_v5 = vadd.f32 %v13039_v20, %v10237_v30  ;;  %v10235_v41 = vadd.f32 %v10194_v36, %v9509_v55 }
 0x4c0   : > { %vm10777_vm11 = vcmp.ge.f32.partialorder %v10745_v16, 0.0  ;;  %v10809_v9 = vmul.f32 0.2, %v10745_v16  ;;  %v10743_v21 = vadd.f32 %v17839_v19, %v10704_v3  ;;  %v10949_v58 = vmax.f32 %v10897_v56, %v10929_v50 }
 0x4c1   : > { %v10895_v53 = vld [vmem:[#allocation3 + $0xa0] ss:$2 sm:$0xff]  ;;  %v10927_v39 = vld [vmem:[#allocation3 + $0xa1] ss:$2 sm:$0xff]  ;;  %v10836_v10 = vsel %vm10772_vm3, %v10740_v57, %v10804_v54  ;;  %v10746_v1 = vadd.f32 %v17839_v19, %v10707_v5  ;;  %v10705_v38 = vadd.f32 %v10664_v12, %v10235_v41 }
 0x4c2   : > { %v10948_v8 = vmax.f32 %v10895_v53, %v10927_v39  ;;  %10868 = vst.msk [vmem:[#allocation3 + $0xc8] sm:$0xff] %vm6638_vm0, %v10836_v10  ;;  %v10841_v51 = vsel %vm10777_vm11, %v10745_v16, %v10809_v9  ;;  %vm10775_vm12 = vcmp.ge.f32.partialorder %v10743_v21, 0.0  ;;  %v10807_v46 = vmul.f32 0.2, %v10743_v21 }
 0x4c3   : > { %10873 = vst.msk [vmem:[#allocation3 + $0xf0] sm:$0xff] %vm6638_vm0, %v10841_v51  ;;  %vm10778_vm4 = vcmp.ge.f32.partialorder %v10746_v1, 0.0  ;;  %v10810_v32 = vmul.f32 0.2, %v10746_v1  ;;  %v10744_v22 = vadd.f32 %v17839_v19, %v10705_v38 }
 0x4c4   : > { %v10959_v59 = vmax.f32 %v10948_v8, %v10949_v58  ;;  %v10839_v37 = vsel %vm10775_vm12, %v10743_v21, %v10807_v46 }
 0x4c5   : > { %10871 = vst.msk [vmem:[#allocation3 + $0xe0] sm:$0xff] %vm6638_vm0, %v10839_v37  ;;  %v10842_v35 = vsel %vm10778_vm4, %v10746_v1, %v10810_v32  ;;  %vm10776_vm7 = vcmp.ge.f32.partialorder %v10744_v22, 0.0  ;;  %v10808_v24 = vmul.f32 0.2, %v10744_v22 }
 0x4c6   : > { %10967 = vst.msk [vmem:[%s17953_s9 + $0x28] sm:$0xff] %vm6638_vm0, %v10959_v59  ;;  %10874 = vst.msk [vmem:[#allocation3 + $0xf8] sm:$0xff] %vm6638_vm0, %v10842_v35  ;;  %v10901_v15 = vld [vmem:[#allocation3 + $0xd0] ss:$2 sm:$0xff]  ;;  %v10933_v13 = vld [vmem:[#allocation3 + $0xd1] ss:$2 sm:$0xff] }
 0x4c7   : > { %v10840_v2 = vsel %vm10776_vm7, %v10744_v22, %v10808_v24  ;;  %v10951_v19 = vmax.f32 %v10901_v15, %v10933_v13 }
 0x4c8   : > { %10872 = vst.msk [vmem:[#allocation3 + $0xe8] sm:$0xff] %vm6638_vm0, %v10840_v2 }
 0x4c9   : > { %v10899_v6 = vld [vmem:[#allocation3 + $0xc0] ss:$2 sm:$0xff]  ;;  %v10931_v17 = vld [vmem:[#allocation3 + $0xc1] ss:$2 sm:$0xff] }
 0x4ca   : > { %v10950_v23 = vmax.f32 %v10899_v6, %v10931_v17 }
 0x4cc   : > { %v10960_v29 = vmax.f32 %v10950_v23, %v10951_v19 }
 0x4cd   : > { %v10905_v40 = vld [vmem:[#allocation3 + $0xf0] ss:$2 sm:$0xff]  ;;  %v10937_v60 = vld [vmem:[#allocation3 + $0xf1] ss:$2 sm:$0xff] }
 0x4ce   : > { %10968 = vst.msk [vmem:[%s17953_s9 + $0x30] sm:$0xff] %vm6638_vm0, %v10960_v29  ;;  %v10953_v43 = vmax.f32 %v10905_v40, %v10937_v60 }
 0x4cf   : > { %v10903_v34 = vld [vmem:[#allocation3 + $0xe0] ss:$2 sm:$0xff]  ;;  %v10935_v31 = vld [vmem:[#allocation3 + $0xe1] ss:$2 sm:$0xff] }
 0x4d0   : > { %v10952_v26 = vmax.f32 %v10903_v34, %v10935_v31 }
 0x4d2   : > { %v10961_v52 = vmax.f32 %v10952_v26, %v10953_v43 }
 0x4d4   : > { %10969 = vst.msk [vmem:[%s17953_s9 + $0x38] sm:$0xff] %vm6638_vm0, %v10961_v52 }
 0x4d5 PF: > { %s15_s20 = sadd.s32 1, %s13237_s20   ;;  %s18623_s18 = smov %s13233_s19 }
 0x4d6   : > { %p12_p5 = scmp.ge.s32.totalorder %s15_s20, 4   ;;  %s18624_s19 = smov %s18626_s21 }
 0x4d8   :  { %14 = sbr.rel (!%p12_p5) target bundleno = 2 (0x2), region = 126 }

</bundles_post_ra>
